<compile_context>
chip_gen: v5e
topology: v5e:2x2
jax: 0.10.0
libtpu: 0.0.40
codegen_flags: <defaults>
</compile_context>

<pallas_src>
import jax
import jax.numpy as jnp
from jax.experimental import pallas as pl
from jax.experimental.pallas import tpu as pltpu

LEAK = 0.2
BN_EPS = 0.8          # eps (passed positionally in the PyTorch module)

IN_REAL = 110         # 100 noise + 10 label
IN_PAD = 128          # lane-aligned K for layer 1
OUT_REAL = 784        # 28*28
OUT_PAD = 896         # 7*128, lane-dense output

_LAYER_DIMS = [(IN_REAL, 128), (128, 256), (256, 512), (512, 1024), (1024, OUT_REAL)]


def _lrelu(v):
    return jnp.where(v > 0, v, LEAK * v)


def _dot_bias(a_f32, w_ref, b_ref):
    # bf16 x bf16 MXU matmul, f32 accumulation; bias add in f32.
    return (
        jnp.dot(a_f32.astype(jnp.bfloat16), w_ref[...],
                preferred_element_type=jnp.float32)
        + b_ref[...]
    )


def _bn_lrelu(h, g_ref, bt_ref):
    # Training-mode BatchNorm1d (batch stats, biased variance, eps=0.8) folded
    # into a single per-feature scale/shift, then LeakyReLU.
    mean = jnp.mean(h, axis=0, keepdims=True)
    c = h - mean
    var = jnp.mean(c * c, axis=0, keepdims=True)
    scale = g_ref[...] * jax.lax.rsqrt(var + BN_EPS)   # rsqrt -> EUP slot
    shift = bt_ref[...] - mean * scale
    return _lrelu(h * scale + shift)                   # 2 VPU ops / element


def generator_kernel(
    x_ref,
    w1_ref, b1_ref,
    w2_ref, b2_ref, g2_ref, bt2_ref,
    w3_ref, b3_ref, g3_ref, bt3_ref,
    w4_ref, b4_ref, g4_ref, bt4_ref,
    w5_ref, b5_ref,
    out_ref,
):
    x = x_ref[...]                                                    # (B, 128) f32

    h = _lrelu(_dot_bias(x, w1_ref, b1_ref))                          # (B, 128)
    h = _bn_lrelu(_dot_bias(h, w2_ref, b2_ref), g2_ref, bt2_ref)      # (B, 256)
    h = _bn_lrelu(_dot_bias(h, w3_ref, b3_ref), g3_ref, bt3_ref)      # (B, 512)
    h = _bn_lrelu(_dot_bias(h, w4_ref, b4_ref), g4_ref, bt4_ref)      # (B, 1024)
    out_ref[...] = jnp.tanh(_dot_bias(h, w5_ref, b5_ref))             # (B, 896)


def mnist_generator_forward(noise, label, params):
    """noise: (B, 100), label: (B, 10) already-embedded / one-hot.
    Returns (B, 1, 28, 28) f32."""
    # Glue: torch.cat((noise, label), -1), then zero-pad K to a lane-aligned 128.
    x = jnp.concatenate([noise, label], axis=-1).astype(jnp.float32)  # (B, 110)
    B = x.shape[0]
    x = jnp.pad(x, ((0, 0), (0, IN_PAD - x.shape[1])))                # (B, 128)

    # Weight prep (plain-JAX glue, constant-foldable under jit):
    #  - bf16 storage for all weight matrices
    #  - w1 zero-padded rows 110->128 (zeros contribute nothing to the dot)
    #  - w5/b5 zero-padded cols 784->896 (extra columns sliced off below)
    bf16 = jnp.bfloat16
    w1 = jnp.pad(params["w1"], ((0, IN_PAD - IN_REAL), (0, 0))).astype(bf16)
    w5 = jnp.pad(params["w5"], ((0, 0), (0, OUT_PAD - OUT_REAL))).astype(bf16)
    b5 = jnp.pad(params["b5"], ((0, 0), (0, OUT_PAD - OUT_REAL)))

    args = (
        x,
        w1, params["b1"],
        params["w2"].astype(bf16), params["b2"], params["g2"], params["bt2"],
        params["w3"].astype(bf16), params["b3"], params["g3"], params["bt3"],
        params["w4"].astype(bf16), params["b4"], params["g4"], params["bt4"],
        w5, b5,
    )

    # Advisory cost estimate: this call is HBM-bound on ~3.2 MB of bf16 weights.
    k_sizes = IN_PAD * 128 + 128 * 256 + 256 * 512 + 512 * 1024 + 1024 * OUT_PAD
    weight_bytes = 2 * k_sizes
    small_bytes = 4 * (128 + 2 * 3 * 256 + 2 * 3 * 512 + 2 * 3 * 1024 + OUT_PAD)
    io_bytes = 4 * B * (IN_PAD + OUT_PAD)
    cost = pl.CostEstimate(
        flops=2 * B * k_sizes,
        transcendentals=B * OUT_PAD + (256 + 512 + 1024),
        bytes_accessed=weight_bytes + small_bytes + io_bytes,
    )

    vmem_spec = pl.BlockSpec(memory_space=pltpu.MemorySpace.VMEM)
    out = pl.pallas_call(
        generator_kernel,
        out_shape=jax.ShapeDtypeStruct((B, OUT_PAD), jnp.float32),
        in_specs=[vmem_spec] * len(args),
        out_specs=vmem_spec,
        compiler_params=pltpu.CompilerParams(vmem_limit_bytes=32 * 1024 * 1024),
        cost_estimate=cost,
    )(*args)

    # Glue: drop the lane padding, then img.view(B, 1, 28, 28).
    return out[:, :OUT_REAL].reshape(B, 1, 28, 28)


def init_params(key):
    """Deterministic synthetic parameter init (PyTorch-like uniform for Linear).
    Stored at natural (unpadded) f32 shapes; bf16 cast / padding happens in the wrapper."""
    params = {}
    keys = jax.random.split(key, 2 * len(_LAYER_DIMS))
    for i, (fan_in, fan_out) in enumerate(_LAYER_DIMS):
        bound = 1.0 / (fan_in ** 0.5)
        params[f"w{i + 1}"] = jax.random.uniform(
            keys[2 * i], (fan_in, fan_out), jnp.float32, minval=-bound, maxval=bound)
        params[f"b{i + 1}"] = jax.random.uniform(
            keys[2 * i + 1], (1, fan_out), jnp.float32, minval=-bound, maxval=bound)
    # BatchNorm affine params (PyTorch default init: weight=1, bias=0).
    for idx, n in [(2, 256), (3, 512), (4, 1024)]:
        params[f"g{idx}"] = jnp.ones((1, n), jnp.float32)
        params[f"bt{idx}"] = jnp.zeros((1, n), jnp.float32)
    return params


if __name__ == "__main__":
    key = jax.random.PRNGKey(0)
    k_params, k_noise, k_label = jax.random.split(key, 3)

    B = 8
    params = init_params(k_params)

    noise = jax.random.normal(k_noise, (B, 100), jnp.float32)
    # Label embedding of 10 classes into dim-10: use one-hot class vectors
    # (forward() consumes the already-embedded label tensor directly).
    labels_int = jax.random.randint(k_label, (B,), 0, 10)
    label = jax.nn.one_hot(labels_int, 10, dtype=jnp.float32)

    img = mnist_generator_forward(noise, label, params)
    img = jax.block_until_ready(img)

    assert img.shape == (B, 1, 28, 28), img.shape
    assert img.dtype == jnp.float32
    assert bool(jnp.all(jnp.isfinite(img)))
    assert bool(jnp.all(jnp.abs(img) <= 1.0))  # tanh range
    print("KERNEL_OK")
</pallas_src>

<mosaic_0001>
module attributes {stable_mosaic.version = 11 : i64} {
  func.func @generator_kernel(%arg0: memref<8x128xf32, #tpu.memory_space<vmem>>, %arg1: memref<128x128xbf16, #tpu.memory_space<vmem>>, %arg2: memref<1x128xf32, #tpu.memory_space<vmem>>, %arg3: memref<128x256xbf16, #tpu.memory_space<vmem>>, %arg4: memref<1x256xf32, #tpu.memory_space<vmem>>, %arg5: memref<1x256xf32, #tpu.memory_space<vmem>>, %arg6: memref<1x256xf32, #tpu.memory_space<vmem>>, %arg7: memref<256x512xbf16, #tpu.memory_space<vmem>>, %arg8: memref<1x512xf32, #tpu.memory_space<vmem>>, %arg9: memref<1x512xf32, #tpu.memory_space<vmem>>, %arg10: memref<1x512xf32, #tpu.memory_space<vmem>>, %arg11: memref<512x1024xbf16, #tpu.memory_space<vmem>>, %arg12: memref<1x1024xf32, #tpu.memory_space<vmem>>, %arg13: memref<1x1024xf32, #tpu.memory_space<vmem>>, %arg14: memref<1x1024xf32, #tpu.memory_space<vmem>>, %arg15: memref<1024x896xbf16, #tpu.memory_space<vmem>>, %arg16: memref<1x896xf32, #tpu.memory_space<vmem>>, %arg17: memref<8x896xf32, #tpu.memory_space<vmem>>) attributes {dimension_semantics = [], scalar_prefetch = 0 : i64, scratch_operands = 0 : i64, tpu.core_type = #tpu.core_type<tc>} {
    %c0 = arith.constant 0 : index
    %c0_0 = arith.constant 0 : index
    %0 = vector.load %arg0[%c0, %c0_0] : memref<8x128xf32, #tpu.memory_space<vmem>>, vector<8x128xf32>
    %1 = arith.truncf %0 : vector<8x128xf32> to vector<8x128xbf16>
    %c0_1 = arith.constant 0 : index
    %c0_2 = arith.constant 0 : index
    %2 = vector.load %arg1[%c0_1, %c0_2] : memref<128x128xbf16, #tpu.memory_space<vmem>>, vector<128x128xbf16>
    %cst = arith.constant dense<0.000000e+00> : vector<8x128xf32>
    %3 = tpu.matmul %1, %2, %cst {dimension_numbers = #tpu.dot_dimension_numbers<[1], [0], [0], [1], [0, 0, 1, 1], [], []>} : vector<8x128xbf16>, vector<128x128xbf16>, vector<8x128xf32> -> vector<8x128xf32>
    %c0_3 = arith.constant 0 : index
    %c0_4 = arith.constant 0 : index
    %4 = vector.load %arg2[%c0_3, %c0_4] : memref<1x128xf32, #tpu.memory_space<vmem>>, vector<1x128xf32>
    %5 = vector.broadcast %4 : vector<1x128xf32> to vector<8x128xf32>
    %6 = arith.addf %3, %5 : vector<8x128xf32>
    %cst_5 = arith.constant 0.000000e+00 : f32
    %7 = vector.broadcast %cst_5 : f32 to vector<8x128xf32>
    %8 = arith.cmpf ogt, %6, %7 : vector<8x128xf32>
    %cst_6 = arith.constant 2.000000e-01 : f32
    %9 = vector.broadcast %cst_6 : f32 to vector<8x128xf32>
    %10 = arith.mulf %9, %6 : vector<8x128xf32>
    %11 = arith.select %8, %6, %10 : vector<8x128xi1>, vector<8x128xf32>
    %12 = arith.truncf %11 : vector<8x128xf32> to vector<8x128xbf16>
    %c0_7 = arith.constant 0 : index
    %c0_8 = arith.constant 0 : index
    %13 = vector.load %arg3[%c0_7, %c0_8] : memref<128x256xbf16, #tpu.memory_space<vmem>>, vector<128x256xbf16>
    %cst_9 = arith.constant dense<0.000000e+00> : vector<8x256xf32>
    %14 = tpu.matmul %12, %13, %cst_9 {dimension_numbers = #tpu.dot_dimension_numbers<[1], [0], [0], [1], [0, 0, 1, 1], [], []>} : vector<8x128xbf16>, vector<128x256xbf16>, vector<8x256xf32> -> vector<8x256xf32>
    %c0_10 = arith.constant 0 : index
    %c0_11 = arith.constant 0 : index
    %15 = vector.load %arg4[%c0_10, %c0_11] : memref<1x256xf32, #tpu.memory_space<vmem>>, vector<1x256xf32>
    %16 = vector.broadcast %15 : vector<1x256xf32> to vector<8x256xf32>
    %17 = arith.addf %14, %16 : vector<8x256xf32>
    %cst_12 = arith.constant dense<0.000000e+00> : vector<256xf32>
    %18 = vector.multi_reduction <add>, %17, %cst_12 [0] : vector<8x256xf32> to vector<256xf32>
    %19 = vector.shape_cast %18 : vector<256xf32> to vector<1x256xf32>
    %cst_13 = arith.constant 8.000000e+00 : f32
    %20 = vector.broadcast %cst_13 : f32 to vector<1x256xf32>
    %21 = arith.divf %19, %20 : vector<1x256xf32>
    %22 = vector.broadcast %21 : vector<1x256xf32> to vector<8x256xf32>
    %23 = arith.subf %17, %22 : vector<8x256xf32>
    %24 = arith.mulf %23, %23 : vector<8x256xf32>
    %cst_14 = arith.constant dense<0.000000e+00> : vector<256xf32>
    %25 = vector.multi_reduction <add>, %24, %cst_14 [0] : vector<8x256xf32> to vector<256xf32>
    %26 = vector.shape_cast %25 : vector<256xf32> to vector<1x256xf32>
    %cst_15 = arith.constant 8.000000e+00 : f32
    %27 = vector.broadcast %cst_15 : f32 to vector<1x256xf32>
    %28 = arith.divf %26, %27 : vector<1x256xf32>
    %c0_16 = arith.constant 0 : index
    %c0_17 = arith.constant 0 : index
    %29 = vector.load %arg5[%c0_16, %c0_17] : memref<1x256xf32, #tpu.memory_space<vmem>>, vector<1x256xf32>
    %cst_18 = arith.constant 8.000000e-01 : f32
    %30 = vector.broadcast %cst_18 : f32 to vector<1x256xf32>
    %31 = arith.addf %28, %30 : vector<1x256xf32>
    %32 = math.rsqrt %31 : vector<1x256xf32>
    %33 = arith.mulf %29, %32 : vector<1x256xf32>
    %c0_19 = arith.constant 0 : index
    %c0_20 = arith.constant 0 : index
    %34 = vector.load %arg6[%c0_19, %c0_20] : memref<1x256xf32, #tpu.memory_space<vmem>>, vector<1x256xf32>
    %35 = arith.mulf %21, %33 : vector<1x256xf32>
    %36 = arith.subf %34, %35 : vector<1x256xf32>
    %37 = vector.broadcast %33 : vector<1x256xf32> to vector<8x256xf32>
    %38 = arith.mulf %17, %37 : vector<8x256xf32>
    %39 = vector.broadcast %36 : vector<1x256xf32> to vector<8x256xf32>
    %40 = arith.addf %38, %39 : vector<8x256xf32>
    %cst_21 = arith.constant 0.000000e+00 : f32
    %41 = vector.broadcast %cst_21 : f32 to vector<8x256xf32>
    %42 = arith.cmpf ogt, %40, %41 : vector<8x256xf32>
    %cst_22 = arith.constant 2.000000e-01 : f32
    %43 = vector.broadcast %cst_22 : f32 to vector<8x256xf32>
    %44 = arith.mulf %43, %40 : vector<8x256xf32>
    %45 = arith.select %42, %40, %44 : vector<8x256xi1>, vector<8x256xf32>
    %46 = arith.truncf %45 : vector<8x256xf32> to vector<8x256xbf16>
    %c0_23 = arith.constant 0 : index
    %c0_24 = arith.constant 0 : index
    %47 = vector.load %arg7[%c0_23, %c0_24] : memref<256x512xbf16, #tpu.memory_space<vmem>>, vector<256x512xbf16>
    %cst_25 = arith.constant dense<0.000000e+00> : vector<8x512xf32>
    %48 = tpu.matmul %46, %47, %cst_25 {dimension_numbers = #tpu.dot_dimension_numbers<[1], [0], [0], [1], [0, 0, 1, 1], [], []>} : vector<8x256xbf16>, vector<256x512xbf16>, vector<8x512xf32> -> vector<8x512xf32>
    %c0_26 = arith.constant 0 : index
    %c0_27 = arith.constant 0 : index
    %49 = vector.load %arg8[%c0_26, %c0_27] : memref<1x512xf32, #tpu.memory_space<vmem>>, vector<1x512xf32>
    %50 = vector.broadcast %49 : vector<1x512xf32> to vector<8x512xf32>
    %51 = arith.addf %48, %50 : vector<8x512xf32>
    %cst_28 = arith.constant dense<0.000000e+00> : vector<512xf32>
    %52 = vector.multi_reduction <add>, %51, %cst_28 [0] : vector<8x512xf32> to vector<512xf32>
    %53 = vector.shape_cast %52 : vector<512xf32> to vector<1x512xf32>
    %cst_29 = arith.constant 8.000000e+00 : f32
    %54 = vector.broadcast %cst_29 : f32 to vector<1x512xf32>
    %55 = arith.divf %53, %54 : vector<1x512xf32>
    %56 = vector.broadcast %55 : vector<1x512xf32> to vector<8x512xf32>
    %57 = arith.subf %51, %56 : vector<8x512xf32>
    %58 = arith.mulf %57, %57 : vector<8x512xf32>
    %cst_30 = arith.constant dense<0.000000e+00> : vector<512xf32>
    %59 = vector.multi_reduction <add>, %58, %cst_30 [0] : vector<8x512xf32> to vector<512xf32>
    %60 = vector.shape_cast %59 : vector<512xf32> to vector<1x512xf32>
    %cst_31 = arith.constant 8.000000e+00 : f32
    %61 = vector.broadcast %cst_31 : f32 to vector<1x512xf32>
    %62 = arith.divf %60, %61 : vector<1x512xf32>
    %c0_32 = arith.constant 0 : index
    %c0_33 = arith.constant 0 : index
    %63 = vector.load %arg9[%c0_32, %c0_33] : memref<1x512xf32, #tpu.memory_space<vmem>>, vector<1x512xf32>
    %cst_34 = arith.constant 8.000000e-01 : f32
    %64 = vector.broadcast %cst_34 : f32 to vector<1x512xf32>
    %65 = arith.addf %62, %64 : vector<1x512xf32>
    %66 = math.rsqrt %65 : vector<1x512xf32>
    %67 = arith.mulf %63, %66 : vector<1x512xf32>
    %c0_35 = arith.constant 0 : index
    %c0_36 = arith.constant 0 : index
    %68 = vector.load %arg10[%c0_35, %c0_36] : memref<1x512xf32, #tpu.memory_space<vmem>>, vector<1x512xf32>
    %69 = arith.mulf %55, %67 : vector<1x512xf32>
    %70 = arith.subf %68, %69 : vector<1x512xf32>
    %71 = vector.broadcast %67 : vector<1x512xf32> to vector<8x512xf32>
    %72 = arith.mulf %51, %71 : vector<8x512xf32>
    %73 = vector.broadcast %70 : vector<1x512xf32> to vector<8x512xf32>
    %74 = arith.addf %72, %73 : vector<8x512xf32>
    %cst_37 = arith.constant 0.000000e+00 : f32
    %75 = vector.broadcast %cst_37 : f32 to vector<8x512xf32>
    %76 = arith.cmpf ogt, %74, %75 : vector<8x512xf32>
    %cst_38 = arith.constant 2.000000e-01 : f32
    %77 = vector.broadcast %cst_38 : f32 to vector<8x512xf32>
    %78 = arith.mulf %77, %74 : vector<8x512xf32>
    %79 = arith.select %76, %74, %78 : vector<8x512xi1>, vector<8x512xf32>
    %80 = arith.truncf %79 : vector<8x512xf32> to vector<8x512xbf16>
    %c0_39 = arith.constant 0 : index
    %c0_40 = arith.constant 0 : index
    %81 = vector.load %arg11[%c0_39, %c0_40] : memref<512x1024xbf16, #tpu.memory_space<vmem>>, vector<512x1024xbf16>
    %cst_41 = arith.constant dense<0.000000e+00> : vector<8x1024xf32>
    %82 = tpu.matmul %80, %81, %cst_41 {dimension_numbers = #tpu.dot_dimension_numbers<[1], [0], [0], [1], [0, 0, 1, 1], [], []>} : vector<8x512xbf16>, vector<512x1024xbf16>, vector<8x1024xf32> -> vector<8x1024xf32>
    %c0_42 = arith.constant 0 : index
    %c0_43 = arith.constant 0 : index
    %83 = vector.load %arg12[%c0_42, %c0_43] : memref<1x1024xf32, #tpu.memory_space<vmem>>, vector<1x1024xf32>
    %84 = vector.broadcast %83 : vector<1x1024xf32> to vector<8x1024xf32>
    %85 = arith.addf %82, %84 : vector<8x1024xf32>
    %cst_44 = arith.constant dense<0.000000e+00> : vector<1024xf32>
    %86 = vector.multi_reduction <add>, %85, %cst_44 [0] : vector<8x1024xf32> to vector<1024xf32>
    %87 = vector.shape_cast %86 : vector<1024xf32> to vector<1x1024xf32>
    %cst_45 = arith.constant 8.000000e+00 : f32
    %88 = vector.broadcast %cst_45 : f32 to vector<1x1024xf32>
    %89 = arith.divf %87, %88 : vector<1x1024xf32>
    %90 = vector.broadcast %89 : vector<1x1024xf32> to vector<8x1024xf32>
    %91 = arith.subf %85, %90 : vector<8x1024xf32>
    %92 = arith.mulf %91, %91 : vector<8x1024xf32>
    %cst_46 = arith.constant dense<0.000000e+00> : vector<1024xf32>
    %93 = vector.multi_reduction <add>, %92, %cst_46 [0] : vector<8x1024xf32> to vector<1024xf32>
    %94 = vector.shape_cast %93 : vector<1024xf32> to vector<1x1024xf32>
    %cst_47 = arith.constant 8.000000e+00 : f32
    %95 = vector.broadcast %cst_47 : f32 to vector<1x1024xf32>
    %96 = arith.divf %94, %95 : vector<1x1024xf32>
    %c0_48 = arith.constant 0 : index
    %c0_49 = arith.constant 0 : index
    %97 = vector.load %arg13[%c0_48, %c0_49] : memref<1x1024xf32, #tpu.memory_space<vmem>>, vector<1x1024xf32>
    %cst_50 = arith.constant 8.000000e-01 : f32
    %98 = vector.broadcast %cst_50 : f32 to vector<1x1024xf32>
    %99 = arith.addf %96, %98 : vector<1x1024xf32>
    %100 = math.rsqrt %99 : vector<1x1024xf32>
    %101 = arith.mulf %97, %100 : vector<1x1024xf32>
    %c0_51 = arith.constant 0 : index
    %c0_52 = arith.constant 0 : index
    %102 = vector.load %arg14[%c0_51, %c0_52] : memref<1x1024xf32, #tpu.memory_space<vmem>>, vector<1x1024xf32>
    %103 = arith.mulf %89, %101 : vector<1x1024xf32>
    %104 = arith.subf %102, %103 : vector<1x1024xf32>
    %105 = vector.broadcast %101 : vector<1x1024xf32> to vector<8x1024xf32>
    %106 = arith.mulf %85, %105 : vector<8x1024xf32>
    %107 = vector.broadcast %104 : vector<1x1024xf32> to vector<8x1024xf32>
    %108 = arith.addf %106, %107 : vector<8x1024xf32>
    %cst_53 = arith.constant 0.000000e+00 : f32
    %109 = vector.broadcast %cst_53 : f32 to vector<8x1024xf32>
    %110 = arith.cmpf ogt, %108, %109 : vector<8x1024xf32>
    %cst_54 = arith.constant 2.000000e-01 : f32
    %111 = vector.broadcast %cst_54 : f32 to vector<8x1024xf32>
    %112 = arith.mulf %111, %108 : vector<8x1024xf32>
    %113 = arith.select %110, %108, %112 : vector<8x1024xi1>, vector<8x1024xf32>
    %114 = arith.truncf %113 : vector<8x1024xf32> to vector<8x1024xbf16>
    %c0_55 = arith.constant 0 : index
    %c0_56 = arith.constant 0 : index
    %115 = vector.load %arg15[%c0_55, %c0_56] : memref<1024x896xbf16, #tpu.memory_space<vmem>>, vector<1024x896xbf16>
    %cst_57 = arith.constant dense<0.000000e+00> : vector<8x896xf32>
    %116 = tpu.matmul %114, %115, %cst_57 {dimension_numbers = #tpu.dot_dimension_numbers<[1], [0], [0], [1], [0, 0, 1, 1], [], []>} : vector<8x1024xbf16>, vector<1024x896xbf16>, vector<8x896xf32> -> vector<8x896xf32>
    %c0_58 = arith.constant 0 : index
    %c0_59 = arith.constant 0 : index
    %117 = vector.load %arg16[%c0_58, %c0_59] : memref<1x896xf32, #tpu.memory_space<vmem>>, vector<1x896xf32>
    %118 = vector.broadcast %117 : vector<1x896xf32> to vector<8x896xf32>
    %119 = arith.addf %116, %118 : vector<8x896xf32>
    %120 = math.tanh %119 : vector<8x896xf32>
    %c0_60 = arith.constant 0 : index
    %c0_61 = arith.constant 0 : index
    %121 = vector.load %arg17[%c0_60, %c0_61] : memref<8x896xf32, #tpu.memory_space<vmem>>, vector<8x896xf32>
    tpu.vector_store %arg17[%c0_60, %c0_61], %120 {strides = array<i32>} : memref<8x896xf32, #tpu.memory_space<vmem>>, vector<8x896xf32>,
    return
  }
}

</mosaic_0001>

<bundles_post_ra>
// kernel: tpu_custom_call.1
= control target key start
LH: loop header
LB: loop body
LE: loop exit
PB: predicated region body
PF: predicated region fallthrough
CT: control target
= control target key end

     0   :  { %s12581_s0 = inlined_call_operand.hbm [shape: f32[8,128], index: 0, kind: input, shape index: {}]   ;;  %s12582_s1 = inlined_call_operand.hbm [shape: bf16[128,128], index: 1, kind: input, shape index: {}]   ;;  %s12583_s2 = inlined_call_operand.hbm [shape: f32[1,128], index: 2, kind: input, shape index: {}]   ;;  %s12584_s3 = inlined_call_operand.hbm [shape: bf16[128,256], index: 3, kind: input, shape index: {}]   ;;  %s12585_s4 = inlined_call_operand.hbm [shape: f32[1,256], index: 4, kind: input, shape index: {}]   ;;  %s12586_s5 = inlined_call_operand.hbm [shape: f32[1,256], index: 5, kind: input, shape index: {}]   ;;  %s12587_s6 = inlined_call_operand.hbm [shape: f32[1,256], index: 6, kind: input, shape index: {}]   ;;  %s12588_s7 = inlined_call_operand.hbm [shape: bf16[256,512], index: 7, kind: input, shape index: {}]   ;;  %s12589_s8 = inlined_call_operand.hbm [shape: f32[1,512], index: 8, kind: input, shape index: {}]   ;;  %s12590_s9 = inlined_call_operand.hbm [shape: f32[1,512], index: 9, kind: input, shape index: {}]   ;;  %s12591_s10 = inlined_call_operand.hbm [shape: f32[1,512], index: 10, kind: input, shape index: {}]   ;;  %s12592_s11 = inlined_call_operand.hbm [shape: bf16[512,1024], index: 11, kind: input, shape index: {}]   ;;  %s12593_s12 = inlined_call_operand.hbm [shape: f32[1,1024], index: 12, kind: input, shape index: {}]   ;;  %s12594_s13 = inlined_call_operand.hbm [shape: f32[1,1024], index: 13, kind: input, shape index: {}]   ;;  %s12595_s14 = inlined_call_operand.hbm [shape: f32[1,1024], index: 14, kind: input, shape index: {}]   ;;  %s12596_s15 = inlined_call_operand.hbm [shape: bf16[1024,896], index: 15, kind: input, shape index: {}]   ;;  %s12597_s16 = inlined_call_operand.hbm [shape: f32[1,896], index: 16, kind: input, shape index: {}]   ;;  %s12598_s17 = inlined_call_operand.hbm [shape: f32[8,896], index: 17, kind: output, shape index: {}]  }
   0x1   :  { %12599 = sst [smem:[#allocation40_spill]] %s12581_s0 }
   0x2   :  { %12600 = sst [smem:[#allocation41_spill]] %s12582_s1 }
   0x3   :  { %12601 = sst [smem:[#allocation42_spill]] %s12598_s17 }
   0x4   :  { %22 = vsyncpa [#allocation3], 0 }
   0x5   :  { %23 = vsyncpa [#allocation6], 0 }
   0x6   :  { %24 = vsyncpa [#allocation9], 0 }
   0x7   :  { %25 = vsyncpa [#allocation12], 0 }
   0x8   :  { %26 = vsyncpa [#allocation15], 0 }
   0x9   :  { %27 = vsyncpa [#allocation18], 0 }
   0xa   :  { %28 = vsyncpa [#allocation21], 0 }
   0xb   :  { %29 = vsyncpa [#allocation24], 0 }
   0xc   :  { %30 = vsyncpa [#allocation27], 0  ;;  %s12602_s26 = sld [smem:[#allocation41_spill]] }
  0x12   :  { %s47_s27 = sshll.u32 %s12602_s26, 4  ;;  %s48_s27 = int_to_ptr.hbm [resolvable:$true] %s47_s27 }
  0x13   :  { %31 = vsyncpa [#allocation4], 0  ;;  %s11709_s28 = smov [#allocation5]   ;;  %s71_s18 = sshll.u32 %s12584_s3, 4  ;;  %s72_s18 = int_to_ptr.hbm [resolvable:$true] %s71_s18 }
  0x14   :  { %s49_s29 = sshll.u32 %s11709_s28, 4  ;;  %s11710_s19 = smov 64   ;;  %s50_s29 = int_to_ptr.vmem [resolvable:$true] %s49_s29 }
  0x15   :  { %s11711_s1 = smov 4   ;;  %s11712_s20 = smov [#allocation8]  }
  0x16   :  { %55 = dma.hbm_to_vmem [thread:$0]  %s48_s27, 1024, %s50_s29, [#allocation6], %s11710_s19, %s11710_s19, %s11711_s1  }
  0x17   :  { %s73_s21 = sshll.u32 %s11712_s20, 4  ;;  %s11713_s22 = smov 128   ;;  %s74_s21 = int_to_ptr.vmem [resolvable:$true] %s73_s21 }
  0x18   :  { %s11714_s23 = smov 8   ;;  %s96_s26 = sshll.u32 %s12586_s5, 4  ;;  %s97_s26 = int_to_ptr.hbm [resolvable:$true] %s96_s26 }
  0x19   :  { %79 = dma.hbm_to_vmem [thread:$0]  %s72_s18, 2048, %s74_s21, [#allocation9], %s11713_s22, %s11713_s22, %s11714_s23  }
  0x1a   :  { %s11715_s28 = smov [#allocation11]   ;;  %s117_s30 = sshll.u32 %s12588_s7, 4  ;;  %s118_s30 = int_to_ptr.hbm [resolvable:$true] %s117_s30 }
  0x1b   :  { %s98_s17 = sshll.u32 %s11715_s28, 4  ;;  %s11716_s27 = smov [#allocation14]   ;;  %s99_s17 = int_to_ptr.vmem [resolvable:$true] %s98_s17 }
  0x1c   :  { %101 = dma.hbm_to_vmem [thread:$0]  %s97_s26, 32, %s99_s17, [#allocation12]  }
  0x1d   :  { %s119_s29 = sshll.u32 %s11716_s27, 4  ;;  %s11717_s19 = smov 256   ;;  %s120_s29 = int_to_ptr.vmem [resolvable:$true] %s119_s29 }
  0x1e   :  { %s11718_s1 = smov 16   ;;  %s142_s5 = sshll.u32 %s12590_s9, 4  ;;  %s143_s5 = int_to_ptr.hbm [resolvable:$true] %s142_s5 }
  0x1f   :  { %125 = dma.hbm_to_vmem [thread:$0]  %s118_s30, 8192, %s120_s29, [#allocation15], %s11717_s19, %s11717_s19, %s11718_s1  }
  0x20   :  { %s11719_s21 = smov [#allocation17]   ;;  %s163_s7 = sshll.u32 %s12592_s11, 4  ;;  %s164_s7 = int_to_ptr.hbm [resolvable:$true] %s163_s7 }
  0x21   :  { %s144_s22 = sshll.u32 %s11719_s21, 4  ;;  %s11720_s17 = smov [#allocation20]   ;;  %s145_s22 = int_to_ptr.vmem [resolvable:$true] %s144_s22 }
  0x22   :  { %147 = dma.hbm_to_vmem [thread:$0]  %s143_s5, 64, %s145_s22, [#allocation18]  }
  0x23   :  { %s165_s25 = sshll.u32 %s11720_s17, 4  ;;  %s11721_s26 = smov 512   ;;  %s166_s25 = int_to_ptr.vmem [resolvable:$true] %s165_s25 }
  0x24   :  { %s11722_s28 = smov 32   ;;  %s188_s9 = sshll.u32 %s12594_s13, 4  ;;  %s189_s9 = int_to_ptr.hbm [resolvable:$true] %s188_s9 }
  0x25   :  { %171 = dma.hbm_to_vmem [thread:$0]  %s164_s7, 32768, %s166_s25, [#allocation21], %s11721_s26, %s11721_s26, %s11722_s28  }
  0x26   :  { %s11723_s30 = smov [#allocation23]   ;;  %s209_s11 = sshll.u32 %s12596_s15, 4  ;;  %s210_s11 = int_to_ptr.hbm [resolvable:$true] %s209_s11 }
  0x27   :  { %s190_s27 = sshll.u32 %s11723_s30, 4  ;;  %s11724_s1 = smov [#allocation26]   ;;  %s191_s27 = int_to_ptr.vmem [resolvable:$true] %s190_s27 }
  0x28   :  { %193 = dma.hbm_to_vmem [thread:$0]  %s189_s9, 128, %s191_s27, [#allocation24]  }
  0x29   :  { %s211_s18 = sshll.u32 %s11724_s1, 4  ;;  %s11725_s20 = smov 448   ;;  %s212_s18 = int_to_ptr.vmem [resolvable:$true] %s211_s18 }
  0x2a   :  { %s11726_s5 = smov 28   ;;  %s12603_s23 = sld [smem:[#allocation40_spill]] }
  0x2b   :  { %217 = dma.hbm_to_vmem [thread:$0]  %s210_s11, 57344, %s212_s18, [#allocation27], %s11725_s20, %s11725_s20, %s11726_s5  }
  0x2c   :  { %s11727_s24 = smov [#allocation2]   ;;  %s61_s15 = sshll.u32 %s12583_s2, 4  ;;  %s62_s15 = int_to_ptr.hbm [resolvable:$true] %s61_s15 }
  0x2d   :  { %s39_s7 = sshll.u32 %s11727_s24, 4  ;;  %s11728_s26 = smov [#allocation7]   ;;  %s40_s7 = int_to_ptr.vmem [resolvable:$true] %s39_s7 }
  0x2e   :  { %s63_s28 = sshll.u32 %s11728_s26, 4  ;;  %s85_s9 = sshll.u32 %s12585_s4, 4  ;;  %s64_s28 = int_to_ptr.vmem [resolvable:$true] %s63_s28  ;;  %s86_s9 = int_to_ptr.hbm [resolvable:$true] %s85_s9 }
  0x2f   :  { %66 = dma.hbm_to_vmem [thread:$0]  %s62_s15, 16, %s64_s28, [#allocation6]  }
  0x30   :  { %s37_s13 = sshll.u32 %s12603_s23, 4  ;;  %s107_s29 = sshll.u32 %s12587_s6, 4  ;;  %s38_s13 = int_to_ptr.hbm [resolvable:$true] %s37_s13  ;;  %s108_s29 = int_to_ptr.hbm [resolvable:$true] %s107_s29 }
  0x31   :  { %42 = dma.hbm_to_vmem [thread:$0]  %s38_s13, 128, %s40_s7, [#allocation3]  }
  0x32   :  { %s11729_s19 = smov [#allocation10]   ;;  %s11730_s2 = smov [#allocation13]  }
  0x33   :  { %s87_s11 = sshll.u32 %s11729_s19, 4  ;;  %s109_s1 = sshll.u32 %s11730_s2, 4  ;;  %s88_s11 = int_to_ptr.vmem [resolvable:$true] %s87_s11  ;;  %s110_s1 = int_to_ptr.vmem [resolvable:$true] %s109_s1 }
  0x34   :  { %90 = dma.hbm_to_vmem [thread:$0]  %s86_s9, 32, %s88_s11, [#allocation9]  }
  0x35   :  { %s131_s5 = sshll.u32 %s12589_s8, 4  ;;  %s153_s22 = sshll.u32 %s12591_s10, 4  ;;  %s132_s5 = int_to_ptr.hbm [resolvable:$true] %s131_s5  ;;  %s154_s22 = int_to_ptr.hbm [resolvable:$true] %s153_s22 }
  0x36   :  { %112 = dma.hbm_to_vmem [thread:$0]  %s108_s29, 32, %s110_s1, [#allocation12]  }
  0x37   :  { %s11731_s23 = smov [#allocation16]   ;;  %s11732_s13 = smov [#allocation19]  }
  0x38   :  { %s133_s6 = sshll.u32 %s11731_s23, 4  ;;  %s155_s24 = sshll.u32 %s11732_s13, 4  ;;  %s134_s6 = int_to_ptr.vmem [resolvable:$true] %s133_s6  ;;  %s156_s24 = int_to_ptr.vmem [resolvable:$true] %s155_s24 }
  0x39   :  { %136 = dma.hbm_to_vmem [thread:$0]  %s132_s5, 64, %s134_s6, [#allocation15]  }
  0x3a   :  { %s177_s25 = sshll.u32 %s12593_s12, 4  ;;  %s199_s26 = sshll.u32 %s12595_s14, 4  ;;  %s178_s25 = int_to_ptr.hbm [resolvable:$true] %s177_s25  ;;  %s200_s26 = int_to_ptr.hbm [resolvable:$true] %s199_s26 }
  0x3b   :  { %158 = dma.hbm_to_vmem [thread:$0]  %s154_s22, 64, %s156_s24, [#allocation18]  }
  0x3c   :  { %s11733_s28 = smov [#allocation22]   ;;  %s11734_s0 = smov [#allocation25]  }
  0x3d   :  { %s179_s10 = sshll.u32 %s11733_s28, 4  ;;  %s201_s3 = sshll.u32 %s11734_s0, 4  ;;  %s180_s10 = int_to_ptr.vmem [resolvable:$true] %s179_s10  ;;  %s202_s3 = int_to_ptr.vmem [resolvable:$true] %s201_s3 }
  0x3e   :  { %182 = dma.hbm_to_vmem [thread:$0]  %s178_s25, 128, %s180_s10, [#allocation21]  }
  0x3f   :  { %s223_s27 = sshll.u32 %s12597_s16, 4  ;;  %s11735_s12 = smov [#allocation28]   ;;  %s224_s27 = int_to_ptr.hbm [resolvable:$true] %s223_s27 }
  0x40   :  { %204 = dma.hbm_to_vmem [thread:$0]  %s200_s26, 128, %s202_s3, [#allocation24]  }
  0x41   :  { %s225_s29 = sshll.u32 %s11735_s12, 4  ;;  %s226_s29 = int_to_ptr.vmem [resolvable:$true] %s225_s29 }
  0x42   :  { %228 = dma.hbm_to_vmem [thread:$0]  %s224_s27, 112, %s226_s29, [#allocation27]  }
  0x43   :  { %11689 = dma.done.wait [#allocation3], 128  }
  0x44   :  { %11690 = vsyncadd [#allocation3], 4294967168 }
  0x45   :  { %11691 = dma.done.wait [#allocation6], 1040  }
  0x46   :  { %11692 = vsyncadd [#allocation6], 4294966256 }
  0x47   :  { %11693 = dma.done.wait [#allocation9], 2080  }
  0x48   :  { %11694 = vsyncadd [#allocation9], 4294965216 }
  0x49   :  { %11695 = dma.done.wait [#allocation12], 64  }
  0x4a   :  { %11696 = vsyncadd [#allocation12], 4294967232 }
  0x4b   :  { %11697 = dma.done.wait [#allocation15], 8256  }
  0x4c   :  { %11698 = vsyncadd [#allocation15], 4294959040 }
  0x4d   :  { %11699 = dma.done.wait [#allocation18], 128  }
  0x4e   :  { %11700 = vsyncadd [#allocation18], 4294967168 }
  0x4f   :  { %11701 = dma.done.wait [#allocation21], 32896  }
  0x50   :  { %11702 = vsyncadd [#allocation21], 4294934400 }
  0x51   :  { %11703 = dma.done.wait [#allocation24], 256  }
  0x52   :  { %11704 = vsyncadd [#allocation24], 4294967040 }
  0x53   :  { %11705 = dma.done.wait [#allocation27], 57456  }
  0x54   :  { %11706 = vsyncadd [#allocation27], 4294909840  ;;  %v10396_v0 = vld [vmem:[#allocation5 + $0x38] sm:$0xff]  ;;  %v10395_v1 = vld [vmem:[#allocation5 + $0x30] sm:$0xff]  ;;  %vm577_vm5 = vcmask 1040384   ;;  %s11737_s14 = smov [#allocation29]  }
  0x55   :  { %367 = vmatpush.bf16.msra.mxu0 %v10396_v0  ;;  %v7311_v2 = vld [vmem:[#allocation8 + $0x70] sm:$0xf]  ;;  %v10412_v3 = vld [vmem:[#allocation8 + $0x74] sm:$0xf0]  ;;  %v10411_v4 = vld [vmem:[#allocation8 + $0x74] sm:$0xf] }
  0x56   :  { %v7312_v5 = vor.u32 %v10412_v3, %v7311_v2  ;;  %v7313_v6 = vld [vmem:[#allocation8 + $0x78] sm:$0xf0]  ;;  %v7303_v7 = vld [vmem:[#allocation8 + $0x60] sm:$0xf]  ;;  %v10410_v8 = vld [vmem:[#allocation8 + $0x64] sm:$0xf0] }
  0x57   :  { %v7316_v9 = vor.u32 %v10411_v4, %v7313_v6  ;;  %v10409_v10 = vld [vmem:[#allocation8 + $0x64] sm:$0xf]  ;;  %v7305_v11 = vld [vmem:[#allocation8 + $0x68] sm:$0xf0]  ;;  %v7304_v13 = vor.u32 %v10410_v8, %v7303_v7  ;;  %v7295_v15 = vld [vmem:[#allocation8 + $0x50] sm:$0xf] }
  0x58   :  { %v10394_v12 = vld [vmem:[#allocation5 + $0x28] sm:$0xff]  ;;  %486 = vmatpush.bf16.msra.mxu1 %v7312_v5  ;;  %v7308_v14 = vor.u32 %v10409_v10, %v7305_v11  ;;  %v10408_v16 = vld [vmem:[#allocation8 + $0x54] sm:$0xf0]  ;;  %v10407_v17 = vld [vmem:[#allocation8 + $0x54] sm:$0xf]  ;;  %s7201_s16 = sshll.u32 %s11737_s14, 4  ;;  %s7202_s16 = int_to_ptr.vmem [resolvable:$true] %s7201_s16 }
  0x59   :  { %368 = vmatpush.bf16.msra.mxu0 %v10395_v1  ;;  %499 = vmatpush.bf16.msra.mxu2 %v7316_v9  ;;  %v7297_v18 = vld [vmem:[#allocation8 + $0x58] sm:$0xf0]  ;;  %v7296_v20 = vor.u32 %v10408_v16, %v7295_v15  ;;  %v7287_v22 = vld [vmem:[#allocation8 + $0x40] sm:$0xf]  ;;  %v10406_v23 = vld [vmem:[#allocation8 + $0x44] sm:$0xf0] }
  0x5a   :  { %v10393_v19 = vld [vmem:[#allocation5 + $0x20] sm:$0xff]  ;;  %v7300_v21 = vor.u32 %v10407_v17, %v7297_v18  ;;  %v7289_v25 = vld [vmem:[#allocation8 + $0x48] sm:$0xf0]  ;;  %v10392_v26 = vld [vmem:[#allocation5 + $0x18] sm:$0xff]  ;;  %v7288_v27 = vor.u32 %v10406_v23, %v7287_v22  ;;  %v11736_v1 = vmov 8.0   ;;  %s12622_s2 = sld [smem:[#allocation42_spill]] }
  0x5b   :  { %v10405_v24 = vld [vmem:[#allocation8 + $0x44] sm:$0xf]  ;;  %v7279_v29 = vld [vmem:[#allocation8 + $0x30] sm:$0xf]  ;;  %v10404_v30 = vld [vmem:[#allocation8 + $0x34] sm:$0xf0]  ;;  %11211 = vrcp.f32 %v11736_v1 }
  0x5c   :  { %487 = vmatpush.bf16.msra.mxu1 %v7304_v13  ;;  %v7292_v28 = vor.u32 %v10405_v24, %v7289_v25  ;;  %v10403_v31 = vld [vmem:[#allocation8 + $0x34] sm:$0xf]  ;;  %v7281_v32 = vld [vmem:[#allocation8 + $0x38] sm:$0xf0]  ;;  %v7280_v34 = vor.u32 %v10404_v30, %v7279_v29  ;;  %v7271_v36 = vld [vmem:[#allocation8 + $0x20] sm:$0xf] }
  0x5d   :  { %369 = vmatpush.bf16.msra.mxu0 %v10394_v12  ;;  %500 = vmatpush.bf16.msra.mxu2 %v7308_v14  ;;  %v10391_v33 = vld [vmem:[#allocation5 + $0x10] sm:$0xff]  ;;  %v7284_v35 = vor.u32 %v10403_v31, %v7281_v32  ;;  %v10402_v37 = vld [vmem:[#allocation8 + $0x24] sm:$0xf0]  ;;  %v10401_v38 = vld [vmem:[#allocation8 + $0x24] sm:$0xf] }
  0x5e   :  { %v7273_v39 = vld [vmem:[#allocation8 + $0x28] sm:$0xf0]  ;;  %v7272_v41 = vor.u32 %v10402_v37, %v7271_v36  ;;  %v10389_v43 = vld [vmem:[#allocation5] sm:$0xff]  ;;  %v297_v44 = vld [vmem:[#allocation2] sm:$0xff] }
  0x5f   :  { %v10390_v40 = vld [vmem:[#allocation5 + $0x8] sm:$0xff]  ;;  %v7276_v42 = vor.u32 %v10401_v38, %v7273_v39  ;;  %v298_v45 = vpack.c.bf16 %v297_v44, %v297_v44  ;;  %v7263_v46 = vld [vmem:[#allocation8 + $0x10] sm:$0xf]  ;;  %v10400_v47 = vld [vmem:[#allocation8 + $0x14] sm:$0xf0] }
  0x60   :  { %488 = vmatpush.bf16.msra.mxu1 %v7296_v20  ;;  %v10399_v48 = vld [vmem:[#allocation8 + $0x14] sm:$0xf]  ;;  %v7264_v49 = vor.u32 %v10400_v47, %v7263_v46  ;;  %v7265_v50 = vld [vmem:[#allocation8 + $0x18] sm:$0xf0]  ;;  %v7255_v52 = vld [vmem:[#allocation8] sm:$0xf] }
  0x61   :  { %370 = vmatpush.bf16.msra.mxu0 %v10393_v19  ;;  %501 = vmatpush.bf16.msra.mxu2 %v7300_v21  ;;  %v7268_v51 = vor.u32 %v10399_v48, %v7265_v50  ;;  %v10398_v53 = vld [vmem:[#allocation8 + $0x4] sm:$0xf0]  ;;  %v10397_v54 = vld [vmem:[#allocation8 + $0x4] sm:$0xf]  ;;  %v7257_v56 = vld [vmem:[#allocation8 + $0x8] sm:$0xf0]  ;;  %v11212_v2 = vpop.eup %11211 }
  0x62   :  { %v7256_v55 = vor.u32 %v10398_v53, %v7255_v52  ;;  %v7260_v57 = vor.u32 %v10397_v54, %v7257_v56  ;;  %v11210_v58 = vld [vmem:[#allocation7] ss:$0 sm:$0xff]  ;;  %v400_v3 = vld [vmem:[#allocation10] sm:$0x3]  ;;  %v525_v4 = vmul.f32 8.0, %v11212_v2  ;;  %vm529_vm1 = vweird.f32 %v11212_v2  ;;  %s7203_s1 = sshll.u32 %s12622_s2, 4  ;;  %s7204_s1 = int_to_ptr.hbm [resolvable:$true] %s7203_s1 }
  0x63   :  { %v402_v5 = vperm.slane %v400_v3, 0  ;;  %v403_v10 = vperm.slane %v400_v3, 1  ;;  %v7431_v13 = vld [vmem:[#allocation14 + $0xe0] sm:$0xf]  ;;  %v10443_v14 = vld [vmem:[#allocation14 + $0xec] sm:$0xf0] }
  0x64   :  { %489 = vmatpush.bf16.msra.mxu1 %v7288_v27  ;;  %v526_v7 = vsub.f32 1.0, %v525_v4  ;;  %v7559_v15 = vld [vmem:[#allocation14 + $0x1e0] sm:$0xf]  ;;  %v7432_v17 = vor.u32 %v10443_v14, %v7431_v13  ;;  %v10475_v18 = vld [vmem:[#allocation14 + $0x1ec] sm:$0xf0] }
  0x65   :  { %371 = vmatpush.bf16.msra.mxu0 %v10392_v26  ;;  %502 = vmatpush.bf16.msra.mxu2 %v7292_v28  ;;  %v10441_v19 = vld [vmem:[#allocation14 + $0xe4] sm:$0xf]  ;;  %v7433_v20 = vld [vmem:[#allocation14 + $0xf0] sm:$0xf0]  ;;  %v7560_v23 = vor.u32 %v10475_v18, %v7559_v15  ;;  %v7415_v32 = vld [vmem:[#allocation14 + $0xc0] sm:$0xf] }
  0x66   :  { %v527_v11 = vmul.f32 %v11212_v2, %v526_v7  ;;  %v7436_v24 = vor.u32 %v10441_v19, %v7433_v20  ;;  %v10473_v25 = vld [vmem:[#allocation14 + $0x1e4] sm:$0xf]  ;;  %v7561_v26 = vld [vmem:[#allocation14 + $0x1f0] sm:$0xf0]  ;;  %1006 = vmatpush.bf16.msra.mxu3 %v7432_v17  ;;  %v10471_v36 = vld [vmem:[#allocation14 + $0x1cc] sm:$0xf0] }
  0x67   :  { %v7564_v29 = vor.u32 %v10473_v25, %v7561_v26  ;;  %v10437_v37 = vld [vmem:[#allocation14 + $0xc4] sm:$0xf]  ;;  %v10435_v50 = vld [vmem:[#allocation14 + $0xac] sm:$0xf0]  ;;  %v7527_v53 = vld [vmem:[#allocation14 + $0x1a0] sm:$0xf] }
  0x68   :  { %490 = vmatpush.bf16.msra.mxu1 %v7280_v34  ;;  %v528_v27 = vadd.f32 %v11212_v2, %v527_v11  ;;  %v10467_v54 = vld [vmem:[#allocation14 + $0x1ac] sm:$0xf0]  ;;  %v10429_v7 = vld [vmem:[#allocation14 + $0x84] sm:$0xf]  ;;  %v7513_v14 = vld [vmem:[#allocation14 + $0x190] sm:$0xf0] }
  0x69   :  { %372 = vmatpush.bf16.msra.mxu0 %v10391_v33  ;;  %503 = vmatpush.bf16.msra.mxu2 %v7284_v35  ;;  %v10439_v33 = vld [vmem:[#allocation14 + $0xcc] sm:$0xf0]  ;;  %v7543_v35 = vld [vmem:[#allocation14 + $0x1c0] sm:$0xf]  ;;  %v10461_v13 = vld [vmem:[#allocation14 + $0x184] sm:$0xf] }
  0x6a   :  { %v7416_v34 = vor.u32 %v10439_v33, %v7415_v32  ;;  %v10431_v3 = vld [vmem:[#allocation14 + $0x8c] sm:$0xf0]  ;;  %v7367_v19 = vld [vmem:[#allocation14 + $0x60] sm:$0xf]  ;;  %v10425_v25 = vld [vmem:[#allocation14 + $0x64] sm:$0xf] }
  0x6b   :  { %v10427_v20 = vld [vmem:[#allocation14 + $0x6c] sm:$0xf0] }
  0x6c   :  { %491 = vmatpush.bf16.msra.mxu1 %v7272_v41  ;;  %v7417_v41 = vld [vmem:[#allocation14 + $0xd0] sm:$0xf0]  ;;  %1007 = vmatpush.bf16.msra.mxu3 %v7416_v34 }
  0x6d   :  { %373 = vmatpush.bf16.msra.mxu0 %v10390_v40  ;;  %504 = vmatpush.bf16.msra.mxu2 %v7276_v42  ;;  %v7544_v40 = vor.u32 %v10471_v36, %v7543_v35  ;;  %v10469_v42 = vld [vmem:[#allocation14 + $0x1c4] sm:$0xf]  ;;  %v7420_v44 = vor.u32 %v10437_v37, %v7417_v41  ;;  %v7351_v36 = vld [vmem:[#allocation14 + $0x40] sm:$0xf]  ;;  %v10423_v37 = vld [vmem:[#allocation14 + $0x4c] sm:$0xf0] }
  0x6e   :  { %v10421_v41 = vld [vmem:[#allocation14 + $0x44] sm:$0xf] }
  0x70   :  { %492 = vmatpush.bf16.msra.mxu1 %v7264_v49  ;;  %v7399_v49 = vld [vmem:[#allocation14 + $0xa0] sm:$0xf] }
  0x71   :  { %374 = vmatpush.bf16.msra.mxu0 %v10389_v43  ;;  %505 = vmatpush.bf16.msra.mxu2 %v7268_v51  ;;  %v11888_v43 = vsel %vm529_vm1, %v11212_v2, %v528_v27  ;;  %v7400_v52 = vor.u32 %v10435_v50, %v7399_v49  ;;  %v7383_v2 = vld [vmem:[#allocation14 + $0x80] sm:$0xf]  ;;  %v7481_v49 = vld [vmem:[#allocation14 + $0x150] sm:$0xf0] }
  0x72   :  { %v7384_v4 = vor.u32 %v10431_v3, %v7383_v2  ;;  %v7465_v2 = vld [vmem:[#allocation14 + $0x130] sm:$0xf0] }
  0x73   :  { %1008 = vmatpush.bf16.msra.mxu3 %v7400_v52 }
  0x74   :  { %375 = vmatmul.bf16.vlgmr.msra.gmra.mxu0 %v298_v45  ;;  %493 = vmatpush.bf16.msra.mxu1 %v7256_v55  ;;  %v7545_v45 = vld [vmem:[#allocation14 + $0x1d0] sm:$0xf0]  ;;  %v10433_v55 = vld [vmem:[#allocation14 + $0xa4] sm:$0xf] }
  0x75   :  { %506 = vmatpush.bf16.msra.mxu2 %v7260_v57  ;;  %1019 = vmatpush.bf16.msrb.mxu0 %v7560_v23  ;;  %v7548_v48 = vor.u32 %v10469_v42, %v7545_v45  ;;  %v7495_v23 = vld [vmem:[#allocation14 + $0x160] sm:$0xf] }
  0x77   :  { %1009 = vmatpush.bf16.msra.mxu3 %v7384_v4 }
  0x78   :  { %1032 = vmatpush.bf16.msrb.mxu1 %v7436_v24  ;;  %v10459_v24 = vld [vmem:[#allocation14 + $0x16c] sm:$0xf0] }
  0x79   :  { %1045 = vmatpush.bf16.msrb.mxu2 %v7564_v29  ;;  %1020 = vmatpush.bf16.msrb.mxu0 %v7544_v40  ;;  %v7369_v29 = vld [vmem:[#allocation14 + $0x70] sm:$0xf0]  ;;  %v10455_v40 = vld [vmem:[#allocation14 + $0x14c] sm:$0xf0] }
  0x7a   :  { %v7372_v32 = vor.u32 %v10425_v25, %v7369_v29 }
  0x7c   :  { %1033 = vmatpush.bf16.msrb.mxu1 %v7420_v44 }
  0x7d   :  { %1046 = vmatpush.bf16.msrb.mxu2 %v7548_v48 }
  0xf1   :  { %v376_v59 = vpop.f32.mrf.mxu0 }
  0xf2   :  { %v377_v60 = vadd.f32 %v11210_v58, %v376_v59  ;;  %v7528_v58 = vor.u32 %v10467_v54, %v7527_v53  ;;  %v7401_v59 = vld [vmem:[#allocation14 + $0xb0] sm:$0xf0]  ;;  %v7335_v53 = vld [vmem:[#allocation14 + $0x20] sm:$0xf]  ;;  %v10419_v54 = vld [vmem:[#allocation14 + $0x2c] sm:$0xf0] }
  0xf4   :  { %v381_v61 = vmul.f32 0.2, %v377_v60  ;;  %vm380_vm0 = vcmp.gt.f32.partialorder %v377_v60, 0.0  ;;  %1021 = vmatpush.bf16.msrb.mxu0 %v7528_v58  ;;  %v10451_v58 = vld [vmem:[#allocation14 + $0x12c] sm:$0xf0] }
  0xf6   :  { %v382_v62 = vsel %vm380_vm0, %v377_v60, %v381_v61  ;;  %v10465_v60 = vld [vmem:[#allocation14 + $0x1a4] sm:$0xf]  ;;  %v7529_v61 = vld [vmem:[#allocation14 + $0x1b0] sm:$0xf0] }
  0xf7   :  { %v383_v63 = vpack.c.bf16 %v382_v62, %v382_v62  ;;  %v7404_v62 = vor.u32 %v10433_v55, %v7401_v59  ;;  %v7336_v55 = vor.u32 %v10419_v54, %v7335_v53  ;;  %v10417_v59 = vld [vmem:[#allocation14 + $0x24] sm:$0xf]  ;;  %v7535_v53 = vld [vmem:[#allocation14 + $0x1a8] sm:$0xf] }
  0xf9   :  { %v378_v0 = vpop.f32.mrf.mxu0  ;;  %494 = vmatmul.bf16.vlgmr.msra.gmra.mxu1 %v383_v63  ;;  %507 = vmatmul.bf16.vlgmr.msra.gmra.mxu2 %v383_v63  ;;  %v7532_v63 = vor.u32 %v10465_v60, %v7529_v61 }
  0xfa   :  { %1034 = vmatpush.bf16.msrb.mxu1 %v7404_v62 }
  0xfb   :  { %1047 = vmatpush.bf16.msrb.mxu2 %v7532_v63  ;;  %v7337_v63 = vld [vmem:[#allocation14 + $0x30] sm:$0xf0] }
 0x176   :  { %v495_v6 = vpop.f32.mrf.mxu1 }
 0x177   :  { %v11879_v8 = vadd.f32 %v495_v6, %v402_v5  ;;  %v7511_v5 = vld [vmem:[#allocation14 + $0x180] sm:$0xf]  ;;  %v10463_v6 = vld [vmem:[#allocation14 + $0x18c] sm:$0xf0] }
 0x178   :  { %v7512_v11 = vor.u32 %v10463_v6, %v7511_v5  ;;  %v7319_v6 = vld [vmem:[#allocation14] sm:$0xf] }
 0x179   :  { %v512_v9 = vrot.slane %v11879_v8, 4 }
 0x17a   :  { %1022 = vmatpush.bf16.msrb.mxu0 %v7512_v11  ;;  %v10447_v11 = vld [vmem:[#allocation14 + $0x10c] sm:$0xf0] }
 0x17b   :  { %v513_v12 = vadd.f32 %v512_v9, %v11879_v8 }
 0x17c   :  { %v508_v16 = vpop.f32.mrf.mxu2 }
 0x17d   :  { %v514_v21 = vrot.slane %v513_v12, 2  ;;  %v11883_v22 = vadd.f32 %v508_v16, %v403_v10  ;;  %v7516_v16 = vor.u32 %v10461_v13, %v7513_v14  ;;  %v7321_v13 = vld [vmem:[#allocation14 + $0x10] sm:$0xf0] }
 0x17e   :  { %v497_v28 = vpop.f32.mrf.mxu1 }
 0x17f   :  { %v515_v30 = vadd.f32 %v514_v21, %v513_v12  ;;  %v518_v31 = vrot.slane %v11883_v22, 4  ;;  %v7385_v12 = vld [vmem:[#allocation14 + $0x90] sm:$0xf0]  ;;  %v7368_v21 = vor.u32 %v10427_v20, %v7367_v19  ;;  %1048 = vmatpush.bf16.msrb.mxu2 %v7516_v16  ;;  %v7496_v28 = vor.u32 %v10459_v24, %v7495_v23  ;;  %v10445_v19 = vld [vmem:[#allocation14 + $0x104] sm:$0xf] }
 0x180   :  { %v7388_v15 = vor.u32 %v10429_v7, %v7385_v12  ;;  %v10415_v7 = vld [vmem:[#allocation14 + $0xc] sm:$0xf0]  ;;  %v10413_v12 = vld [vmem:[#allocation14 + $0x4] sm:$0xf]  ;;  %v7449_v20 = vld [vmem:[#allocation14 + $0x110] sm:$0xf0] }
 0x181   :  { %v516_v38 = vrot.slane %v515_v30, 1  ;;  %v519_v39 = vadd.f32 %v518_v31, %v11883_v22  ;;  %v7497_v31 = vld [vmem:[#allocation14 + $0x170] sm:$0xf0]  ;;  %1010 = vmatpush.bf16.msra.mxu3 %v7368_v21  ;;  %1023 = vmatpush.bf16.msrb.mxu0 %v7496_v28  ;;  %v7439_v21 = vld [vmem:[#allocation14 + $0xe8] sm:$0xf]  ;;  %v7452_v25 = vor.u32 %v10445_v19, %v7449_v20 }
 0x182   :  { %1035 = vmatpush.bf16.msrb.mxu1 %v7388_v15  ;;  %v10444_v23 = vld [vmem:[#allocation14 + $0xf4] sm:$0xf0]  ;;  %v10442_v28 = vld [vmem:[#allocation14 + $0xec] sm:$0xf] }
 0x183   :  { %v517_v46 = vadd.f32 %v516_v38, %v515_v30  ;;  %v520_v47 = vrot.slane %v519_v39, 2  ;;  %v10457_v30 = vld [vmem:[#allocation14 + $0x164] sm:$0xf]  ;;  %v7352_v38 = vor.u32 %v10423_v37, %v7351_v36  ;;  %v7440_v29 = vor.u32 %v10444_v23, %v7439_v21  ;;  %v7423_v37 = vld [vmem:[#allocation14 + $0xc8] sm:$0xf] }
 0x184   :  { %v510_v51 = vpop.f32.mrf.mxu2  ;;  %v7500_v33 = vor.u32 %v10457_v30, %v7497_v31  ;;  %v7441_v31 = vld [vmem:[#allocation14 + $0xf8] sm:$0xf0]  ;;  %v7375_v21 = vld [vmem:[#allocation14 + $0x68] sm:$0xf]  ;;  %v10428_v23 = vld [vmem:[#allocation14 + $0x74] sm:$0xf0] }
 0x185   :  { %v11891_v56 = vmul.f32 %v11888_v43, %v517_v46  ;;  %v521_v57 = vadd.f32 %v520_v47, %v519_v39  ;;  %v7479_v39 = vld [vmem:[#allocation14 + $0x140] sm:$0xf]  ;;  %v7353_v46 = vld [vmem:[#allocation14 + $0x50] sm:$0xf0]  ;;  %v10453_v47 = vld [vmem:[#allocation14 + $0x144] sm:$0xf]  ;;  %1011 = vmatpush.bf16.msra.mxu3 %v7352_v38 }
 0x186   :  { %1036 = vmatpush.bf16.msrb.mxu1 %v7372_v32  ;;  %1049 = vmatpush.bf16.msrb.mxu2 %v7500_v33  ;;  %v7480_v45 = vor.u32 %v10455_v40, %v7479_v39  ;;  %v7356_v48 = vor.u32 %v10421_v41, %v7353_v46  ;;  %v7484_v52 = vor.u32 %v10453_v47, %v7481_v49  ;;  %v10474_v32 = vld [vmem:[#allocation14 + $0x1ec] sm:$0xf]  ;;  %v7569_v33 = vld [vmem:[#allocation14 + $0x1f8] sm:$0xf0]  ;;  %v10440_v38 = vld [vmem:[#allocation14 + $0xd4] sm:$0xf0] }
 0x187   :  { %v533_v0 = vsub.f32 %v11879_v8, %v11891_v56  ;;  %v522_v1 = vrot.slane %v521_v57, 1  ;;  %v7572_v36 = vor.u32 %v10474_v32, %v7569_v33  ;;  %v7551_v39 = vld [vmem:[#allocation14 + $0x1c8] sm:$0xf]  ;;  %v7424_v40 = vor.u32 %v10440_v38, %v7423_v37  ;;  %v10472_v41 = vld [vmem:[#allocation14 + $0x1d4] sm:$0xf0] }
 0x188   :  { %1024 = vmatpush.bf16.msrb.mxu0 %v7480_v45  ;;  %v7552_v46 = vor.u32 %v10472_v41, %v7551_v39  ;;  %v7553_v49 = vld [vmem:[#allocation14 + $0x1d8] sm:$0xf0]  ;;  %v7359_v37 = vld [vmem:[#allocation14 + $0x48] sm:$0xf]  ;;  %v10424_v38 = vld [vmem:[#allocation14 + $0x54] sm:$0xf0] }
 0x189   :  { %v535_v9 = vmul.f32 %v533_v0, %v533_v0  ;;  %v523_v10 = vadd.f32 %v522_v1, %v521_v57  ;;  %v7463_v57 = vld [vmem:[#allocation14 + $0x120] sm:$0xf]  ;;  %v10449_v0 = vld [vmem:[#allocation14 + $0x124] sm:$0xf]  ;;  %1012 = vmatpush.bf16.msra.mxu3 %v7336_v55  ;;  %v7340_v1 = vor.u32 %v10417_v59, %v7337_v63  ;;  %v10468_v55 = vld [vmem:[#allocation14 + $0x1b4] sm:$0xf0] }
 0x18a   :  { %1037 = vmatpush.bf16.msrb.mxu1 %v7356_v48  ;;  %1050 = vmatpush.bf16.msrb.mxu2 %v7484_v52  ;;  %v7464_v62 = vor.u32 %v10451_v58, %v7463_v57  ;;  %v7468_v5 = vor.u32 %v10449_v0, %v7465_v2  ;;  %v10470_v48 = vld [vmem:[#allocation14 + $0x1cc] sm:$0xf]  ;;  %v10436_v52 = vld [vmem:[#allocation14 + $0xb4] sm:$0xf0]  ;;  %v7409_v58 = vld [vmem:[#allocation14 + $0xb8] sm:$0xf0] }
 0x18b   :  { %v537_v17 = vrot.slane %v535_v9, 4  ;;  %v11896_v18 = vmul.f32 %v11888_v43, %v523_v10  ;;  %v7320_v10 = vor.u32 %v10415_v7, %v7319_v6  ;;  %v10434_v57 = vld [vmem:[#allocation14 + $0xac] sm:$0xf]  ;;  %v7537_v63 = vld [vmem:[#allocation14 + $0x1b8] sm:$0xf0] }
 0x18c   :  { %1025 = vmatpush.bf16.msrb.mxu0 %v7464_v62  ;;  %v10466_v62 = vld [vmem:[#allocation14 + $0x1ac] sm:$0xf]  ;;  %v7412_v0 = vor.u32 %v10434_v57, %v7409_v58  ;;  %v7391_v2 = vld [vmem:[#allocation14 + $0x88] sm:$0xf]  ;;  %v10464_v6 = vld [vmem:[#allocation14 + $0x194] sm:$0xf0] }
 0x18d   :  { %v538_v26 = vadd.f32 %v537_v17, %v535_v9  ;;  %v534_v27 = vsub.f32 %v11883_v22, %v11896_v18  ;;  %v7447_v9 = vld [vmem:[#allocation14 + $0x100] sm:$0xf]  ;;  %v7324_v17 = vor.u32 %v10413_v12, %v7321_v13  ;;  %1013 = vmatpush.bf16.msra.mxu3 %v7320_v10  ;;  %v10430_v7 = vld [vmem:[#allocation14 + $0x8c] sm:$0xf]  ;;  %v7505_v32 = vld [vmem:[#allocation14 + $0x178] sm:$0xf0] }
 0x18e   :  { %1038 = vmatpush.bf16.msrb.mxu1 %v7340_v1  ;;  %1051 = vmatpush.bf16.msrb.mxu2 %v7468_v5  ;;  %v7448_v16 = vor.u32 %v10447_v11, %v7447_v9  ;;  %v7540_v1 = vor.u32 %v10466_v62, %v7537_v63  ;;  %v7519_v5 = vld [vmem:[#allocation14 + $0x188] sm:$0xf]  ;;  %v7393_v9 = vld [vmem:[#allocation14 + $0x98] sm:$0xf0]  ;;  %v10462_v10 = vld [vmem:[#allocation14 + $0x18c] sm:$0xf] }
 0x18f   :  { %v539_v34 = vrot.slane %v538_v26, 2  ;;  %v536_v35 = vmul.f32 %v534_v27, %v534_v27  ;;  %v10476_v27 = vld [vmem:[#allocation14 + $0x1f4] sm:$0xf0]  ;;  %v7521_v11 = vld [vmem:[#allocation14 + $0x198] sm:$0xf0]  ;;  %v7520_v13 = vor.u32 %v10464_v6, %v7519_v5 }
 0x190   :  { %1026 = vmatpush.bf16.msrb.mxu0 %v7448_v16  ;;  %v7396_v16 = vor.u32 %v10430_v7, %v7393_v9  ;;  %v7487_v39 = vld [vmem:[#allocation14 + $0x148] sm:$0xf]  ;;  %v10422_v41 = vld [vmem:[#allocation14 + $0x4c] sm:$0xf]  ;;  %v7473_v63 = vld [vmem:[#allocation14 + $0x138] sm:$0xf0] }
 0x191   :  { %v540_v42 = vadd.f32 %v539_v34, %v538_v26  ;;  %v543_v44 = vrot.slane %v536_v35, 4  ;;  %v7567_v26 = vld [vmem:[#allocation14 + $0x1e8] sm:$0xf]  ;;  %1058 = vmatpush.bf16.msrb.mxu3 %v7440_v29  ;;  %v10450_v62 = vld [vmem:[#allocation14 + $0x12c] sm:$0xf] }
 0x192   :  { %1039 = vmatpush.bf16.msrb.mxu1 %v7324_v17  ;;  %v7568_v30 = vor.u32 %v10476_v27, %v7567_v26  ;;  %1052 = vmatpush.bf16.msrb.mxu2 %v7452_v25  ;;  %v7524_v17 = vor.u32 %v10462_v10, %v7521_v11  ;;  %v7376_v25 = vor.u32 %v10428_v23, %v7375_v21  ;;  %v7503_v26 = vld [vmem:[#allocation14 + $0x168] sm:$0xf]  ;;  %v10460_v27 = vld [vmem:[#allocation14 + $0x174] sm:$0xf0] }
 0x193   :  { %v541_v50 = vrot.slane %v540_v42, 1  ;;  %v544_v51 = vadd.f32 %v543_v44, %v536_v35  ;;  %v7444_v35 = vor.u32 %v10442_v28, %v7441_v31  ;;  %v7425_v44 = vld [vmem:[#allocation14 + $0xd8] sm:$0xf0]  ;;  %v10426_v28 = vld [vmem:[#allocation14 + $0x6c] sm:$0xf]  ;;  %v7504_v29 = vor.u32 %v10460_v27, %v7503_v26 }
 0x194   :  { %1071 = vmatpush.bf16.msra.mxu0 %v7568_v30  ;;  %v7377_v30 = vld [vmem:[#allocation14 + $0x78] sm:$0xf0]  ;;  %v10458_v31 = vld [vmem:[#allocation14 + $0x16c] sm:$0xf]  ;;  %v7471_v58 = vld [vmem:[#allocation14 + $0x128] sm:$0xf]  ;;  %v7476_v7 = vor.u32 %v10450_v62, %v7473_v63 }
 0x195   :  { %v542_v60 = vadd.f32 %v541_v50, %v540_v42  ;;  %v545_v61 = vrot.slane %v544_v51, 2  ;;  %v10438_v42 = vld [vmem:[#allocation14 + $0xcc] sm:$0xf]  ;;  %v7556_v50 = vor.u32 %v10470_v48, %v7553_v49  ;;  %1059 = vmatpush.bf16.msrb.mxu3 %v7424_v40  ;;  %v10456_v40 = vld [vmem:[#allocation14 + $0x154] sm:$0xf0] }
 0x196   :  { %1084 = vmatpush.bf16.msra.mxu1 %v7444_v35  ;;  %1097 = vmatpush.bf16.msra.mxu2 %v7572_v36  ;;  %v7428_v47 = vor.u32 %v10438_v42, %v7425_v44  ;;  %v7380_v35 = vor.u32 %v10426_v28, %v7377_v30  ;;  %v7508_v36 = vor.u32 %v10458_v31, %v7505_v32  ;;  %v7361_v48 = vld [vmem:[#allocation14 + $0x58] sm:$0xf0]  ;;  %v10454_v49 = vld [vmem:[#allocation14 + $0x14c] sm:$0xf]  ;;  %v10416_v9 = vld [vmem:[#allocation14 + $0x14] sm:$0xf0] }
 0x197   :  { %v549_v3 = vmul.f32 %v542_v60, %v11888_v43  ;;  %v546_v4 = vadd.f32 %v545_v61, %v544_v51  ;;  %v7407_v51 = vld [vmem:[#allocation14 + $0xa8] sm:$0xf]  ;;  %v7536_v61 = vor.u32 %v10468_v55, %v7535_v53  ;;  %v10448_v11 = vld [vmem:[#allocation14 + $0x114] sm:$0xf0]  ;;  %v581_v27 = vld [vmem:[#allocation13] sm:$0x3] }
 0x198   :  { %1072 = vmatpush.bf16.msra.mxu0 %v7552_v46  ;;  %v7408_v60 = vor.u32 %v10436_v52, %v7407_v51  ;;  %v7360_v46 = vor.u32 %v10424_v38, %v7359_v37  ;;  %v7343_v51 = vld [vmem:[#allocation14 + $0x28] sm:$0xf]  ;;  %v10420_v52 = vld [vmem:[#allocation14 + $0x34] sm:$0xf0] }
 0x199   :  { %v11901_v14 = vadd.f32 0.8, %v549_v3  ;;  %v547_v15 = vrot.slane %v546_v4, 1  ;;  %v10432_v3 = vld [vmem:[#allocation14 + $0x94] sm:$0xf0] }
 0x19a   :  { %1085 = vmatpush.bf16.msra.mxu1 %v7428_v47  ;;  %1098 = vmatpush.bf16.msra.mxu2 %v7556_v50  ;;  %v7392_v12 = vor.u32 %v10432_v3, %v7391_v2  ;;  %v7488_v47 = vor.u32 %v10456_v40, %v7487_v39  ;;  %v7489_v50 = vld [vmem:[#allocation14 + $0x158] sm:$0xf0]  ;;  %v7344_v2 = vor.u32 %v10420_v52, %v7343_v51  ;;  %v7455_v10 = vld [vmem:[#allocation14 + $0x108] sm:$0xf] }
 0x19b   :  { %11213 = vrsqrt.f32 %v11901_v14  ;;  %v548_v24 = vadd.f32 %v547_v15, %v546_v4  ;;  %1060 = vmatpush.bf16.msrb.mxu3 %v7408_v60  ;;  %v7492_v57 = vor.u32 %v10454_v49, %v7489_v50  ;;  %v10418_v60 = vld [vmem:[#allocation14 + $0x2c] sm:$0xf]  ;;  %vm560_vm7 = vweird.f32 %v11901_v14 }
 0x19c   :  { %1073 = vmatpush.bf16.msra.mxu0 %v7536_v61  ;;  %v7345_v61 = vld [vmem:[#allocation14 + $0x38] sm:$0xf0]  ;;  %v7456_v21 = vor.u32 %v10448_v11, %v7455_v10 }
 0x19d   :  { %v550_v34 = vmul.f32 %v548_v24, %v11888_v43  ;;  %v7348_v6 = vor.u32 %v10418_v60, %v7345_v61  ;;  %v10537_v60 = vld [vmem:[#allocation20 + $0x1dc] sm:$0xf0] }
 0x19e   :  { %1086 = vmatpush.bf16.msra.mxu1 %v7412_v0  ;;  %1099 = vmatpush.bf16.msra.mxu2 %v7540_v1  ;;  %v551_v0 = vld [vmem:[#allocation11] sm:$0x3]  ;;  %v8055_v61 = vld [vmem:[#allocation20 + $0x3c0] sm:$0xf] }
 0x19f   :  { %v11905_v45 = vadd.f32 0.8, %v550_v34  ;;  %1061 = vmatpush.bf16.msrb.mxu3 %v7392_v12  ;;  %v10414_v12 = vld [vmem:[#allocation14 + $0xc] sm:$0xf] }
 0x1a0   :  { %1074 = vmatpush.bf16.msra.mxu0 %v7520_v13  ;;  %v7329_v13 = vld [vmem:[#allocation14 + $0x18] sm:$0xf0] }
 0x1a1   :  { %v11907_v54 = vpop.eup %11213  ;;  %11215 = vrsqrt.f32 %v11905_v45  ;;  %vm570_vm3 = vweird.f32 %v11905_v45  ;;  %v7332_v23 = vor.u32 %v10414_v12, %v7329_v13 }
 0x1a2   :  { %v555_v59 = vmul.f32 %v11907_v54, %v11901_v14  ;;  %1087 = vmatpush.bf16.msra.mxu1 %v7396_v16  ;;  %1100 = vmatpush.bf16.msra.mxu2 %v7524_v17  ;;  %vm561_vm6 = vweird.f32 %v11907_v54  ;;  %v10446_v16 = vld [vmem:[#allocation14 + $0x10c] sm:$0xf]  ;;  %v7457_v17 = vld [vmem:[#allocation14 + $0x118] sm:$0xf0] }
 0x1a3   :  { %1062 = vmatpush.bf16.msrb.mxu3 %v7376_v25  ;;  %vm562_vm8 = vmor %vm560_vm7, %vm561_vm6  ;;  %v7460_v26 = vor.u32 %v10446_v16, %v7457_v17  ;;  %v10529_v16 = vld [vmem:[#allocation20 + $0x19c] sm:$0xf0] }
 0x1a4   :  { %v556_v4 = vmul.f32 %v11907_v54, %v555_v59  ;;  %1075 = vmatpush.bf16.msra.mxu0 %v7504_v29  ;;  %v10452_v59 = vld [vmem:[#allocation14 + $0x134] sm:$0xf0]  ;;  %v8023_v17 = vld [vmem:[#allocation20 + $0x380] sm:$0xf] }
 0x1a5   :  { %v7472_v3 = vor.u32 %v10452_v59, %v7471_v58  ;;  %v7799_v59 = vld [vmem:[#allocation20 + $0x1c0] sm:$0xf] }
 0x1a6   :  { %v557_v19 = vmul.f32 0.5, %v556_v4  ;;  %1088 = vmatpush.bf16.msra.mxu1 %v7380_v35  ;;  %1101 = vmatpush.bf16.msra.mxu2 %v7508_v36  ;;  %v7327_v4 = vld [vmem:[#allocation14 + $0x8] sm:$0xf]  ;;  %v7800_v63 = vor.u32 %v10537_v60, %v7799_v59  ;;  %v10513_v59 = vld [vmem:[#allocation20 + $0x11c] sm:$0xf0] }
 0x1a7   :  { %v11913_v15 = vpop.eup %11215  ;;  %1063 = vmatpush.bf16.msrb.mxu3 %v7360_v46  ;;  %v7959_v60 = vld [vmem:[#allocation20 + $0x300] sm:$0xf] }
 0x1a8   :  { %v565_v20 = vmul.f32 %v11913_v15, %v11905_v45  ;;  %vm571_vm2 = vweird.f32 %v11913_v15  ;;  %v558_v33 = vsub.f32 1.5, %v557_v19  ;;  %v7364_v45 = vor.u32 %v10422_v41, %v7361_v48  ;;  %1076 = vmatpush.bf16.msra.mxu0 %v7488_v47 }
 0x1a9   :  { %vm11922_vm4 = vmor %vm570_vm3, %vm571_vm2 }
 0x1aa   :  { %v566_v24 = vmul.f32 %v11913_v15, %v565_v20  ;;  %v559_v53 = vmul.f32 %v11907_v54, %v558_v33  ;;  %1089 = vmatpush.bf16.msra.mxu1 %v7364_v45  ;;  %1102 = vmatpush.bf16.msra.mxu2 %v7492_v57  ;;  %v7328_v20 = vor.u32 %v10416_v9, %v7327_v4  ;;  %v10729_v9 = vld [vmem:[#allocation20 + $0x7dc] sm:$0xf0] }
 0x1ab   :  { %1064 = vmatpush.bf16.msrb.mxu3 %v7344_v2  ;;  %v10665_v2 = vld [vmem:[#allocation20 + $0x5dc] sm:$0xf0] }
 0x1ac   :  { %v567_v34 = vmul.f32 0.5, %v566_v24  ;;  %v563_v14 = vsel %vm562_vm8, %v11907_v54, %v559_v53  ;;  %1077 = vmatpush.bf16.msra.mxu0 %v7472_v3  ;;  %vm1227_vm8 = vcmask 1042434  }
 0x1ae   :  { %v568_v42 = vsub.f32 1.5, %v567_v34  ;;  %1090 = vmatpush.bf16.msra.mxu1 %v7348_v6  ;;  %1103 = vmatpush.bf16.msra.mxu2 %v7476_v7  ;;  %v8567_v7 = vld [vmem:[#allocation20 + $0x7c0] sm:$0xf] }
 0x1af   :  { %1065 = vmatpush.bf16.msrb.mxu3 %v7328_v20  ;;  %v8568_v11 = vor.u32 %v10729_v9, %v8567_v7  ;;  %v8471_v9 = vld [vmem:[#allocation20 + $0x700] sm:$0xf] }
 0x1b0   :  { %v569_v55 = vmul.f32 %v11913_v15, %v568_v42  ;;  %1078 = vmatpush.bf16.msra.mxu0 %v7456_v21 }
 0x1b2   :  { %v573_v1 = vsel %vm11922_vm4, %v11913_v15, %v569_v55  ;;  %1091 = vmatpush.bf16.msra.mxu1 %v7332_v23  ;;  %1104 = vmatpush.bf16.msra.mxu2 %v7460_v26  ;;  %v10593_v23 = vld [vmem:[#allocation20 + $0x39c] sm:$0xf0] }
 0x1b3   :  { %v576_v5 = vrot.slane %v573_v1, 7  ;;  %v8311_v1 = vld [vmem:[#allocation20 + $0x5c0] sm:$0xf] }
 0x1b4   :  { %v8312_v6 = vor.u32 %v10665_v2, %v8311_v1  ;;  %v10577_v1 = vld [vmem:[#allocation20 + $0x31c] sm:$0xf0] }
 0x1b5   :  { %v578_v15 = vsel %vm577_vm5, %v563_v14, %v576_v5  ;;  %v8215_v2 = vld [vmem:[#allocation20 + $0x500] sm:$0xf] }
 0x1b6   :  { %v580_v19 = vmul.f32 %v578_v15, %v551_v0  ;;  %v10601_v0 = vld [vmem:[#allocation20 + $0x3dc] sm:$0xf0] }
 0x1b7   :  { %v8056_v5 = vor.u32 %v10601_v0, %v8055_v61  ;;  %v7767_v15 = vld [vmem:[#allocation20 + $0x180] sm:$0xf] }
 0x1b8   :  { %v583_v24 = vperm.slane %v580_v19, 0  ;;  %v584_v25 = vperm.slane %v580_v19, 1  ;;  %v7768_v21 = vor.u32 %v10529_v16, %v7767_v15  ;;  %v7671_v16 = vld [vmem:[#allocation20 + $0xc0] sm:$0xf] }
 0x1ba   :  { %v588_v54 = vmul.f32 %v584_v25, %v11896_v18  ;;  %v587_v28 = vmul.f32 %v583_v24, %v11891_v56  ;;  %v596_v32 = vmul.f32 %v584_v25, %v11883_v22  ;;  %v595_v34 = vmul.f32 %v583_v24, %v11879_v8  ;;  %v11942_v8 = vld [vmem:[#allocation16] sm:$0xf]  ;;  %v8279_v24 = vld [vmem:[#allocation20 + $0x580] sm:$0xf] }
 0x1bb   :  { %v679_v44 = vperm.slane %v11942_v8, 1  ;;  %v678_v46 = vperm.slane %v11942_v8, 0  ;;  %v10657_v25 = vld [vmem:[#allocation20 + $0x59c] sm:$0xf0] }
 0x1bc   :  { %v591_v29 = vrot.slane %v588_v54, 7  ;;  %v681_v54 = vperm.slane %v11942_v8, 3 }
 0x1be   :  { %v592_v30 = vsel %vm577_vm5, %v587_v28, %v591_v29  ;;  %v8280_v28 = vor.u32 %v10657_v25, %v8279_v24  ;;  %v8535_v29 = vld [vmem:[#allocation20 + $0x780] sm:$0xf] }
 0x1bf   :  { %v594_v31 = vsub.f32 %v581_v27, %v592_v30  ;;  %v8024_v27 = vor.u32 %v10593_v23, %v8023_v17  ;;  %v10721_v30 = vld [vmem:[#allocation20 + $0x79c] sm:$0xf0] }
 0x1c0   :  { %v10505_v17 = vld [vmem:[#allocation20 + $0xdc] sm:$0xf0] }
 0x1c1   :  { %v599_v33 = vperm.slane %v594_v31, 1  ;;  %v598_v35 = vperm.slane %v594_v31, 0  ;;  %v7927_v23 = vld [vmem:[#allocation20 + $0x2c0] sm:$0xf] }
 0x1c2   :  { %v10569_v24 = vld [vmem:[#allocation20 + $0x2dc] sm:$0xf0] }
 0x1c3   :  { %v603_v36 = vadd.f32 %v599_v33, %v596_v32  ;;  %v602_v37 = vadd.f32 %v598_v35, %v595_v34  ;;  %v680_v32 = vperm.slane %v11942_v8, 2  ;;  %v8536_v33 = vor.u32 %v10721_v30, %v8535_v29  ;;  %v7735_v35 = vld [vmem:[#allocation20 + $0x140] sm:$0xf] }
 0x1c4   :  { %v10633_v29 = vld [vmem:[#allocation20 + $0x4dc] sm:$0xf0] }
 0x1c5   :  { %vm604_vm9 = vcmp.gt.f32.partialorder %v602_v37, 0.0  ;;  %v606_v18 = vmul.f32 0.2, %v602_v37  ;;  %vm605_vm10 = vcmp.gt.f32.partialorder %v603_v36, 0.0  ;;  %v607_v38 = vmul.f32 0.2, %v603_v36 }
 0x1c7   :  { %v608_v39 = vsel %vm604_vm9, %v602_v37, %v606_v18  ;;  %v609_v40 = vsel %vm605_vm10, %v603_v36, %v607_v38  ;;  %v10521_v36 = vld [vmem:[#allocation20 + $0x15c] sm:$0xf0]  ;;  %vm1229_vm9 = vcmask 1041408  }
 0x1c8   :  { %v610_v56 = vpack.c.bf16 %v608_v39, %v608_v39  ;;  %v611_v41 = vpack.c.bf16 %v609_v40, %v609_v40  ;;  %v7991_v37 = vld [vmem:[#allocation20 + $0x340] sm:$0xf]  ;;  %v7736_v38 = vor.u32 %v10521_v36, %v7735_v35 }
 0x1c9   :  { %v10585_v39 = vld [vmem:[#allocation20 + $0x35c] sm:$0xf0] }
 0x1ca   :  { %1014 = vmatmul.bf16.vlgmr.msra.gmra.mxu3 %v610_v56  ;;  %1027 = vmatmul.bf16.vlgmr.msrb.gmra.mxu0 %v611_v41  ;;  %v8247_v40 = vld [vmem:[#allocation20 + $0x540] sm:$0xf]  ;;  %v7992_v8 = vor.u32 %v10585_v39, %v7991_v37 }
 0x1cb   :  { %1040 = vmatmul.bf16.vlgmr.msrb.gmra.mxu1 %v610_v56  ;;  %1053 = vmatmul.bf16.vlgmr.msrb.gmra.mxu2 %v611_v41  ;;  %v10697_v35 = vld [vmem:[#allocation20 + $0x6dc] sm:$0xf0] }
 0x1cc   :  { %2846 = vmatpush.bf16.msra.mxu3 %v7800_v63  ;;  %2859 = vmatpush.bf16.msrb.mxu0 %v8056_v5  ;;  %v10497_v39 = vld [vmem:[#allocation20 + $0x9c] sm:$0xf0] }
 0x1cd   :  { %2872 = vmatpush.bf16.msrb.mxu1 %v8312_v6  ;;  %2885 = vmatpush.bf16.msrb.mxu2 %v8568_v11  ;;  %v7960_v6 = vor.u32 %v10577_v1, %v7959_v60  ;;  %v10489_v1 = vld [vmem:[#allocation20 + $0x5c] sm:$0xf0] }
 0x1d0   :  { %2847 = vmatpush.bf16.msra.mxu3 %v7768_v21  ;;  %2860 = vmatpush.bf16.msrb.mxu0 %v8024_v27  ;;  %v7672_v21 = vor.u32 %v10505_v17, %v7671_v16  ;;  %v7928_v27 = vor.u32 %v10569_v24, %v7927_v23  ;;  %v10681_v17 = vld [vmem:[#allocation20 + $0x65c] sm:$0xf0] }
 0x1d1   :  { %2873 = vmatpush.bf16.msrb.mxu1 %v8280_v28  ;;  %2886 = vmatpush.bf16.msrb.mxu2 %v8536_v33  ;;  %v8183_v28 = vld [vmem:[#allocation20 + $0x4c0] sm:$0xf] }
 0x1d2   :  { %v8184_v33 = vor.u32 %v10633_v29, %v8183_v28  ;;  %v7575_v23 = vld [vmem:[#allocation20] sm:$0xf] }
 0x1d3   :  { %v10481_v24 = vld [vmem:[#allocation20 + $0x1c] sm:$0xf0] }
 0x1d4   :  { %2848 = vmatpush.bf16.msra.mxu3 %v7736_v38  ;;  %2861 = vmatpush.bf16.msrb.mxu0 %v7992_v8  ;;  %v7639_v38 = vld [vmem:[#allocation20 + $0x80] sm:$0xf] }
 0x1d5   :  { %v10561_v8 = vld [vmem:[#allocation20 + $0x29c] sm:$0xf0] }
 0x1d6   :  { %v10545_v28 = vld [vmem:[#allocation20 + $0x21c] sm:$0xf0] }
 0x1d7   :  { %v8087_v29 = vld [vmem:[#allocation20 + $0x400] sm:$0xf] }
 0x1d8   :  { %2862 = vmatpush.bf16.msrb.mxu0 %v7960_v6  ;;  %v10553_v6 = vld [vmem:[#allocation20 + $0x25c] sm:$0xf0] }
 0x1da   :  { %1066 = vmatmul.bf16.vlgmr.msrb.gmra.mxu3 %v610_v56  ;;  %1079 = vmatmul.bf16.vlgmr.msra.gmra.mxu0 %v611_v41 }
 0x1db   :  { %1092 = vmatmul.bf16.vlgmr.msra.gmra.mxu1 %v610_v56  ;;  %1105 = vmatmul.bf16.vlgmr.msra.gmra.mxu2 %v611_v41  ;;  %v10649_v56 = vld [vmem:[#allocation20 + $0x55c] sm:$0xf0] }
 0x1dc   :  { %2863 = vmatpush.bf16.msrb.mxu0 %v7928_v27  ;;  %v7576_v27 = vor.u32 %v10481_v24, %v7575_v23 }
 0x247   :  { %v1028_v22 = vpop.f32.mrf.mxu0 }
 0x248   :  { %v1041_v42 = vpop.f32.mrf.mxu1 }
 0x249   :  { %v1042_v47 = vadd.f32 %v1041_v42, %v679_v44  ;;  %v8248_v44 = vor.u32 %v10649_v56, %v8247_v40 }
 0x24b   :  { %2874 = vmatpush.bf16.msrb.mxu1 %v8248_v44 }
 0x24d   :  { %v1015_v48 = vpop.f32.mrf.mxu3 }
 0x24e   :  { %v1016_v49 = vadd.f32 %v1015_v48, %v678_v46  ;;  %v1054_v45 = vpop.f32.mrf.mxu2  ;;  %v8503_v46 = vld [vmem:[#allocation20 + $0x740] sm:$0xf] }
 0x24f   :  { %v11946_v50 = vadd.f32 %v1054_v45, %v1042_v47  ;;  %v1030_v51 = vpop.f32.mrf.mxu0  ;;  %v10713_v47 = vld [vmem:[#allocation20 + $0x75c] sm:$0xf0] }
 0x250   :  { %v11948_v52 = vadd.f32 %v1028_v22, %v1016_v49  ;;  %v1043_v53 = vpop.f32.mrf.mxu1  ;;  %v8504_v51 = vor.u32 %v10713_v47, %v8503_v46 }
 0x251   :  { %v1116_v55 = vrot.slane %v11946_v50, 4 }
 0x252   :  { %v1110_v57 = vrot.slane %v11948_v52, 4  ;;  %2887 = vmatpush.bf16.msrb.mxu2 %v8504_v51 }
 0x253   :  { %v1117_v58 = vadd.f32 %v1116_v55, %v11946_v50 }
 0x254   :  { %v1111_v62 = vadd.f32 %v1110_v57, %v11948_v52 }
 0x255   :  { %v1118_v3 = vrot.slane %v1117_v58, 2  ;;  %v1017_v4 = vpop.f32.mrf.mxu3 }
 0x256   :  { %v1112_v10 = vrot.slane %v1111_v62, 2  ;;  %v1056_v14 = vpop.f32.mrf.mxu2 }
 0x257   :  { %v1119_v12 = vadd.f32 %v1118_v3, %v1117_v58  ;;  %v1080_v13 = vpop.f32.mrf.mxu0  ;;  %v7703_v58 = vld [vmem:[#allocation20 + $0x100] sm:$0xf] }
 0x258   :  { %v1113_v19 = vadd.f32 %v1112_v10, %v1111_v62  ;;  %v1093_v20 = vpop.f32.mrf.mxu1  ;;  %v7704_v0 = vor.u32 %v10513_v59, %v7703_v58  ;;  %v10641_v3 = vld [vmem:[#allocation20 + $0x51c] sm:$0xf0] }
 0x259   :  { %v1120_v26 = vrot.slane %v1119_v12, 1  ;;  %v1094_v22 = vadd.f32 %v1093_v20, %v681_v54  ;;  %v8216_v7 = vor.u32 %v10641_v3, %v8215_v2  ;;  %v10705_v10 = vld [vmem:[#allocation20 + $0x71c] sm:$0xf0] }
 0x25a   :  { %v1114_v31 = vrot.slane %v1113_v19, 1  ;;  %2849 = vmatpush.bf16.msra.mxu3 %v7704_v0  ;;  %v8407_v58 = vld [vmem:[#allocation20 + $0x680] sm:$0xf] }
 0x25b   :  { %v1121_v34 = vadd.f32 %v1120_v26, %v1119_v12  ;;  %v8472_v12 = vor.u32 %v10705_v10, %v8471_v9  ;;  %2875 = vmatpush.bf16.msrb.mxu1 %v8216_v7  ;;  %v10689_v59 = vld [vmem:[#allocation20 + $0x69c] sm:$0xf0] }
 0x25c   :  { %v1115_v18 = vadd.f32 %v1114_v31, %v1113_v19  ;;  %v7607_v0 = vld [vmem:[#allocation20 + $0x40] sm:$0xf] }
 0x25d   :  { %v11957_v41 = vmul.f32 %v1121_v34, %v11888_v43  ;;  %v1067_v42 = vpop.f32.mrf.mxu3  ;;  %2888 = vmatpush.bf16.msrb.mxu2 %v8472_v12  ;;  %v8439_v34 = vld [vmem:[#allocation20 + $0x6c0] sm:$0xf] }
 0x25e   :  { %v11960_v48 = vmul.f32 %v1115_v18, %v11888_v43  ;;  %v1068_v49 = vadd.f32 %v1067_v42, %v680_v32  ;;  %v1106_v45 = vpop.f32.mrf.mxu2  ;;  %2850 = vmatpush.bf16.msra.mxu3 %v7672_v21  ;;  %v8440_v18 = vor.u32 %v10697_v35, %v8439_v34  ;;  %v7895_v42 = vld [vmem:[#allocation20 + $0x280] sm:$0xf] }
 0x25f   :  { %v1139_v53 = vsub.f32 %v11946_v50, %v11957_v41  ;;  %v11964_v55 = vadd.f32 %v1106_v45, %v1094_v22  ;;  %v1082_v57 = vpop.f32.mrf.mxu0  ;;  %2876 = vmatpush.bf16.msrb.mxu1 %v8184_v33  ;;  %v7640_v22 = vor.u32 %v10497_v39, %v7639_v38  ;;  %v7896_v47 = vor.u32 %v10561_v8, %v7895_v42  ;;  %v10625_v45 = vld [vmem:[#allocation20 + $0x49c] sm:$0xf0]  ;;  %v10533_v39 = vld [vmem:[#allocation20 + $0x1c4] sm:$0xf] }
 0x260   :  { %v1138_v61 = vsub.f32 %v11948_v52, %v11960_v48  ;;  %v11968_v62 = vadd.f32 %v1080_v13, %v1068_v49  ;;  %v1095_v63 = vpop.f32.mrf.mxu1  ;;  %v8151_v49 = vld [vmem:[#allocation20 + $0x480] sm:$0xf]  ;;  %v10597_v42 = vld [vmem:[#allocation20 + $0x3c4] sm:$0xf] }
 0x261   :  { %v1143_v4 = vmul.f32 %v1139_v53, %v1139_v53  ;;  %v1128_v5 = vrot.slane %v11964_v55, 4  ;;  %2889 = vmatpush.bf16.msrb.mxu2 %v8440_v18  ;;  %v8152_v57 = vor.u32 %v10625_v45, %v8151_v49  ;;  %2864 = vmatpush.bf16.msrb.mxu0 %v7896_v47  ;;  %v8408_v63 = vor.u32 %v10689_v59, %v8407_v58  ;;  %v8375_v12 = vld [vmem:[#allocation20 + $0x640] sm:$0xf]  ;;  %v8313_v45 = vld [vmem:[#allocation20 + $0x5e0] sm:$0xf0] }
 0x262   :  { %v1142_v14 = vmul.f32 %v1138_v61, %v1138_v61  ;;  %v1122_v11 = vrot.slane %v11968_v62, 4  ;;  %2851 = vmatpush.bf16.msra.mxu3 %v7640_v22  ;;  %v8376_v21 = vor.u32 %v10681_v17, %v8375_v12  ;;  %v8343_v35 = vld [vmem:[#allocation20 + $0x600] sm:$0xf]  ;;  %v8537_v12 = vld [vmem:[#allocation20 + $0x7a0] sm:$0xf0] }
 0x263   :  { %v1152_v13 = vrot.slane %v1143_v4, 4  ;;  %v1129_v15 = vadd.f32 %v1128_v5, %v11964_v55  ;;  %2877 = vmatpush.bf16.msrb.mxu1 %v8152_v57  ;;  %v7863_v5 = vld [vmem:[#allocation20 + $0x240] sm:$0xf] }
 0x264   :  { %v1146_v19 = vrot.slane %v1142_v14, 4  ;;  %v1123_v20 = vadd.f32 %v1122_v11, %v11968_v62  ;;  %v7864_v10 = vor.u32 %v10553_v6, %v7863_v5  ;;  %v10617_v11 = vld [vmem:[#allocation20 + $0x45c] sm:$0xf0]  ;;  %v10653_v5 = vld [vmem:[#allocation20 + $0x584] sm:$0xf] }
 0x265   :  { %v1153_v25 = vadd.f32 %v1152_v13, %v1143_v4  ;;  %v1130_v26 = vrot.slane %v1129_v15, 2  ;;  %v1069_v54 = vpop.f32.mrf.mxu3  ;;  %v7608_v4 = vor.u32 %v10489_v1, %v7607_v0  ;;  %2890 = vmatpush.bf16.msrb.mxu2 %v8408_v63  ;;  %v10589_v1 = vld [vmem:[#allocation20 + $0x384] sm:$0xf] }
 0x266   :  { %v1147_v30 = vadd.f32 %v1146_v19, %v1142_v14  ;;  %v1124_v31 = vrot.slane %v1123_v20, 2  ;;  %v1108_v32 = vpop.f32.mrf.mxu2  ;;  %v8119_v14 = vld [vmem:[#allocation20 + $0x440] sm:$0xf]  ;;  %2865 = vmatpush.bf16.msrb.mxu0 %v7864_v10  ;;  %v8281_v6 = vld [vmem:[#allocation20 + $0x5a0] sm:$0xf0] }
 0x267   :  { %v1154_v36 = vrot.slane %v1153_v25, 2  ;;  %v1131_v37 = vadd.f32 %v1130_v26, %v1129_v15  ;;  %2852 = vmatpush.bf16.msra.mxu3 %v7608_v4  ;;  %v8120_v16 = vor.u32 %v10617_v11, %v8119_v14  ;;  %v8284_v14 = vor.u32 %v10653_v5, %v8281_v6  ;;  %v10717_v11 = vld [vmem:[#allocation20 + $0x784] sm:$0xf] }
 0x268   :  { %v1148_v40 = vrot.slane %v1147_v30, 2  ;;  %v1125_v56 = vadd.f32 %v1124_v31, %v1123_v20  ;;  %v8185_v5 = vld [vmem:[#allocation20 + $0x4e0] sm:$0xf0] }
 0x269   :  { %v1155_v44 = vadd.f32 %v1154_v36, %v1153_v25  ;;  %v1132_v46 = vrot.slane %v1131_v37, 1  ;;  %v7831_v25 = vld [vmem:[#allocation20 + $0x200] sm:$0xf]  ;;  %2878 = vmatpush.bf16.msrb.mxu1 %v8120_v16  ;;  %2891 = vmatpush.bf16.msrb.mxu2 %v8376_v21  ;;  %v10581_v21 = vld [vmem:[#allocation20 + $0x344] sm:$0xf] }
 0x26a   :  { %v1149_v51 = vadd.f32 %v1148_v40, %v1147_v30  ;;  %v1126_v53 = vrot.slane %v1125_v56, 1  ;;  %v10609_v30 = vld [vmem:[#allocation20 + $0x41c] sm:$0xf0]  ;;  %v7832_v33 = vor.u32 %v10545_v28, %v7831_v25  ;;  %v7801_v40 = vld [vmem:[#allocation20 + $0x1e0] sm:$0xf0] }
 0x26b   :  { %v1156_v60 = vrot.slane %v1155_v44, 1  ;;  %v1133_v61 = vadd.f32 %v1132_v46, %v1131_v37  ;;  %v8088_v34 = vor.u32 %v10609_v30, %v8087_v29  ;;  %v10673_v36 = vld [vmem:[#allocation20 + $0x61c] sm:$0xf0]  ;;  %2853 = vmatpush.bf16.msra.mxu3 %v7576_v27  ;;  %v7804_v22 = vor.u32 %v10533_v39, %v7801_v40  ;;  %v10661_v46 = vld [vmem:[#allocation20 + $0x5c4] sm:$0xf] }
 0x26c   :  { %v1150_v2 = vrot.slane %v1149_v51, 1  ;;  %v1127_v3 = vadd.f32 %v1126_v53, %v1125_v56  ;;  %v8344_v38 = vor.u32 %v10673_v36, %v8343_v35  ;;  %2866 = vmatpush.bf16.msrb.mxu0 %v7832_v33  ;;  %v8569_v53 = vld [vmem:[#allocation20 + $0x7e0] sm:$0xf0]  ;;  %v8316_v58 = vor.u32 %v10661_v46, %v8313_v45 }
 0x26d   :  { %v1157_v7 = vadd.f32 %v1156_v60, %v1155_v44  ;;  %v11975_v9 = vmul.f32 %v1133_v61, %v11888_v43  ;;  %2879 = vmatpush.bf16.msrb.mxu1 %v8088_v34  ;;  %v8057_v44 = vld [vmem:[#allocation20 + $0x3e0] sm:$0xf0] }
 0x26e   :  { %v1151_v13 = vadd.f32 %v1150_v2, %v1149_v51  ;;  %v11978_v15 = vmul.f32 %v1127_v3, %v11888_v43  ;;  %2892 = vmatpush.bf16.msrb.mxu2 %v8344_v38  ;;  %v8060_v49 = vor.u32 %v10597_v42, %v8057_v44  ;;  %v10725_v51 = vld [vmem:[#allocation20 + $0x7c4] sm:$0xf] }
 0x26f   :  { %v1171_v19 = vmul.f32 %v1157_v7, %v11888_v43  ;;  %v1141_v20 = vsub.f32 %v11964_v55, %v11975_v9  ;;  %2898 = vmatpush.bf16.msrb.mxu3 %v7804_v22  ;;  %v8572_v59 = vor.u32 %v10725_v51, %v8569_v53  ;;  %v10525_v60 = vld [vmem:[#allocation20 + $0x184] sm:$0xf] }
 0x270   :  { %v1170_v26 = vmul.f32 %v1151_v13, %v11888_v43  ;;  %v1140_v54 = vsub.f32 %v11968_v62, %v11978_v15  ;;  %v7769_v61 = vld [vmem:[#allocation20 + $0x1a0] sm:$0xf0]  ;;  %2911 = vmatpush.bf16.msra.mxu0 %v8060_v49 }
 0x271   :  { %v11986_v31 = vadd.f32 0.8, %v1171_v19  ;;  %v1145_v32 = vmul.f32 %v1141_v20, %v1141_v20  ;;  %v7772_v0 = vor.u32 %v10525_v60, %v7769_v61  ;;  %v8025_v2 = vld [vmem:[#allocation20 + $0x3a0] sm:$0xf0]  ;;  %2924 = vmatpush.bf16.msra.mxu1 %v8316_v58  ;;  %v8540_v19 = vor.u32 %v10717_v11, %v8537_v12 }
 0x272   :  { %v11988_v37 = vadd.f32 0.8, %v1170_v26  ;;  %v1144_v18 = vmul.f32 %v1140_v54, %v1140_v54  ;;  %2937 = vmatpush.bf16.msra.mxu2 %v8572_v59  ;;  %v8028_v4 = vor.u32 %v10589_v1, %v8025_v2  ;;  %v10517_v13 = vld [vmem:[#allocation20 + $0x144] sm:$0xf] }
 0x273   :  { %11217 = vrsqrt.f32 %v11986_v31  ;;  %v1164_v56 = vrot.slane %v1145_v32, 4  ;;  %2899 = vmatpush.bf16.msrb.mxu3 %v7772_v0  ;;  %v7737_v20 = vld [vmem:[#allocation20 + $0x160] sm:$0xf0]  ;;  %vm1195_vm12 = vweird.f32 %v11986_v31 }
 0x274   :  { %v1158_v8 = vrot.slane %v1144_v18, 4  ;;  %11219 = vrsqrt.f32 %v11988_v37  ;;  %2912 = vmatpush.bf16.msra.mxu0 %v8028_v4  ;;  %v7740_v24 = vor.u32 %v10517_v13, %v7737_v20  ;;  %v7993_v25 = vld [vmem:[#allocation20 + $0x360] sm:$0xf0]  ;;  %vm1185_vm13 = vweird.f32 %v11988_v37 }
 0x275   :  { %v1165_v47 = vadd.f32 %v1164_v56, %v1145_v32  ;;  %v10645_v26 = vld [vmem:[#allocation20 + $0x544] sm:$0xf]  ;;  %2925 = vmatpush.bf16.msra.mxu1 %v8284_v14  ;;  %v7996_v28 = vor.u32 %v10581_v21, %v7993_v25 }
 0x276   :  { %v1159_v57 = vadd.f32 %v1158_v8, %v1144_v18  ;;  %2938 = vmatpush.bf16.msra.mxu2 %v8540_v19  ;;  %v8249_v29 = vld [vmem:[#allocation20 + $0x560] sm:$0xf0] }
 0x277   :  { %v1166_v63 = vrot.slane %v1165_v47, 2  ;;  %v10709_v30 = vld [vmem:[#allocation20 + $0x744] sm:$0xf]  ;;  %2900 = vmatpush.bf16.msrb.mxu3 %v7740_v24  ;;  %v8252_v34 = vor.u32 %v10645_v26, %v8249_v29 }
 0x278   :  { %v1160_v3 = vrot.slane %v1159_v57, 2  ;;  %v8505_v35 = vld [vmem:[#allocation20 + $0x760] sm:$0xf0]  ;;  %2913 = vmatpush.bf16.msra.mxu0 %v7996_v28 }
 0x279   :  { %v11992_v7 = vpop.eup %11217  ;;  %v1167_v10 = vadd.f32 %v1166_v63, %v1165_v47  ;;  %v10509_v36 = vld [vmem:[#allocation20 + $0x104] sm:$0xf]  ;;  %v8508_v39 = vor.u32 %v10709_v30, %v8505_v35  ;;  %2926 = vmatpush.bf16.msra.mxu1 %v8252_v34 }
 0x27a   :  { %v1190_v16 = vmul.f32 %v11992_v7, %v11986_v31  ;;  %v1161_v17 = vadd.f32 %v1160_v3, %v1159_v57  ;;  %v11996_v54 = vpop.eup %11219  ;;  %v7705_v18 = vld [vmem:[#allocation20 + $0x120] sm:$0xf0]  ;;  %vm1196_vm11 = vweird.f32 %v11992_v7 }
 0x27b   :  { %v1168_v23 = vrot.slane %v1167_v10, 1  ;;  %v7708_v40 = vor.u32 %v10509_v36, %v7705_v18  ;;  %v10573_v56 = vld [vmem:[#allocation20 + $0x304] sm:$0xf]  ;;  %v1180_v42 = vmul.f32 %v11996_v54, %v11988_v37  ;;  %2939 = vmatpush.bf16.msra.mxu2 %v8508_v39  ;;  %vm1186_vm14 = vweird.f32 %v11996_v54  ;;  %vm12029_vm15 = vmor %vm1195_vm12, %vm1196_vm11 }
 0x27c   :  { %v1162_v27 = vrot.slane %v1161_v17, 1  ;;  %v1191_v32 = vmul.f32 %v11992_v7, %v1190_v16  ;;  %v7961_v22 = vld [vmem:[#allocation20 + $0x320] sm:$0xf0]  ;;  %vm12042_vm2 = vmor %vm1185_vm13, %vm1186_vm14 }
 0x27d   :  { %v1169_v33 = vadd.f32 %v1168_v23, %v1167_v10  ;;  %v7964_v44 = vor.u32 %v10573_v56, %v7961_v22  ;;  %v10637_v46 = vld [vmem:[#allocation20 + $0x504] sm:$0xf]  ;;  %2901 = vmatpush.bf16.msrb.mxu3 %v7708_v40  ;;  %v1181_v1 = vmul.f32 %v11996_v54, %v1180_v42 }
 0x27e   :  { %v1163_v38 = vadd.f32 %v1162_v27, %v1161_v17  ;;  %v8217_v47 = vld [vmem:[#allocation20 + $0x520] sm:$0xf0]  ;;  %v12003_v57 = vmul.f32 0.5, %v1191_v32 }
 0x27f   :  { %v1173_v8 = vmul.f32 %v1169_v33, %v11888_v43  ;;  %v8220_v45 = vor.u32 %v10637_v46, %v8217_v47  ;;  %v10701_v51 = vld [vmem:[#allocation20 + $0x704] sm:$0xf]  ;;  %2914 = vmatpush.bf16.msra.mxu0 %v7964_v44  ;;  %v12012_v24 = vmul.f32 0.5, %v1181_v1 }
 0x280   :  { %v1172_v49 = vmul.f32 %v1163_v38, %v11888_v43  ;;  %v8473_v53 = vld [vmem:[#allocation20 + $0x720] sm:$0xf0]  ;;  %v1193_v25 = vsub.f32 1.5, %v12003_v57 }
 0x281   :  { %v12005_v58 = vadd.f32 0.8, %v1173_v8  ;;  %v8476_v59 = vor.u32 %v10701_v51, %v8473_v53  ;;  %v10501_v60 = vld [vmem:[#allocation20 + $0xc4] sm:$0xf]  ;;  %2927 = vmatpush.bf16.msra.mxu1 %v8220_v45  ;;  %v1183_v46 = vsub.f32 1.5, %v12012_v24 }
 0x282   :  { %v12007_v61 = vadd.f32 0.8, %v1172_v49  ;;  %v7673_v63 = vld [vmem:[#allocation20 + $0xe0] sm:$0xf0]  ;;  %v1194_v57 = vmul.f32 %v11992_v7, %v1193_v25 }
 0x283   :  { %v10565_v0 = vld [vmem:[#allocation20 + $0x2c4] sm:$0xf]  ;;  %11221 = vrsqrt.f32 %v12005_v58  ;;  %v7676_v2 = vor.u32 %v10501_v60, %v7673_v63  ;;  %2940 = vmatpush.bf16.msra.mxu2 %v8476_v59  ;;  %vm1215_vm3 = vweird.f32 %v12005_v58 }
 0x284   :  { %v7929_v3 = vld [vmem:[#allocation20 + $0x2e0] sm:$0xf0]  ;;  %11223 = vrsqrt.f32 %v12007_v61  ;;  %vm1205_vm4 = vweird.f32 %v12007_v61 }
 0x285   :  { %v10629_v4 = vld [vmem:[#allocation20 + $0x4c4] sm:$0xf]  ;;  %v7932_v6 = vor.u32 %v10565_v0, %v7929_v3  ;;  %2902 = vmatpush.bf16.msrb.mxu3 %v7676_v2 }
 0x286   :  { %v10693_v10 = vld [vmem:[#allocation20 + $0x6c4] sm:$0xf]  ;;  %v8188_v12 = vor.u32 %v10629_v4, %v8185_v5 }
 0x287   :  { %v8441_v14 = vld [vmem:[#allocation20 + $0x6e0] sm:$0xf0]  ;;  %2915 = vmatpush.bf16.msra.mxu0 %v7932_v6 }
 0x288   :  { %v10493_v11 = vld [vmem:[#allocation20 + $0x84] sm:$0xf]  ;;  %v8444_v13 = vor.u32 %v10693_v10, %v8441_v14  ;;  %2928 = vmatpush.bf16.msra.mxu1 %v8188_v12 }
 0x289   :  { %v7641_v16 = vld [vmem:[#allocation20 + $0xa0] sm:$0xf0]  ;;  %v12015_v35 = vpop.eup %11221 }
 0x28a   :  { %v10557_v17 = vld [vmem:[#allocation20 + $0x284] sm:$0xf]  ;;  %v7644_v19 = vor.u32 %v10493_v11, %v7641_v16  ;;  %2941 = vmatpush.bf16.msra.mxu2 %v8444_v13  ;;  %v11224_v40 = vpop.eup %11223  ;;  %v1210_v56 = vmul.f32 %v12015_v35, %v12005_v58  ;;  %vm1216_vm0 = vweird.f32 %v12015_v35  ;;  %v1198_v13 = vsel %vm12029_vm15, %v11992_v7, %v1194_v57 }
 0x28b   :  { %v7897_v20 = vld [vmem:[#allocation20 + $0x2a0] sm:$0xf0]  ;;  %v1200_v8 = vmul.f32 %v11224_v40, %v12007_v61  ;;  %vm1206_vm1 = vweird.f32 %v11224_v40  ;;  %vm1217_vm6 = vmor %vm1215_vm3, %vm1216_vm0  ;;  %v1223_v7 = vrot.slane %v1198_v13, 7  ;;  %v1174_v61 = vld [vmem:[#allocation17] sm:$0xf] }
 0x28c   :  { %v10621_v21 = vld [vmem:[#allocation20 + $0x484] sm:$0xf]  ;;  %v7900_v26 = vor.u32 %v10557_v17, %v7897_v20  ;;  %2903 = vmatpush.bf16.msrb.mxu3 %v7644_v19  ;;  %v1211_v47 = vmul.f32 %v12015_v35, %v1210_v56  ;;  %v1184_v17 = vmul.f32 %v11996_v54, %v1183_v46  ;;  %vm1207_vm7 = vmor %vm1205_vm4, %vm1206_vm1  ;;  %v1233_v56 = vld [vmem:[#allocation19] sm:$0xf] }
 0x28d   :  { %v8153_v23 = vld [vmem:[#allocation20 + $0x4a0] sm:$0xf0]  ;;  %v1201_v59 = vmul.f32 %v11224_v40, %v1200_v8  ;;  %v10530_v19 = vld [vmem:[#allocation20 + $0x1a4] sm:$0xf0] }
 0x28e   :  { %v10685_v27 = vld [vmem:[#allocation20 + $0x684] sm:$0xf]  ;;  %v8156_v29 = vor.u32 %v10621_v21, %v8153_v23  ;;  %2916 = vmatpush.bf16.msra.mxu0 %v7900_v26  ;;  %v1212_v2 = vmul.f32 0.5, %v1211_v47  ;;  %v1188_v37 = vsel %vm12042_vm2, %v11996_v54, %v1184_v17  ;;  %v7775_v17 = vld [vmem:[#allocation20 + $0x188] sm:$0xf] }
 0x28f   :  { %v8409_v28 = vld [vmem:[#allocation20 + $0x6a0] sm:$0xf0]  ;;  %v1202_v5 = vmul.f32 0.5, %v1201_v59  ;;  %v1226_v26 = vsel %vm577_vm5, %v1188_v37, %v1223_v7  ;;  %v8031_v37 = vld [vmem:[#allocation20 + $0x388] sm:$0xf] }
 0x290   :  { %v8412_v30 = vor.u32 %v10685_v27, %v8409_v28  ;;  %v10485_v32 = vld [vmem:[#allocation20 + $0x44] sm:$0xf]  ;;  %2929 = vmatpush.bf16.msra.mxu1 %v8156_v29  ;;  %v1213_v11 = vsub.f32 1.5, %v1212_v2  ;;  %v8319_v2 = vld [vmem:[#allocation20 + $0x5c8] sm:$0xf] }
 0x291   :  { %v7609_v33 = vld [vmem:[#allocation20 + $0x60] sm:$0xf0]  ;;  %v1203_v16 = vsub.f32 1.5, %v1202_v5 }
 0x292   :  { %v10549_v34 = vld [vmem:[#allocation20 + $0x244] sm:$0xf]  ;;  %v7612_v36 = vor.u32 %v10485_v32, %v7609_v33  ;;  %2942 = vmatpush.bf16.msra.mxu2 %v8412_v30  ;;  %v1214_v20 = vmul.f32 %v12015_v35, %v1213_v11 }
 0x293   :  { %v7865_v18 = vld [vmem:[#allocation20 + $0x260] sm:$0xf0]  ;;  %v1204_v21 = vmul.f32 %v11224_v40, %v1203_v16 }
 0x294   :  { %v10613_v38 = vld [vmem:[#allocation20 + $0x444] sm:$0xf]  ;;  %v7868_v44 = vor.u32 %v10549_v34, %v7865_v18  ;;  %2904 = vmatpush.bf16.msrb.mxu3 %v7612_v36  ;;  %v1218_v23 = vsel %vm1217_vm6, %v12015_v35, %v1214_v20 }
 0x295   :  { %v8121_v39 = vld [vmem:[#allocation20 + $0x460] sm:$0xf0]  ;;  %v1208_v24 = vsel %vm1207_vm7, %v11224_v40, %v1204_v21  ;;  %v1225_v25 = vrot.slane %v1218_v23, 5 }
 0x296   :  { %v10677_v22 = vld [vmem:[#allocation20 + $0x644] sm:$0xf]  ;;  %v8124_v49 = vor.u32 %v10613_v38, %v8121_v39  ;;  %2917 = vmatpush.bf16.msra.mxu0 %v7868_v44  ;;  %v1224_v58 = vrot.slane %v1208_v24, 6  ;;  %v10594_v24 = vld [vmem:[#allocation20 + $0x3a4] sm:$0xf0] }
 0x297   :  { %v8377_v42 = vld [vmem:[#allocation20 + $0x660] sm:$0xf0] }
 0x298   :  { %v8380_v45 = vor.u32 %v10677_v22, %v8377_v42  ;;  %v10477_v51 = vld [vmem:[#allocation20 + $0x4] sm:$0xf]  ;;  %2930 = vmatpush.bf16.msra.mxu1 %v8124_v49  ;;  %v1228_v27 = vsel %vm1227_vm8, %v1224_v58, %v1225_v25  ;;  %v8287_v58 = vld [vmem:[#allocation20 + $0x588] sm:$0xf] }
 0x299   :  { %v7577_v53 = vld [vmem:[#allocation20 + $0x20] sm:$0xf0]  ;;  %v1230_v28 = vsel %vm1229_vm9, %v1226_v26, %v1228_v27  ;;  %v10658_v25 = vld [vmem:[#allocation20 + $0x5a4] sm:$0xf0]  ;;  %v7776_v27 = vor.u32 %v10530_v19, %v7775_v17 }
 0x29a   :  { %v7580_v60 = vor.u32 %v10477_v51, %v7577_v53  ;;  %v10541_v63 = vld [vmem:[#allocation20 + $0x204] sm:$0xf]  ;;  %2943 = vmatpush.bf16.msra.mxu2 %v8380_v45  ;;  %v1232_v29 = vmul.f32 %v1230_v28, %v1174_v61  ;;  %v7807_v51 = vld [vmem:[#allocation20 + $0x1c8] sm:$0xf]  ;;  %v8032_v28 = vor.u32 %v10594_v24, %v8031_v37 }
 0x29b   :  { %v7833_v0 = vld [vmem:[#allocation20 + $0x220] sm:$0xf0]  ;;  %v8543_v61 = vld [vmem:[#allocation20 + $0x788] sm:$0xf] }
 0x29c   :  { %v10605_v1 = vld [vmem:[#allocation20 + $0x404] sm:$0xf]  ;;  %v7836_v6 = vor.u32 %v10541_v63, %v7833_v0  ;;  %2905 = vmatpush.bf16.msrb.mxu3 %v7580_v60  ;;  %v1235_v30 = vperm.slane %v1232_v29, 0  ;;  %v1236_v32 = vperm.slane %v1232_v29, 1  ;;  %v1237_v33 = vperm.slane %v1232_v29, 2 }
 0x29d   :  { %v8089_v3 = vld [vmem:[#allocation20 + $0x420] sm:$0xf0]  ;;  %v1238_v34 = vperm.slane %v1232_v29, 3  ;;  %v10538_v63 = vld [vmem:[#allocation20 + $0x1e4] sm:$0xf0] }
 0x29e   :  { %v10669_v4 = vld [vmem:[#allocation20 + $0x604] sm:$0xf]  ;;  %v8092_v31 = vor.u32 %v10605_v1, %v8089_v3  ;;  %2918 = vmatpush.bf16.msra.mxu0 %v7836_v6  ;;  %v1244_v35 = vmul.f32 %v1236_v32, %v11957_v41  ;;  %v1245_v54 = vmul.f32 %v1237_v33, %v11978_v15  ;;  %v1243_v18 = vmul.f32 %v1235_v30, %v11960_v48  ;;  %v8063_v0 = vld [vmem:[#allocation20 + $0x3c8] sm:$0xf] }
 0x29f   :  { %v8345_v10 = vld [vmem:[#allocation20 + $0x620] sm:$0xf0]  ;;  %v1246_v36 = vmul.f32 %v1238_v34, %v11975_v9  ;;  %v1259_v46 = vmul.f32 %v1235_v30, %v11948_v52  ;;  %v1260_v41 = vmul.f32 %v1236_v32, %v11946_v50  ;;  %v1261_v15 = vmul.f32 %v1237_v33, %v11968_v62  ;;  %v10602_v1 = vld [vmem:[#allocation20 + $0x3e4] sm:$0xf0] }
 0x2a0   :  { %v8348_v12 = vor.u32 %v10669_v4, %v8345_v10  ;;  %2931 = vmatpush.bf16.msra.mxu1 %v8092_v31  ;;  %v1251_v38 = vrot.slane %v1244_v35, 7  ;;  %v1252_v39 = vrot.slane %v1245_v54, 6  ;;  %v1262_v9 = vmul.f32 %v1238_v34, %v11964_v55  ;;  %v10666_v52 = vld [vmem:[#allocation20 + $0x5e4] sm:$0xf0] }
 0x2a1   :  { %v1253_v40 = vrot.slane %v1246_v36, 5  ;;  %v8575_v3 = vld [vmem:[#allocation20 + $0x7c8] sm:$0xf]  ;;  %v7808_v14 = vor.u32 %v10538_v63, %v7807_v51  ;;  %v8064_v11 = vor.u32 %v10602_v1, %v8063_v0  ;;  %v8320_v7 = vor.u32 %v10666_v52, %v8319_v2 }
 0x2a2   :  { %2944 = vmatpush.bf16.msra.mxu2 %v8348_v12  ;;  %v1254_v22 = vsel %vm577_vm5, %v1243_v18, %v1251_v38  ;;  %v10730_v50 = vld [vmem:[#allocation20 + $0x7e4] sm:$0xf0]  ;;  %v8288_v32 = vor.u32 %v10658_v25, %v8287_v58 }
 0x2a3   :  { %v1255_v42 = vsel %vm1227_vm8, %v1252_v39, %v1253_v40  ;;  %v8576_v23 = vor.u32 %v10730_v50, %v8575_v3  ;;  %v10722_v26 = vld [vmem:[#allocation20 + $0x7a4] sm:$0xf0] }
 0x2a4   :  { %v1256_v8 = vsel %vm1229_vm9, %v1254_v22, %v1255_v42  ;;  %v7743_v29 = vld [vmem:[#allocation20 + $0x148] sm:$0xf]  ;;  %v8544_v33 = vor.u32 %v10722_v26, %v8543_v61 }
 0x2a5   :  { %v1258_v44 = vsub.f32 %v1233_v56, %v1256_v8  ;;  %v10522_v30 = vld [vmem:[#allocation20 + $0x164] sm:$0xf0] }
 0x2a6   :  { %v7999_v34 = vld [vmem:[#allocation20 + $0x348] sm:$0xf]  ;;  %v7744_v39 = vor.u32 %v10522_v30, %v7743_v29 }
 0x2a7   :  { %v1264_v48 = vperm.slane %v1258_v44, 0  ;;  %v1265_v47 = vperm.slane %v1258_v44, 1  ;;  %v1266_v49 = vperm.slane %v1258_v44, 2  ;;  %v1267_v45 = vperm.slane %v1258_v44, 3  ;;  %v10586_v35 = vld [vmem:[#allocation20 + $0x364] sm:$0xf0] }
 0x2a8   :  { %v8255_v54 = vld [vmem:[#allocation20 + $0x548] sm:$0xf]  ;;  %v8000_v40 = vor.u32 %v10586_v35, %v7999_v34 }
 0x2a9   :  { %v1272_v53 = vadd.f32 %v1264_v48, %v1259_v46  ;;  %v1273_v57 = vadd.f32 %v1265_v47, %v1260_v41  ;;  %v1274_v59 = vadd.f32 %v1266_v49, %v1261_v15  ;;  %v1275_v60 = vadd.f32 %v1267_v45, %v1262_v9  ;;  %v10650_v36 = vld [vmem:[#allocation20 + $0x564] sm:$0xf0] }
 0x2aa   :  { %v8511_v18 = vld [vmem:[#allocation20 + $0x748] sm:$0xf]  ;;  %v8256_v42 = vor.u32 %v10650_v36, %v8255_v54 }
 0x2ab   :  { %vm1278_vm10 = vcmp.gt.f32.partialorder %v1274_v59, 0.0  ;;  %vm1279_vm11 = vcmp.gt.f32.partialorder %v1275_v60, 0.0  ;;  %v1280_v62 = vmul.f32 0.2, %v1272_v53  ;;  %v1281_v55 = vmul.f32 0.2, %v1273_v57 }
 0x2ac   :  { %v1282_v4 = vmul.f32 0.2, %v1274_v59  ;;  %v1283_v5 = vmul.f32 0.2, %v1275_v60  ;;  %vm1276_vm12 = vcmp.gt.f32.partialorder %v1272_v53, 0.0  ;;  %vm1277_vm13 = vcmp.gt.f32.partialorder %v1273_v57, 0.0 }
 0x2ad   :  { %v1284_v6 = vsel %vm1276_vm12, %v1272_v53, %v1280_v62  ;;  %v1285_v10 = vsel %vm1277_vm13, %v1273_v57, %v1281_v55  ;;  %v10714_v38 = vld [vmem:[#allocation20 + $0x764] sm:$0xf0] }
 0x2ae   :  { %v1287_v31 = vsel %vm1279_vm11, %v1275_v60, %v1283_v5  ;;  %v12069_v12 = vpack.c.bf16 %v1284_v6, %v1284_v6  ;;  %v12071_v13 = vpack.c.bf16 %v1285_v10, %v1285_v10  ;;  %v1286_v16 = vsel %vm1278_vm10, %v1274_v59, %v1282_v4  ;;  %v7711_v56 = vld [vmem:[#allocation20 + $0x108] sm:$0xf] }
 0x2af   :  { %v12073_v20 = vpack.c.bf16 %v1287_v31, %v1287_v31  ;;  %v12075_v21 = vpack.c.bf16 %v1286_v16, %v1286_v16  ;;  %v10514_v22 = vld [vmem:[#allocation20 + $0x124] sm:$0xf0]  ;;  %v8512_v8 = vor.u32 %v10714_v38, %v8511_v18 }
 0x2b0   :  { %2854 = vmatmul.bf16.vlgmr.msra.gmra.mxu3 %v12069_v12  ;;  %2867 = vmatmul.bf16.vlgmr.msrb.gmra.mxu0 %v12071_v13  ;;  %v7967_v44 = vld [vmem:[#allocation20 + $0x308] sm:$0xf]  ;;  %v7712_v47 = vor.u32 %v10514_v22, %v7711_v56  ;;  %v7809_v56 = vld [vmem:[#allocation20 + $0x1e8] sm:$0xf0] }
 0x2b1   :  { %2880 = vmatmul.bf16.vlgmr.msrb.gmra.mxu1 %v12075_v21  ;;  %2893 = vmatmul.bf16.vlgmr.msrb.gmra.mxu2 %v12073_v20  ;;  %v10578_v46 = vld [vmem:[#allocation20 + $0x324] sm:$0xf0]  ;;  %v10598_v22 = vld [vmem:[#allocation20 + $0x3cc] sm:$0xf] }
 0x2b2   :  { %2950 = vmatpush.bf16.msra.mxu3 %v7808_v14  ;;  %2963 = vmatpush.bf16.msrb.mxu0 %v8064_v11  ;;  %v8223_v41 = vld [vmem:[#allocation20 + $0x508] sm:$0xf]  ;;  %v7968_v49 = vor.u32 %v10578_v46, %v7967_v44 }
 0x2b3   :  { %2976 = vmatpush.bf16.msrb.mxu1 %v8320_v7  ;;  %2989 = vmatpush.bf16.msrb.mxu2 %v8576_v23  ;;  %v10642_v15 = vld [vmem:[#allocation20 + $0x524] sm:$0xf0] }
 0x2b4   :  { %v8479_v9 = vld [vmem:[#allocation20 + $0x708] sm:$0xf]  ;;  %v8224_v53 = vor.u32 %v10642_v15, %v8223_v41  ;;  %v8321_v41 = vld [vmem:[#allocation20 + $0x5e8] sm:$0xf0] }
 0x2b5   :  { %v10706_v48 = vld [vmem:[#allocation20 + $0x724] sm:$0xf0]  ;;  %v10726_v15 = vld [vmem:[#allocation20 + $0x7cc] sm:$0xf] }
 0x2b6   :  { %2951 = vmatpush.bf16.msra.mxu3 %v7776_v27  ;;  %2964 = vmatpush.bf16.msrb.mxu0 %v8032_v28  ;;  %v7679_v45 = vld [vmem:[#allocation20 + $0xc8] sm:$0xf]  ;;  %v8480_v57 = vor.u32 %v10706_v48, %v8479_v9  ;;  %v8577_v9 = vld [vmem:[#allocation20 + $0x7e8] sm:$0xf0] }
 0x2b7   :  { %2977 = vmatpush.bf16.msrb.mxu1 %v8288_v32  ;;  %2990 = vmatpush.bf16.msrb.mxu2 %v8544_v33  ;;  %v10506_v51 = vld [vmem:[#allocation20 + $0xe4] sm:$0xf0] }
 0x2b8   :  { %v7935_v59 = vld [vmem:[#allocation20 + $0x2c8] sm:$0xf]  ;;  %v7680_v52 = vor.u32 %v10506_v51, %v7679_v45  ;;  %v10526_v51 = vld [vmem:[#allocation20 + $0x18c] sm:$0xf] }
 0x2b9   :  { %v10570_v60 = vld [vmem:[#allocation20 + $0x2e4] sm:$0xf0] }
 0x2ba   :  { %2952 = vmatpush.bf16.msra.mxu3 %v7744_v39  ;;  %2965 = vmatpush.bf16.msrb.mxu0 %v8000_v40  ;;  %v8191_v63 = vld [vmem:[#allocation20 + $0x4c8] sm:$0xf]  ;;  %v7936_v3 = vor.u32 %v10570_v60, %v7935_v59  ;;  %v10534_v40 = vld [vmem:[#allocation20 + $0x1cc] sm:$0xf]  ;;  %v8580_v59 = vor.u32 %v10726_v15, %v8577_v9 }
 0x2bb   :  { %2978 = vmatpush.bf16.msrb.mxu1 %v8256_v42  ;;  %2991 = vmatpush.bf16.msrb.mxu2 %v8512_v8  ;;  %v10634_v0 = vld [vmem:[#allocation20 + $0x4e4] sm:$0xf0]  ;;  %v8065_v42 = vld [vmem:[#allocation20 + $0x3e8] sm:$0xf0] }
 0x2bc   :  { %v8447_v1 = vld [vmem:[#allocation20 + $0x6c8] sm:$0xf]  ;;  %v8192_v55 = vor.u32 %v10634_v0, %v8191_v63  ;;  %v10662_v8 = vld [vmem:[#allocation20 + $0x5cc] sm:$0xf]  ;;  %v8068_v45 = vor.u32 %v10598_v22, %v8065_v42 }
 0x2bd   :  { %v10698_v2 = vld [vmem:[#allocation20 + $0x6e4] sm:$0xf0]  ;;  %v10590_v60 = vld [vmem:[#allocation20 + $0x38c] sm:$0xf] }
 0x2be   :  { %2953 = vmatpush.bf16.msra.mxu3 %v7712_v47  ;;  %2966 = vmatpush.bf16.msrb.mxu0 %v7968_v49  ;;  %v7647_v50 = vld [vmem:[#allocation20 + $0x88] sm:$0xf]  ;;  %v8448_v4 = vor.u32 %v10698_v2, %v8447_v1  ;;  %v7812_v49 = vor.u32 %v10534_v40, %v7809_v56  ;;  %v8033_v63 = vld [vmem:[#allocation20 + $0x3a8] sm:$0xf0] }
 0x2bf   :  { %v10498_v62 = vld [vmem:[#allocation20 + $0xa4] sm:$0xf0]  ;;  %2979 = vmatpush.bf16.msrb.mxu1 %v8224_v53  ;;  %2992 = vmatpush.bf16.msrb.mxu2 %v8480_v57  ;;  %v7777_v53 = vld [vmem:[#allocation20 + $0x1a8] sm:$0xf0]  ;;  %v8324_v57 = vor.u32 %v10662_v8, %v8321_v41 }
 0x2c0   :  { %v7903_v5 = vld [vmem:[#allocation20 + $0x288] sm:$0xf]  ;;  %2906 = vmatmul.bf16.vlgmr.msrb.gmra.mxu3 %v12069_v12  ;;  %2919 = vmatmul.bf16.vlgmr.msra.gmra.mxu0 %v12071_v13  ;;  %v7648_v16 = vor.u32 %v10498_v62, %v7647_v50  ;;  %v10654_v0 = vld [vmem:[#allocation20 + $0x58c] sm:$0xf]  ;;  %v8036_v50 = vor.u32 %v10590_v60, %v8033_v63 }
 0x2c1   :  { %v10562_v6 = vld [vmem:[#allocation20 + $0x2a4] sm:$0xf0]  ;;  %2932 = vmatmul.bf16.vlgmr.msra.gmra.mxu1 %v12075_v21  ;;  %2945 = vmatmul.bf16.vlgmr.msra.gmra.mxu2 %v12073_v20  ;;  %v8289_v1 = vld [vmem:[#allocation20 + $0x5a8] sm:$0xf0] }
 0x2c2   :  { %v8159_v10 = vld [vmem:[#allocation20 + $0x488] sm:$0xf]  ;;  %2954 = vmatpush.bf16.msra.mxu3 %v7680_v52  ;;  %2967 = vmatpush.bf16.msrb.mxu0 %v7936_v3  ;;  %v7904_v17 = vor.u32 %v10562_v6, %v7903_v5  ;;  %v10718_v2 = vld [vmem:[#allocation20 + $0x78c] sm:$0xf]  ;;  %v7780_v3 = vor.u32 %v10526_v51, %v7777_v53 }
 0x2c3   :  { %v10626_v14 = vld [vmem:[#allocation20 + $0x4a4] sm:$0xf0]  ;;  %2980 = vmatpush.bf16.msrb.mxu1 %v8192_v55  ;;  %2993 = vmatpush.bf16.msrb.mxu2 %v8448_v4  ;;  %v8545_v52 = vld [vmem:[#allocation20 + $0x7a8] sm:$0xf0]  ;;  %v8292_v4 = vor.u32 %v10654_v0, %v8289_v1 }
 0x2c4   :  { %v8415_v11 = vld [vmem:[#allocation20 + $0x688] sm:$0xf]  ;;  %v8160_v23 = vor.u32 %v10626_v14, %v8159_v10  ;;  %v10518_v62 = vld [vmem:[#allocation20 + $0x14c] sm:$0xf]  ;;  %v8548_v5 = vor.u32 %v10718_v2, %v8545_v52 }
 0x2c5   :  { %v10690_v31 = vld [vmem:[#allocation20 + $0x6a4] sm:$0xf0]  ;;  %v7745_v55 = vld [vmem:[#allocation20 + $0x168] sm:$0xf0] }
 0x2c6   :  { %v7615_v19 = vld [vmem:[#allocation20 + $0x48] sm:$0xf]  ;;  %v8416_v37 = vor.u32 %v10690_v31, %v8415_v11  ;;  %2955 = vmatpush.bf16.msra.mxu3 %v7648_v16  ;;  %2968 = vmatpush.bf16.msrb.mxu0 %v7904_v17  ;;  %v10582_v6 = vld [vmem:[#allocation20 + $0x34c] sm:$0xf]  ;;  %v7748_v17 = vor.u32 %v10518_v62, %v7745_v55 }
 0x2c7   :  { %v10490_v7 = vld [vmem:[#allocation20 + $0x64] sm:$0xf0]  ;;  %2981 = vmatpush.bf16.msrb.mxu1 %v8160_v23  ;;  %v8001_v10 = vld [vmem:[#allocation20 + $0x368] sm:$0xf0] }
 0x2c8   :  { %v7871_v24 = vld [vmem:[#allocation20 + $0x248] sm:$0xf]  ;;  %v7616_v29 = vor.u32 %v10490_v7, %v7615_v19  ;;  %2994 = vmatpush.bf16.msrb.mxu2 %v8416_v37  ;;  %v10646_v14 = vld [vmem:[#allocation20 + $0x54c] sm:$0xf]  ;;  %v8004_v19 = vor.u32 %v10582_v6, %v8001_v10 }
 0x2c9   :  { %v10554_v58 = vld [vmem:[#allocation20 + $0x264] sm:$0xf0]  ;;  %v8257_v11 = vld [vmem:[#allocation20 + $0x568] sm:$0xf0] }
 0x2ca   :  { %v8127_v25 = vld [vmem:[#allocation20 + $0x448] sm:$0xf]  ;;  %v7872_v30 = vor.u32 %v10554_v58, %v7871_v24  ;;  %2956 = vmatpush.bf16.msra.mxu3 %v7616_v29  ;;  %v10710_v31 = vld [vmem:[#allocation20 + $0x74c] sm:$0xf]  ;;  %v8260_v37 = vor.u32 %v10646_v14, %v8257_v11 }
 0x2cb   :  { %v10618_v61 = vld [vmem:[#allocation20 + $0x464] sm:$0xf0]  ;;  %v8513_v16 = vld [vmem:[#allocation20 + $0x768] sm:$0xf0] }
 0x2cc   :  { %v8383_v26 = vld [vmem:[#allocation20 + $0x648] sm:$0xf]  ;;  %v8128_v35 = vor.u32 %v10618_v61, %v8127_v25  ;;  %2969 = vmatpush.bf16.msrb.mxu0 %v7872_v30  ;;  %v10510_v7 = vld [vmem:[#allocation20 + $0x10c] sm:$0xf]  ;;  %v8516_v24 = vor.u32 %v10710_v31, %v8513_v16 }
 0x2cd   :  { %v10682_v27 = vld [vmem:[#allocation20 + $0x664] sm:$0xf0]  ;;  %v7713_v23 = vld [vmem:[#allocation20 + $0x128] sm:$0xf0] }
 0x2ce   :  { %v7583_v28 = vld [vmem:[#allocation20 + $0x8] sm:$0xf]  ;;  %v8384_v54 = vor.u32 %v10682_v27, %v8383_v26  ;;  %2982 = vmatpush.bf16.msrb.mxu1 %v8128_v35  ;;  %v10574_v58 = vld [vmem:[#allocation20 + $0x30c] sm:$0xf]  ;;  %v7716_v29 = vor.u32 %v10510_v7, %v7713_v23  ;;  %v10539_v7 = vld [vmem:[#allocation20 + $0x1ec] sm:$0xf0] }
 0x2cf   :  { %v10482_v32 = vld [vmem:[#allocation20 + $0x24] sm:$0xf0]  ;;  %v7969_v25 = vld [vmem:[#allocation20 + $0x328] sm:$0xf0]  ;;  %v8071_v23 = vld [vmem:[#allocation20 + $0x3d0] sm:$0xf] }
 0x2d0   :  { %v7839_v33 = vld [vmem:[#allocation20 + $0x208] sm:$0xf]  ;;  %v7584_v44 = vor.u32 %v10482_v32, %v7583_v28  ;;  %2995 = vmatpush.bf16.msrb.mxu2 %v8384_v54  ;;  %v10638_v61 = vld [vmem:[#allocation20 + $0x50c] sm:$0xf]  ;;  %v7972_v30 = vor.u32 %v10574_v58, %v7969_v25 }
 0x2d1   :  { %v10546_v34 = vld [vmem:[#allocation20 + $0x224] sm:$0xf0]  ;;  %v8225_v26 = vld [vmem:[#allocation20 + $0x528] sm:$0xf0] }
 0x2d2   :  { %v8095_v36 = vld [vmem:[#allocation20 + $0x408] sm:$0xf]  ;;  %v7840_v46 = vor.u32 %v10546_v34, %v7839_v33  ;;  %2957 = vmatpush.bf16.msra.mxu3 %v7584_v44  ;;  %v10702_v27 = vld [vmem:[#allocation20 + $0x70c] sm:$0xf]  ;;  %v8228_v34 = vor.u32 %v10638_v61, %v8225_v26  ;;  %v10667_v61 = vld [vmem:[#allocation20 + $0x5ec] sm:$0xf0] }
 0x2d3   :  { %v10610_v18 = vld [vmem:[#allocation20 + $0x424] sm:$0xf0]  ;;  %v8481_v28 = vld [vmem:[#allocation20 + $0x728] sm:$0xf0]  ;;  %v8583_v26 = vld [vmem:[#allocation20 + $0x7d0] sm:$0xf] }
 0x2d4   :  { %v8351_v38 = vld [vmem:[#allocation20 + $0x608] sm:$0xf]  ;;  %v8096_v48 = vor.u32 %v10610_v18, %v8095_v36  ;;  %2970 = vmatpush.bf16.msrb.mxu0 %v7840_v46  ;;  %v10502_v32 = vld [vmem:[#allocation20 + $0xcc] sm:$0xf]  ;;  %v8484_v35 = vor.u32 %v10702_v27, %v8481_v28  ;;  %v10731_v27 = vld [vmem:[#allocation20 + $0x7ec] sm:$0xf0] }
 0x2d5   :  { %v10674_v39 = vld [vmem:[#allocation20 + $0x624] sm:$0xf0]  ;;  %2958 = vmatmul.bf16.vlgmr.msra.gmra.mxu3 %v12069_v12  ;;  %v7681_v33 = vld [vmem:[#allocation20 + $0xe8] sm:$0xf0] }
 0x2d6   :  { %v8352_v47 = vor.u32 %v10674_v39, %v8351_v38  ;;  %2983 = vmatpush.bf16.msrb.mxu1 %v8096_v48  ;;  %3002 = vmatpush.bf16.msrb.mxu3 %v7812_v49  ;;  %v10566_v54 = vld [vmem:[#allocation20 + $0x2cc] sm:$0xf]  ;;  %v7684_v56 = vor.u32 %v10502_v32, %v7681_v33  ;;  %v7783_v33 = vld [vmem:[#allocation20 + $0x190] sm:$0xf] }
 0x2d7   :  { %2971 = vmatmul.bf16.vlgmr.msrb.gmra.mxu0 %v12071_v13  ;;  %v7937_v36 = vld [vmem:[#allocation20 + $0x2e8] sm:$0xf0] }
 0x2d8   :  { %2996 = vmatpush.bf16.msrb.mxu2 %v8352_v47  ;;  %3015 = vmatpush.bf16.msra.mxu0 %v8068_v45  ;;  %v10630_v18 = vld [vmem:[#allocation20 + $0x4cc] sm:$0xf]  ;;  %v7940_v22 = vor.u32 %v10566_v54, %v7937_v36  ;;  %v8584_v54 = vor.u32 %v10731_v27, %v8583_v26  ;;  %v8039_v36 = vld [vmem:[#allocation20 + $0x390] sm:$0xf] }
 0x2d9   :  { %2984 = vmatmul.bf16.vlgmr.msrb.gmra.mxu1 %v12075_v21  ;;  %v8193_v38 = vld [vmem:[#allocation20 + $0x4e8] sm:$0xf0]  ;;  %v10563_v26 = vld [vmem:[#allocation20 + $0x2ac] sm:$0xf0] }
 0x2da   :  { %3028 = vmatpush.bf16.msra.mxu1 %v8324_v57  ;;  %3003 = vmatpush.bf16.msrb.mxu3 %v7780_v3  ;;  %v10694_v39 = vld [vmem:[#allocation20 + $0x6cc] sm:$0xf]  ;;  %v8196_v44 = vor.u32 %v10630_v18, %v8193_v38  ;;  %v10595_v18 = vld [vmem:[#allocation20 + $0x3ac] sm:$0xf0] }
 0x2db   :  { %2997 = vmatmul.bf16.vlgmr.msrb.gmra.mxu2 %v12073_v20  ;;  %v8449_v40 = vld [vmem:[#allocation20 + $0x6e8] sm:$0xf0]  ;;  %v8295_v38 = vld [vmem:[#allocation20 + $0x590] sm:$0xf] }
 0x2dc   :  { %3041 = vmatpush.bf16.msra.mxu2 %v8580_v59  ;;  %3016 = vmatpush.bf16.msra.mxu0 %v8036_v50  ;;  %v10494_v42 = vld [vmem:[#allocation20 + $0x8c] sm:$0xf]  ;;  %v8452_v46 = vor.u32 %v10694_v39, %v8449_v40  ;;  %v10659_v39 = vld [vmem:[#allocation20 + $0x5ac] sm:$0xf0] }
 0x2dd   :  { %v7649_v8 = vld [vmem:[#allocation20 + $0xa8] sm:$0xf0]  ;;  %v8551_v40 = vld [vmem:[#allocation20 + $0x790] sm:$0xf] }
 0x2de   :  { %3029 = vmatpush.bf16.msra.mxu1 %v8292_v4  ;;  %3004 = vmatpush.bf16.msrb.mxu3 %v7748_v17  ;;  %v10558_v41 = vld [vmem:[#allocation20 + $0x28c] sm:$0xf]  ;;  %v7652_v45 = vor.u32 %v10494_v42, %v7649_v8  ;;  %v8040_v42 = vor.u32 %v10595_v18, %v8039_v36  ;;  %v7751_v8 = vld [vmem:[#allocation20 + $0x150] sm:$0xf] }
 0x2df   :  { %v7905_v15 = vld [vmem:[#allocation20 + $0x2a8] sm:$0xf0]  ;;  %v8167_v27 = vld [vmem:[#allocation20 + $0x490] sm:$0xf] }
 0x2e0   :  { %3042 = vmatpush.bf16.msra.mxu2 %v8548_v5  ;;  %3017 = vmatpush.bf16.msra.mxu0 %v8004_v19  ;;  %v10622_v9 = vld [vmem:[#allocation20 + $0x48c] sm:$0xf]  ;;  %v7908_v51 = vor.u32 %v10558_v41, %v7905_v15  ;;  %v7815_v19 = vld [vmem:[#allocation20 + $0x1d0] sm:$0xf] }
 0x2e1   :  { %v8161_v48 = vld [vmem:[#allocation20 + $0x4a8] sm:$0xf0]  ;;  %v8007_v15 = vld [vmem:[#allocation20 + $0x350] sm:$0xf] }
 0x2e2   :  { %3030 = vmatpush.bf16.msra.mxu1 %v8260_v37  ;;  %3005 = vmatpush.bf16.msrb.mxu3 %v7716_v29  ;;  %v10686_v47 = vld [vmem:[#allocation20 + $0x68c] sm:$0xf]  ;;  %v8164_v59 = vor.u32 %v10622_v9, %v8161_v48  ;;  %v10603_v37 = vld [vmem:[#allocation20 + $0x3ec] sm:$0xf0] }
 0x2e3   :  { %v8417_v49 = vld [vmem:[#allocation20 + $0x6a8] sm:$0xf0]  ;;  %v8072_v32 = vor.u32 %v10603_v37, %v8071_v23  ;;  %v10587_v9 = vld [vmem:[#allocation20 + $0x36c] sm:$0xf0] }
 0x2e4   :  { %3043 = vmatpush.bf16.msra.mxu2 %v8516_v24  ;;  %3018 = vmatpush.bf16.msra.mxu0 %v7972_v30  ;;  %v10486_v53 = vld [vmem:[#allocation20 + $0x4c] sm:$0xf]  ;;  %v8420_v60 = vor.u32 %v10686_v47, %v8417_v49  ;;  %v8327_v24 = vld [vmem:[#allocation20 + $0x5d0] sm:$0xf]  ;;  %v7816_v30 = vor.u32 %v10539_v7, %v7815_v19 }
 0x2e5   :  { %v7617_v57 = vld [vmem:[#allocation20 + $0x68] sm:$0xf0]  ;;  %v8263_v48 = vld [vmem:[#allocation20 + $0x550] sm:$0xf] }
 0x2e6   :  { %3031 = vmatpush.bf16.msra.mxu1 %v8228_v34  ;;  %3006 = vmatpush.bf16.msrb.mxu3 %v7684_v56  ;;  %v10550_v63 = vld [vmem:[#allocation20 + $0x24c] sm:$0xf]  ;;  %v7620_v62 = vor.u32 %v10486_v53, %v7617_v57  ;;  %v10531_v34 = vld [vmem:[#allocation20 + $0x1ac] sm:$0xf0]  ;;  %v8008_v53 = vor.u32 %v10587_v9, %v8007_v15 }
 0x2e7   :  { %v7873_v0 = vld [vmem:[#allocation20 + $0x268] sm:$0xf0]  ;;  %v10723_v56 = vld [vmem:[#allocation20 + $0x7ac] sm:$0xf0] }
 0x2e8   :  { %3044 = vmatpush.bf16.msra.mxu2 %v8484_v35  ;;  %3019 = vmatpush.bf16.msra.mxu0 %v7940_v22  ;;  %v10614_v1 = vld [vmem:[#allocation20 + $0x44c] sm:$0xf]  ;;  %v7876_v55 = vor.u32 %v10550_v63, %v7873_v0  ;;  %v8328_v35 = vor.u32 %v10667_v61, %v8327_v24  ;;  %v7784_v22 = vor.u32 %v10531_v34, %v7783_v33  ;;  %v10651_v47 = vld [vmem:[#allocation20 + $0x56c] sm:$0xf0] }
 0x2e9   :  { %v8129_v2 = vld [vmem:[#allocation20 + $0x468] sm:$0xf0]  ;;  %v8552_v41 = vor.u32 %v10723_v56, %v8551_v40  ;;  %v8519_v49 = vld [vmem:[#allocation20 + $0x750] sm:$0xf] }
 0x2ea   :  { %3032 = vmatpush.bf16.msra.mxu1 %v8196_v44  ;;  %v10678_v52 = vld [vmem:[#allocation20 + $0x64c] sm:$0xf]  ;;  %3007 = vmatpush.bf16.msrb.mxu3 %v7652_v45  ;;  %v8132_v10 = vor.u32 %v10614_v1, %v8129_v2  ;;  %v10523_v44 = vld [vmem:[#allocation20 + $0x16c] sm:$0xf0] }
 0x2eb   :  { %v8385_v3 = vld [vmem:[#allocation20 + $0x668] sm:$0xf0]  ;;  %v10715_v45 = vld [vmem:[#allocation20 + $0x76c] sm:$0xf0] }
 0x2ec   :  { %3045 = vmatpush.bf16.msra.mxu2 %v8452_v46  ;;  %v10478_v50 = vld [vmem:[#allocation20 + $0xc] sm:$0xf]  ;;  %3020 = vmatpush.bf16.msra.mxu0 %v7908_v51  ;;  %v8388_v14 = vor.u32 %v10678_v52, %v8385_v3  ;;  %v8296_v46 = vor.u32 %v10659_v39, %v8295_v38  ;;  %v7752_v51 = vor.u32 %v10523_v44, %v7751_v8  ;;  %v7719_v57 = vld [vmem:[#allocation20 + $0x110] sm:$0xf] }
 0x2ed   :  { %v7585_v4 = vld [vmem:[#allocation20 + $0x28] sm:$0xf0]  ;;  %v8520_v63 = vor.u32 %v10715_v45, %v8519_v49  ;;  %v7975_v0 = vld [vmem:[#allocation20 + $0x310] sm:$0xf] }
 0x2ee   :  { %v10542_v5 = vld [vmem:[#allocation20 + $0x20c] sm:$0xf]  ;;  %3033 = vmatpush.bf16.msra.mxu1 %v8164_v59  ;;  %3008 = vmatpush.bf16.msrb.mxu3 %v7620_v62  ;;  %v7588_v58 = vor.u32 %v10478_v50, %v7585_v4  ;;  %v10515_v59 = vld [vmem:[#allocation20 + $0x12c] sm:$0xf0] }
 0x2ef   :  { %v7841_v6 = vld [vmem:[#allocation20 + $0x228] sm:$0xf0]  ;;  %v10579_v1 = vld [vmem:[#allocation20 + $0x32c] sm:$0xf0]  ;;  %v7720_v62 = vor.u32 %v10515_v59, %v7719_v57  ;;  %v7817_v57 = vld [vmem:[#allocation20 + $0x1f0] sm:$0xf0] }
 0x2f0   :  { %3046 = vmatpush.bf16.msra.mxu2 %v8420_v60  ;;  %v10606_v11 = vld [vmem:[#allocation20 + $0x40c] sm:$0xf]  ;;  %3021 = vmatpush.bf16.msra.mxu0 %v7876_v55  ;;  %v7844_v25 = vor.u32 %v10542_v5, %v7841_v6  ;;  %v8264_v60 = vor.u32 %v10651_v47, %v8263_v48  ;;  %v8231_v2 = vld [vmem:[#allocation20 + $0x510] sm:$0xf]  ;;  %v7976_v55 = vor.u32 %v10579_v1, %v7975_v0  ;;  %v10599_v59 = vld [vmem:[#allocation20 + $0x3d4] sm:$0xf] }
 0x2f1   :  { %v8097_v31 = vld [vmem:[#allocation20 + $0x428] sm:$0xf0]  ;;  %v10643_v52 = vld [vmem:[#allocation20 + $0x52c] sm:$0xf0] }
 0x2f2   :  { %v10670_v16 = vld [vmem:[#allocation20 + $0x60c] sm:$0xf]  ;;  %3034 = vmatpush.bf16.msra.mxu1 %v8132_v10  ;;  %v8100_v28 = vor.u32 %v10606_v11, %v8097_v31  ;;  %3009 = vmatpush.bf16.msrb.mxu3 %v7588_v58  ;;  %v8487_v3 = vld [vmem:[#allocation20 + $0x710] sm:$0xf]  ;;  %v8232_v6 = vor.u32 %v10643_v52, %v8231_v2  ;;  %v8329_v2 = vld [vmem:[#allocation20 + $0x5f0] sm:$0xf0] }
 0x2f3   :  { %v8353_v17 = vld [vmem:[#allocation20 + $0x628] sm:$0xf0]  ;;  %v10707_v50 = vld [vmem:[#allocation20 + $0x72c] sm:$0xf0]  ;;  %v10727_v52 = vld [vmem:[#allocation20 + $0x7d4] sm:$0xf] }
 0x2f4   :  { %3047 = vmatpush.bf16.msra.mxu2 %v8388_v14  ;;  %v8356_v29 = vor.u32 %v10670_v16, %v8353_v17  ;;  %3022 = vmatpush.bf16.msra.mxu0 %v7844_v25  ;;  %v7687_v4 = vld [vmem:[#allocation20 + $0xd0] sm:$0xf]  ;;  %v8488_v10 = vor.u32 %v10707_v50, %v8487_v3  ;;  %v8585_v3 = vld [vmem:[#allocation20 + $0x7f0] sm:$0xf0] }
 0x2f5   :  { %3010 = vmatmul.bf16.vlgmr.msrb.gmra.mxu3 %v12069_v12  ;;  %v10507_v5 = vld [vmem:[#allocation20 + $0xec] sm:$0xf0] }
 0x2f6   :  { %3035 = vmatpush.bf16.msra.mxu1 %v8100_v28  ;;  %3054 = vmatpush.bf16.msra.mxu3 %v7816_v30  ;;  %v7943_v14 = vld [vmem:[#allocation20 + $0x2d0] sm:$0xf]  ;;  %v7688_v7 = vor.u32 %v10507_v5, %v7687_v4  ;;  %v10527_v5 = vld [vmem:[#allocation20 + $0x194] sm:$0xf] }
 0x2f7   :  { %3023 = vmatmul.bf16.vlgmr.msra.gmra.mxu0 %v12071_v13  ;;  %v10571_v11 = vld [vmem:[#allocation20 + $0x2ec] sm:$0xf0] }
 0x2f8   :  { %3048 = vmatpush.bf16.msra.mxu2 %v8356_v29  ;;  %3067 = vmatpush.bf16.msrb.mxu0 %v8072_v32  ;;  %v8199_v31 = vld [vmem:[#allocation20 + $0x4d0] sm:$0xf]  ;;  %v7944_v23 = vor.u32 %v10571_v11, %v7943_v14  ;;  %v8588_v14 = vor.u32 %v10727_v52, %v8585_v3  ;;  %v10591_v11 = vld [vmem:[#allocation20 + $0x394] sm:$0xf] }
 0x2f9   :  { %3036 = vmatmul.bf16.vlgmr.msra.gmra.mxu1 %v12075_v21  ;;  %v10635_v16 = vld [vmem:[#allocation20 + $0x4ec] sm:$0xf0]  ;;  %v7913_v52 = vld [vmem:[#allocation20 + $0x2b0] sm:$0xf0] }
 0x2fa   :  { %3080 = vmatpush.bf16.msrb.mxu1 %v8328_v35  ;;  %3055 = vmatpush.bf16.msra.mxu3 %v7784_v22  ;;  %v8455_v17 = vld [vmem:[#allocation20 + $0x6d0] sm:$0xf]  ;;  %v8200_v58 = vor.u32 %v10635_v16, %v8199_v31  ;;  %v8041_v31 = vld [vmem:[#allocation20 + $0x3b0] sm:$0xf0] }
 0x2fb   :  { %3049 = vmatmul.bf16.vlgmr.msra.gmra.mxu2 %v12073_v20  ;;  %v10699_v19 = vld [vmem:[#allocation20 + $0x6ec] sm:$0xf0]  ;;  %v10655_v16 = vld [vmem:[#allocation20 + $0x594] sm:$0xf] }
 0x2fc   :  { %3093 = vmatpush.bf16.msrb.mxu2 %v8584_v54  ;;  %3068 = vmatpush.bf16.msrb.mxu0 %v8040_v42  ;;  %v7655_v37 = vld [vmem:[#allocation20 + $0x90] sm:$0xf]  ;;  %v8456_v25 = vor.u32 %v10699_v19, %v8455_v17  ;;  %v8297_v17 = vld [vmem:[#allocation20 + $0x5b0] sm:$0xf0] }
 0x2fd   :  { %v10499_v24 = vld [vmem:[#allocation20 + $0xac] sm:$0xf0]  ;;  %v10719_v19 = vld [vmem:[#allocation20 + $0x794] sm:$0xf] }
 0x2fe   :  { %3081 = vmatpush.bf16.msrb.mxu1 %v8296_v46  ;;  %3056 = vmatpush.bf16.msra.mxu3 %v7752_v51  ;;  %v7911_v61 = vld [vmem:[#allocation20 + $0x290] sm:$0xf]  ;;  %v7656_v32 = vor.u32 %v10499_v24, %v7655_v37  ;;  %v8044_v37 = vor.u32 %v10591_v11, %v8041_v31  ;;  %v10519_v24 = vld [vmem:[#allocation20 + $0x154] sm:$0xf] }
 0x2ff   :  { %v10627_v28 = vld [vmem:[#allocation20 + $0x4ac] sm:$0xf0]  ;;  %v7912_v33 = vor.u32 %v10563_v26, %v7911_v61  ;;  %v10583_v26 = vld [vmem:[#allocation20 + $0x354] sm:$0xf] }
 0x300   :  { %3094 = vmatpush.bf16.msrb.mxu2 %v8552_v41  ;;  %3069 = vmatpush.bf16.msrb.mxu0 %v8008_v53  ;;  %v8423_v29 = vld [vmem:[#allocation20 + $0x690] sm:$0xf]  ;;  %v8168_v54 = vor.u32 %v10627_v28, %v8167_v27  ;;  %v10535_v53 = vld [vmem:[#allocation20 + $0x1d4] sm:$0xf] }
 0x301   :  { %v10691_v30 = vld [vmem:[#allocation20 + $0x6ac] sm:$0xf0]  ;;  %v8009_v27 = vld [vmem:[#allocation20 + $0x370] sm:$0xf0] }
 0x302   :  { %3082 = vmatpush.bf16.msrb.mxu1 %v8264_v60  ;;  %3057 = vmatpush.bf16.msra.mxu3 %v7720_v62  ;;  %v7623_v34 = vld [vmem:[#allocation20 + $0x50] sm:$0xf]  ;;  %v8424_v36 = vor.u32 %v10691_v30, %v8423_v29  ;;  %v8073_v60 = vld [vmem:[#allocation20 + $0x3f0] sm:$0xf0] }
 0x303   :  { %v10491_v35 = vld [vmem:[#allocation20 + $0x6c] sm:$0xf0]  ;;  %v8076_v4 = vor.u32 %v10599_v59, %v8073_v60  ;;  %v10647_v28 = vld [vmem:[#allocation20 + $0x554] sm:$0xf] }
 0x304   :  { %3095 = vmatpush.bf16.msrb.mxu2 %v8520_v63  ;;  %3070 = vmatpush.bf16.msrb.mxu0 %v7976_v55  ;;  %v7879_v18 = vld [vmem:[#allocation20 + $0x250] sm:$0xf]  ;;  %v7624_v8 = vor.u32 %v10491_v35, %v7623_v34  ;;  %v10663_v63 = vld [vmem:[#allocation20 + $0x5d4] sm:$0xf]  ;;  %v7820_v55 = vor.u32 %v10535_v53, %v7817_v57  ;;  %v8012_v34 = vor.u32 %v10583_v26, %v8009_v27 }
 0x305   :  { %v10555_v38 = vld [vmem:[#allocation20 + $0x26c] sm:$0xf0]  ;;  %v8265_v29 = vld [vmem:[#allocation20 + $0x570] sm:$0xf0] }
 0x306   :  { %3083 = vmatpush.bf16.msrb.mxu1 %v8232_v6  ;;  %3058 = vmatpush.bf16.msra.mxu3 %v7688_v7  ;;  %v8135_v39 = vld [vmem:[#allocation20 + $0x450] sm:$0xf]  ;;  %v7880_v44 = vor.u32 %v10555_v38, %v7879_v18  ;;  %v7785_v6 = vld [vmem:[#allocation20 + $0x1b0] sm:$0xf0] }
 0x307   :  { %v10619_v40 = vld [vmem:[#allocation20 + $0x46c] sm:$0xf0]  ;;  %v8553_v7 = vld [vmem:[#allocation20 + $0x7b0] sm:$0xf0] }
 0x308   :  { %3096 = vmatpush.bf16.msrb.mxu2 %v8488_v10  ;;  %3071 = vmatpush.bf16.msrb.mxu0 %v7944_v23  ;;  %v8391_v56 = vld [vmem:[#allocation20 + $0x650] sm:$0xf]  ;;  %v8136_v9 = vor.u32 %v10619_v40, %v8135_v39  ;;  %v8332_v10 = vor.u32 %v10663_v63, %v8329_v2  ;;  %v7788_v23 = vor.u32 %v10527_v5, %v7785_v6  ;;  %v10711_v30 = vld [vmem:[#allocation20 + $0x754] sm:$0xf] }
 0x309   :  { %v10683_v22 = vld [vmem:[#allocation20 + $0x66c] sm:$0xf0]  ;;  %v8556_v61 = vor.u32 %v10719_v19, %v8553_v7  ;;  %v10511_v35 = vld [vmem:[#allocation20 + $0x114] sm:$0xf] }
 0x30a   :  { %3084 = vmatpush.bf16.msrb.mxu1 %v8200_v58  ;;  %v7591_v42 = vld [vmem:[#allocation20 + $0x10] sm:$0xf]  ;;  %3059 = vmatpush.bf16.msra.mxu3 %v7656_v32  ;;  %v8392_v48 = vor.u32 %v10683_v22, %v8391_v56  ;;  %v7753_v58 = vld [vmem:[#allocation20 + $0x170] sm:$0xf0] }
 0x30b   :  { %v10483_v46 = vld [vmem:[#allocation20 + $0x2c] sm:$0xf0]  ;;  %v8521_v32 = vld [vmem:[#allocation20 + $0x770] sm:$0xf0] }
 0x30c   :  { %3097 = vmatpush.bf16.msrb.mxu2 %v8456_v25  ;;  %3072 = vmatpush.bf16.msrb.mxu0 %v7912_v33  ;;  %v7847_v41 = vld [vmem:[#allocation20 + $0x210] sm:$0xf]  ;;  %v7592_v0 = vor.u32 %v10483_v46, %v7591_v42  ;;  %v8300_v25 = vor.u32 %v10655_v16, %v8297_v17  ;;  %v7756_v33 = vor.u32 %v10519_v24, %v7753_v58  ;;  %v10575_v38 = vld [vmem:[#allocation20 + $0x314] sm:$0xf] }
 0x30d   :  { %v10547_v15 = vld [vmem:[#allocation20 + $0x22c] sm:$0xf0]  ;;  %v8524_v18 = vor.u32 %v10711_v30, %v8521_v32  ;;  %v7977_v39 = vld [vmem:[#allocation20 + $0x330] sm:$0xf0] }
 0x30e   :  { %3085 = vmatpush.bf16.msrb.mxu1 %v8168_v54  ;;  %v8103_v47 = vld [vmem:[#allocation20 + $0x410] sm:$0xf]  ;;  %3060 = vmatpush.bf16.msra.mxu3 %v7624_v8  ;;  %v7848_v1 = vor.u32 %v10547_v15, %v7847_v41  ;;  %v7721_v54 = vld [vmem:[#allocation20 + $0x130] sm:$0xf0] }
 0x30f   :  { %v10611_v49 = vld [vmem:[#allocation20 + $0x42c] sm:$0xf0]  ;;  %v10639_v40 = vld [vmem:[#allocation20 + $0x514] sm:$0xf]  ;;  %v7724_v8 = vor.u32 %v10511_v35, %v7721_v54  ;;  %v10540_v35 = vld [vmem:[#allocation20 + $0x1f4] sm:$0xf0] }
 0x310   :  { %3098 = vmatpush.bf16.msrb.mxu2 %v8424_v36  ;;  %v8359_v45 = vld [vmem:[#allocation20 + $0x610] sm:$0xf]  ;;  %3073 = vmatpush.bf16.msrb.mxu0 %v7880_v44  ;;  %v8104_v50 = vor.u32 %v10611_v49, %v8103_v47  ;;  %v8268_v36 = vor.u32 %v10647_v28, %v8265_v29  ;;  %v8233_v56 = vld [vmem:[#allocation20 + $0x530] sm:$0xf0]  ;;  %v7980_v44 = vor.u32 %v10575_v38, %v7977_v39  ;;  %v8079_v54 = vld [vmem:[#allocation20 + $0x3d8] sm:$0xf] }
 0x311   :  { %v10675_v51 = vld [vmem:[#allocation20 + $0x62c] sm:$0xf0]  ;;  %v10703_v22 = vld [vmem:[#allocation20 + $0x714] sm:$0xf]  ;;  %v8236_v15 = vor.u32 %v10639_v40, %v8233_v56  ;;  %v10668_v40 = vld [vmem:[#allocation20 + $0x5f4] sm:$0xf0] }
 0x312   :  { %3086 = vmatpush.bf16.msrb.mxu1 %v8136_v9  ;;  %v8360_v62 = vor.u32 %v10675_v51, %v8359_v45  ;;  %3061 = vmatpush.bf16.msra.mxu3 %v7592_v0  ;;  %v8489_v42 = vld [vmem:[#allocation20 + $0x730] sm:$0xf0]  ;;  %v8591_v56 = vld [vmem:[#allocation20 + $0x7d8] sm:$0xf] }
 0x313   :  { %v10503_v46 = vld [vmem:[#allocation20 + $0xd4] sm:$0xf]  ;;  %v8492_v9 = vor.u32 %v10703_v22, %v8489_v42  ;;  %v10732_v22 = vld [vmem:[#allocation20 + $0x7f4] sm:$0xf0] }
 0x314   :  { %3099 = vmatpush.bf16.msrb.mxu2 %v8392_v48  ;;  %3074 = vmatpush.bf16.msrb.mxu0 %v7848_v1  ;;  %v7689_v41 = vld [vmem:[#allocation20 + $0xf0] sm:$0xf0] }
 0x315   :  { %3062 = vmatmul.bf16.vlgmr.msra.gmra.mxu3 %v12069_v12  ;;  %v10567_v48 = vld [vmem:[#allocation20 + $0x2d4] sm:$0xf]  ;;  %v7692_v57 = vor.u32 %v10503_v46, %v7689_v41  ;;  %v7791_v41 = vld [vmem:[#allocation20 + $0x198] sm:$0xf] }
 0x316   :  { %3087 = vmatpush.bf16.msrb.mxu1 %v8104_v50  ;;  %3106 = vmatpush.bf16.msrb.mxu3 %v7820_v55  ;;  %v7945_v47 = vld [vmem:[#allocation20 + $0x2f0] sm:$0xf0] }
 0x317   :  { %3075 = vmatmul.bf16.vlgmr.msrb.gmra.mxu0 %v12071_v13  ;;  %v10631_v49 = vld [vmem:[#allocation20 + $0x4d4] sm:$0xf]  ;;  %v7948_v59 = vor.u32 %v10567_v48, %v7945_v47  ;;  %v8592_v48 = vor.u32 %v10732_v22, %v8591_v56  ;;  %v8047_v47 = vld [vmem:[#allocation20 + $0x398] sm:$0xf] }
 0x318   :  { %3100 = vmatpush.bf16.msrb.mxu2 %v8360_v62  ;;  %3119 = vmatpush.bf16.msra.mxu0 %v8076_v4  ;;  %v8201_v45 = vld [vmem:[#allocation20 + $0x4f0] sm:$0xf0] }
 0x319   :  { %3088 = vmatmul.bf16.vlgmr.msrb.gmra.mxu1 %v12075_v21  ;;  %v10695_v51 = vld [vmem:[#allocation20 + $0x6d4] sm:$0xf]  ;;  %v8204_v0 = vor.u32 %v10631_v49, %v8201_v45  ;;  %v10596_v49 = vld [vmem:[#allocation20 + $0x3b4] sm:$0xf0] }
 0x31a   :  { %3132 = vmatpush.bf16.msra.mxu1 %v8332_v10  ;;  %3107 = vmatpush.bf16.msrb.mxu3 %v7788_v23  ;;  %v8457_v53 = vld [vmem:[#allocation20 + $0x6f0] sm:$0xf0]  ;;  %v8303_v45 = vld [vmem:[#allocation20 + $0x598] sm:$0xf] }
 0x31b   :  { %3101 = vmatmul.bf16.vlgmr.msrb.gmra.mxu2 %v12073_v20  ;;  %v10495_v60 = vld [vmem:[#allocation20 + $0x94] sm:$0xf]  ;;  %v8460_v1 = vor.u32 %v10695_v51, %v8457_v53  ;;  %v10660_v51 = vld [vmem:[#allocation20 + $0x5b4] sm:$0xf0] }
 0x31c   :  { %3145 = vmatpush.bf16.msra.mxu2 %v8588_v14  ;;  %3120 = vmatpush.bf16.msra.mxu0 %v8044_v37  ;;  %v7657_v63 = vld [vmem:[#allocation20 + $0xb0] sm:$0xf0]  ;;  %v8559_v53 = vld [vmem:[#allocation20 + $0x798] sm:$0xf] }
 0x31d   :  { %v10559_v2 = vld [vmem:[#allocation20 + $0x294] sm:$0xf]  ;;  %v7660_v4 = vor.u32 %v10495_v60, %v7657_v63  ;;  %v8048_v60 = vor.u32 %v10596_v49, %v8047_v47  ;;  %v7759_v63 = vld [vmem:[#allocation20 + $0x158] sm:$0xf] }
 0x31e   :  { %3133 = vmatpush.bf16.msra.mxu1 %v8300_v25  ;;  %3108 = vmatpush.bf16.msrb.mxu3 %v7756_v33  ;;  %v10623_v3 = vld [vmem:[#allocation20 + $0x494] sm:$0xf]  ;;  %v7916_v5 = vor.u32 %v10559_v2, %v7913_v52  ;;  %v8015_v52 = vld [vmem:[#allocation20 + $0x358] sm:$0xf] }
 0x31f   :  { %v8169_v50 = vld [vmem:[#allocation20 + $0x4b0] sm:$0xf0]  ;;  %v10564_v47 = vld [vmem:[#allocation20 + $0x2b4] sm:$0xf0] }
 0x320   :  { %3146 = vmatpush.bf16.msra.mxu2 %v8556_v61  ;;  %3121 = vmatpush.bf16.msra.mxu0 %v8012_v34  ;;  %v10687_v62 = vld [vmem:[#allocation20 + $0x694] sm:$0xf]  ;;  %v8172_v14 = vor.u32 %v10623_v3, %v8169_v50  ;;  %v7823_v34 = vld [vmem:[#allocation20 + $0x1d8] sm:$0xf] }
 0x321   :  { %v8425_v55 = vld [vmem:[#allocation20 + $0x6b0] sm:$0xf0]  ;;  %v10588_v3 = vld [vmem:[#allocation20 + $0x374] sm:$0xf0] }
 0x322   :  { %3134 = vmatpush.bf16.msra.mxu1 %v8268_v36  ;;  %3109 = vmatpush.bf16.msrb.mxu3 %v7724_v8  ;;  %v10487_v6 = vld [vmem:[#allocation20 + $0x54] sm:$0xf]  ;;  %v8428_v11 = vor.u32 %v10687_v62, %v8425_v55  ;;  %v10604_v36 = vld [vmem:[#allocation20 + $0x3f4] sm:$0xf0] }
 0x323   :  { %v7625_v10 = vld [vmem:[#allocation20 + $0x70] sm:$0xf0]  ;;  %v8080_v46 = vor.u32 %v10604_v36, %v8079_v54  ;;  %v8271_v50 = vld [vmem:[#allocation20 + $0x558] sm:$0xf] }
 0x324   :  { %3147 = vmatpush.bf16.msra.mxu2 %v8524_v18  ;;  %3122 = vmatpush.bf16.msra.mxu0 %v7980_v44  ;;  %v10551_v31 = vld [vmem:[#allocation20 + $0x254] sm:$0xf]  ;;  %v7628_v24 = vor.u32 %v10487_v6, %v7625_v10  ;;  %v8335_v18 = vld [vmem:[#allocation20 + $0x5d8] sm:$0xf]  ;;  %v7824_v44 = vor.u32 %v10540_v35, %v7823_v34  ;;  %v12101_v6 = vld [vmem:[#allocation22] sm:$0xff] }
 0x325   :  { %v7881_v16 = vld [vmem:[#allocation20 + $0x270] sm:$0xf0]  ;;  %v10652_v62 = vld [vmem:[#allocation20 + $0x574] sm:$0xf0] }
 0x326   :  { %3135 = vmatpush.bf16.msra.mxu1 %v8236_v15  ;;  %3110 = vmatpush.bf16.msrb.mxu3 %v7692_v57  ;;  %v10615_v17 = vld [vmem:[#allocation20 + $0x454] sm:$0xf]  ;;  %v7884_v58 = vor.u32 %v10551_v31, %v7881_v16  ;;  %v10532_v15 = vld [vmem:[#allocation20 + $0x1b4] sm:$0xf0] }
 0x327   :  { %v8137_v19 = vld [vmem:[#allocation20 + $0x470] sm:$0xf0]  ;;  %v10724_v57 = vld [vmem:[#allocation20 + $0x7b4] sm:$0xf0] }
 0x328   :  { %3148 = vmatpush.bf16.msra.mxu2 %v8492_v9  ;;  %3123 = vmatpush.bf16.msra.mxu0 %v7948_v59  ;;  %v10679_v7 = vld [vmem:[#allocation20 + $0x654] sm:$0xf]  ;;  %v8140_v27 = vor.u32 %v10615_v17, %v8137_v19  ;;  %v8336_v9 = vor.u32 %v10668_v40, %v8335_v18  ;;  %v7792_v59 = vor.u32 %v10532_v15, %v7791_v41  ;;  %v8527_v55 = vld [vmem:[#allocation20 + $0x758] sm:$0xf] }
 0x329   :  { %v8393_v23 = vld [vmem:[#allocation20 + $0x670] sm:$0xf0]  ;;  %v8560_v2 = vor.u32 %v10724_v57, %v8559_v53  ;;  %v7727_v31 = vld [vmem:[#allocation20 + $0x118] sm:$0xf]  ;;  %v8272_v19 = vor.u32 %v10652_v62, %v8271_v50 }
 0x32a   :  { %3136 = vmatpush.bf16.msra.mxu1 %v8204_v0  ;;  %v10479_v37 = vld [vmem:[#allocation20 + $0x14] sm:$0xf]  ;;  %3111 = vmatpush.bf16.msrb.mxu3 %v7660_v4  ;;  %v8396_v28 = vor.u32 %v10679_v7, %v8393_v23  ;;  %v10524_v0 = vld [vmem:[#allocation20 + $0x174] sm:$0xf0] }
 0x32b   :  { %v7593_v25 = vld [vmem:[#allocation20 + $0x30] sm:$0xf0]  ;;  %v10716_v4 = vld [vmem:[#allocation20 + $0x774] sm:$0xf0]  ;;  %v7760_v10 = vor.u32 %v10524_v0, %v7759_v63 }
 0x32c   :  { %3149 = vmatpush.bf16.msra.mxu2 %v8460_v1  ;;  %3124 = vmatpush.bf16.msra.mxu0 %v7916_v5  ;;  %v10543_v61 = vld [vmem:[#allocation20 + $0x214] sm:$0xf]  ;;  %v7596_v38 = vor.u32 %v10479_v37, %v7593_v25  ;;  %v8304_v1 = vor.u32 %v10660_v51, %v8303_v45  ;;  %v10516_v16 = vld [vmem:[#allocation20 + $0x134] sm:$0xf0]  ;;  %v8528_v7 = vor.u32 %v10716_v4, %v8527_v55 }
 0x32d   :  { %v7849_v26 = vld [vmem:[#allocation20 + $0x230] sm:$0xf0]  ;;  %v2868_v5 = vpop.f32.mrf.mxu0  ;;  %v7983_v17 = vld [vmem:[#allocation20 + $0x318] sm:$0xf] }
 0x32e   :  { %3137 = vmatpush.bf16.msra.mxu1 %v8172_v14  ;;  %v10607_v29 = vld [vmem:[#allocation20 + $0x414] sm:$0xf]  ;;  %3112 = vmatpush.bf16.msrb.mxu3 %v7628_v24  ;;  %v7852_v39 = vor.u32 %v10543_v61, %v7849_v26  ;;  %v8016_v14 = vor.u32 %v10588_v3, %v8015_v52  ;;  %v10580_v23 = vld [vmem:[#allocation20 + $0x334] sm:$0xf0]  ;;  %v1550_v61 = vperm.slane %v12101_v6, 0  ;;  %v7728_v26 = vor.u32 %v10516_v16, %v7727_v31 }
 0x32f   :  { %v8105_v30 = vld [vmem:[#allocation20 + $0x430] sm:$0xf0]  ;;  %v8239_v37 = vld [vmem:[#allocation20 + $0x518] sm:$0xf] }
 0x330   :  { %3150 = vmatpush.bf16.msra.mxu2 %v8428_v11  ;;  %v10671_v32 = vld [vmem:[#allocation20 + $0x614] sm:$0xf]  ;;  %3125 = vmatpush.bf16.msra.mxu0 %v7884_v58  ;;  %v8108_v42 = vor.u32 %v10607_v29, %v8105_v30  ;;  %v2881_v11 = vpop.f32.mrf.mxu1  ;;  %v10644_v24 = vld [vmem:[#allocation20 + $0x534] sm:$0xf0] }
 0x331   :  { %v8361_v33 = vld [vmem:[#allocation20 + $0x630] sm:$0xf0]  ;;  %v8495_v58 = vld [vmem:[#allocation20 + $0x718] sm:$0xf]  ;;  %v8240_v30 = vor.u32 %v10644_v24, %v8239_v37 }
 0x332   :  { %3138 = vmatpush.bf16.msra.mxu1 %v8140_v27  ;;  %v8364_v8 = vor.u32 %v10671_v32, %v8361_v33  ;;  %3113 = vmatpush.bf16.msrb.mxu3 %v7596_v38  ;;  %v10708_v25 = vld [vmem:[#allocation20 + $0x734] sm:$0xf0]  ;;  %v7984_v27 = vor.u32 %v10580_v23, %v7983_v17 }
 0x333   :  { %v10508_v29 = vld [vmem:[#allocation20 + $0xf4] sm:$0xf0]  ;;  %v8496_v32 = vor.u32 %v10708_v25, %v8495_v58  ;;  %v2855_v33 = vpop.f32.mrf.mxu3 }
 0x334   :  { %3151 = vmatpush.bf16.msra.mxu2 %v8396_v28  ;;  %3126 = vmatpush.bf16.msra.mxu0 %v7852_v39  ;;  %v7695_v28 = vld [vmem:[#allocation20 + $0xd8] sm:$0xf]  ;;  %v2856_v36 = vadd.f32 %v2855_v33, %v1550_v61  ;;  %v2894_v18 = vpop.f32.mrf.mxu2  ;;  %v8081_v33 = vld [vmem:[#allocation20 + $0x3f8] sm:$0xf0] }
 0x335   :  { %3114 = vmatmul.bf16.vlgmr.msrb.gmra.mxu3 %v12069_v12  ;;  %v7951_v34 = vld [vmem:[#allocation20 + $0x2d8] sm:$0xf]  ;;  %v2870_v56 = vpop.f32.mrf.mxu0 }
 0x336   :  { %3139 = vmatpush.bf16.msra.mxu1 %v8108_v42  ;;  %3158 = vmatpush.bf16.msra.mxu3 %v7824_v44  ;;  %v10572_v35 = vld [vmem:[#allocation20 + $0x2f4] sm:$0xf0]  ;;  %v2869_v22 = vadd.f32 %v2868_v5, %v2856_v36  ;;  %v7696_v42 = vor.u32 %v10508_v29, %v7695_v28  ;;  %v10536_v28 = vld [vmem:[#allocation20 + $0x1dc] sm:$0xf] }
 0x337   :  { %3127 = vmatmul.bf16.vlgmr.msra.gmra.mxu0 %v12071_v13  ;;  %v8207_v54 = vld [vmem:[#allocation20 + $0x4d8] sm:$0xf]  ;;  %v7825_v29 = vld [vmem:[#allocation20 + $0x1f8] sm:$0xf0] }
 0x338   :  { %3152 = vmatpush.bf16.msra.mxu2 %v8364_v8  ;;  %3171 = vmatpush.bf16.msrb.mxu0 %v8080_v46  ;;  %v10636_v38 = vld [vmem:[#allocation20 + $0x4f4] sm:$0xf0]  ;;  %v7952_v8 = vor.u32 %v10572_v35, %v7951_v34  ;;  %v2883_v44 = vpop.f32.mrf.mxu1  ;;  %v2882_v45 = vadd.f32 %v2881_v11, %v2869_v22  ;;  %v10664_v34 = vld [vmem:[#allocation20 + $0x5dc] sm:$0xf]  ;;  %v7828_v22 = vor.u32 %v10536_v28, %v7825_v29 }
 0x339   :  { %3140 = vmatmul.bf16.vlgmr.msra.gmra.mxu1 %v12075_v21  ;;  %v8463_v39 = vld [vmem:[#allocation20 + $0x6d8] sm:$0xf]  ;;  %v8208_v15 = vor.u32 %v10636_v38, %v8207_v54  ;;  %v8337_v36 = vld [vmem:[#allocation20 + $0x5f8] sm:$0xf0] }
 0x33a   :  { %3184 = vmatpush.bf16.msrb.mxu1 %v8336_v9  ;;  %3159 = vmatpush.bf16.msra.mxu3 %v7792_v59  ;;  %v10700_v40 = vld [vmem:[#allocation20 + $0x6f4] sm:$0xf0]  ;;  %v12104_v59 = vadd.f32 %v2894_v18, %v2882_v45  ;;  %v10728_v18 = vld [vmem:[#allocation20 + $0x7dc] sm:$0xf] }
 0x33b   :  { %3153 = vmatmul.bf16.vlgmr.msra.gmra.mxu2 %v12073_v20  ;;  %v7663_v46 = vld [vmem:[#allocation20 + $0x98] sm:$0xf]  ;;  %v8464_v9 = vor.u32 %v10700_v40, %v8463_v39  ;;  %v2857_v3 = vpop.f32.mrf.mxu3  ;;  %v8593_v38 = vld [vmem:[#allocation20 + $0x7f8] sm:$0xf0] }
 0x33c   :  { %3197 = vmatpush.bf16.msrb.mxu2 %v8592_v48  ;;  %3172 = vmatpush.bf16.msrb.mxu0 %v8048_v60  ;;  %v10500_v41 = vld [vmem:[#allocation20 + $0xb4] sm:$0xf0]  ;;  %v2896_v4 = vpop.f32.mrf.mxu2  ;;  %v10656_v45 = vld [vmem:[#allocation20 + $0x59c] sm:$0xf] }
 0x33d   :  { %v7919_v48 = vld [vmem:[#allocation20 + $0x298] sm:$0xf]  ;;  %v7664_v60 = vor.u32 %v10500_v41, %v7663_v46  ;;  %v2920_v11 = vpop.f32.mrf.mxu0  ;;  %v10528_v46 = vld [vmem:[#allocation20 + $0x19c] sm:$0xf] }
 0x33e   :  { %3185 = vmatpush.bf16.msrb.mxu1 %v8304_v1  ;;  %3160 = vmatpush.bf16.msra.mxu3 %v7760_v10  ;;  %v8175_v49 = vld [vmem:[#allocation20 + $0x498] sm:$0xf]  ;;  %v7920_v63 = vor.u32 %v10564_v47, %v7919_v48  ;;  %v7793_v41 = vld [vmem:[#allocation20 + $0x1b8] sm:$0xf0] }
 0x33f   :  { %v10628_v51 = vld [vmem:[#allocation20 + $0x4b4] sm:$0xf0]  ;;  %v10592_v47 = vld [vmem:[#allocation20 + $0x39c] sm:$0xf] }
 0x340   :  { %3198 = vmatpush.bf16.msrb.mxu2 %v8560_v2  ;;  %3173 = vmatpush.bf16.msrb.mxu0 %v8016_v14  ;;  %v8431_v53 = vld [vmem:[#allocation20 + $0x698] sm:$0xf]  ;;  %v8176_v2 = vor.u32 %v10628_v51, %v8175_v49  ;;  %v8049_v49 = vld [vmem:[#allocation20 + $0x3b8] sm:$0xf0] }
 0x341   :  { %v10692_v57 = vld [vmem:[#allocation20 + $0x6b4] sm:$0xf0]  ;;  %v7761_v3 = vld [vmem:[#allocation20 + $0x178] sm:$0xf0] }
 0x342   :  { %3186 = vmatpush.bf16.msrb.mxu1 %v8272_v19  ;;  %3161 = vmatpush.bf16.msra.mxu3 %v7728_v26  ;;  %v7631_v0 = vld [vmem:[#allocation20 + $0x58] sm:$0xf]  ;;  %v8432_v52 = vor.u32 %v10692_v57, %v8431_v53  ;;  %v8305_v57 = vld [vmem:[#allocation20 + $0x5b8] sm:$0xf0] }
 0x343   :  { %v10492_v1 = vld [vmem:[#allocation20 + $0x74] sm:$0xf0]  ;;  %v2907_v56 = vpop.f32.mrf.mxu3  ;;  %v8017_v4 = vld [vmem:[#allocation20 + $0x378] sm:$0xf0] }
 0x344   :  { %3199 = vmatpush.bf16.msrb.mxu2 %v8528_v7  ;;  %3174 = vmatpush.bf16.msrb.mxu0 %v7984_v27  ;;  %v7887_v50 = vld [vmem:[#allocation20 + $0x258] sm:$0xf]  ;;  %v7632_v17 = vor.u32 %v10492_v1, %v7631_v0  ;;  %v2933_v7 = vpop.f32.mrf.mxu1  ;;  %v2946_v44 = vpop.f32.mrf.mxu2  ;;  %v7796_v1 = vor.u32 %v10528_v46, %v7793_v41  ;;  %v10704_v28 = vld [vmem:[#allocation20 + $0x71c] sm:$0xf] }
 0x345   :  { %v10556_v62 = vld [vmem:[#allocation20 + $0x274] sm:$0xf0]  ;;  %v2922_v48 = vpop.f32.mrf.mxu0  ;;  %v8497_v29 = vld [vmem:[#allocation20 + $0x738] sm:$0xf0] }
 0x346   :  { %3187 = vmatpush.bf16.msrb.mxu1 %v8240_v30  ;;  %3162 = vmatpush.bf16.msra.mxu3 %v7696_v42  ;;  %v8143_v55 = vld [vmem:[#allocation20 + $0x458] sm:$0xf]  ;;  %v7888_v19 = vor.u32 %v10556_v62, %v7887_v50  ;;  %v1551_v30 = vperm.slane %v12101_v6, 1  ;;  %v8308_v50 = vor.u32 %v10656_v45, %v8305_v57  ;;  %v10496_v41 = vld [vmem:[#allocation20 + $0x9c] sm:$0xf] }
 0x347   :  { %v10620_v5 = vld [vmem:[#allocation20 + $0x474] sm:$0xf0]  ;;  %v7921_v45 = vld [vmem:[#allocation20 + $0x2b8] sm:$0xf0] }
 0x348   :  { %3200 = vmatpush.bf16.msrb.mxu2 %v8496_v32  ;;  %3175 = vmatpush.bf16.msrb.mxu0 %v7952_v8  ;;  %v8399_v10 = vld [vmem:[#allocation20 + $0x658] sm:$0xf]  ;;  %v8144_v58 = vor.u32 %v10620_v5, %v8143_v55  ;;  %v10600_v32 = vld [vmem:[#allocation20 + $0x3dc] sm:$0xf]  ;;  %v2908_v8 = vadd.f32 %v2907_v56, %v1551_v30 }
 0x349   :  { %v10684_v14 = vld [vmem:[#allocation20 + $0x674] sm:$0xf0]  ;;  %v8084_v42 = vor.u32 %v10600_v32, %v8081_v33  ;;  %v10584_v55 = vld [vmem:[#allocation20 + $0x35c] sm:$0xf] }
 0x34a   :  { %3188 = vmatpush.bf16.msrb.mxu1 %v8208_v15  ;;  %v7599_v31 = vld [vmem:[#allocation20 + $0x18] sm:$0xf]  ;;  %3163 = vmatpush.bf16.msra.mxu3 %v7664_v60  ;;  %v8400_v25 = vor.u32 %v10684_v14, %v8399_v10  ;;  %v8340_v15 = vor.u32 %v10664_v34, %v8337_v36  ;;  %v2921_v51 = vadd.f32 %v2920_v11, %v2908_v8  ;;  %v10720_v60 = vld [vmem:[#allocation20 + $0x79c] sm:$0xf]  ;;  %v1552_v8 = vperm.slane %v12101_v6, 2 }
 0x34b   :  { %v10484_v16 = vld [vmem:[#allocation20 + $0x34] sm:$0xf0]  ;;  %v10648_v5 = vld [vmem:[#allocation20 + $0x55c] sm:$0xf] }
 0x34c   :  { %3201 = vmatpush.bf16.msrb.mxu2 %v8464_v9  ;;  %3176 = vmatpush.bf16.msrb.mxu0 %v7920_v63  ;;  %v7855_v23 = vld [vmem:[#allocation20 + $0x218] sm:$0xf]  ;;  %v7600_v35 = vor.u32 %v10484_v16, %v7599_v31  ;;  %v8596_v9 = vor.u32 %v10728_v18, %v8593_v38  ;;  %v2935_v53 = vpop.f32.mrf.mxu1  ;;  %v8561_v63 = vld [vmem:[#allocation20 + $0x7b8] sm:$0xf0]  ;;  %v2934_v0 = vadd.f32 %v2933_v7, %v2921_v51  ;;  %v2909_v16 = vpop.f32.mrf.mxu3 }
 0x34d   :  { %v10548_v37 = vld [vmem:[#allocation20 + $0x234] sm:$0xf0]  ;;  %v8564_v62 = vor.u32 %v10720_v60, %v8561_v63  ;;  %v8273_v14 = vld [vmem:[#allocation20 + $0x578] sm:$0xf0]  ;;  %v2948_v7 = vpop.f32.mrf.mxu2  ;;  %v8500_v38 = vor.u32 %v10704_v28, %v8497_v29 }
 0x34e   :  { %v8111_v24 = vld [vmem:[#allocation20 + $0x418] sm:$0xf]  ;;  %3189 = vmatpush.bf16.msrb.mxu1 %v8176_v2  ;;  %3164 = vmatpush.bf16.msra.mxu3 %v7632_v17  ;;  %v7856_v54 = vor.u32 %v10548_v37, %v7855_v23  ;;  %v8052_v2 = vor.u32 %v10592_v47, %v8049_v49  ;;  %v12107_v10 = vadd.f32 %v2946_v44, %v2934_v0  ;;  %v10712_v11 = vld [vmem:[#allocation20 + $0x75c] sm:$0xf] }
 0x34f   :  { %v10612_v61 = vld [vmem:[#allocation20 + $0x434] sm:$0xf0]  ;;  %v8529_v31 = vld [vmem:[#allocation20 + $0x778] sm:$0xf0] }
 0x350   :  { %3202 = vmatpush.bf16.msrb.mxu2 %v8432_v52  ;;  %v8367_v26 = vld [vmem:[#allocation20 + $0x618] sm:$0xf]  ;;  %3177 = vmatpush.bf16.msrb.mxu0 %v7888_v19  ;;  %v8112_v39 = vor.u32 %v10612_v61, %v8111_v24  ;;  %v10520_v52 = vld [vmem:[#allocation20 + $0x15c] sm:$0xf]  ;;  %v8020_v19 = vor.u32 %v10584_v55, %v8017_v4  ;;  %v8276_v24 = vor.u32 %v10648_v5, %v8273_v14 }
 0x351   :  { %v10676_v27 = vld [vmem:[#allocation20 + $0x634] sm:$0xf0]  ;;  %v7764_v17 = vor.u32 %v10520_v52, %v7761_v3  ;;  %v10512_v23 = vld [vmem:[#allocation20 + $0x11c] sm:$0xf] }
 0x352   :  { %3190 = vmatpush.bf16.msrb.mxu1 %v8144_v58  ;;  %v8368_v40 = vor.u32 %v10676_v27, %v8367_v26  ;;  %3165 = vmatpush.bf16.msra.mxu3 %v7600_v35  ;;  %v7729_v37 = vld [vmem:[#allocation20 + $0x138] sm:$0xf0]  ;;  %v8532_v58 = vor.u32 %v10712_v11, %v8529_v31 }
 0x353   :  { %v7985_v61 = vld [vmem:[#allocation20 + $0x338] sm:$0xf0]  ;;  %v7732_v33 = vor.u32 %v10512_v23, %v7729_v37 }
 0x354   :  { %3203 = vmatpush.bf16.msrb.mxu2 %v8400_v25  ;;  %3178 = vmatpush.bf16.msrb.mxu0 %v7856_v54  ;;  %v10576_v25 = vld [vmem:[#allocation20 + $0x31c] sm:$0xf]  ;;  %v2972_v30 = vpop.f32.mrf.mxu0 }
 0x355   :  { %3166 = vmatmul.bf16.vlgmr.msra.gmra.mxu3 %v12069_v12  ;;  %v10640_v26 = vld [vmem:[#allocation20 + $0x51c] sm:$0xf]  ;;  %v7988_v34 = vor.u32 %v10576_v25, %v7985_v61 }
 0x356   :  { %3191 = vmatpush.bf16.msrb.mxu1 %v8112_v39  ;;  %3210 = vmatpush.bf16.msrb.mxu3 %v7828_v22  ;;  %v8241_v27 = vld [vmem:[#allocation20 + $0x538] sm:$0xf0]  ;;  %v2985_v32 = vpop.f32.mrf.mxu1 }
 0x357   :  { %3179 = vmatmul.bf16.vlgmr.msrb.gmra.mxu0 %v12071_v13  ;;  %v10504_v35 = vld [vmem:[#allocation20 + $0xdc] sm:$0xf]  ;;  %v8244_v18 = vor.u32 %v10640_v26, %v8241_v27 }
 0x358   :  { %3204 = vmatpush.bf16.msrb.mxu2 %v8368_v40  ;;  %3223 = vmatpush.bf16.msra.mxu0 %v8084_v42  ;;  %v7697_v54 = vld [vmem:[#allocation20 + $0xf8] sm:$0xf0]  ;;  %v2959_v47 = vpop.f32.mrf.mxu3 }
 0x359   :  { %3192 = vmatmul.bf16.vlgmr.msrb.gmra.mxu1 %v12075_v21  ;;  %v10568_v36 = vld [vmem:[#allocation20 + $0x2dc] sm:$0xf]  ;;  %v7700_v44 = vor.u32 %v10504_v35, %v7697_v54  ;;  %v2960_v53 = vadd.f32 %v2959_v47, %v1552_v8 }
 0x35a   :  { %3236 = vmatpush.bf16.msra.mxu1 %v8340_v15  ;;  %3211 = vmatpush.bf16.msrb.mxu3 %v7796_v1  ;;  %v7953_v39 = vld [vmem:[#allocation20 + $0x2f8] sm:$0xf0] }
 0x35b   :  { %3205 = vmatmul.bf16.vlgmr.msrb.gmra.mxu2 %v12073_v20  ;;  %v10632_v40 = vld [vmem:[#allocation20 + $0x4dc] sm:$0xf]  ;;  %v7956_v46 = vor.u32 %v10568_v36, %v7953_v39 }
 0x35c   :  { %3249 = vmatpush.bf16.msra.mxu2 %v8596_v9  ;;  %3224 = vmatpush.bf16.msra.mxu0 %v8052_v2  ;;  %v8209_v56 = vld [vmem:[#allocation20 + $0x4f8] sm:$0xf0]  ;;  %v2974_v1 = vpop.f32.mrf.mxu0  ;;  %v2973_v2 = vadd.f32 %v2972_v30, %v2960_v53 }
 0x35d   :  { %v10696_v22 = vld [vmem:[#allocation20 + $0x6dc] sm:$0xf]  ;;  %v8212_v9 = vor.u32 %v10632_v40, %v8209_v56  ;;  %v1553_v56 = vperm.slane %v12101_v6, 3 }
 0x35e   :  { %3237 = vmatpush.bf16.msra.mxu1 %v8308_v50  ;;  %3212 = vmatpush.bf16.msrb.mxu3 %v7764_v17  ;;  %v8465_v42 = vld [vmem:[#allocation20 + $0x6f8] sm:$0xf0]  ;;  %v2998_v57 = vpop.f32.mrf.mxu2  ;;  %v2987_v52 = vpop.f32.mrf.mxu1  ;;  %v2986_v16 = vadd.f32 %v2985_v32, %v2973_v2  ;;  %v3262_v2 = vrot.slane %v12104_v59, 4 }
 0x35f   :  { %v7665_v15 = vld [vmem:[#allocation20 + $0xb8] sm:$0xf0]  ;;  %v8468_v48 = vor.u32 %v10696_v22, %v8465_v42  ;;  %v3268_v52 = vrot.slane %v12107_v10, 4 }
 0x360   :  { %3250 = vmatpush.bf16.msra.mxu2 %v8564_v62  ;;  %3225 = vmatpush.bf16.msra.mxu0 %v8020_v19  ;;  %v10560_v49 = vld [vmem:[#allocation20 + $0x29c] sm:$0xf]  ;;  %v7668_v3 = vor.u32 %v10496_v41, %v7665_v15  ;;  %v12114_v23 = vadd.f32 %v2998_v57, %v2986_v16  ;;  %v2961_v27 = vpop.f32.mrf.mxu3 }
 0x361   :  { %v10624_v51 = vld [vmem:[#allocation20 + $0x49c] sm:$0xf]  ;;  %v7924_v50 = vor.u32 %v10560_v49, %v7921_v45 }
 0x362   :  { %3238 = vmatpush.bf16.msra.mxu1 %v8276_v24  ;;  %3213 = vmatpush.bf16.msrb.mxu3 %v7732_v33  ;;  %v8177_v60 = vld [vmem:[#allocation20 + $0x4b8] sm:$0xf0] }
 0x363   :  { %v10688_v63 = vld [vmem:[#allocation20 + $0x69c] sm:$0xf]  ;;  %v8180_v4 = vor.u32 %v10624_v51, %v8177_v60 }
 0x364   :  { %3251 = vmatpush.bf16.msra.mxu2 %v8532_v58  ;;  %3226 = vmatpush.bf16.msra.mxu0 %v7988_v34  ;;  %v8433_v0 = vld [vmem:[#allocation20 + $0x6b8] sm:$0xf0] }
 0x365   :  { %v10488_v62 = vld [vmem:[#allocation20 + $0x5c] sm:$0xf]  ;;  %v8436_v5 = vor.u32 %v10688_v63, %v8433_v0 }
 0x366   :  { %3239 = vmatpush.bf16.msra.mxu1 %v8244_v18  ;;  %3214 = vmatpush.bf16.msrb.mxu3 %v7700_v44  ;;  %v7633_v55 = vld [vmem:[#allocation20 + $0x78] sm:$0xf0]  ;;  %v3000_v32 = vpop.f32.mrf.mxu2 }
 0x367   :  { %v10552_v14 = vld [vmem:[#allocation20 + $0x25c] sm:$0xf]  ;;  %v7636_v37 = vor.u32 %v10488_v62, %v7633_v55  ;;  %v3263_v62 = vadd.f32 %v3262_v2, %v12104_v59  ;;  %v3269_v55 = vadd.f32 %v3268_v52, %v12107_v10 }
 0x368   :  { %3252 = vmatpush.bf16.msra.mxu2 %v8500_v38  ;;  %3227 = vmatpush.bf16.msra.mxu0 %v7956_v46  ;;  %v7889_v11 = vld [vmem:[#allocation20 + $0x278] sm:$0xf0] }
 0x369   :  { %v10616_v31 = vld [vmem:[#allocation20 + $0x45c] sm:$0xf]  ;;  %v7892_v24 = vor.u32 %v10552_v14, %v7889_v11  ;;  %v3270_v11 = vrot.slane %v3269_v55, 2 }
 0x36a   :  { %3240 = vmatpush.bf16.msra.mxu1 %v8212_v9  ;;  %v8145_v17 = vld [vmem:[#allocation20 + $0x478] sm:$0xf0]  ;;  %3215 = vmatpush.bf16.msrb.mxu3 %v7668_v3 }
 0x36b   :  { %v10680_v19 = vld [vmem:[#allocation20 + $0x65c] sm:$0xf]  ;;  %v8148_v61 = vor.u32 %v10616_v31, %v8145_v17  ;;  %v3274_v31 = vrot.slane %v12114_v23, 4 }
 0x36c   :  { %3253 = vmatpush.bf16.msra.mxu2 %v8468_v48  ;;  %v8401_v7 = vld [vmem:[#allocation20 + $0x678] sm:$0xf0]  ;;  %3228 = vmatpush.bf16.msra.mxu0 %v7924_v50 }
 0x36d   :  { %v10480_v58 = vld [vmem:[#allocation20 + $0x1c] sm:$0xf]  ;;  %v8404_v26 = vor.u32 %v10680_v19, %v8401_v7 }
 0x36e   :  { %v7601_v25 = vld [vmem:[#allocation20 + $0x38] sm:$0xf0]  ;;  %3241 = vmatpush.bf16.msra.mxu1 %v8180_v4  ;;  %3216 = vmatpush.bf16.msrb.mxu3 %v7636_v37  ;;  %v1555_v4 = vperm.slane %v12101_v6, 5 }
 0x36f   :  { %v10544_v28 = vld [vmem:[#allocation20 + $0x21c] sm:$0xf]  ;;  %v7604_v54 = vor.u32 %v10480_v58, %v7601_v25  ;;  %v3271_v25 = vadd.f32 %v3270_v11, %v3269_v55 }
 0x370   :  { %3254 = vmatpush.bf16.msra.mxu2 %v8436_v5  ;;  %v7857_v29 = vld [vmem:[#allocation20 + $0x238] sm:$0xf0]  ;;  %3229 = vmatpush.bf16.msra.mxu0 %v7892_v24  ;;  %v3264_v5 = vrot.slane %v3263_v62, 2 }
 0x371   :  { %v10608_v30 = vld [vmem:[#allocation20 + $0x41c] sm:$0xf]  ;;  %v7860_v36 = vor.u32 %v10544_v28, %v7857_v29  ;;  %v3272_v32 = vrot.slane %v3271_v25, 1 }
 0x372   :  { %v8113_v33 = vld [vmem:[#allocation20 + $0x438] sm:$0xf0]  ;;  %3242 = vmatpush.bf16.msra.mxu1 %v8148_v61  ;;  %3217 = vmatpush.bf16.msrb.mxu3 %v7604_v54  ;;  %v3265_v58 = vadd.f32 %v3264_v5, %v3263_v62  ;;  %v3275_v61 = vadd.f32 %v3274_v31, %v12114_v23 }
 0x373   :  { %v10672_v34 = vld [vmem:[#allocation20 + $0x61c] sm:$0xf]  ;;  %v8116_v18 = vor.u32 %v10608_v30, %v8113_v33 }
 0x374   :  { %v8369_v35 = vld [vmem:[#allocation20 + $0x638] sm:$0xf0]  ;;  %3255 = vmatpush.bf16.msra.mxu2 %v8404_v26  ;;  %3230 = vmatpush.bf16.msra.mxu0 %v7860_v36  ;;  %v3024_v39 = vpop.f32.mrf.mxu0  ;;  %v3266_v29 = vrot.slane %v3265_v58, 1  ;;  %v3276_v33 = vrot.slane %v3275_v61, 2 }
 0x375   :  { %v8372_v38 = vor.u32 %v10672_v34, %v8369_v35  ;;  %3218 = vmatmul.bf16.vlgmr.msrb.gmra.mxu3 %v12069_v12 }
 0x376   :  { %3243 = vmatpush.bf16.msra.mxu1 %v8116_v18  ;;  %v3037_v40 = vpop.f32.mrf.mxu1  ;;  %v3267_v36 = vadd.f32 %v3266_v29, %v3265_v58  ;;  %v3273_v18 = vadd.f32 %v3272_v32, %v3271_v25 }
 0x377   :  { %3231 = vmatmul.bf16.vlgmr.msra.gmra.mxu0 %v12071_v13 }
 0x378   :  { %3256 = vmatpush.bf16.msra.mxu2 %v8372_v38  ;;  %v3011_v22 = vpop.f32.mrf.mxu3  ;;  %v3277_v38 = vadd.f32 %v3276_v33, %v3275_v61 }
 0x379   :  { %3244 = vmatmul.bf16.vlgmr.msra.gmra.mxu1 %v12075_v21  ;;  %v3012_v42 = vadd.f32 %v3011_v22, %v1553_v56  ;;  %v1554_v21 = vperm.slane %v12101_v6, 4  ;;  %v12140_v56 = vmul.f32 %v3267_v36, %v11888_v43 }
 0x37b   :  { %3257 = vmatmul.bf16.vlgmr.msra.gmra.mxu2 %v12073_v20  ;;  %v3025_v46 = vadd.f32 %v3024_v39, %v3012_v42  ;;  %v12144_v42 = vmul.f32 %v3273_v18, %v11888_v43 }
 0x37c   :  { %v3026_v44 = vpop.f32.mrf.mxu0 }
 0x37d   :  { %v3038_v15 = vadd.f32 %v3037_v40, %v3025_v46 }
 0x37e   :  { %v3050_v8 = vpop.f32.mrf.mxu2  ;;  %v3039_v41 = vpop.f32.mrf.mxu1 }
 0x37f   :  { %v12121_v9 = vadd.f32 %v3050_v8, %v3038_v15  ;;  %v3278_v8 = vrot.slane %v3277_v38, 1  ;;  %v3318_v41 = vsub.f32 %v12104_v59, %v12140_v56 }
 0x380   :  { %v3013_v12 = vpop.f32.mrf.mxu3 }
 0x381   :  { %v3280_v19 = vrot.slane %v12121_v9, 4  ;;  %v3319_v12 = vsub.f32 %v12107_v10, %v12144_v42 }
 0x383   :  { %v3281_v27 = vadd.f32 %v3280_v19, %v12121_v9 }
 0x385   :  { %v3282_v54 = vrot.slane %v3281_v27, 2 }
 0x386   :  { %v3052_v48 = vpop.f32.mrf.mxu2 }
 0x387   :  { %v3283_v40 = vadd.f32 %v3282_v54, %v3281_v27  ;;  %v3279_v48 = vadd.f32 %v3278_v8, %v3277_v38 }
 0x389   :  { %v3284_v46 = vrot.slane %v3283_v40, 1 }
 0x394   :  { %v3076_v13 = vpop.f32.mrf.mxu0 }
 0x396   :  { %v3089_v47 = vpop.f32.mrf.mxu1 }
 0x398   :  { %v3063_v20 = vpop.f32.mrf.mxu3 }
 0x399   :  { %v3064_v49 = vadd.f32 %v3063_v20, %v1554_v21  ;;  %v3326_v21 = vmul.f32 %v3318_v41, %v3318_v41 }
 0x39b   :  { %v3077_v53 = vadd.f32 %v3076_v13, %v3064_v49 }
 0x39c   :  { %v3078_v51 = vpop.f32.mrf.mxu0 }
 0x39d   :  { %v3090_v60 = vadd.f32 %v3089_v47, %v3077_v53  ;;  %v3285_v47 = vadd.f32 %v3284_v46, %v3283_v40  ;;  %v12152_v51 = vmul.f32 %v3279_v48, %v11888_v43 }
 0x39e   :  { %v3102_v45 = vpop.f32.mrf.mxu2  ;;  %v3091_v57 = vpop.f32.mrf.mxu1 }
 0x39f   :  { %v12124_v63 = vadd.f32 %v3102_v45, %v3090_v60  ;;  %v3327_v45 = vmul.f32 %v3319_v12, %v3319_v12  ;;  %v12155_v60 = vmul.f32 %v3285_v47, %v11888_v43 }
 0x3a0   :  { %v3065_v0 = vpop.f32.mrf.mxu3 }
 0x3a1   :  { %v3286_v34 = vrot.slane %v12124_v63, 4  ;;  %v1556_v0 = vperm.slane %v12101_v6, 6  ;;  %v3340_v52 = vrot.slane %v3327_v45, 4  ;;  %v3321_v62 = vsub.f32 %v12121_v9, %v12155_v60 }
 0x3a3   :  { %v3287_v39 = vadd.f32 %v3286_v34, %v12124_v63 }
 0x3a5   :  { %v3288_v44 = vrot.slane %v3287_v39, 2 }
 0x3a6   :  { %v3104_v1 = vpop.f32.mrf.mxu2 }
 0x3a7   :  { %v3289_v13 = vadd.f32 %v3288_v44, %v3287_v39  ;;  %v3334_v1 = vrot.slane %v3326_v21, 4 }
 0x3a9   :  { %v3290_v53 = vrot.slane %v3289_v13, 1 }
 0x3b4   :  { %v3128_v3 = vpop.f32.mrf.mxu0 }
 0x3b6   :  { %v3141_v50 = vpop.f32.mrf.mxu1 }
 0x3b8   :  { %v3115_v14 = vpop.f32.mrf.mxu3 }
 0x3b9   :  { %v3116_v16 = vadd.f32 %v3115_v14, %v1555_v4  ;;  %v3335_v14 = vadd.f32 %v3334_v1, %v3326_v21 }
 0x3bb   :  { %v3129_v37 = vadd.f32 %v3128_v3, %v3116_v16  ;;  %v3320_v3 = vsub.f32 %v12114_v23, %v12152_v51  ;;  %v3341_v16 = vadd.f32 %v3340_v52, %v3327_v45  ;;  %v3336_v25 = vrot.slane %v3335_v14, 2 }
 0x3bc   :  { %v3130_v7 = vpop.f32.mrf.mxu0 }
 0x3bd   :  { %v3142_v26 = vadd.f32 %v3141_v50, %v3129_v37  ;;  %v3291_v50 = vadd.f32 %v3290_v53, %v3289_v13  ;;  %v3337_v54 = vadd.f32 %v3336_v25, %v3335_v14 }
 0x3be   :  { %v3154_v17 = vpop.f32.mrf.mxu2  ;;  %v3143_v24 = vpop.f32.mrf.mxu1 }
 0x3bf   :  { %v12135_v28 = vadd.f32 %v3154_v17, %v3142_v26  ;;  %v3328_v17 = vmul.f32 %v3320_v3, %v3320_v3  ;;  %v12163_v19 = vmul.f32 %v3291_v50, %v11888_v43  ;;  %v3329_v24 = vmul.f32 %v3321_v62, %v3321_v62 }
 0x3c0   :  { %v3117_v30 = vpop.f32.mrf.mxu3  ;;  %v3342_v26 = vrot.slane %v3341_v16, 2  ;;  %v3338_v44 = vrot.slane %v3337_v54, 1 }
 0x3c1   :  { %v3292_v22 = vrot.slane %v12135_v28, 4  ;;  %v3346_v27 = vrot.slane %v3328_v17, 4  ;;  %v3322_v29 = vsub.f32 %v12124_v63, %v12163_v19  ;;  %v3352_v32 = vrot.slane %v3329_v24, 4 }
 0x3c2   :  { %v3343_v18 = vadd.f32 %v3342_v26, %v3341_v16  ;;  %v3339_v21 = vadd.f32 %v3338_v44, %v3337_v54  ;;  %v10785_v26 = vld [vmem:[#allocation26 + $0x1a0] sm:$0xf0] }
 0x3c3   :  { %v3293_v15 = vadd.f32 %v3292_v22, %v12135_v28  ;;  %v3347_v38 = vadd.f32 %v3346_v27, %v3328_v17  ;;  %v3330_v39 = vmul.f32 %v3322_v29, %v3322_v29  ;;  %v3353_v22 = vadd.f32 %v3352_v32, %v3329_v24  ;;  %v9019_v27 = vld [vmem:[#allocation26 + $0x348] sm:$0xf]  ;;  %v10897_v54 = vld [vmem:[#allocation26 + $0x520] sm:$0xf0] }
 0x3c4   :  { %v3344_v41 = vrot.slane %v3343_v18, 1  ;;  %v1557_v17 = vperm.slane %v12101_v6, 7 }
 0x3c5   :  { %v3294_v20 = vrot.slane %v3293_v15, 2  ;;  %v3358_v12 = vrot.slane %v3330_v39, 4  ;;  %v3354_v13 = vrot.slane %v3353_v22, 2 }
 0x3c6   :  { %v3156_v35 = vpop.f32.mrf.mxu2 }
 0x3c7   :  { %v3295_v2 = vadd.f32 %v3294_v20, %v3293_v15  ;;  %v3348_v15 = vrot.slane %v3347_v38, 2  ;;  %v3359_v53 = vadd.f32 %v3358_v12, %v3330_v39 }
 0x3c9   :  { %v3296_v11 = vrot.slane %v3295_v2, 1  ;;  %v3349_v45 = vadd.f32 %v3348_v15, %v3347_v38  ;;  %v3360_v62 = vrot.slane %v3359_v53, 2 }
 0x3cb   :  { %v3297_v61 = vadd.f32 %v3296_v11, %v3295_v2  ;;  %v3382_v2 = vmul.f32 %v3339_v21, %v11888_v43  ;;  %v3350_v50 = vrot.slane %v3349_v45, 1  ;;  %v3361_v24 = vadd.f32 %v3360_v62, %v3359_v53  ;;  %v8767_v21 = vld [vmem:[#allocation26 + $0x150] sm:$0xf]  ;;  %v10834_v53 = vld [vmem:[#allocation26 + $0x328] sm:$0xf0] }
 0x3cc   :  { %v9439_v62 = vld [vmem:[#allocation26 + $0x690] sm:$0xf] }
 0x3cd   :  { %v12171_v36 = vmul.f32 %v3297_v61, %v11888_v43  ;;  %v8795_v61 = vld [vmem:[#allocation26 + $0x188] sm:$0xf] }
 0x3cf   :  { %v3323_v46 = vsub.f32 %v12135_v28, %v12171_v36 }
 0x3d1   :  { %v3331_v20 = vmul.f32 %v3323_v46, %v3323_v46  ;;  %v3362_v46 = vrot.slane %v3361_v24, 1 }
 0x3d3   :  { %v3364_v52 = vrot.slane %v3331_v20, 4 }
 0x3d4   :  { %v3180_v49 = vpop.f32.mrf.mxu0 }
 0x3d5   :  { %v3365_v16 = vadd.f32 %v3364_v52, %v3331_v20  ;;  %v10778_v20 = vld [vmem:[#allocation26 + $0x168] sm:$0xf0] }
 0x3d6   :  { %v3193_v57 = vpop.f32.mrf.mxu1 }
 0x3d8   :  { %v3167_v55 = vpop.f32.mrf.mxu3 }
 0x3d9   :  { %v3168_v4 = vadd.f32 %v3167_v55, %v1556_v0  ;;  %v3355_v0 = vadd.f32 %v3354_v13, %v3353_v22  ;;  %v9467_v22 = vld [vmem:[#allocation26 + $0x6c8] sm:$0xf] }
 0x3db   :  { %v3181_v7 = vadd.f32 %v3180_v49, %v3168_v4  ;;  %v3345_v49 = vadd.f32 %v3344_v41, %v3343_v18  ;;  %v3366_v18 = vrot.slane %v3365_v16, 2 }
 0x3dc   :  { %v3182_v31 = vpop.f32.mrf.mxu0 }
 0x3dd   :  { %v3194_v58 = vadd.f32 %v3193_v57, %v3181_v7  ;;  %v3383_v3 = vmul.f32 %v3345_v49, %v11888_v43  ;;  %v12183_v31 = vadd.f32 0.8, %v3382_v2  ;;  %v8991_v49 = vld [vmem:[#allocation26 + $0x310] sm:$0xf]  ;;  %v3367_v2 = vadd.f32 %v3366_v18, %v3365_v16 }
 0x3de   :  { %v3206_v5 = vpop.f32.mrf.mxu2  ;;  %v3195_v37 = vpop.f32.mrf.mxu1 }
 0x3df   :  { %v12167_v30 = vadd.f32 %v3206_v5, %v3194_v58  ;;  %v3356_v5 = vrot.slane %v3355_v0, 1  ;;  %v12186_v7 = vadd.f32 0.8, %v3383_v3  ;;  %v3351_v37 = vadd.f32 %v3350_v50, %v3349_v45 }
 0x3e0   :  { %v3169_v33 = vpop.f32.mrf.mxu3  ;;  %v8768_v45 = vor.u32 %v10778_v20, %v8767_v21  ;;  %v8992_v3 = vor.u32 %v10834_v53, %v8991_v49  ;;  %11225 = vrsqrt.f32 %v12183_v31  ;;  %v10876_v21 = vld [vmem:[#allocation26 + $0x478] sm:$0xf0]  ;;  %v9383_v20 = vld [vmem:[#allocation26 + $0x620] sm:$0xf] }
 0x3e1   :  { %v3298_v34 = vrot.slane %v12167_v30, 4  ;;  %v3357_v25 = vadd.f32 %v3356_v5, %v3355_v0  ;;  %v8796_v33 = vor.u32 %v10785_v26, %v8795_v61  ;;  %v3384_v44 = vmul.f32 %v3351_v37, %v11888_v43  ;;  %v10890_v0 = vld [vmem:[#allocation26 + $0x4e8] sm:$0xf0]  ;;  %v10771_v61 = vld [vmem:[#allocation26 + $0x130] sm:$0xf0] }
 0x3e2   :  { %v8963_v26 = vld [vmem:[#allocation26 + $0x2d8] sm:$0xf]  ;;  %11227 = vrsqrt.f32 %v12186_v7  ;;  %vm3415_vm0 = vweird.f32 %v12186_v7 }
 0x3e3   :  { %v3299_v40 = vadd.f32 %v3298_v34, %v12167_v30  ;;  %v10841_v34 = vld [vmem:[#allocation26 + $0x360] sm:$0xf0]  ;;  %6454 = vmatpush.bf16.msra.mxu3 %v8796_v33  ;;  %v12190_v5 = vadd.f32 0.8, %v3384_v44  ;;  %v10764_v44 = vld [vmem:[#allocation26 + $0xf8] sm:$0xf0] }
 0x3e5   :  { %v3300_v8 = vrot.slane %v3299_v40, 2  ;;  %11229 = vrsqrt.f32 %v12190_v5  ;;  %vm3425_vm1 = vweird.f32 %v12190_v5 }
 0x3e6   :  { %v3208_v35 = vpop.f32.mrf.mxu2  ;;  %v12203_v49 = vpop.eup %11225 }
 0x3e7   :  { %v3301_v48 = vadd.f32 %v3300_v8, %v3299_v40  ;;  %v9243_v35 = vld [vmem:[#allocation26 + $0x508] sm:$0xf]  ;;  %v9020_v40 = vor.u32 %v10841_v34, %v9019_v27  ;;  %v10953_v8 = vld [vmem:[#allocation26 + $0x6e0] sm:$0xf0]  ;;  %6455 = vmatpush.bf16.msra.mxu3 %v8768_v45  ;;  %v10827_v27 = vld [vmem:[#allocation26 + $0x2f0] sm:$0xf0] }
 0x3e8   :  { %v9244_v6 = vor.u32 %v10897_v54, %v9243_v35  ;;  %v9468_v12 = vor.u32 %v10953_v8, %v9467_v22  ;;  %v8964_v34 = vor.u32 %v10827_v27, %v8963_v26  ;;  %v10883_v35 = vld [vmem:[#allocation26 + $0x4b0] sm:$0xf0]  ;;  %v9411_v54 = vld [vmem:[#allocation26 + $0x658] sm:$0xf]  ;;  %v8711_v8 = vld [vmem:[#allocation26 + $0xe0] sm:$0xf] }
 0x3e9   :  { %v3302_v47 = vrot.slane %v3301_v48, 1  ;;  %6467 = vmatpush.bf16.msrb.mxu0 %v9020_v40  ;;  %v10939_v40 = vld [vmem:[#allocation26 + $0x670] sm:$0xf0] }
 0x3ea   :  { %6480 = vmatpush.bf16.msrb.mxu1 %v9244_v6  ;;  %6493 = vmatpush.bf16.msrb.mxu2 %v9468_v12  ;;  %v9412_v22 = vor.u32 %v10939_v40, %v9411_v54  ;;  %v9159_v12 = vld [vmem:[#allocation26 + $0x460] sm:$0xf]  ;;  %v8879_v40 = vld [vmem:[#allocation26 + $0x230] sm:$0xf] }
 0x3eb   :  { %v3303_v57 = vadd.f32 %v3302_v47, %v3301_v48  ;;  %v3385_v48 = vmul.f32 %v3357_v25, %v11888_v43  ;;  %v8739_v25 = vld [vmem:[#allocation26 + $0x118] sm:$0xf] }
 0x3ec   :  { %v8740_v16 = vor.u32 %v10771_v61, %v8739_v25  ;;  %v10813_v25 = vld [vmem:[#allocation26 + $0x280] sm:$0xf0]  ;;  %v9131_v61 = vld [vmem:[#allocation26 + $0x428] sm:$0xf] }
 0x3ed   :  { %v12177_v1 = vmul.f32 %v3303_v57, %v11888_v43  ;;  %v9215_v57 = vld [vmem:[#allocation26 + $0x4d0] sm:$0xf]  ;;  %v12192_v37 = vadd.f32 0.8, %v3385_v48  ;;  %6468 = vmatpush.bf16.msrb.mxu0 %v8992_v3 }
 0x3ee   :  { %v9216_v50 = vor.u32 %v10890_v0, %v9215_v57  ;;  %6456 = vmatpush.bf16.msra.mxu3 %v8740_v16  ;;  %v9160_v57 = vor.u32 %v10876_v21, %v9159_v12  ;;  %v10932_v0 = vld [vmem:[#allocation26 + $0x638] sm:$0xf0] }
 0x3ef   :  { %v3324_v55 = vsub.f32 %v12167_v30, %v12177_v1  ;;  %11231 = vrsqrt.f32 %v12192_v37  ;;  %vm3435_vm7 = vweird.f32 %v12192_v37 }
 0x3f0   :  { %6481 = vmatpush.bf16.msrb.mxu1 %v9216_v50  ;;  %v9384_v50 = vor.u32 %v10932_v0, %v9383_v20 }
 0x3f1   :  { %v3332_v11 = vmul.f32 %v3324_v55, %v3324_v55  ;;  %v10946_v55 = vld [vmem:[#allocation26 + $0x6a8] sm:$0xf0]  ;;  %6469 = vmatpush.bf16.msrb.mxu0 %v8964_v34 }
 0x3f3   :  { %v3370_v58 = vrot.slane %v3332_v11, 4 }
 0x3f4   :  { %v3232_v4 = vpop.f32.mrf.mxu0 }
 0x3f5   :  { %v3371_v29 = vadd.f32 %v3370_v58, %v3332_v11 }
 0x3f6   :  { %v3245_v14 = vpop.f32.mrf.mxu1 }
 0x3f7   :  { %v3372_v41 = vrot.slane %v3371_v29, 2 }
 0x3f8   :  { %v3219_v32 = vpop.f32.mrf.mxu3 }
 0x3f9   :  { %v3220_v38 = vadd.f32 %v3219_v32, %v1557_v17  ;;  %v3373_v11 = vadd.f32 %v3372_v41, %v3371_v29  ;;  %v9440_v17 = vor.u32 %v10946_v55, %v9439_v62  ;;  %v9187_v32 = vld [vmem:[#allocation26 + $0x498] sm:$0xf]  ;;  %v8712_v41 = vor.u32 %v10764_v44, %v8711_v8  ;;  %v8683_v62 = vld [vmem:[#allocation26 + $0xa8] sm:$0xf]  ;;  %v10806_v44 = vld [vmem:[#allocation26 + $0x248] sm:$0xf0] }
 0x3fa   :  { %v8907_v55 = vld [vmem:[#allocation26 + $0x268] sm:$0xf] }
 0x3fb   :  { %v3233_v13 = vadd.f32 %v3232_v4, %v3220_v38  ;;  %v3363_v4 = vadd.f32 %v3362_v46, %v3361_v24  ;;  %6494 = vmatpush.bf16.msrb.mxu2 %v9440_v17  ;;  %v3368_v24 = vrot.slane %v3367_v2, 1  ;;  %v3374_v38 = vrot.slane %v3373_v11, 1  ;;  %v8935_v46 = vld [vmem:[#allocation26 + $0x2a0] sm:$0xf]  ;;  %6457 = vmatpush.bf16.msra.mxu3 %v8712_v41  ;;  %v10862_v41 = vld [vmem:[#allocation26 + $0x408] sm:$0xf0] }
 0x3fc   :  { %v3234_v15 = vpop.f32.mrf.mxu0  ;;  %v8908_v27 = vor.u32 %v10813_v25, %v8907_v55 }
 0x3fd   :  { %v3246_v52 = vadd.f32 %v3245_v14, %v3233_v13  ;;  %v3386_v18 = vmul.f32 %v3363_v4, %v11888_v43  ;;  %v10820_v15 = vld [vmem:[#allocation26 + $0x2b8] sm:$0xf0]  ;;  %v3369_v48 = vadd.f32 %v3368_v24, %v3367_v2  ;;  %v3375_v53 = vadd.f32 %v3374_v38, %v3373_v11  ;;  %v10757_v2 = vld [vmem:[#allocation26 + $0xc0] sm:$0xf0]  ;;  %v9355_v24 = vld [vmem:[#allocation26 + $0x5e8] sm:$0xf] }
 0x3fe   :  { %v3258_v39 = vpop.f32.mrf.mxu2  ;;  %v3247_v47 = vpop.f32.mrf.mxu1  ;;  %v8684_v17 = vor.u32 %v10757_v2, %v8683_v62  ;;  %v8655_v38 = vld [vmem:[#allocation26 + $0x70] sm:$0xf]  ;;  %v10743_v62 = vld [vmem:[#allocation26 + $0x50] sm:$0xf0]  ;;  %v8851_v2 = vld [vmem:[#allocation26 + $0x1f8] sm:$0xf] }
 0x3ff   :  { %v12194_v58 = vadd.f32 %v3258_v39, %v3246_v52  ;;  %v9188_v39 = vor.u32 %v10883_v35, %v9187_v32  ;;  %6495 = vmatpush.bf16.msrb.mxu2 %v9412_v22  ;;  %v8936_v47 = vor.u32 %v10820_v15, %v8935_v46  ;;  %v12205_v45 = vadd.f32 0.8, %v3386_v18  ;;  %v12207_v52 = vpop.eup %11227  ;;  %v9103_v46 = vld [vmem:[#allocation26 + $0x3f0] sm:$0xf] }
 0x400   :  { %v3221_v14 = vpop.f32.mrf.mxu3  ;;  %v12209_v4 = vpop.eup %11229  ;;  %v3387_v11 = vmul.f32 %v3369_v48, %v11888_v43  ;;  %v3388_v34 = vmul.f32 %v3375_v53, %v11888_v43  ;;  %6458 = vmatpush.bf16.msra.mxu3 %v8684_v17  ;;  %v3410_v54 = vmul.f32 %v12207_v52, %v12186_v7  ;;  %v8880_v48 = vor.u32 %v10806_v44, %v8879_v40  ;;  %v10736_v40 = vld [vmem:[#allocation26 + $0x18] sm:$0xf0]  ;;  %v9047_v44 = vld [vmem:[#allocation26 + $0x380] sm:$0xf] }
 0x401   :  { %v3304_v29 = vrot.slane %v12194_v58, 4  ;;  %6482 = vmatpush.bf16.msrb.mxu1 %v9188_v39  ;;  %6470 = vmatpush.bf16.msrb.mxu0 %v8936_v47  ;;  %v10869_v14 = vld [vmem:[#allocation26 + $0x440] sm:$0xf0]  ;;  %v12211_v16 = vpop.eup %11231  ;;  %11233 = vrsqrt.f32 %v12205_v45  ;;  %v10750_v39 = vld [vmem:[#allocation26 + $0x88] sm:$0xf0]  ;;  %v9104_v53 = vor.u32 %v10862_v41, %v9103_v46  ;;  %vm3416_vm14 = vweird.f32 %v12207_v52 }
 0x402   :  { %v9132_v32 = vor.u32 %v10869_v14, %v9131_v61  ;;  %v3430_v22 = vmul.f32 %v12211_v16, %v12192_v37  ;;  %v8656_v8 = vor.u32 %v10750_v39, %v8655_v38  ;;  %v12224_v15 = vadd.f32 0.8, %v3387_v11  ;;  %v10918_v47 = vld [vmem:[#allocation26 + $0x5c8] sm:$0xf0]  ;;  %v10799_v14 = vld [vmem:[#allocation26 + $0x210] sm:$0xf0]  ;;  %vm12281_vm2 = vmor %vm3415_vm0, %vm3416_vm14 }
 0x403   :  { %v3305_v6 = vadd.f32 %v3304_v29, %v12194_v58  ;;  %6496 = vmatpush.bf16.msrb.mxu2 %v9384_v50  ;;  %v10925_v29 = vld [vmem:[#allocation26 + $0x600] sm:$0xf0]  ;;  %v12230_v20 = vadd.f32 0.8, %v3388_v34  ;;  %v3411_v0 = vmul.f32 %v12207_v52, %v3410_v54  ;;  %v8627_v50 = vld [vmem:[#allocation26 + $0x38] sm:$0xf]  ;;  %vm3426_vm15 = vweird.f32 %v12209_v4 }
 0x404   :  { %v9356_v35 = vor.u32 %v10925_v29, %v9355_v24  ;;  %6459 = vmatpush.bf16.msra.mxu3 %v8656_v8  ;;  %v3431_v25 = vmul.f32 %v12211_v16, %v3430_v22  ;;  %v8628_v61 = vor.u32 %v10743_v62, %v8627_v50  ;;  %v9075_v11 = vld [vmem:[#allocation26 + $0x3b8] sm:$0xf]  ;;  %11235 = vrsqrt.f32 %v12224_v15  ;;  %v8599_v39 = vld [vmem:[#allocation26] sm:$0xf]  ;;  %v10792_v8 = vld [vmem:[#allocation26 + $0x1d8] sm:$0xf0] }
 0x405   :  { %v3306_v13 = vrot.slane %v3305_v6, 2  ;;  %6483 = vmatpush.bf16.msrb.mxu1 %v9160_v57  ;;  %6471 = vmatpush.bf16.msrb.mxu0 %v8908_v27  ;;  %v9299_v29 = vld [vmem:[#allocation26 + $0x578] sm:$0xf]  ;;  %11237 = vrsqrt.f32 %v12230_v20  ;;  %v12243_v54 = vmul.f32 0.5, %v3411_v0  ;;  %v8823_v22 = vld [vmem:[#allocation26 + $0x1c0] sm:$0xf]  ;;  %vm3436_vm3 = vweird.f32 %v12211_v16  ;;  %vm12291_vm4 = vmor %vm3425_vm1, %vm3426_vm15 }
 0x406   :  { %v3260_v33 = vpop.f32.mrf.mxu2  ;;  %v12249_v41 = vmul.f32 0.5, %v3431_v25  ;;  %v9691_v0 = vld [vmem:[#allocation26 + $0x888] sm:$0xf]  ;;  %v11065_v25 = vld [vmem:[#allocation26 + $0xa60] sm:$0xf0]  ;;  %vm12311_vm10 = vmor %vm3435_vm7, %vm3436_vm3  ;;  %vm3445_vm11 = vweird.f32 %v12205_v45  ;;  %vm3455_vm14 = vweird.f32 %v12224_v15  ;;  %vm3405_vm1 = vweird.f32 %v12183_v31 }
 0x407   :  { %v3307_v3 = vadd.f32 %v3306_v13, %v3305_v6  ;;  %v3400_v33 = vmul.f32 %v12203_v49, %v12183_v31  ;;  %v3420_v6 = vmul.f32 %v12209_v4, %v12190_v5  ;;  %6497 = vmatpush.bf16.msrb.mxu2 %v9356_v35  ;;  %v9327_v13 = vld [vmem:[#allocation26 + $0x5b0] sm:$0xf]  ;;  %v12235_v55 = vpop.eup %11233  ;;  %v10251_v5 = vld [vmem:[#allocation26 + $0xce8] sm:$0xf]  ;;  %v11142_v37 = vld [vmem:[#allocation26 + $0xcc8] sm:$0xf0]  ;;  %vm3465_vm3 = vweird.f32 %v12230_v20 }
 0x408   :  { %v9328_v57 = vor.u32 %v10918_v47, %v9327_v13  ;;  %6460 = vmatpush.bf16.msra.mxu3 %v8628_v61  ;;  %v8824_v13 = vor.u32 %v10792_v8, %v8823_v22  ;;  %v10848_v47 = vld [vmem:[#allocation26 + $0x398] sm:$0xf0]  ;;  %v9915_v61 = vld [vmem:[#allocation26 + $0xa48] sm:$0xf]  ;;  %vm3446_vm6 = vweird.f32 %v12235_v55 }
 0x409   :  { %v3308_v26 = vrot.slane %v3307_v3, 1  ;;  %6484 = vmatpush.bf16.msrb.mxu1 %v9132_v32  ;;  %v3401_v21 = vmul.f32 %v12203_v49, %v3400_v33  ;;  %6472 = vmatpush.bf16.msrb.mxu0 %v8880_v48  ;;  %v3421_v17 = vmul.f32 %v12209_v4, %v3420_v6  ;;  %v8852_v32 = vor.u32 %v10799_v14, %v8851_v2  ;;  %v10911_v33 = vld [vmem:[#allocation26 + $0x590] sm:$0xf0]  ;;  %vm12323_vm12 = vmor %vm3445_vm11, %vm3446_vm6 }
 0x40a   :  { %v9300_v35 = vor.u32 %v10911_v33, %v9299_v29  ;;  %v8600_v6 = vor.u32 %v10736_v40, %v8599_v39  ;;  %v12251_v50 = vpop.eup %11235  ;;  %v11121_v29 = vld [vmem:[#allocation26 + $0xc20] sm:$0xf0]  ;;  %v9663_v39 = vld [vmem:[#allocation26 + $0x850] sm:$0xf]  ;;  %vm3406_vm6 = vweird.f32 %v12203_v49  ;;  %vm3497_vm11 = vcmask 1044484  }
 0x40b   :  { %v3309_v18 = vadd.f32 %v3308_v26, %v3307_v3  ;;  %v10855_v26 = vld [vmem:[#allocation26 + $0x3d0] sm:$0xf0]  ;;  %6498 = vmatpush.bf16.msrb.mxu2 %v9328_v57  ;;  %v12240_v34 = vmul.f32 0.5, %v3401_v21  ;;  %v12247_v46 = vmul.f32 0.5, %v3421_v17  ;;  %v9271_v21 = vld [vmem:[#allocation26 + $0x540] sm:$0xf]  ;;  %v12254_v14 = vpop.eup %11237  ;;  %v3450_v22 = vmul.f32 %v12251_v50, %v12224_v15 }
 0x40c   :  { %v9076_v24 = vor.u32 %v10855_v26, %v9075_v11  ;;  %6461 = vmatpush.bf16.msra.mxu3 %v8600_v6  ;;  %v10904_v57 = vld [vmem:[#allocation26 + $0x558] sm:$0xf0]  ;;  %v3413_v26 = vsub.f32 1.5, %v12243_v54  ;;  %v3433_v6 = vsub.f32 1.5, %v12249_v41  ;;  %vm3456_vm13 = vweird.f32 %v12251_v50  ;;  %v10195_v15 = vld [vmem:[#allocation26 + $0xc78] sm:$0xf] }
 0x40d   :  { %v12227_v12 = vmul.f32 %v3309_v18, %v11888_v43  ;;  %6485 = vmatpush.bf16.msrb.mxu1 %v9104_v53  ;;  %v3440_v18 = vmul.f32 %v12235_v55, %v12205_v45  ;;  %6473 = vmatpush.bf16.msrb.mxu0 %v8852_v32  ;;  %v9048_v53 = vor.u32 %v10848_v47, %v9047_v44  ;;  %v3403_v11 = vsub.f32 1.5, %v12240_v34  ;;  %v11002_v44 = vld [vmem:[#allocation26 + $0x868] sm:$0xf0]  ;;  %vm12336_vm0 = vmor %vm3455_vm14, %vm3456_vm13 }
 0x40e   :  { %v9272_v17 = vor.u32 %v10904_v57, %v9271_v21  ;;  %v9916_v32 = vor.u32 %v11065_v25, %v9915_v61  ;;  %v3423_v40 = vsub.f32 1.5, %v12247_v46  ;;  %v11058_v57 = vld [vmem:[#allocation26 + $0xa28] sm:$0xf0]  ;;  %v10111_v46 = vld [vmem:[#allocation26 + $0xbd0] sm:$0xf]  ;;  %vm3466_vm15 = vweird.f32 %v12254_v14  ;;  %vm3407_vm13 = vmor %vm3405_vm1, %vm3406_vm6 }
 0x40f   :  { %v3325_v3 = vsub.f32 %v12194_v58, %v12227_v12  ;;  %6499 = vmatpush.bf16.msrb.mxu2 %v9300_v35  ;;  %v3441_v62 = vmul.f32 %v12235_v55, %v3440_v18  ;;  %v10363_v18 = vld [vmem:[#allocation26 + $0xdc8] sm:$0xf]  ;;  %vm3501_vm14 = vcmask 1045508  }
 0x411   :  { %v3333_v27 = vmul.f32 %v3325_v3, %v3325_v3  ;;  %6486 = vmatpush.bf16.msrb.mxu1 %v9076_v24  ;;  %v11009_v3 = vld [vmem:[#allocation26 + $0x8a0] sm:$0xf0]  ;;  %6474 = vmatpush.bf16.msrb.mxu0 %v8824_v13  ;;  %v10139_v24 = vld [vmem:[#allocation26 + $0xc08] sm:$0xf]  ;;  %v9887_v13 = vld [vmem:[#allocation26 + $0xa10] sm:$0xf] }
 0x412   :  { %v10140_v35 = vor.u32 %v11121_v29, %v10139_v24  ;;  %v12262_v47 = vmul.f32 0.5, %v3441_v62  ;;  %v10995_v24 = vld [vmem:[#allocation26 + $0x830] sm:$0xf0]  ;;  %v9859_v62 = vld [vmem:[#allocation26 + $0x9d8] sm:$0xf]  ;;  %v3451_v29 = vmul.f32 %v12251_v50, %v3450_v22 }
 0x413   :  { %v3376_v38 = vrot.slane %v3333_v27, 4  ;;  %6500 = vmatpush.bf16.msrb.mxu2 %v9272_v17  ;;  %v11170_v17 = vld [vmem:[#allocation26 + $0xda8] sm:$0xf0]  ;;  %v9831_v22 = vld [vmem:[#allocation26 + $0x9a0] sm:$0xf] }
 0x415   :  { %v3377_v48 = vadd.f32 %v3376_v38, %v3333_v27  ;;  %6487 = vmatpush.bf16.msrb.mxu1 %v9048_v53  ;;  %v9692_v27 = vor.u32 %v11009_v3, %v9691_v0  ;;  %v11177_v38 = vld [vmem:[#allocation26 + $0xde0] sm:$0xf0]  ;;  %6519 = vmatpush.bf16.msra.mxu0 %v9916_v32  ;;  %v9664_v53 = vor.u32 %v11002_v44, %v9663_v39  ;;  %v11114_v3 = vld [vmem:[#allocation26 + $0xbe8] sm:$0xf0]  ;;  %v9635_v32 = vld [vmem:[#allocation26 + $0x818] sm:$0xf] }
 0x416   :  { %v10364_v8 = vor.u32 %v11177_v38, %v10363_v18  ;;  %v9888_v0 = vor.u32 %v11058_v57, %v9887_v13  ;;  %v10112_v25 = vor.u32 %v11114_v3, %v10111_v46  ;;  %v9636_v18 = vor.u32 %v10995_v24, %v9635_v32  ;;  %v10083_v38 = vld [vmem:[#allocation26 + $0xb98] sm:$0xf]  ;;  %v11107_v39 = vld [vmem:[#allocation26 + $0xbb0] sm:$0xf0]  ;;  %v9607_v3 = vld [vmem:[#allocation26 + $0x7e0] sm:$0xf] }
 0x417   :  { %v3378_v2 = vrot.slane %v3377_v48, 2  ;;  %6506 = vmatpush.bf16.msrb.mxu3 %v9692_v27  ;;  %v11163_v57 = vld [vmem:[#allocation26 + $0xd70] sm:$0xf0]  ;;  %v11156_v32 = vld [vmem:[#allocation26 + $0xd38] sm:$0xf0]  ;;  %v3452_v24 = vmul.f32 0.5, %v3451_v29 }
 0x418   :  { %6545 = vmatpush.bf16.msra.mxu2 %v10364_v8  ;;  %v11037_v29 = vld [vmem:[#allocation26 + $0x980] sm:$0xf0] }
 0x419   :  { %v3379_v33 = vadd.f32 %v3378_v2, %v3377_v48  ;;  %v3460_v48 = vmul.f32 %v12254_v14, %v12230_v20  ;;  %6532 = vmatpush.bf16.msra.mxu1 %v10140_v35  ;;  %v10335_v2 = vld [vmem:[#allocation26 + $0xd90] sm:$0xf]  ;;  %6520 = vmatpush.bf16.msra.mxu0 %v9888_v0  ;;  %v11051_v35 = vld [vmem:[#allocation26 + $0x9f0] sm:$0xf0]  ;;  %v11044_v0 = vld [vmem:[#allocation26 + $0x9b8] sm:$0xf0] }
 0x41a   :  { %v10336_v27 = vor.u32 %v11170_v17, %v10335_v2  ;;  %v9860_v13 = vor.u32 %v11051_v35, %v9859_v62  ;;  %v10988_v2 = vld [vmem:[#allocation26 + $0x7f8] sm:$0xf0]  ;;  %v10055_v17 = vld [vmem:[#allocation26 + $0xb60] sm:$0xf]  ;;  %v3424_v35 = vmul.f32 %v12209_v4, %v3423_v40  ;;  %v3434_v40 = vmul.f32 %v12211_v16, %v3433_v6 }
 0x41b   :  { %v3380_v21 = vrot.slane %v3379_v33, 1  ;;  %6507 = vmatpush.bf16.msrb.mxu3 %v9664_v53  ;;  %v3461_v8 = vmul.f32 %v12254_v14, %v3460_v48  ;;  %v9608_v48 = vor.u32 %v10988_v2, %v9607_v3  ;;  %v3443_v3 = vsub.f32 1.5, %v12262_v47  ;;  %v11016_v20 = vld [vmem:[#allocation26 + $0x8d8] sm:$0xf0] }
 0x41c   :  { %6546 = vmatpush.bf16.msra.mxu2 %v10336_v27  ;;  %v3453_v2 = vsub.f32 1.5, %v3452_v24  ;;  %v12306_v47 = vmul.f32 %v12207_v52, %v3413_v26  ;;  %v11086_v24 = vld [vmem:[#allocation26 + $0xb08] sm:$0xf0] }
 0x41d   :  { %v3381_v61 = vadd.f32 %v3380_v21, %v3379_v33  ;;  %6533 = vmatpush.bf16.msra.mxu1 %v10112_v25  ;;  %v10084_v33 = vor.u32 %v11107_v39, %v10083_v38  ;;  %v10307_v21 = vld [vmem:[#allocation26 + $0xd58] sm:$0xf]  ;;  %6521 = vmatpush.bf16.msra.mxu0 %v9860_v13  ;;  %v10279_v25 = vld [vmem:[#allocation26 + $0xd20] sm:$0xf]  ;;  %v12272_v62 = vmul.f32 0.5, %v3461_v8 }
 0x41e   :  { %v10308_v46 = vor.u32 %v11163_v57, %v10307_v21  ;;  %v10280_v38 = vor.u32 %v11156_v32, %v10279_v25  ;;  %v10981_v39 = vld [vmem:[#allocation26 + $0x7c0] sm:$0xf0]  ;;  %v10027_v8 = vld [vmem:[#allocation26 + $0xb28] sm:$0xf]  ;;  %v11030_v25 = vld [vmem:[#allocation26 + $0x948] sm:$0xf0] }
 0x41f   :  { %v3389_v44 = vmul.f32 %v3381_v61, %v11888_v43  ;;  %6508 = vmatpush.bf16.msrb.mxu3 %v9636_v18  ;;  %v9832_v43 = vor.u32 %v11044_v0, %v9831_v22  ;;  %v11100_v61 = vld [vmem:[#allocation26 + $0xb78] sm:$0xf0]  ;;  %v9579_v18 = vld [vmem:[#allocation26 + $0x7a8] sm:$0xf]  ;;  %v11093_v13 = vld [vmem:[#allocation26 + $0xb40] sm:$0xf0]  ;;  %v3428_v22 = vsel %vm12291_vm4, %v12209_v4, %v3424_v35 }
 0x420   :  { %v10056_v27 = vor.u32 %v11100_v61, %v10055_v17  ;;  %6547 = vmatpush.bf16.msra.mxu2 %v10308_v46  ;;  %v9580_v7 = vor.u32 %v10981_v39, %v9579_v18  ;;  %v11149_v57 = vld [vmem:[#allocation26 + $0xd00] sm:$0xf0]  ;;  %v3463_v41 = vsub.f32 1.5, %v12272_v62  ;;  %v10028_v6 = vor.u32 %v11093_v13, %v10027_v8  ;;  %v9551_v17 = vld [vmem:[#allocation26 + $0x770] sm:$0xf]  ;;  %vm12351_vm4 = vmor %vm3465_vm3, %vm3466_vm15 }
 0x421   :  { %v12269_v53 = vadd.f32 0.8, %v3389_v44  ;;  %6534 = vmatpush.bf16.msra.mxu1 %v10084_v33  ;;  %v9803_v44 = vld [vmem:[#allocation26 + $0x968] sm:$0xf]  ;;  %6522 = vmatpush.bf16.msra.mxu0 %v9832_v43  ;;  %v10252_v0 = vor.u32 %v11149_v57, %v10251_v5  ;;  %v9775_v43 = vld [vmem:[#allocation26 + $0x930] sm:$0xf]  ;;  %v3454_v39 = vmul.f32 %v12251_v50, %v3453_v2 }
 0x422   :  { %v9804_v21 = vor.u32 %v11037_v29, %v9803_v44  ;;  %v9999_v32 = vld [vmem:[#allocation26 + $0xaf0] sm:$0xf]  ;;  %v9776_v26 = vor.u32 %v11030_v25, %v9775_v43  ;;  %v3488_v35 = vrot.slane %v3428_v22, 6  ;;  %v9523_v8 = vld [vmem:[#allocation26 + $0x738] sm:$0xf]  ;;  %vm3503_vm15 = vcmask 1043456  }
 0x423   :  { %11239 = vrsqrt.f32 %v12269_v53  ;;  %6509 = vmatpush.bf16.msrb.mxu3 %v9608_v48  ;;  %v10974_v48 = vld [vmem:[#allocation26 + $0x788] sm:$0xf0]  ;;  %v10000_v45 = vor.u32 %v11086_v24, %v9999_v32  ;;  %v10967_v13 = vld [vmem:[#allocation26 + $0x750] sm:$0xf0]  ;;  %v9971_v5 = vld [vmem:[#allocation26 + $0xab8] sm:$0xf]  ;;  %v3458_v32 = vsel %vm12336_vm0, %v12251_v50, %v3454_v39  ;;  %vm3475_vm7 = vweird.f32 %v12269_v53 }
 0x424   :  { %6548 = vmatpush.bf16.msra.mxu2 %v10280_v38  ;;  %v9552_v54 = vor.u32 %v10974_v48, %v9551_v17  ;;  %v3438_v38 = vsel %vm12311_vm10, %v12211_v16, %v3434_v40  ;;  %v3444_v16 = vmul.f32 %v12235_v55, %v3443_v3  ;;  %v3464_v40 = vmul.f32 %v12254_v14, %v3463_v41  ;;  %v11079_v57 = vld [vmem:[#allocation26 + $0xad0] sm:$0xf0]  ;;  %v9495_v48 = vld [vmem:[#allocation26 + $0x700] sm:$0xf]  ;;  %v10960_v43 = vld [vmem:[#allocation26 + $0x718] sm:$0xf0] }
 0x425   :  { %6535 = vmatpush.bf16.msra.mxu1 %v10056_v27  ;;  %6523 = vmatpush.bf16.msra.mxu0 %v9804_v21  ;;  %v10223_v27 = vld [vmem:[#allocation26 + $0xcb0] sm:$0xf]  ;;  %v11023_v21 = vld [vmem:[#allocation26 + $0x910] sm:$0xf0]  ;;  %v3489_v46 = vrot.slane %v3438_v38, 5  ;;  %v9524_v3 = vor.u32 %v10967_v13, %v9523_v8  ;;  %v3418_v41 = vsel %vm12281_vm2, %v12207_v52, %v12306_v47  ;;  %v9972_v17 = vor.u32 %v11079_v57, %v9971_v5 }
 0x426   :  { %v10224_v29 = vor.u32 %v11142_v37, %v10223_v27  ;;  %v9719_v25 = vld [vmem:[#allocation26 + $0x8c0] sm:$0xf]  ;;  %v3404_v47 = vmul.f32 %v12203_v49, %v3403_v11  ;;  %v3448_v50 = vsel %vm12323_vm12, %v12235_v55, %v3444_v16  ;;  %v11128_v27 = vld [vmem:[#allocation26 + $0xc58] sm:$0xf0]  ;;  %v9496_v34 = vor.u32 %v10960_v43, %v9495_v48  ;;  %v3390_v8 = vld [vmem:[#allocation23] sm:$0xff] }
 0x427   :  { %6510 = vmatpush.bf16.msrb.mxu3 %v9580_v7  ;;  %v9747_v7 = vld [vmem:[#allocation26 + $0x8f8] sm:$0xf]  ;;  %v9943_v33 = vld [vmem:[#allocation26 + $0xa80] sm:$0xf]  ;;  %v9720_v11 = vor.u32 %v11016_v20, %v9719_v25  ;;  %v3487_v38 = vrot.slane %v3418_v41, 7  ;;  %v3491_v18 = vrot.slane %v3458_v32, 3 }
 0x428   :  { %6549 = vmatpush.bf16.msra.mxu2 %v10252_v0  ;;  %v9748_v22 = vor.u32 %v11023_v21, %v9747_v7  ;;  %v11135_v0 = vld [vmem:[#allocation26 + $0xc90] sm:$0xf0]  ;;  %vm3499_vm12 = vcmask 1046534  }
 0x429   :  { %v12301_v61 = vpop.eup %11239  ;;  %6536 = vmatpush.bf16.msra.mxu1 %v10028_v6  ;;  %6524 = vmatpush.bf16.msra.mxu0 %v9776_v26  ;;  %v10196_v52 = vor.u32 %v11135_v0, %v10195_v15  ;;  %v10167_v26 = vld [vmem:[#allocation26 + $0xc40] sm:$0xf] }
 0x42a   :  { %v3470_v62 = vmul.f32 %v12301_v61, %v12269_v53  ;;  %vm3476_vm2 = vweird.f32 %v12301_v61  ;;  %v10168_v39 = vor.u32 %v11128_v27, %v10167_v26  ;;  %v3490_v53 = vrot.slane %v3448_v50, 4 }
 0x42b   :  { %6511 = vmatpush.bf16.msrb.mxu3 %v9552_v54  ;;  %v11072_v54 = vld [vmem:[#allocation26 + $0xa98] sm:$0xf0]  ;;  %vm3477_vm10 = vmor %vm3475_vm7, %vm3476_vm2 }
 0x42c   :  { %v3471_v44 = vmul.f32 %v12301_v61, %v3470_v62  ;;  %6550 = vmatpush.bf16.msra.mxu2 %v10224_v29  ;;  %v3468_v62 = vsel %vm12351_vm4, %v12254_v14, %v3464_v40  ;;  %v9944_v55 = vor.u32 %v11072_v54, %v9943_v33  ;;  %v3408_v29 = vsel %vm3407_vm13, %v12203_v49, %v3404_v47  ;;  %v3507_v33 = vld [vmem:[#allocation25] sm:$0xff] }
 0x42d   :  { %6537 = vmatpush.bf16.msra.mxu1 %v10000_v45  ;;  %6525 = vmatpush.bf16.msra.mxu0 %v9748_v22  ;;  %v3495_v45 = vsel %vm1227_vm8, %v3488_v35, %v3489_v46  ;;  %v3498_v13 = vsel %vm3497_vm11, %v3490_v53, %v3491_v18  ;;  %v10782_v18 = vld [vmem:[#allocation26 + $0x18c] sm:$0xf] }
 0x42e   :  { %v3472_v6 = vmul.f32 0.5, %v3471_v44  ;;  %v3492_v44 = vrot.slane %v3468_v62, 2  ;;  %v10838_v53 = vld [vmem:[#allocation26 + $0x34c] sm:$0xf] }
 0x42f   :  { %6512 = vmatpush.bf16.msrb.mxu3 %v9524_v3 }
 0x430   :  { %v3473_v4 = vsub.f32 1.5, %v3472_v6  ;;  %6551 = vmatpush.bf16.msra.mxu2 %v10196_v52 }
 0x431   :  { %6538 = vmatpush.bf16.msra.mxu1 %v9972_v17  ;;  %6526 = vmatpush.bf16.msra.mxu0 %v9720_v11 }
 0x432   :  { %v3474_v37 = vmul.f32 %v12301_v61, %v3473_v4 }
 0x433   :  { %6513 = vmatpush.bf16.msrb.mxu3 %v9496_v34 }
 0x434   :  { %v3478_v14 = vsel %vm3477_vm10, %v12301_v61, %v3474_v37  ;;  %v3494_v61 = vsel %vm577_vm5, %v3408_v29, %v3487_v38  ;;  %6552 = vmatpush.bf16.msra.mxu2 %v10168_v39  ;;  %v10894_v29 = vld [vmem:[#allocation26 + $0x50c] sm:$0xf] }
 0x435   :  { %v3493_v35 = vrot.slane %v3478_v14, 1  ;;  %6539 = vmatpush.bf16.msra.mxu1 %v9944_v55  ;;  %v3496_v31 = vsel %vm1229_vm9, %v3494_v61, %v3495_v45  ;;  %v8797_v55 = vld [vmem:[#allocation26 + $0x1a4] sm:$0xf0] }
 0x437   :  { %v3500_v7 = vsel %vm3499_vm12, %v3492_v44, %v3493_v35  ;;  %v9021_v35 = vld [vmem:[#allocation26 + $0x364] sm:$0xf0] }
 0x438   :  { %v3502_v16 = vsel %vm3501_vm14, %v3498_v13, %v3500_v7 }
 0x439   :  { %v3504_v40 = vsel %vm3503_vm15, %v3496_v31, %v3502_v16  ;;  %v9024_v16 = vor.u32 %v10838_v53, %v9021_v35  ;;  %v9161_v53 = vld [vmem:[#allocation26 + $0x47c] sm:$0xf0] }
 0x43a   :  { %v12383_v21 = vmul.f32 %v3504_v40, %v3390_v8  ;;  %v8800_v8 = vor.u32 %v10782_v18, %v8797_v55  ;;  %v9469_v40 = vld [vmem:[#allocation26 + $0x6e4] sm:$0xf0]  ;;  %v8713_v18 = vld [vmem:[#allocation26 + $0xfc] sm:$0xf0]  ;;  %v10873_v55 = vld [vmem:[#allocation26 + $0x464] sm:$0xf] }
 0x43c   :  { %v3509_v49 = vperm.slane %v12383_v21, 0  ;;  %v3510_v5 = vperm.slane %v12383_v21, 1  ;;  %v3511_v57 = vperm.slane %v12383_v21, 2  ;;  %v3512_v46 = vperm.slane %v12383_v21, 3 }
 0x43d   :  { %v3513_v2 = vperm.slane %v12383_v21, 4  ;;  %v3514_v6 = vperm.slane %v12383_v21, 5  ;;  %v3515_v3 = vperm.slane %v12383_v21, 6  ;;  %v3516_v22 = vperm.slane %v12383_v21, 7  ;;  %v10817_v21 = vld [vmem:[#allocation26 + $0x2a4] sm:$0xf] }
 0x43e   :  { %v3526_v15 = vmul.f32 %v3510_v5, %v12144_v42  ;;  %v3527_v0 = vmul.f32 %v3511_v57, %v12152_v51  ;;  %v3528_v41 = vmul.f32 %v3512_v46, %v12155_v60  ;;  %v3525_v51 = vmul.f32 %v3509_v49, %v12140_v56 }
 0x43f   :  { %v3529_v17 = vmul.f32 %v3513_v2, %v12163_v19  ;;  %v3530_v48 = vmul.f32 %v3514_v6, %v12171_v36  ;;  %v3531_v43 = vmul.f32 %v3515_v3, %v12177_v1  ;;  %v3532_v42 = vmul.f32 %v3516_v22, %v12227_v12 }
 0x440   :  { %v3541_v25 = vrot.slane %v3526_v15, 7  ;;  %v3542_v60 = vrot.slane %v3527_v0, 6  ;;  %v3543_v32 = vrot.slane %v3528_v41, 5  ;;  %v3557_v54 = vmul.f32 %v3509_v49, %v12104_v59  ;;  %v10775_v15 = vld [vmem:[#allocation26 + $0x154] sm:$0xf] }
 0x441   :  { %v3544_v24 = vrot.slane %v3529_v17, 4  ;;  %v3545_v4 = vrot.slane %v3530_v48, 3  ;;  %v3546_v19 = vrot.slane %v3531_v43, 2  ;;  %v3547_v52 = vrot.slane %v3532_v42, 1  ;;  %v8769_v0 = vld [vmem:[#allocation26 + $0x16c] sm:$0xf0] }
 0x442   :  { %v3548_v20 = vsel %vm577_vm5, %v3525_v51, %v3541_v25  ;;  %v3549_v36 = vsel %vm1227_vm8, %v3542_v60, %v3543_v32  ;;  %v3558_v27 = vmul.f32 %v3510_v5, %v12107_v10  ;;  %v3559_v34 = vmul.f32 %v3511_v57, %v12114_v23  ;;  %v9245_v10 = vld [vmem:[#allocation26 + $0x524] sm:$0xf0]  ;;  %v10950_v23 = vld [vmem:[#allocation26 + $0x6cc] sm:$0xf]  ;;  %v10831_v43 = vld [vmem:[#allocation26 + $0x314] sm:$0xf] }
 0x443   :  { %v3550_v1 = vsel %vm1229_vm9, %v3548_v20, %v3549_v36  ;;  %v3551_v47 = vsel %vm3497_vm11, %v3544_v24, %v3545_v4  ;;  %v3552_v12 = vsel %vm3499_vm12, %v3546_v19, %v3547_v52  ;;  %v3560_v38 = vmul.f32 %v3512_v46, %v12121_v9  ;;  %v8993_v42 = vld [vmem:[#allocation26 + $0x32c] sm:$0xf0]  ;;  %v10887_v24 = vld [vmem:[#allocation26 + $0x4d4] sm:$0xf] }
 0x444   :  { %v3553_v56 = vsel %vm3501_vm14, %v3551_v47, %v3552_v12  ;;  %v9248_v46 = vor.u32 %v10894_v29, %v9245_v10  ;;  %v9472_v32 = vor.u32 %v10950_v23, %v9469_v40  ;;  %v9217_v4 = vld [vmem:[#allocation26 + $0x4ec] sm:$0xf0]  ;;  %v8772_v20 = vor.u32 %v10775_v15, %v8769_v0  ;;  %v10943_v36 = vld [vmem:[#allocation26 + $0x694] sm:$0xf]  ;;  %v10810_v40 = vld [vmem:[#allocation26 + $0x26c] sm:$0xf] }
 0x445   :  { %v3554_v50 = vsel %vm3503_vm15, %v3550_v1, %v3553_v56  ;;  %v3561_v1 = vmul.f32 %v3513_v2, %v12124_v63  ;;  %v3563_v47 = vmul.f32 %v3515_v3, %v12167_v30  ;;  %v8996_v12 = vor.u32 %v10831_v43, %v8993_v42  ;;  %v10768_v56 = vld [vmem:[#allocation26 + $0x11c] sm:$0xf]  ;;  %v8741_v2 = vld [vmem:[#allocation26 + $0x134] sm:$0xf0]  ;;  %v10866_v0 = vld [vmem:[#allocation26 + $0x42c] sm:$0xf] }
 0x446   :  { %v12416_v62 = vsub.f32 %v3507_v33, %v3554_v50  ;;  %v9441_v33 = vld [vmem:[#allocation26 + $0x6ac] sm:$0xf0]  ;;  %v3562_v50 = vmul.f32 %v3514_v6, %v12135_v28  ;;  %v9220_v63 = vor.u32 %v10887_v24, %v9217_v4  ;;  %v9413_v28 = vld [vmem:[#allocation26 + $0x674] sm:$0xf0]  ;;  %v10761_v6 = vld [vmem:[#allocation26 + $0xe4] sm:$0xf] }
 0x447   :  { %v8716_v23 = vor.u32 %v10761_v6, %v8713_v18  ;;  %v10922_v42 = vld [vmem:[#allocation26 + $0x5ec] sm:$0xf]  ;;  %v10733_v18 = vld [vmem:[#allocation26 + $0x4] sm:$0xf] }
 0x448   :  { %v3566_v26 = vperm.slane %v12416_v62, 0  ;;  %v3567_v37 = vperm.slane %v12416_v62, 1  ;;  %v3568_v11 = vperm.slane %v12416_v62, 2  ;;  %v3569_v45 = vperm.slane %v12416_v62, 3 }
 0x449   :  { %v3570_v51 = vperm.slane %v12416_v62, 4  ;;  %v3572_v25 = vperm.slane %v12416_v62, 6  ;;  %v3571_v19 = vperm.slane %v12416_v62, 5  ;;  %v3573_v52 = vperm.slane %v12416_v62, 7 }
 0x44a   :  { %v3582_v14 = vadd.f32 %v3566_v26, %v3557_v54  ;;  %v3583_v39 = vadd.f32 %v3567_v37, %v3558_v27  ;;  %v3584_v59 = vadd.f32 %v3568_v11, %v3559_v34  ;;  %v3585_v44 = vadd.f32 %v3569_v45, %v3560_v38  ;;  %v10824_v54 = vld [vmem:[#allocation26 + $0x2dc] sm:$0xf]  ;;  %v8965_v26 = vld [vmem:[#allocation26 + $0x2f4] sm:$0xf0] }
 0x44b   :  { %v3564_v62 = vmul.f32 %v3516_v22, %v12194_v58  ;;  %v3586_v30 = vadd.f32 %v3570_v51, %v3561_v1  ;;  %v3588_v3 = vadd.f32 %v3572_v25, %v3563_v47  ;;  %v9444_v27 = vor.u32 %v10943_v36, %v9441_v33  ;;  %v10880_v37 = vld [vmem:[#allocation26 + $0x49c] sm:$0xf]  ;;  %v9189_v34 = vld [vmem:[#allocation26 + $0x4b4] sm:$0xf0]  ;;  %v8937_v22 = vld [vmem:[#allocation26 + $0x2bc] sm:$0xf0] }
 0x44c   :  { %vm3590_vm5 = vcmp.gt.f32.partialorder %v3582_v14, 0.0  ;;  %v3598_v61 = vmul.f32 0.2, %v3582_v14  ;;  %vm3591_vm8 = vcmp.gt.f32.partialorder %v3583_v39, 0.0  ;;  %v3599_v13 = vmul.f32 0.2, %v3583_v39 }
 0x44d   :  { %vm3592_vm9 = vcmp.gt.f32.partialorder %v3584_v59, 0.0  ;;  %v3600_v9 = vmul.f32 0.2, %v3584_v59  ;;  %vm3593_vm0 = vcmp.gt.f32.partialorder %v3585_v44, 0.0  ;;  %v3601_v31 = vmul.f32 0.2, %v3585_v44 }
 0x44e   :  { %v3606_v7 = vsel %vm3590_vm5, %v3582_v14, %v3598_v61  ;;  %v3607_v5 = vsel %vm3591_vm8, %v3583_v39, %v3599_v13  ;;  %v10936_v11 = vld [vmem:[#allocation26 + $0x65c] sm:$0xf]  ;;  %v3587_v38 = vadd.f32 %v3571_v19, %v3562_v50  ;;  %v3589_v45 = vadd.f32 %v3573_v52, %v3564_v62  ;;  %v10754_v13 = vld [vmem:[#allocation26 + $0xac] sm:$0xf]  ;;  %v9357_v51 = vld [vmem:[#allocation26 + $0x604] sm:$0xf0] }
 0x44f   :  { %v12426_v49 = vpack.c.bf16 %v3606_v7, %v3606_v7  ;;  %v3608_v57 = vsel %vm3592_vm9, %v3584_v59, %v3600_v9  ;;  %v12428_v41 = vpack.c.bf16 %v3607_v5, %v3607_v5  ;;  %v3609_v48 = vsel %vm3593_vm0, %v3585_v44, %v3601_v31  ;;  %v10929_v59 = vld [vmem:[#allocation26 + $0x624] sm:$0xf]  ;;  %v8909_v5 = vld [vmem:[#allocation26 + $0x284] sm:$0xf0]  ;;  %v8657_v36 = vld [vmem:[#allocation26 + $0x8c] sm:$0xf0] }
 0x450   :  { %v12430_v17 = vpack.c.bf16 %v3608_v57, %v3608_v57  ;;  %v12435_v60 = vpack.c.bf16 %v3609_v48, %v3609_v48  ;;  %v8744_v58 = vor.u32 %v10768_v56, %v8741_v2  ;;  %v8968_v14 = vor.u32 %v10824_v54, %v8965_v26  ;;  %v9133_v48 = vld [vmem:[#allocation26 + $0x444] sm:$0xf0]  ;;  %v10803_v33 = vld [vmem:[#allocation26 + $0x234] sm:$0xf]  ;;  %v9105_v50 = vld [vmem:[#allocation26 + $0x40c] sm:$0xf0] }
 0x451   :  { %6462 = vmatmul.bf16.vlgmr.msra.gmra.mxu3 %v12426_v49  ;;  %6475 = vmatmul.bf16.vlgmr.msrb.gmra.mxu0 %v12428_v41  ;;  %v9192_v39 = vor.u32 %v10880_v37, %v9189_v34  ;;  %v3602_v44 = vmul.f32 0.2, %v3586_v30  ;;  %v9416_v35 = vor.u32 %v10936_v11, %v9413_v28  ;;  %vm3594_vm1 = vcmp.gt.f32.partialorder %v3586_v30, 0.0  ;;  %v10859_v56 = vld [vmem:[#allocation26 + $0x3f4] sm:$0xf] }
 0x452   :  { %6488 = vmatmul.bf16.vlgmr.msrb.gmra.mxu1 %v12430_v17  ;;  %6501 = vmatmul.bf16.vlgmr.msrb.gmra.mxu2 %v12435_v60  ;;  %v3603_v29 = vmul.f32 0.2, %v3587_v38  ;;  %v3604_v10 = vmul.f32 0.2, %v3588_v3  ;;  %v3605_v61 = vmul.f32 0.2, %v3589_v45  ;;  %v8940_v9 = vor.u32 %v10817_v21, %v8937_v22 }
 0x453   :  { %6558 = vmatpush.bf16.msra.mxu3 %v8800_v8  ;;  %6571 = vmatpush.bf16.msrb.mxu0 %v9024_v16  ;;  %v9385_v8 = vld [vmem:[#allocation26 + $0x63c] sm:$0xf0]  ;;  %vm3595_vm3 = vcmp.gt.f32.partialorder %v3587_v38, 0.0  ;;  %vm3596_vm4 = vcmp.gt.f32.partialorder %v3588_v3, 0.0  ;;  %vm3597_vm2 = vcmp.gt.f32.partialorder %v3589_v45, 0.0  ;;  %v9164_v7 = vor.u32 %v10873_v55, %v9161_v53 }
 0x454   :  { %6584 = vmatpush.bf16.msrb.mxu1 %v9248_v46  ;;  %6597 = vmatpush.bf16.msrb.mxu2 %v9472_v32  ;;  %v3610_v31 = vsel %vm3594_vm1, %v3586_v30, %v3602_v44  ;;  %v8685_v16 = vld [vmem:[#allocation26 + $0xc4] sm:$0xf0]  ;;  %v9388_v57 = vor.u32 %v10929_v59, %v9385_v8  ;;  %v3611_v46 = vsel %vm3595_vm3, %v3587_v38, %v3603_v29  ;;  %v10915_v62 = vld [vmem:[#allocation26 + $0x5b4] sm:$0xf]  ;;  %v10740_v30 = vld [vmem:[#allocation26 + $0x3c] sm:$0xf] }
 0x455   :  { %v3612_v15 = vsel %vm3596_vm4, %v3588_v3, %v3604_v10  ;;  %v3613_v43 = vsel %vm3597_vm2, %v3589_v45, %v3605_v61  ;;  %v12457_v25 = vpack.c.bf16 %v3610_v31, %v3610_v31  ;;  %v8688_v32 = vor.u32 %v10754_v13, %v8685_v16  ;;  %v8629_v3 = vld [vmem:[#allocation26 + $0x54] sm:$0xf0]  ;;  %v10852_v11 = vld [vmem:[#allocation26 + $0x3bc] sm:$0xf]  ;;  %v10789_v55 = vld [vmem:[#allocation26 + $0x1c4] sm:$0xf] }
 0x456   :  { %v8912_v24 = vor.u32 %v10810_v40, %v8909_v5  ;;  %v12459_v4 = vpack.c.bf16 %v3611_v46, %v3611_v46  ;;  %v12461_v19 = vpack.c.bf16 %v3612_v15, %v3612_v15  ;;  %v9136_v52 = vor.u32 %v10866_v0, %v9133_v48  ;;  %v8853_v34 = vld [vmem:[#allocation26 + $0x214] sm:$0xf0]  ;;  %v10908_v45 = vld [vmem:[#allocation26 + $0x57c] sm:$0xf]  ;;  %v9049_v59 = vld [vmem:[#allocation26 + $0x39c] sm:$0xf0] }
 0x457   :  { %6559 = vmatpush.bf16.msra.mxu3 %v8772_v20  ;;  %6572 = vmatpush.bf16.msrb.mxu0 %v8996_v12  ;;  %v10747_v20 = vld [vmem:[#allocation26 + $0x74] sm:$0xf]  ;;  %v12463_v1 = vpack.c.bf16 %v3613_v43, %v3613_v43  ;;  %v9360_v47 = vor.u32 %v10922_v42, %v9357_v51  ;;  %v8881_v12 = vld [vmem:[#allocation26 + $0x24c] sm:$0xf0]  ;;  %v9108_v26 = vor.u32 %v10859_v56, %v9105_v50  ;;  %v9077_v38 = vld [vmem:[#allocation26 + $0x3d4] sm:$0xf0] }
 0x458   :  { %6585 = vmatpush.bf16.msrb.mxu1 %v9220_v63  ;;  %6598 = vmatpush.bf16.msrb.mxu2 %v9444_v27  ;;  %v9329_v63 = vld [vmem:[#allocation26 + $0x5cc] sm:$0xf0]  ;;  %v8660_v2 = vor.u32 %v10747_v20, %v8657_v36  ;;  %v8884_v54 = vor.u32 %v10803_v33, %v8881_v12  ;;  %v10796_v27 = vld [vmem:[#allocation26 + $0x1fc] sm:$0xf]  ;;  %v9301_v28 = vld [vmem:[#allocation26 + $0x594] sm:$0xf0]  ;;  %v8632_v6 = vor.u32 %v10740_v30, %v8629_v3 }
 0x459   :  { %v9332_v37 = vor.u32 %v10915_v62, %v9329_v63  ;;  %v8856_v21 = vor.u32 %v10796_v27, %v8853_v34  ;;  %v9080_v22 = vor.u32 %v10852_v11, %v9077_v38  ;;  %v9304_v53 = vor.u32 %v10908_v45, %v9301_v28  ;;  %v10901_v44 = vld [vmem:[#allocation26 + $0x544] sm:$0xf]  ;;  %v11006_v29 = vld [vmem:[#allocation26 + $0x88c] sm:$0xf]  ;;  %v9693_v10 = vld [vmem:[#allocation26 + $0x8a4] sm:$0xf0] }
 0x45a   :  { %v11062_v61 = vld [vmem:[#allocation26 + $0xa4c] sm:$0xf]  ;;  %v10365_v40 = vld [vmem:[#allocation26 + $0xde4] sm:$0xf0]  ;;  %v10999_v0 = vld [vmem:[#allocation26 + $0x854] sm:$0xf] }
 0x45b   :  { %6560 = vmatpush.bf16.msra.mxu3 %v8744_v58  ;;  %6573 = vmatpush.bf16.msrb.mxu0 %v8968_v14  ;;  %v8601_v58 = vld [vmem:[#allocation26 + $0x1c] sm:$0xf0]  ;;  %v11118_v13 = vld [vmem:[#allocation26 + $0xc0c] sm:$0xf]  ;;  %v9665_v48 = vld [vmem:[#allocation26 + $0x86c] sm:$0xf0] }
 0x45c   :  { %6586 = vmatpush.bf16.msrb.mxu1 %v9192_v39  ;;  %6599 = vmatpush.bf16.msrb.mxu2 %v9416_v35  ;;  %v8825_v14 = vld [vmem:[#allocation26 + $0x1dc] sm:$0xf0]  ;;  %v10845_v39 = vld [vmem:[#allocation26 + $0x384] sm:$0xf]  ;;  %v8604_v8 = vor.u32 %v10733_v18, %v8601_v58  ;;  %v11174_v16 = vld [vmem:[#allocation26 + $0xdcc] sm:$0xf]  ;;  %v9668_v36 = vor.u32 %v10999_v0, %v9665_v48 }
 0x45d   :  { %v9273_v35 = vld [vmem:[#allocation26 + $0x55c] sm:$0xf0]  ;;  %v9052_v31 = vor.u32 %v10845_v39, %v9049_v59  ;;  %v11055_v43 = vld [vmem:[#allocation26 + $0xa14] sm:$0xf]  ;;  %v10368_v42 = vor.u32 %v11174_v16, %v10365_v40  ;;  %v9889_v51 = vld [vmem:[#allocation26 + $0xa2c] sm:$0xf0] }
 0x45e   :  { %v9276_v5 = vor.u32 %v10901_v44, %v9273_v35  ;;  %v10337_v20 = vld [vmem:[#allocation26 + $0xdac] sm:$0xf0]  ;;  %v9892_v33 = vor.u32 %v11055_v43, %v9889_v51  ;;  %v10992_v12 = vld [vmem:[#allocation26 + $0x81c] sm:$0xf]  ;;  %v9637_v56 = vld [vmem:[#allocation26 + $0x834] sm:$0xf0] }
 0x45f   :  { %6561 = vmatpush.bf16.msra.mxu3 %v8716_v23  ;;  %6574 = vmatpush.bf16.msrb.mxu0 %v8940_v9  ;;  %v9917_v23 = vld [vmem:[#allocation26 + $0xa64] sm:$0xf0]  ;;  %v11048_v50 = vld [vmem:[#allocation26 + $0x9dc] sm:$0xf]  ;;  %v9861_v63 = vld [vmem:[#allocation26 + $0x9f4] sm:$0xf0]  ;;  %v9640_v3 = vor.u32 %v10992_v12, %v9637_v56 }
 0x460   :  { %6587 = vmatpush.bf16.msrb.mxu1 %v9164_v7  ;;  %6600 = vmatpush.bf16.msrb.mxu2 %v9388_v57  ;;  %v10141_v9 = vld [vmem:[#allocation26 + $0xc24] sm:$0xf0]  ;;  %v8828_v7 = vor.u32 %v10789_v55, %v8825_v14  ;;  %v9696_v57 = vor.u32 %v11006_v29, %v9693_v10  ;;  %v9920_v46 = vor.u32 %v11062_v61, %v9917_v23  ;;  %v10309_v30 = vld [vmem:[#allocation26 + $0xd74] sm:$0xf0]  ;;  %v10985_v34 = vld [vmem:[#allocation26 + $0x7e4] sm:$0xf] }
 0x461   :  { %6514 = vmatmul.bf16.vlgmr.msrb.gmra.mxu3 %v12457_v25  ;;  %6527 = vmatmul.bf16.vlgmr.msra.gmra.mxu0 %v12459_v4  ;;  %v10144_v15 = vor.u32 %v11118_v13, %v10141_v9  ;;  %v9864_v27 = vor.u32 %v11048_v50, %v9861_v63  ;;  %v9609_v11 = vld [vmem:[#allocation26 + $0x7fc] sm:$0xf0]  ;;  %v11041_v38 = vld [vmem:[#allocation26 + $0x9a4] sm:$0xf]  ;;  %v10978_v39 = vld [vmem:[#allocation26 + $0x7ac] sm:$0xf] }
 0x462   :  { %6540 = vmatmul.bf16.vlgmr.msra.gmra.mxu1 %v12461_v19  ;;  %6553 = vmatmul.bf16.vlgmr.msra.gmra.mxu2 %v12463_v1  ;;  %v9833_v28 = vld [vmem:[#allocation26 + $0x9bc] sm:$0xf0]  ;;  %v11153_v58 = vld [vmem:[#allocation26 + $0xd24] sm:$0xf]  ;;  %v11034_v59 = vld [vmem:[#allocation26 + $0x96c] sm:$0xf] }
 0x463   :  { %6562 = vmatpush.bf16.msra.mxu3 %v8688_v32  ;;  %6575 = vmatpush.bf16.msrb.mxu0 %v8912_v24  ;;  %v11111_v32 = vld [vmem:[#allocation26 + $0xbd4] sm:$0xf]  ;;  %v10113_v24 = vld [vmem:[#allocation26 + $0xbec] sm:$0xf0]  ;;  %v10057_v18 = vld [vmem:[#allocation26 + $0xb7c] sm:$0xf0]  ;;  %v9836_v55 = vor.u32 %v11041_v38, %v9833_v28 }
 0x464   :  { %6588 = vmatpush.bf16.msrb.mxu1 %v9136_v52  ;;  %6601 = vmatpush.bf16.msrb.mxu2 %v9360_v47  ;;  %v11167_v52 = vld [vmem:[#allocation26 + $0xd94] sm:$0xf]  ;;  %v10116_v47 = vor.u32 %v11111_v32, %v10113_v24  ;;  %v9805_v35 = vld [vmem:[#allocation26 + $0x984] sm:$0xf0]  ;;  %v11090_v29 = vld [vmem:[#allocation26 + $0xb2c] sm:$0xf] }
 0x465   :  { %v10340_v62 = vor.u32 %v11167_v52, %v10337_v20  ;;  %v10029_v10 = vld [vmem:[#allocation26 + $0xb44] sm:$0xf0]  ;;  %v11146_v61 = vld [vmem:[#allocation26 + $0xcec] sm:$0xf]  ;;  %v9808_v13 = vor.u32 %v11034_v59, %v9805_v35  ;;  %v11027_v16 = vld [vmem:[#allocation26 + $0x934] sm:$0xf] }
 0x466   :  { %v10032_v9 = vor.u32 %v11090_v29, %v10029_v10  ;;  %v10225_v0 = vld [vmem:[#allocation26 + $0xccc] sm:$0xf0]  ;;  %v10964_v51 = vld [vmem:[#allocation26 + $0x73c] sm:$0xf]  ;;  %v9525_v32 = vld [vmem:[#allocation26 + $0x754] sm:$0xf0] }
 0x467   :  { %6563 = vmatpush.bf16.msra.mxu3 %v8660_v2  ;;  %6576 = vmatpush.bf16.msrb.mxu0 %v8884_v54  ;;  %v11104_v2 = vld [vmem:[#allocation26 + $0xb9c] sm:$0xf]  ;;  %v10085_v54 = vld [vmem:[#allocation26 + $0xbb4] sm:$0xf0]  ;;  %v9528_v56 = vor.u32 %v10964_v51, %v9525_v32  ;;  %v10957_v50 = vld [vmem:[#allocation26 + $0x704] sm:$0xf] }
 0x468   :  { %6589 = vmatpush.bf16.msrb.mxu1 %v9108_v26  ;;  %6602 = vmatpush.bf16.msrb.mxu2 %v9332_v37  ;;  %v11160_v26 = vld [vmem:[#allocation26 + $0xd5c] sm:$0xf]  ;;  %v10088_v37 = vor.u32 %v11104_v2, %v10085_v54  ;;  %v9749_v20 = vld [vmem:[#allocation26 + $0x914] sm:$0xf0]  ;;  %v11013_v54 = vld [vmem:[#allocation26 + $0x8c4] sm:$0xf] }
 0x469   :  { %v10312_v45 = vor.u32 %v11160_v26, %v10309_v30  ;;  %v11020_v24 = vld [vmem:[#allocation26 + $0x8fc] sm:$0xf]  ;;  %v10197_v12 = vld [vmem:[#allocation26 + $0xc94] sm:$0xf0]  ;;  %v9721_v26 = vld [vmem:[#allocation26 + $0x8dc] sm:$0xf0] }
 0x46a   :  { %v9752_v63 = vor.u32 %v11020_v24, %v9749_v20  ;;  %v11069_v30 = vld [vmem:[#allocation26 + $0xa84] sm:$0xf]  ;;  %v10786_v38 = vld [vmem:[#allocation26 + $0x1a8] sm:$0xf0]  ;;  %v8775_v35 = vld [vmem:[#allocation26 + $0x158] sm:$0xf] }
 0x46b   :  { %6564 = vmatpush.bf16.msra.mxu3 %v8632_v6  ;;  %6577 = vmatpush.bf16.msrb.mxu0 %v8856_v21  ;;  %v11097_v6 = vld [vmem:[#allocation26 + $0xb64] sm:$0xf]  ;;  %v10281_v21 = vld [vmem:[#allocation26 + $0xd3c] sm:$0xf0]  ;;  %v10779_v29 = vld [vmem:[#allocation26 + $0x170] sm:$0xf0] }
 0x46c   :  { %6590 = vmatpush.bf16.msrb.mxu1 %v9080_v22  ;;  %6603 = vmatpush.bf16.msrb.mxu2 %v9304_v53  ;;  %v9612_v22 = vor.u32 %v10985_v34, %v9609_v11  ;;  %v10060_v14 = vor.u32 %v11097_v6, %v10057_v18  ;;  %v9581_v53 = vld [vmem:[#allocation26 + $0x7c4] sm:$0xf0]  ;;  %v10284_v44 = vor.u32 %v11153_v58, %v10281_v21  ;;  %v10169_v34 = vld [vmem:[#allocation26 + $0xc5c] sm:$0xf0]  ;;  %v8803_v11 = vld [vmem:[#allocation26 + $0x190] sm:$0xf] }
 0x46d   :  { %v9584_v23 = vor.u32 %v10978_v39, %v9581_v53  ;;  %v10842_v6 = vld [vmem:[#allocation26 + $0x368] sm:$0xf0]  ;;  %v9251_v18 = vld [vmem:[#allocation26 + $0x510] sm:$0xf]  ;;  %v9724_v21 = vor.u32 %v11013_v54, %v9721_v26  ;;  %v8804_v53 = vor.u32 %v10786_v38, %v8803_v11  ;;  %v8999_v10 = vld [vmem:[#allocation26 + $0x318] sm:$0xf] }
 0x46e   :  { %v10898_v58 = vld [vmem:[#allocation26 + $0x528] sm:$0xf0]  ;;  %v10940_v51 = vld [vmem:[#allocation26 + $0x678] sm:$0xf0]  ;;  %v8719_v20 = vld [vmem:[#allocation26 + $0xe8] sm:$0xf] }
 0x46f   :  { %6565 = vmatpush.bf16.msra.mxu3 %v8604_v8  ;;  %6578 = vmatpush.bf16.msrb.mxu0 %v8828_v7  ;;  %v10253_v8 = vld [vmem:[#allocation26 + $0xd04] sm:$0xf0]  ;;  %v10971_v7 = vld [vmem:[#allocation26 + $0x774] sm:$0xf]  ;;  %v9139_v11 = vld [vmem:[#allocation26 + $0x430] sm:$0xf] }
 0x470   :  { %6591 = vmatpush.bf16.msrb.mxu1 %v9052_v31  ;;  %6604 = vmatpush.bf16.msrb.mxu2 %v9276_v5  ;;  %v9553_v31 = vld [vmem:[#allocation26 + $0x78c] sm:$0xf0]  ;;  %v10256_v40 = vor.u32 %v11146_v61, %v10253_v8  ;;  %v10835_v8 = vld [vmem:[#allocation26 + $0x330] sm:$0xf0]  ;;  %v10870_v38 = vld [vmem:[#allocation26 + $0x448] sm:$0xf0] }
 0x471   :  { %v9777_v5 = vld [vmem:[#allocation26 + $0x94c] sm:$0xf0]  ;;  %v9556_v48 = vor.u32 %v10971_v7, %v9553_v31  ;;  %v10947_v7 = vld [vmem:[#allocation26 + $0x6b0] sm:$0xf0]  ;;  %v8776_v31 = vor.u32 %v10779_v29, %v8775_v35 }
 0x472   :  { %6566 = vmatmul.bf16.vlgmr.msra.gmra.mxu3 %v12426_v49  ;;  %6579 = vmatmul.bf16.vlgmr.msrb.gmra.mxu0 %v12428_v41  ;;  %v9780_v43 = vor.u32 %v11027_v16, %v9777_v5  ;;  %v9000_v16 = vor.u32 %v10835_v8, %v8999_v10  ;;  %v8747_v5 = vld [vmem:[#allocation26 + $0x120] sm:$0xf]  ;;  %v10919_v35 = vld [vmem:[#allocation26 + $0x5d0] sm:$0xf0] }
 0x473   :  { %6610 = vmatpush.bf16.msrb.mxu3 %v9696_v57  ;;  %6623 = vmatpush.bf16.msra.mxu0 %v9920_v46  ;;  %v11083_v57 = vld [vmem:[#allocation26 + $0xaf4] sm:$0xf]  ;;  %v10001_v46 = vld [vmem:[#allocation26 + $0xb0c] sm:$0xf0]  ;;  %v8635_v8 = vld [vmem:[#allocation26 + $0x40] sm:$0xf] }
 0x474   :  { %6636 = vmatpush.bf16.msra.mxu1 %v10144_v15  ;;  %6649 = vmatpush.bf16.msra.mxu2 %v10368_v42  ;;  %v11139_v15 = vld [vmem:[#allocation26 + $0xcb4] sm:$0xf]  ;;  %v10004_v42 = vor.u32 %v11083_v57, %v10001_v46  ;;  %v10772_v57 = vld [vmem:[#allocation26 + $0x138] sm:$0xf0]  ;;  %v8971_v46 = vld [vmem:[#allocation26 + $0x2e0] sm:$0xf] }
 0x475   :  { %6592 = vmatmul.bf16.vlgmr.msrb.gmra.mxu1 %v12430_v17  ;;  %6605 = vmatmul.bf16.vlgmr.msrb.gmra.mxu2 %v12435_v60  ;;  %v10228_v52 = vor.u32 %v11139_v15, %v10225_v0  ;;  %v10828_v0 = vld [vmem:[#allocation26 + $0x2f8] sm:$0xf0]  ;;  %v8748_v32 = vor.u32 %v10772_v57, %v8747_v5 }
 0x476   :  { %v8972_v24 = vor.u32 %v10828_v0, %v8971_v46  ;;  %v10912_v5 = vld [vmem:[#allocation26 + $0x598] sm:$0xf0]  ;;  %v8607_v46 = vld [vmem:[#allocation26 + $0x8] sm:$0xf] }
 0x477   :  { %6611 = vmatpush.bf16.msrb.mxu3 %v9668_v36  ;;  %6624 = vmatpush.bf16.msra.mxu0 %v9892_v33  ;;  %v11076_v36 = vld [vmem:[#allocation26 + $0xabc] sm:$0xf]  ;;  %v9973_v33 = vld [vmem:[#allocation26 + $0xad4] sm:$0xf0] }
 0x478   :  { %6637 = vmatpush.bf16.msra.mxu1 %v10116_v47  ;;  %6650 = vmatpush.bf16.msra.mxu2 %v10340_v62  ;;  %v11132_v47 = vld [vmem:[#allocation26 + $0xc7c] sm:$0xf]  ;;  %v9497_v62 = vld [vmem:[#allocation26 + $0x71c] sm:$0xf0]  ;;  %v9976_v2 = vor.u32 %v11076_v36, %v9973_v33  ;;  %v10765_v36 = vld [vmem:[#allocation26 + $0x100] sm:$0xf0] }
 0x479   :  { %v9500_v28 = vor.u32 %v10957_v50, %v9497_v62  ;;  %v8943_v33 = vld [vmem:[#allocation26 + $0x2a8] sm:$0xf]  ;;  %v10877_v50 = vld [vmem:[#allocation26 + $0x480] sm:$0xf0] }
 0x47a   :  { %v9391_v62 = vld [vmem:[#allocation26 + $0x628] sm:$0xf] }
 0x47b   :  { %6612 = vmatpush.bf16.msrb.mxu3 %v9640_v3  ;;  %6625 = vmatpush.bf16.msra.mxu0 %v9864_v27  ;;  %v10200_v3 = vor.u32 %v11132_v47, %v10197_v12  ;;  %v9945_v27 = vld [vmem:[#allocation26 + $0xa9c] sm:$0xf0]  ;;  %v10821_v12 = vld [vmem:[#allocation26 + $0x2c0] sm:$0xf0] }
 0x47c   :  { %6638 = vmatpush.bf16.msra.mxu1 %v10088_v37  ;;  %6651 = vmatpush.bf16.msra.mxu2 %v10312_v45  ;;  %v11125_v37 = vld [vmem:[#allocation26 + $0xc44] sm:$0xf]  ;;  %v9027_v45 = vld [vmem:[#allocation26 + $0x350] sm:$0xf]  ;;  %v8944_v54 = vor.u32 %v10821_v12, %v8943_v33  ;;  %v11010_v33 = vld [vmem:[#allocation26 + $0x8a8] sm:$0xf0] }
 0x47d   :  { %v10172_v39 = vor.u32 %v11125_v37, %v10169_v34  ;;  %v9028_v59 = vor.u32 %v10842_v6, %v9027_v45  ;;  %v10814_v34 = vld [vmem:[#allocation26 + $0x288] sm:$0xf0]  ;;  %v9363_v45 = vld [vmem:[#allocation26 + $0x5f0] sm:$0xf] }
 0x47f   :  { %6613 = vmatpush.bf16.msrb.mxu3 %v9612_v22  ;;  %6626 = vmatpush.bf16.msra.mxu0 %v9836_v55  ;;  %v9948_v22 = vor.u32 %v11069_v30, %v9945_v27  ;;  %v9475_v55 = vld [vmem:[#allocation26 + $0x6d0] sm:$0xf] }
 0x480   :  { %6639 = vmatpush.bf16.msra.mxu1 %v10060_v14  ;;  %6652 = vmatpush.bf16.msra.mxu2 %v10284_v44  ;;  %v10954_v14 = vld [vmem:[#allocation26 + $0x6e8] sm:$0xf0]  ;;  %v9252_v44 = vor.u32 %v10898_v58, %v9251_v18  ;;  %v8691_v30 = vld [vmem:[#allocation26 + $0xb0] sm:$0xf]  ;;  %v9140_v58 = vor.u32 %v10870_v38, %v9139_v11  ;;  %v11003_v11 = vld [vmem:[#allocation26 + $0x870] sm:$0xf0] }
 0x481   :  { %v9476_v61 = vor.u32 %v10954_v14, %v9475_v55  ;;  %v8915_v27 = vld [vmem:[#allocation26 + $0x270] sm:$0xf]  ;;  %v8887_v55 = vld [vmem:[#allocation26 + $0x238] sm:$0xf] }
 0x482   :  { %v8916_v18 = vor.u32 %v10814_v34, %v8915_v27  ;;  %v9671_v34 = vld [vmem:[#allocation26 + $0x858] sm:$0xf] }
 0x483   :  { %6614 = vmatpush.bf16.msrb.mxu3 %v9584_v23  ;;  %6627 = vmatpush.bf16.msra.mxu0 %v9808_v13  ;;  %v9223_v23 = vld [vmem:[#allocation26 + $0x4d8] sm:$0xf]  ;;  %v10891_v13 = vld [vmem:[#allocation26 + $0x4f0] sm:$0xf0] }
 0x484   :  { %6640 = vmatpush.bf16.msra.mxu1 %v10032_v9  ;;  %6653 = vmatpush.bf16.msra.mxu2 %v10256_v40  ;;  %v9447_v9 = vld [vmem:[#allocation26 + $0x698] sm:$0xf]  ;;  %v9224_v40 = vor.u32 %v10891_v13, %v9223_v23  ;;  %v10744_v23 = vld [vmem:[#allocation26 + $0x58] sm:$0xf0]  ;;  %v8859_v13 = vld [vmem:[#allocation26 + $0x200] sm:$0xf] }
 0x485   :  { %v9448_v15 = vor.u32 %v10947_v7, %v9447_v9  ;;  %v10800_v7 = vld [vmem:[#allocation26 + $0x218] sm:$0xf0]  ;;  %v8636_v57 = vor.u32 %v10744_v23, %v8635_v8  ;;  %v9895_v38 = vld [vmem:[#allocation26 + $0xa18] sm:$0xf] }
 0x486   :  { %v8860_v0 = vor.u32 %v10800_v7, %v8859_v13  ;;  %v11164_v8 = vld [vmem:[#allocation26 + $0xd78] sm:$0xf0]  ;;  %v9615_v7 = vld [vmem:[#allocation26 + $0x7e8] sm:$0xf] }
 0x487   :  { %6615 = vmatpush.bf16.msrb.mxu3 %v9556_v48  ;;  %6628 = vmatpush.bf16.msra.mxu0 %v9780_v43  ;;  %v9195_v48 = vld [vmem:[#allocation26 + $0x4a0] sm:$0xf]  ;;  %v10884_v43 = vld [vmem:[#allocation26 + $0x4b8] sm:$0xf0] }
 0x488   :  { %6641 = vmatpush.bf16.msra.mxu1 %v10004_v42  ;;  %6654 = vmatpush.bf16.msra.mxu2 %v10228_v52  ;;  %v9419_v42 = vld [vmem:[#allocation26 + $0x660] sm:$0xf]  ;;  %v9196_v52 = vor.u32 %v10884_v43, %v9195_v48  ;;  %v8831_v43 = vld [vmem:[#allocation26 + $0x1c8] sm:$0xf] }
 0x489   :  { %v9420_v47 = vor.u32 %v10940_v51, %v9419_v42  ;;  %v10793_v42 = vld [vmem:[#allocation26 + $0x1e0] sm:$0xf0]  ;;  %v9055_v51 = vld [vmem:[#allocation26 + $0x388] sm:$0xf] }
 0x48b   :  { %6616 = vmatpush.bf16.msrb.mxu3 %v9528_v56  ;;  %6629 = vmatpush.bf16.msra.mxu0 %v9752_v63  ;;  %v9167_v56 = vld [vmem:[#allocation26 + $0x468] sm:$0xf]  ;;  %v10933_v63 = vld [vmem:[#allocation26 + $0x640] sm:$0xf0] }
 0x48c   :  { %6642 = vmatpush.bf16.msra.mxu1 %v9976_v2  ;;  %6655 = vmatpush.bf16.msra.mxu2 %v10200_v3  ;;  %v8720_v2 = vor.u32 %v10765_v36, %v8719_v20  ;;  %v9168_v26 = vor.u32 %v10877_v50, %v9167_v56  ;;  %v10758_v3 = vld [vmem:[#allocation26 + $0xc8] sm:$0xf0]  ;;  %v9392_v37 = vor.u32 %v10933_v63, %v9391_v62  ;;  %v10905_v20 = vld [vmem:[#allocation26 + $0x560] sm:$0xf0]  ;;  %v9699_v36 = vld [vmem:[#allocation26 + $0x890] sm:$0xf] }
 0x48d   :  { %v8692_v6 = vor.u32 %v10758_v3, %v8691_v30  ;;  %v11066_v56 = vld [vmem:[#allocation26 + $0xa68] sm:$0xf0]  ;;  %v10147_v50 = vld [vmem:[#allocation26 + $0xc10] sm:$0xf]  ;;  %v8832_v63 = vor.u32 %v10793_v42, %v8831_v43  ;;  %v9700_v3 = vor.u32 %v11010_v33, %v9699_v36 }
 0x48e   :  { %v11122_v62 = vld [vmem:[#allocation26 + $0xc28] sm:$0xf0]  ;;  %v10035_v36 = vld [vmem:[#allocation26 + $0xb30] sm:$0xf] }
 0x48f   :  { %6617 = vmatpush.bf16.msrb.mxu3 %v9500_v28  ;;  %6630 = vmatpush.bf16.msra.mxu0 %v9724_v21  ;;  %v10926_v28 = vld [vmem:[#allocation26 + $0x608] sm:$0xf0]  ;;  %v8663_v21 = vld [vmem:[#allocation26 + $0x78] sm:$0xf] }
 0x490   :  { %6643 = vmatpush.bf16.msra.mxu1 %v9948_v22  ;;  %6656 = vmatpush.bf16.msra.mxu2 %v10172_v39  ;;  %v10751_v22 = vld [vmem:[#allocation26 + $0x90] sm:$0xf0]  ;;  %v9364_v14 = vor.u32 %v10926_v28, %v9363_v45  ;;  %v11094_v33 = vld [vmem:[#allocation26 + $0xb48] sm:$0xf0] }
 0x491   :  { %v10807_v39 = vld [vmem:[#allocation26 + $0x250] sm:$0xf0]  ;;  %v8664_v29 = vor.u32 %v10751_v22, %v8663_v21  ;;  %v9672_v22 = vor.u32 %v11003_v11, %v9671_v34 }
 0x492   :  { %6618 = vmatmul.bf16.vlgmr.msrb.gmra.mxu3 %v12457_v25  ;;  %6631 = vmatmul.bf16.vlgmr.msra.gmra.mxu0 %v12459_v4  ;;  %v8888_v10 = vor.u32 %v10807_v39, %v8887_v55  ;;  %v11059_v28 = vld [vmem:[#allocation26 + $0xa30] sm:$0xf0]  ;;  %v9643_v39 = vld [vmem:[#allocation26 + $0x820] sm:$0xf] }
 0x493   :  { %6662 = vmatpush.bf16.msra.mxu3 %v8804_v53  ;;  %6675 = vmatpush.bf16.msrb.mxu0 %v9028_v59  ;;  %v9111_v53 = vld [vmem:[#allocation26 + $0x3f8] sm:$0xf]  ;;  %v10863_v59 = vld [vmem:[#allocation26 + $0x410] sm:$0xf0]  ;;  %v9896_v55 = vor.u32 %v11059_v28, %v9895_v38  ;;  %v9531_v28 = vld [vmem:[#allocation26 + $0x740] sm:$0xf] }
 0x494   :  { %6688 = vmatpush.bf16.msrb.mxu1 %v9252_v44  ;;  %6701 = vmatpush.bf16.msrb.mxu2 %v9476_v61  ;;  %v9335_v44 = vld [vmem:[#allocation26 + $0x5b8] sm:$0xf]  ;;  %v9112_v61 = vor.u32 %v10863_v59, %v9111_v53  ;;  %v11171_v21 = vld [vmem:[#allocation26 + $0xdb0] sm:$0xf0]  ;;  %v10996_v53 = vld [vmem:[#allocation26 + $0x838] sm:$0xf0] }
 0x495   :  { %6644 = vmatmul.bf16.vlgmr.msra.gmra.mxu1 %v12461_v19  ;;  %6657 = vmatmul.bf16.vlgmr.msra.gmra.mxu2 %v12463_v1  ;;  %v9336_v9 = vor.u32 %v10919_v35, %v9335_v44  ;;  %v9867_v59 = vld [vmem:[#allocation26 + $0x9e0] sm:$0xf]  ;;  %v11052_v35 = vld [vmem:[#allocation26 + $0x9f8] sm:$0xf0]  ;;  %v9644_v23 = vor.u32 %v10996_v53, %v9643_v39  ;;  %v11143_v34 = vld [vmem:[#allocation26 + $0xcd0] sm:$0xf0] }
 0x496   :  { %v9868_v13 = vor.u32 %v11052_v35, %v9867_v59  ;;  %v11136_v39 = vld [vmem:[#allocation26 + $0xc98] sm:$0xf0]  ;;  %v9503_v59 = vld [vmem:[#allocation26 + $0x708] sm:$0xf] }
 0x497   :  { %6663 = vmatpush.bf16.msra.mxu3 %v8776_v31  ;;  %6676 = vmatpush.bf16.msrb.mxu0 %v9000_v16  ;;  %v9083_v31 = vld [vmem:[#allocation26 + $0x3c0] sm:$0xf]  ;;  %v10856_v16 = vld [vmem:[#allocation26 + $0x3d8] sm:$0xf0] }
 0x498   :  { %6689 = vmatpush.bf16.msrb.mxu1 %v9224_v40  ;;  %6702 = vmatpush.bf16.msrb.mxu2 %v9448_v15  ;;  %v9307_v40 = vld [vmem:[#allocation26 + $0x580] sm:$0xf]  ;;  %v10737_v15 = vld [vmem:[#allocation26 + $0x20] sm:$0xf0]  ;;  %v9084_v48 = vor.u32 %v10856_v16, %v9083_v31  ;;  %v9839_v16 = vld [vmem:[#allocation26 + $0x9a8] sm:$0xf] }
 0x499   :  { %v8608_v12 = vor.u32 %v10737_v15, %v8607_v46  ;;  %v10989_v31 = vld [vmem:[#allocation26 + $0x800] sm:$0xf0]  ;;  %v10287_v15 = vld [vmem:[#allocation26 + $0xd28] sm:$0xf] }
 0x49a   :  { %v11101_v46 = vld [vmem:[#allocation26 + $0xb80] sm:$0xf0] }
 0x49b   :  { %6664 = vmatpush.bf16.msra.mxu3 %v8748_v32  ;;  %6677 = vmatpush.bf16.msrb.mxu0 %v8972_v24  ;;  %v9308_v32 = vor.u32 %v10912_v5, %v9307_v40  ;;  %v10849_v24 = vld [vmem:[#allocation26 + $0x3a0] sm:$0xf0] }
 0x49c   :  { %6690 = vmatpush.bf16.msrb.mxu1 %v9196_v52  ;;  %6703 = vmatpush.bf16.msrb.mxu2 %v9420_v47  ;;  %v9279_v52 = vld [vmem:[#allocation26 + $0x548] sm:$0xf]  ;;  %v9923_v47 = vld [vmem:[#allocation26 + $0xa50] sm:$0xf]  ;;  %v11045_v5 = vld [vmem:[#allocation26 + $0x9c0] sm:$0xf0] }
 0x49d   :  { %v9280_v30 = vor.u32 %v10905_v20, %v9279_v52  ;;  %v9924_v27 = vor.u32 %v11066_v56, %v9923_v47  ;;  %v9840_v43 = vor.u32 %v11045_v5, %v9839_v16  ;;  %v11038_v20 = vld [vmem:[#allocation26 + $0x988] sm:$0xf0]  ;;  %v10259_v47 = vld [vmem:[#allocation26 + $0xcf0] sm:$0xf] }
 0x49e   :  { %v8805_v16 = vld [vmem:[#allocation26 + $0x1ac] sm:$0xf0] }
 0x49f   :  { %6665 = vmatpush.bf16.msra.mxu3 %v8720_v2  ;;  %6678 = vmatpush.bf16.msrb.mxu0 %v8944_v54  ;;  %v9056_v2 = vor.u32 %v10849_v24, %v9055_v51  ;;  %v10371_v54 = vld [vmem:[#allocation26 + $0xdd0] sm:$0xf] }
 0x4a0   :  { %6691 = vmatpush.bf16.msrb.mxu1 %v9168_v26  ;;  %6704 = vmatpush.bf16.msrb.mxu2 %v9392_v37  ;;  %v11178_v26 = vld [vmem:[#allocation26 + $0xde8] sm:$0xf0]  ;;  %v10148_v37 = vor.u32 %v11122_v62, %v10147_v50  ;;  %v9587_v51 = vld [vmem:[#allocation26 + $0x7b0] sm:$0xf]  ;;  %v10036_v62 = vor.u32 %v11094_v33, %v10035_v36  ;;  %v8777_v36 = vld [vmem:[#allocation26 + $0x174] sm:$0xf0] }
 0x4a1   :  { %v10372_v45 = vor.u32 %v11178_v26, %v10371_v54  ;;  %v9811_v24 = vld [vmem:[#allocation26 + $0x970] sm:$0xf]  ;;  %v9783_v54 = vld [vmem:[#allocation26 + $0x938] sm:$0xf]  ;;  %v10832_v33 = vld [vmem:[#allocation26 + $0x31c] sm:$0xf] }
 0x4a2   :  { %v9812_v50 = vor.u32 %v11038_v20, %v9811_v24  ;;  %v10776_v20 = vld [vmem:[#allocation26 + $0x15c] sm:$0xf] }
 0x4a3   :  { %6666 = vmatpush.bf16.msra.mxu3 %v8692_v6  ;;  %6679 = vmatpush.bf16.msrb.mxu0 %v8916_v18  ;;  %v10119_v6 = vld [vmem:[#allocation26 + $0xbd8] sm:$0xf]  ;;  %v11115_v18 = vld [vmem:[#allocation26 + $0xbf0] sm:$0xf0] }
 0x4a4   :  { %6692 = vmatpush.bf16.msrb.mxu1 %v9140_v58  ;;  %6705 = vmatpush.bf16.msrb.mxu2 %v9364_v14  ;;  %v10343_v58 = vld [vmem:[#allocation26 + $0xd98] sm:$0xf]  ;;  %v10120_v14 = vor.u32 %v11115_v18, %v10119_v6  ;;  %v10968_v6 = vld [vmem:[#allocation26 + $0x758] sm:$0xf0]  ;;  %v9755_v18 = vld [vmem:[#allocation26 + $0x900] sm:$0xf] }
 0x4a5   :  { %v10344_v44 = vor.u32 %v11171_v21, %v10343_v58  ;;  %v11024_v21 = vld [vmem:[#allocation26 + $0x918] sm:$0xf0]  ;;  %v9532_v53 = vor.u32 %v10968_v6, %v9531_v28  ;;  %v9421_v28 = vld [vmem:[#allocation26 + $0x67c] sm:$0xf0] }
 0x4a6   :  { %v9756_v35 = vor.u32 %v11024_v21, %v9755_v18  ;;  %v10762_v21 = vld [vmem:[#allocation26 + $0xec] sm:$0xf] }
 0x4a7   :  { %6667 = vmatpush.bf16.msra.mxu3 %v8664_v29  ;;  %6680 = vmatpush.bf16.msrb.mxu0 %v8888_v10  ;;  %v10091_v29 = vld [vmem:[#allocation26 + $0xba0] sm:$0xf]  ;;  %v11108_v10 = vld [vmem:[#allocation26 + $0xbb8] sm:$0xf0] }
 0x4a8   :  { %6693 = vmatpush.bf16.msrb.mxu1 %v9112_v61  ;;  %6706 = vmatpush.bf16.msrb.mxu2 %v9336_v9  ;;  %v10315_v61 = vld [vmem:[#allocation26 + $0xd60] sm:$0xf]  ;;  %v10092_v9 = vor.u32 %v11108_v10, %v10091_v29  ;;  %v9727_v10 = vld [vmem:[#allocation26 + $0x8c8] sm:$0xf] }
 0x4a9   :  { %v10316_v40 = vor.u32 %v11164_v8, %v10315_v61  ;;  %v11017_v61 = vld [vmem:[#allocation26 + $0x8e0] sm:$0xf0]  ;;  %v9951_v8 = vld [vmem:[#allocation26 + $0xa88] sm:$0xf] }
 0x4ab   :  { %6668 = vmatpush.bf16.msra.mxu3 %v8636_v57  ;;  %6681 = vmatpush.bf16.msrb.mxu0 %v8860_v0  ;;  %v10063_v57 = vld [vmem:[#allocation26 + $0xb68] sm:$0xf]  ;;  %v11157_v0 = vld [vmem:[#allocation26 + $0xd40] sm:$0xf0] }
 0x4ac   :  { %6694 = vmatpush.bf16.msrb.mxu1 %v9084_v48  ;;  %6707 = vmatpush.bf16.msrb.mxu2 %v9308_v32  ;;  %v9616_v48 = vor.u32 %v10989_v31, %v9615_v7  ;;  %v10064_v42 = vor.u32 %v11101_v46, %v10063_v57  ;;  %v10982_v32 = vld [vmem:[#allocation26 + $0x7c8] sm:$0xf0]  ;;  %v10288_v52 = vor.u32 %v11157_v0, %v10287_v15  ;;  %v11129_v7 = vld [vmem:[#allocation26 + $0xc60] sm:$0xf0]  ;;  %v10783_v31 = vld [vmem:[#allocation26 + $0x194] sm:$0xf] }
 0x4ad   :  { %v9588_v56 = vor.u32 %v10982_v32, %v9587_v51  ;;  %v9029_v57 = vld [vmem:[#allocation26 + $0x36c] sm:$0xf0]  ;;  %v10895_v46 = vld [vmem:[#allocation26 + $0x514] sm:$0xf]  ;;  %v9728_v0 = vor.u32 %v11017_v61, %v9727_v10  ;;  %v8808_v32 = vor.u32 %v10783_v31, %v8805_v16  ;;  %v10930_v10 = vld [vmem:[#allocation26 + $0x62c] sm:$0xf] }
 0x4ae   :  { %v9253_v15 = vld [vmem:[#allocation26 + $0x52c] sm:$0xf0]  ;;  %v9393_v61 = vld [vmem:[#allocation26 + $0x644] sm:$0xf0]  ;;  %v10755_v31 = vld [vmem:[#allocation26 + $0xb4] sm:$0xf] }
 0x4af   :  { %6669 = vmatpush.bf16.msra.mxu3 %v8608_v12  ;;  %6682 = vmatpush.bf16.msrb.mxu0 %v8832_v63  ;;  %v11150_v12 = vld [vmem:[#allocation26 + $0xd08] sm:$0xf0]  ;;  %v9559_v63 = vld [vmem:[#allocation26 + $0x778] sm:$0xf]  ;;  %v8693_v16 = vld [vmem:[#allocation26 + $0xcc] sm:$0xf0] }
 0x4b0   :  { %6695 = vmatpush.bf16.msrb.mxu1 %v9056_v2  ;;  %6708 = vmatpush.bf16.msrb.mxu2 %v9280_v30  ;;  %v10975_v2 = vld [vmem:[#allocation26 + $0x790] sm:$0xf0]  ;;  %v10260_v26 = vor.u32 %v11150_v12, %v10259_v47  ;;  %v9001_v12 = vld [vmem:[#allocation26 + $0x334] sm:$0xf0] }
 0x4b1   :  { %v11031_v30 = vld [vmem:[#allocation26 + $0x950] sm:$0xf0]  ;;  %v9560_v11 = vor.u32 %v10975_v2, %v9559_v63  ;;  %v9449_v63 = vld [vmem:[#allocation26 + $0x6b4] sm:$0xf0]  ;;  %v8780_v2 = vor.u32 %v10776_v20, %v8777_v36  ;;  %v10748_v36 = vld [vmem:[#allocation26 + $0x7c] sm:$0xf] }
 0x4b2   :  { %6670 = vmatmul.bf16.vlgmr.msra.gmra.mxu3 %v12426_v49  ;;  %6683 = vmatmul.bf16.vlgmr.msrb.gmra.mxu0 %v12428_v41  ;;  %v9784_v38 = vor.u32 %v11031_v30, %v9783_v54  ;;  %v9004_v54 = vor.u32 %v10832_v33, %v9001_v12  ;;  %v10769_v30 = vld [vmem:[#allocation26 + $0x124] sm:$0xf]  ;;  %v8665_v33 = vld [vmem:[#allocation26 + $0x94] sm:$0xf0] }
 0x4b3   :  { %6714 = vmatpush.bf16.msrb.mxu3 %v9700_v3  ;;  %6727 = vmatpush.bf16.msra.mxu0 %v9924_v27  ;;  %v10007_v3 = vld [vmem:[#allocation26 + $0xaf8] sm:$0xf]  ;;  %v11087_v27 = vld [vmem:[#allocation26 + $0xb10] sm:$0xf0] }
 0x4b4   :  { %6740 = vmatpush.bf16.msra.mxu1 %v10148_v37  ;;  %6753 = vmatpush.bf16.msra.mxu2 %v10372_v45  ;;  %v10231_v37 = vld [vmem:[#allocation26 + $0xcb8] sm:$0xf]  ;;  %v10008_v45 = vor.u32 %v11087_v27, %v10007_v3  ;;  %v8749_v3 = vld [vmem:[#allocation26 + $0x13c] sm:$0xf0]  ;;  %v10825_v27 = vld [vmem:[#allocation26 + $0x2e4] sm:$0xf] }
 0x4b5   :  { %6696 = vmatmul.bf16.vlgmr.msrb.gmra.mxu1 %v12430_v17  ;;  %6709 = vmatmul.bf16.vlgmr.msrb.gmra.mxu2 %v12435_v60  ;;  %v10232_v58 = vor.u32 %v11143_v34, %v10231_v37  ;;  %v8973_v34 = vld [vmem:[#allocation26 + $0x2fc] sm:$0xf0]  ;;  %v8752_v6 = vor.u32 %v10769_v30, %v8749_v3 }
 0x4b7   :  { %6715 = vmatpush.bf16.msrb.mxu3 %v9672_v22  ;;  %6728 = vmatpush.bf16.msra.mxu0 %v9896_v55  ;;  %v9979_v22 = vld [vmem:[#allocation26 + $0xac0] sm:$0xf]  ;;  %v11080_v55 = vld [vmem:[#allocation26 + $0xad8] sm:$0xf0] }
 0x4b8   :  { %6741 = vmatpush.bf16.msra.mxu1 %v10120_v14  ;;  %6754 = vmatpush.bf16.msra.mxu2 %v10344_v44  ;;  %v10203_v14 = vld [vmem:[#allocation26 + $0xc80] sm:$0xf]  ;;  %v10961_v44 = vld [vmem:[#allocation26 + $0x720] sm:$0xf0]  ;;  %v9980_v29 = vor.u32 %v11080_v55, %v9979_v22  ;;  %v8976_v22 = vor.u32 %v10825_v27, %v8973_v34 }
 0x4b9   :  { %v9504_v5 = vor.u32 %v10961_v44, %v9503_v59  ;;  %v8945_v44 = vld [vmem:[#allocation26 + $0x2c4] sm:$0xf0]  ;;  %v8637_v34 = vld [vmem:[#allocation26 + $0x5c] sm:$0xf0] }
 0x4bb   :  { %6716 = vmatpush.bf16.msrb.mxu3 %v9644_v23  ;;  %6729 = vmatpush.bf16.msra.mxu0 %v9868_v13  ;;  %v10204_v23 = vor.u32 %v11136_v39, %v10203_v14  ;;  %v11073_v13 = vld [vmem:[#allocation26 + $0xaa0] sm:$0xf0]  ;;  %v8721_v14 = vld [vmem:[#allocation26 + $0x104] sm:$0xf0]  ;;  %v10818_v39 = vld [vmem:[#allocation26 + $0x2ac] sm:$0xf] }
 0x4bc   :  { %6742 = vmatpush.bf16.msra.mxu1 %v10092_v9  ;;  %6755 = vmatpush.bf16.msra.mxu2 %v10316_v40  ;;  %v10175_v9 = vld [vmem:[#allocation26 + $0xc48] sm:$0xf]  ;;  %v10839_v40 = vld [vmem:[#allocation26 + $0x354] sm:$0xf] }
 0x4bd   :  { %v10176_v51 = vor.u32 %v11129_v7, %v10175_v9  ;;  %v9032_v24 = vor.u32 %v10839_v40, %v9029_v57  ;;  %v10811_v40 = vld [vmem:[#allocation26 + $0x274] sm:$0xf]  ;;  %v8917_v57 = vld [vmem:[#allocation26 + $0x28c] sm:$0xf0] }
 0x4bf   :  { %6717 = vmatpush.bf16.msrb.mxu3 %v9616_v48  ;;  %6730 = vmatpush.bf16.msra.mxu0 %v9840_v43  ;;  %v9952_v48 = vor.u32 %v11073_v13, %v9951_v8  ;;  %v10951_v43 = vld [vmem:[#allocation26 + $0x6d4] sm:$0xf]  ;;  %v8724_v8 = vor.u32 %v10762_v21, %v8721_v14  ;;  %v8948_v13 = vor.u32 %v10818_v39, %v8945_v44  ;;  %v10734_v44 = vld [vmem:[#allocation26 + $0xc] sm:$0xf] }
 0x4c0   :  { %6743 = vmatpush.bf16.msra.mxu1 %v10064_v42  ;;  %6756 = vmatpush.bf16.msra.mxu2 %v10288_v52  ;;  %v9477_v42 = vld [vmem:[#allocation26 + $0x6ec] sm:$0xf0]  ;;  %v9256_v52 = vor.u32 %v10895_v46, %v9253_v15  ;;  %v10867_v46 = vld [vmem:[#allocation26 + $0x434] sm:$0xf] }
 0x4c1   :  { %v9480_v47 = vor.u32 %v10951_v43, %v9477_v42  ;;  %v9141_v15 = vld [vmem:[#allocation26 + $0x44c] sm:$0xf0] }
 0x4c2   :  { %v9365_v43 = vld [vmem:[#allocation26 + $0x60c] sm:$0xf0]  ;;  %v9144_v20 = vor.u32 %v10867_v46, %v9141_v15  ;;  %v11119_v15 = vld [vmem:[#allocation26 + $0xc14] sm:$0xf] }
 0x4c3   :  { %6718 = vmatpush.bf16.msrb.mxu3 %v9588_v56  ;;  %6731 = vmatpush.bf16.msra.mxu0 %v9812_v50  ;;  %v10888_v56 = vld [vmem:[#allocation26 + $0x4dc] sm:$0xf]  ;;  %v9225_v50 = vld [vmem:[#allocation26 + $0x4f4] sm:$0xf0]  ;;  %v9925_v46 = vld [vmem:[#allocation26 + $0xa6c] sm:$0xf0] }
 0x4c4   :  { %6744 = vmatpush.bf16.msra.mxu1 %v10036_v62  ;;  %6757 = vmatpush.bf16.msra.mxu2 %v10260_v26  ;;  %v10944_v62 = vld [vmem:[#allocation26 + $0x69c] sm:$0xf]  ;;  %v9228_v26 = vor.u32 %v10888_v56, %v9225_v50  ;;  %v8889_v56 = vld [vmem:[#allocation26 + $0x254] sm:$0xf0] }
 0x4c5   :  { %v9452_v37 = vor.u32 %v10944_v62, %v9449_v63  ;;  %v10860_v50 = vld [vmem:[#allocation26 + $0x3fc] sm:$0xf]  ;;  %v9113_v62 = vld [vmem:[#allocation26 + $0x414] sm:$0xf0] }
 0x4c6   :  { %v10916_v63 = vld [vmem:[#allocation26 + $0x5bc] sm:$0xf]  ;;  %v9116_v3 = vor.u32 %v10860_v50, %v9113_v62 }
 0x4c7   :  { %6719 = vmatpush.bf16.msrb.mxu3 %v9560_v11  ;;  %6732 = vmatpush.bf16.msra.mxu0 %v9784_v38  ;;  %v10881_v11 = vld [vmem:[#allocation26 + $0x4a4] sm:$0xf]  ;;  %v9197_v38 = vld [vmem:[#allocation26 + $0x4bc] sm:$0xf0]  ;;  %v11056_v50 = vld [vmem:[#allocation26 + $0xa1c] sm:$0xf] }
 0x4c8   :  { %6745 = vmatpush.bf16.msra.mxu1 %v10008_v45  ;;  %6758 = vmatpush.bf16.msra.mxu2 %v10232_v58  ;;  %v10937_v45 = vld [vmem:[#allocation26 + $0x664] sm:$0xf]  ;;  %v9200_v55 = vor.u32 %v10881_v11, %v9197_v38 }
 0x4c9   :  { %v9424_v59 = vor.u32 %v10937_v45, %v9421_v28  ;;  %v10797_v11 = vld [vmem:[#allocation26 + $0x204] sm:$0xf]  ;;  %v8861_v45 = vld [vmem:[#allocation26 + $0x21c] sm:$0xf0] }
 0x4ca   :  { %v10853_v28 = vld [vmem:[#allocation26 + $0x3c4] sm:$0xf] }
 0x4cb   :  { %6720 = vmatpush.bf16.msrb.mxu3 %v9532_v53  ;;  %6733 = vmatpush.bf16.msra.mxu0 %v9756_v35  ;;  %v12487_v53 = vld [vmem:[#allocation28] sm:$0xff]  ;;  %v10874_v35 = vld [vmem:[#allocation26 + $0x46c] sm:$0xf] }
 0x4cc   :  { %6746 = vmatpush.bf16.msra.mxu1 %v9980_v29  ;;  %6759 = vmatpush.bf16.msra.mxu2 %v10204_v23  ;;  %v9169_v29 = vld [vmem:[#allocation26 + $0x484] sm:$0xf0]  ;;  %v4136_v23 = vperm.slane %v12487_v53, 0 }
 0x4cd   :  { %v9172_v9 = vor.u32 %v10874_v35, %v9169_v29  ;;  %v8609_v35 = vld [vmem:[#allocation26 + $0x24] sm:$0xf0]  ;;  %v8864_v29 = vor.u32 %v10797_v11, %v8861_v45 }
 0x4ce   :  { %v6476_v18 = vpop.f32.mrf.mxu0 }
 0x4cf   :  { %6721 = vmatpush.bf16.msrb.mxu3 %v9504_v5  ;;  %6734 = vmatpush.bf16.msra.mxu0 %v9728_v0  ;;  %v12485_v58 = vpop.f32.mrf.mxu1  ;;  %v9396_v5 = vor.u32 %v10930_v10, %v9393_v61  ;;  %v10790_v61 = vld [vmem:[#allocation26 + $0x1cc] sm:$0xf] }
 0x4d0   :  { %6747 = vmatpush.bf16.msra.mxu1 %v9952_v48  ;;  %6760 = vmatpush.bf16.msra.mxu2 %v10176_v51  ;;  %v10923_v48 = vld [vmem:[#allocation26 + $0x5f4] sm:$0xf]  ;;  %v8696_v51 = vor.u32 %v10755_v31, %v8693_v16  ;;  %v9281_v31 = vld [vmem:[#allocation26 + $0x564] sm:$0xf0] }
 0x4d1   :  { %v9368_v12 = vor.u32 %v10923_v48, %v9365_v43  ;;  %v11007_v16 = vld [vmem:[#allocation26 + $0x894] sm:$0xf]  ;;  %v10149_v48 = vld [vmem:[#allocation26 + $0xc2c] sm:$0xf0] }
 0x4d2   :  { %6722 = vmatmul.bf16.vlgmr.msrb.gmra.mxu3 %v12457_v25  ;;  %6735 = vmatmul.bf16.vlgmr.msra.gmra.mxu0 %v12459_v4 }
 0x4d3   :  { %6766 = vmatpush.bf16.msra.mxu3 %v8808_v32  ;;  %6779 = vmatpush.bf16.msrb.mxu0 %v9032_v24 }
 0x4d4   :  { %6792 = vmatpush.bf16.msrb.mxu1 %v9256_v52  ;;  %6805 = vmatpush.bf16.msrb.mxu2 %v9480_v47  ;;  %v6463_v7 = vpop.f32.mrf.mxu3  ;;  %v8920_v52 = vor.u32 %v10811_v40, %v8917_v57  ;;  %v10804_v47 = vld [vmem:[#allocation26 + $0x23c] sm:$0xf]  ;;  %v11063_v40 = vld [vmem:[#allocation26 + $0xa54] sm:$0xf]  ;;  %v8612_v57 = vor.u32 %v10734_v44, %v8609_v35  ;;  %v10317_v44 = vld [vmem:[#allocation26 + $0xd7c] sm:$0xf0] }
 0x4d5   :  { %6748 = vmatmul.bf16.vlgmr.msra.gmra.mxu1 %v12461_v19  ;;  %6761 = vmatmul.bf16.vlgmr.msra.gmra.mxu2 %v12463_v1  ;;  %v12490_v0 = vpop.f32.mrf.mxu2  ;;  %v6464_v42 = vadd.f32 %v6463_v7, %v4136_v23  ;;  %v8892_v30 = vor.u32 %v10804_v47, %v8889_v56  ;;  %v10846_v23 = vld [vmem:[#allocation26 + $0x38c] sm:$0xf]  ;;  %v10152_v47 = vor.u32 %v11119_v15, %v10149_v48  ;;  %v9673_v56 = vld [vmem:[#allocation26 + $0x874] sm:$0xf0] }
 0x4d6   :  { %v6478_v32 = vpop.f32.mrf.mxu0  ;;  %v10902_v7 = vld [vmem:[#allocation26 + $0x54c] sm:$0xf] }
 0x4d7   :  { %6767 = vmatpush.bf16.msra.mxu3 %v8780_v2  ;;  %6780 = vmatpush.bf16.msrb.mxu0 %v9004_v54  ;;  %v6491_v24 = vpop.f32.mrf.mxu1  ;;  %v9337_v2 = vld [vmem:[#allocation26 + $0x5d4] sm:$0xf0]  ;;  %v6477_v54 = vadd.f32 %v6476_v18, %v6464_v42  ;;  %v10373_v32 = vld [vmem:[#allocation26 + $0xdec] sm:$0xf0] }
 0x4d8   :  { %6793 = vmatpush.bf16.msrb.mxu1 %v9228_v26  ;;  %6806 = vmatpush.bf16.msrb.mxu2 %v9452_v37  ;;  %v8668_v26 = vor.u32 %v10748_v36, %v8665_v33  ;;  %v10741_v37 = vld [vmem:[#allocation26 + $0x44] sm:$0xf]  ;;  %v9340_v38 = vor.u32 %v10916_v63, %v9337_v2  ;;  %v9928_v33 = vor.u32 %v11063_v40, %v9925_v46  ;;  %v11154_v40 = vld [vmem:[#allocation26 + $0xd2c] sm:$0xf] }
 0x4d9   :  { %v6490_v18 = vadd.f32 %v12485_v58, %v6477_v54  ;;  %v8640_v14 = vor.u32 %v10741_v37, %v8637_v34  ;;  %v9701_v58 = vld [vmem:[#allocation26 + $0x8ac] sm:$0xf0]  ;;  %v10345_v37 = vld [vmem:[#allocation26 + $0xdb4] sm:$0xf0] }
 0x4db   :  { %6768 = vmatpush.bf16.msra.mxu3 %v8752_v6  ;;  %6781 = vmatpush.bf16.msrb.mxu0 %v8976_v22  ;;  %v9085_v6 = vld [vmem:[#allocation26 + $0x3dc] sm:$0xf0]  ;;  %v10909_v22 = vld [vmem:[#allocation26 + $0x584] sm:$0xf] }
 0x4dc   :  { %6794 = vmatpush.bf16.msrb.mxu1 %v9200_v55  ;;  %6807 = vmatpush.bf16.msrb.mxu2 %v9424_v59  ;;  %v6465_v27 = vpop.f32.mrf.mxu3  ;;  %v9309_v55 = vld [vmem:[#allocation26 + $0x59c] sm:$0xf0]  ;;  %v9088_v10 = vor.u32 %v10853_v28, %v9085_v6  ;;  %v10993_v28 = vld [vmem:[#allocation26 + $0x824] sm:$0xf] }
 0x4dd   :  { %v6504_v21 = vpop.f32.mrf.mxu2  ;;  %v11168_v27 = vld [vmem:[#allocation26 + $0xd9c] sm:$0xf]  ;;  %v9645_v6 = vld [vmem:[#allocation26 + $0x83c] sm:$0xf0] }
 0x4de   :  { %v6528_v39 = vpop.f32.mrf.mxu0  ;;  %v11049_v21 = vld [vmem:[#allocation26 + $0x9e4] sm:$0xf] }
 0x4df   :  { %6769 = vmatpush.bf16.msra.mxu3 %v8724_v8  ;;  %6782 = vmatpush.bf16.msrb.mxu0 %v8948_v13  ;;  %v6541_v59 = vpop.f32.mrf.mxu1  ;;  %v8833_v8 = vld [vmem:[#allocation26 + $0x1e4] sm:$0xf0]  ;;  %v9312_v13 = vor.u32 %v10909_v22, %v9309_v55  ;;  %v10348_v55 = vor.u32 %v11168_v27, %v10345_v37  ;;  %v10009_v27 = vld [vmem:[#allocation26 + $0xb14] sm:$0xf0] }
 0x4e0   :  { %6795 = vmatpush.bf16.msrb.mxu1 %v9172_v9  ;;  %6808 = vmatpush.bf16.msrb.mxu2 %v9396_v5  ;;  %v9057_v9 = vld [vmem:[#allocation26 + $0x3a4] sm:$0xf0]  ;;  %v6503_v5 = vadd.f32 %v12490_v0, %v6490_v18  ;;  %v8836_v43 = vor.u32 %v10790_v61, %v8833_v8  ;;  %v11000_v0 = vld [vmem:[#allocation26 + $0x85c] sm:$0xf]  ;;  %v9869_v18 = vld [vmem:[#allocation26 + $0x9fc] sm:$0xf0] }
 0x4e1   :  { %v9060_v42 = vor.u32 %v10846_v23, %v9057_v9  ;;  %v9676_v11 = vor.u32 %v11000_v0, %v9673_v56  ;;  %v10986_v23 = vld [vmem:[#allocation26 + $0x7ec] sm:$0xf] }
 0x4e2   :  { %v11042_v9 = vld [vmem:[#allocation26 + $0x9ac] sm:$0xf] }
 0x4e3   :  { %6770 = vmatpush.bf16.msra.mxu3 %v8696_v51  ;;  %6783 = vmatpush.bf16.msrb.mxu0 %v8920_v52  ;;  %v11175_v51 = vld [vmem:[#allocation26 + $0xdd4] sm:$0xf]  ;;  %v9284_v52 = vor.u32 %v10902_v7, %v9281_v31  ;;  %v9841_v31 = vld [vmem:[#allocation26 + $0x9c4] sm:$0xf0] }
 0x4e4   :  { %6796 = vmatpush.bf16.msrb.mxu1 %v9144_v20  ;;  %6809 = vmatpush.bf16.msrb.mxu2 %v9368_v12  ;;  %v6515_v24 = vpop.f32.mrf.mxu3  ;;  %v9704_v20 = vor.u32 %v11007_v16, %v9701_v58  ;;  %v10376_v62 = vor.u32 %v11175_v51, %v10373_v32  ;;  %v11098_v16 = vld [vmem:[#allocation26 + $0xb6c] sm:$0xf]  ;;  %v10065_v58 = vld [vmem:[#allocation26 + $0xb84] sm:$0xf0]  ;;  %v9844_v48 = vor.u32 %v11042_v9, %v9841_v31  ;;  %v9589_v51 = vld [vmem:[#allocation26 + $0x7cc] sm:$0xf0] }
 0x4e5   :  { %v6516_v36 = vadd.f32 %v6515_v24, %v6503_v5  ;;  %v6554_v12 = vpop.f32.mrf.mxu2  ;;  %v10289_v5 = vld [vmem:[#allocation26 + $0xd44] sm:$0xf0]  ;;  %v11035_v32 = vld [vmem:[#allocation26 + $0x974] sm:$0xf] }
 0x4e6   :  { %v6530_v2 = vpop.f32.mrf.mxu0  ;;  %v9729_v31 = vld [vmem:[#allocation26 + $0x8e4] sm:$0xf0] }
 0x4e7   :  { %6771 = vmatpush.bf16.msra.mxu3 %v8668_v26  ;;  %6784 = vmatpush.bf16.msrb.mxu0 %v8892_v30  ;;  %v6529_v63 = vadd.f32 %v6528_v39, %v6516_v36  ;;  %v6543_v54 = vpop.f32.mrf.mxu1  ;;  %v9897_v26 = vld [vmem:[#allocation26 + $0xa34] sm:$0xf0]  ;;  %v11112_v30 = vld [vmem:[#allocation26 + $0xbdc] sm:$0xf]  ;;  %v10093_v39 = vld [vmem:[#allocation26 + $0xbbc] sm:$0xf0] }
 0x4e8   :  { %6797 = vmatpush.bf16.msrb.mxu1 %v9116_v3  ;;  %6810 = vmatpush.bf16.msrb.mxu2 %v9340_v38  ;;  %v10121_v3 = vld [vmem:[#allocation26 + $0xbf4] sm:$0xf0]  ;;  %v9900_v38 = vor.u32 %v11056_v50, %v9897_v26  ;;  %v11091_v36 = vld [vmem:[#allocation26 + $0xb34] sm:$0xf]  ;;  %v11028_v54 = vld [vmem:[#allocation26 + $0x93c] sm:$0xf] }
 0x4e9   :  { %v6542_v34 = vadd.f32 %v6541_v59, %v6529_v63  ;;  %v10124_v45 = vor.u32 %v11112_v30, %v10121_v3  ;;  %v11161_v59 = vld [vmem:[#allocation26 + $0xd64] sm:$0xf]  ;;  %v10972_v63 = vld [vmem:[#allocation26 + $0x77c] sm:$0xf]  ;;  %v9561_v2 = vld [vmem:[#allocation26 + $0x794] sm:$0xf0] }
 0x4ea   :  { %v10320_v7 = vor.u32 %v11161_v59, %v10317_v44  ;;  %v9785_v30 = vld [vmem:[#allocation26 + $0x954] sm:$0xf0]  ;;  %v11084_v3 = vld [vmem:[#allocation26 + $0xafc] sm:$0xf]  ;;  %v11077_v59 = vld [vmem:[#allocation26 + $0xac4] sm:$0xf] }
 0x4eb   :  { %6772 = vmatpush.bf16.msra.mxu3 %v8640_v14  ;;  %6785 = vmatpush.bf16.msrb.mxu0 %v8864_v29  ;;  %v6555_v22 = vadd.f32 %v6554_v12, %v6542_v34  ;;  %v11105_v14 = vld [vmem:[#allocation26 + $0xba4] sm:$0xf]  ;;  %v9648_v29 = vor.u32 %v10993_v28, %v9645_v6  ;;  %v10261_v12 = vld [vmem:[#allocation26 + $0xd0c] sm:$0xf0]  ;;  %v11140_v34 = vld [vmem:[#allocation26 + $0xcbc] sm:$0xf]  ;;  %v9564_v28 = vor.u32 %v10972_v63, %v9561_v2 }
 0x4ec   :  { %6798 = vmatpush.bf16.msrb.mxu1 %v9088_v10  ;;  %6811 = vmatpush.bf16.msrb.mxu2 %v9312_v13  ;;  %v6517_v35 = vpop.f32.mrf.mxu3  ;;  %v9872_v10 = vor.u32 %v11049_v21, %v9869_v18  ;;  %v10096_v61 = vor.u32 %v11105_v14, %v10093_v39  ;;  %v9617_v13 = vld [vmem:[#allocation26 + $0x804] sm:$0xf0]  ;;  %v9788_v6 = vor.u32 %v11028_v54, %v9785_v30  ;;  %v11021_v18 = vld [vmem:[#allocation26 + $0x904] sm:$0xf]  ;;  %v9757_v39 = vld [vmem:[#allocation26 + $0x91c] sm:$0xf0] }
 0x4ed   :  { %11241 = vtanh.f32 %v6555_v22  ;;  %v6556_v8 = vpop.f32.mrf.mxu2  ;;  %v9620_v15 = vor.u32 %v10986_v23, %v9617_v13  ;;  %v10012_v21 = vor.u32 %v11084_v3, %v10009_v27  ;;  %v10965_v22 = vld [vmem:[#allocation26 + $0x744] sm:$0xf]  ;;  %v9981_v44 = vld [vmem:[#allocation26 + $0xadc] sm:$0xf0]  ;;  %v9760_v23 = vor.u32 %v11021_v18, %v9757_v39  ;;  %v10836_v27 = vld [vmem:[#allocation26 + $0x338] sm:$0xf0] }
 0x4ee   :  { %v11133_v35 = vld [vmem:[#allocation26 + $0xc84] sm:$0xf]  ;;  %v9505_v8 = vld [vmem:[#allocation26 + $0x724] sm:$0xf0]  ;;  %v9984_v13 = vor.u32 %v11077_v59, %v9981_v44  ;;  %v8783_v54 = vld [vmem:[#allocation26 + $0x160] sm:$0xf] }
 0x4ef   :  { %6773 = vmatpush.bf16.msra.mxu3 %v8612_v57  ;;  %6786 = vmatpush.bf16.msrb.mxu0 %v8836_v43  ;;  %v12498_v57 = vpop.f32.mrf.mxu0  ;;  %v10068_v43 = vor.u32 %v11098_v16, %v10065_v58  ;;  %v11070_v16 = vld [vmem:[#allocation26 + $0xa8c] sm:$0xf]  ;;  %v9007_v30 = vld [vmem:[#allocation26 + $0x320] sm:$0xf]  ;;  %v8979_v18 = vld [vmem:[#allocation26 + $0x2e8] sm:$0xf] }
 0x4f0   :  { %6799 = vmatpush.bf16.msrb.mxu1 %v9060_v42  ;;  %6812 = vmatpush.bf16.msrb.mxu2 %v9284_v52  ;;  %v10979_v42 = vld [vmem:[#allocation26 + $0x7b4] sm:$0xf]  ;;  %v10292_v52 = vor.u32 %v11154_v40, %v10289_v5  ;;  %v9953_v40 = vld [vmem:[#allocation26 + $0xaa4] sm:$0xf0]  ;;  %v11126_v5 = vld [vmem:[#allocation26 + $0xc4c] sm:$0xf] }
 0x4f1   :  { %v9592_v0 = vor.u32 %v10979_v42, %v9589_v51  ;;  %v10787_v42 = vld [vmem:[#allocation26 + $0x1b0] sm:$0xf0]  ;;  %v9035_v51 = vld [vmem:[#allocation26 + $0x358] sm:$0xf]  ;;  %v10829_v39 = vld [vmem:[#allocation26 + $0x300] sm:$0xf0] }
 0x4f2   :  { %6774 = vmatmul.bf16.vlgmr.msra.gmra.mxu3 %v12426_v49  ;;  %6787 = vmatmul.bf16.vlgmr.msrb.gmra.mxu0 %v12428_v41  ;;  %v12500_v46 = vpop.f32.mrf.mxu1  ;;  %v9203_v59 = vld [vmem:[#allocation26 + $0x4a8] sm:$0xf]  ;;  %v10885_v44 = vld [vmem:[#allocation26 + $0x4c0] sm:$0xf0] }
 0x4f3   :  { %6818 = vmatpush.bf16.msrb.mxu3 %v9704_v20  ;;  %6831 = vmatpush.bf16.msra.mxu0 %v9928_v33  ;;  %v11242_v24 = vpop.eup %11241  ;;  %v9813_v20 = vld [vmem:[#allocation26 + $0x98c] sm:$0xf0] }
 0x4f4   :  { %6844 = vmatpush.bf16.msra.mxu1 %v10152_v47  ;;  %6857 = vmatpush.bf16.msra.mxu2 %v10376_v62  ;;  %v10037_v33 = vld [vmem:[#allocation26 + $0xb4c] sm:$0xf0]  ;;  %7189 = vst [vmem:[#allocation29] sm:$0xff] %v11242_v24  ;;  %v11147_v47 = vld [vmem:[#allocation26 + $0xcf4] sm:$0xf]  ;;  %v9816_v56 = vor.u32 %v11035_v32, %v9813_v20 }
 0x4f5   :  { %6800 = vmatmul.bf16.vlgmr.msrb.gmra.mxu1 %v12430_v17  ;;  %6813 = vmatmul.bf16.vlgmr.msrb.gmra.mxu2 %v12435_v60  ;;  %v10040_v50 = vor.u32 %v11091_v36, %v10037_v33  ;;  %v12502_v62 = vpop.f32.mrf.mxu3  ;;  %v10264_v26 = vor.u32 %v11147_v47, %v10261_v12  ;;  %v10843_v24 = vld [vmem:[#allocation26 + $0x370] sm:$0xf0]  ;;  %v9956_v33 = vor.u32 %v11070_v16, %v9953_v40  ;;  %v9483_v47 = vld [vmem:[#allocation26 + $0x6d8] sm:$0xf]  ;;  %v9175_v16 = vld [vmem:[#allocation26 + $0x470] sm:$0xf] }
 0x4f6   :  { %v10899_v20 = vld [vmem:[#allocation26 + $0x530] sm:$0xf0]  ;;  %v9036_v63 = vor.u32 %v10843_v24, %v9035_v51  ;;  %v9399_v40 = vld [vmem:[#allocation26 + $0x630] sm:$0xf] }
 0x4f7   :  { %6819 = vmatpush.bf16.msrb.mxu3 %v9676_v11  ;;  %6832 = vmatpush.bf16.msra.mxu0 %v9900_v38  ;;  %v10233_v11 = vld [vmem:[#allocation26 + $0xcd4] sm:$0xf0]  ;;  %v6582_v38 = vpop.f32.mrf.mxu0  ;;  %v10955_v12 = vld [vmem:[#allocation26 + $0x6f0] sm:$0xf0] }
 0x4f8   :  { %6845 = vmatpush.bf16.msra.mxu1 %v10124_v45  ;;  %6858 = vmatpush.bf16.msra.mxu2 %v10348_v55  ;;  %v12504_v37 = vpop.f32.mrf.mxu2  ;;  %v9533_v55 = vld [vmem:[#allocation26 + $0x75c] sm:$0xf0]  ;;  %v10236_v14 = vor.u32 %v11140_v34, %v10233_v11  ;;  %v9484_v3 = vor.u32 %v10955_v12, %v9483_v47  ;;  %v10892_v11 = vld [vmem:[#allocation26 + $0x4f8] sm:$0xf0]  ;;  %v10759_v24 = vld [vmem:[#allocation26 + $0xd0] sm:$0xf0] }
 0x4f9   :  { %v9231_v34 = vld [vmem:[#allocation26 + $0x4e0] sm:$0xf]  ;;  %v10871_v47 = vld [vmem:[#allocation26 + $0x450] sm:$0xf0]  ;;  %v9371_v12 = vld [vmem:[#allocation26 + $0x5f8] sm:$0xf] }
 0x4fa   :  { %v6595_v45 = vpop.f32.mrf.mxu1  ;;  %v9455_v38 = vld [vmem:[#allocation26 + $0x6a0] sm:$0xf] }
 0x4fb   :  { %6820 = vmatpush.bf16.msrb.mxu3 %v9648_v29  ;;  %6833 = vmatpush.bf16.msra.mxu0 %v9872_v10  ;;  %v10205_v29 = vld [vmem:[#allocation26 + $0xc9c] sm:$0xf0]  ;;  %v9536_v10 = vor.u32 %v10965_v22, %v9533_v55  ;;  %v10948_v45 = vld [vmem:[#allocation26 + $0x6b8] sm:$0xf0]  ;;  %v8755_v22 = vld [vmem:[#allocation26 + $0x128] sm:$0xf] }
 0x4fc   :  { %6846 = vmatpush.bf16.msra.mxu1 %v10096_v61  ;;  %6859 = vmatpush.bf16.msra.mxu2 %v10320_v7  ;;  %v10958_v61 = vld [vmem:[#allocation26 + $0x70c] sm:$0xf]  ;;  %v10208_v58 = vor.u32 %v11133_v35, %v10205_v29  ;;  %v10773_v55 = vld [vmem:[#allocation26 + $0x140] sm:$0xf0] }
 0x4fd   :  { %v6569_v9 = vpop.f32.mrf.mxu3  ;;  %v11014_v7 = vld [vmem:[#allocation26 + $0x8cc] sm:$0xf]  ;;  %v9508_v32 = vor.u32 %v10958_v61, %v9505_v8  ;;  %v10941_v35 = vld [vmem:[#allocation26 + $0x680] sm:$0xf0]  ;;  %v8980_v61 = vor.u32 %v10829_v39, %v8979_v18  ;;  %v9204_v8 = vor.u32 %v10885_v44, %v9203_v59  ;;  %v8867_v59 = vld [vmem:[#allocation26 + $0x208] sm:$0xf] }
 0x4fe   :  { %v9732_v36 = vor.u32 %v11014_v7, %v9729_v31  ;;  %v8951_v9 = vld [vmem:[#allocation26 + $0x2b0] sm:$0xf]  ;;  %v10822_v31 = vld [vmem:[#allocation26 + $0x2c8] sm:$0xf0]  ;;  %v10745_v39 = vld [vmem:[#allocation26 + $0x60] sm:$0xf0] }
 0x4ff   :  { %6821 = vmatpush.bf16.msrb.mxu3 %v9620_v15  ;;  %6834 = vmatpush.bf16.msra.mxu0 %v9844_v48  ;;  %v10177_v15 = vld [vmem:[#allocation26 + $0xc64] sm:$0xf0] }
 0x500   :  { %6847 = vmatpush.bf16.msra.mxu1 %v10068_v43  ;;  %6860 = vmatpush.bf16.msra.mxu2 %v10292_v52  ;;  %v6608_v48 = vpop.f32.mrf.mxu2  ;;  %v8811_v43 = vld [vmem:[#allocation26 + $0x198] sm:$0xf] }
 0x501   :  { %v9259_v52 = vld [vmem:[#allocation26 + $0x518] sm:$0xf] }
 0x502   :  { %v9260_v2 = vor.u32 %v10899_v20, %v9259_v52  ;;  %v8923_v52 = vld [vmem:[#allocation26 + $0x278] sm:$0xf] }
 0x503   :  { %6822 = vmatpush.bf16.msrb.mxu3 %v9592_v0  ;;  %6835 = vmatpush.bf16.msra.mxu0 %v9816_v56  ;;  %v4137_v0 = vperm.slane %v12487_v53, 1  ;;  %v10180_v56 = vor.u32 %v11126_v5, %v10177_v15  ;;  %v10934_v5 = vld [vmem:[#allocation26 + $0x648] sm:$0xf0] }
 0x504   :  { %6848 = vmatpush.bf16.msra.mxu1 %v10040_v50  ;;  %6861 = vmatpush.bf16.msra.mxu2 %v10264_v26  ;;  %v8812_v50 = vor.u32 %v10787_v42, %v8811_v43  ;;  %v10780_v26 = vld [vmem:[#allocation26 + $0x178] sm:$0xf0]  ;;  %v8952_v42 = vor.u32 %v10822_v31, %v8951_v9  ;;  %v9400_v20 = vor.u32 %v10934_v5, %v9399_v40  ;;  %v8615_v9 = vld [vmem:[#allocation26 + $0x10] sm:$0xf]  ;;  %v10794_v5 = vld [vmem:[#allocation26 + $0x1e8] sm:$0xf0] }
 0x505   :  { %v8784_v53 = vor.u32 %v10780_v26, %v8783_v54  ;;  %v8671_v54 = vld [vmem:[#allocation26 + $0x80] sm:$0xf]  ;;  %v10752_v26 = vld [vmem:[#allocation26 + $0x98] sm:$0xf0]  ;;  %v8839_v40 = vld [vmem:[#allocation26 + $0x1d0] sm:$0xf] }
 0x507   :  { %6823 = vmatpush.bf16.msrb.mxu3 %v9564_v28  ;;  %6836 = vmatpush.bf16.msra.mxu0 %v9788_v6  ;;  %v6568_v28 = vadd.f32 %v12502_v62, %v4137_v0  ;;  %v9008_v6 = vor.u32 %v10836_v27, %v9007_v30  ;;  %v9427_v62 = vld [vmem:[#allocation26 + $0x668] sm:$0xf]  ;;  %v10927_v0 = vld [vmem:[#allocation26 + $0x610] sm:$0xf0]  ;;  %v8895_v30 = vld [vmem:[#allocation26 + $0x240] sm:$0xf] }
 0x508   :  { %6849 = vmatpush.bf16.msra.mxu1 %v10012_v21  ;;  %6862 = vmatpush.bf16.msra.mxu2 %v10236_v14  ;;  %v9232_v21 = vor.u32 %v10892_v11, %v9231_v34  ;;  %v9456_v14 = vor.u32 %v10948_v45, %v9455_v38  ;;  %v9428_v7 = vor.u32 %v10941_v35, %v9427_v62  ;;  %v10808_v34 = vld [vmem:[#allocation26 + $0x258] sm:$0xf0]  ;;  %v9119_v11 = vld [vmem:[#allocation26 + $0x400] sm:$0xf]  ;;  %v10801_v35 = vld [vmem:[#allocation26 + $0x220] sm:$0xf0] }
 0x509   :  { %v6581_v29 = vadd.f32 %v12498_v57, %v6568_v28  ;;  %v10864_v38 = vld [vmem:[#allocation26 + $0x418] sm:$0xf0]  ;;  %v9343_v28 = vld [vmem:[#allocation26 + $0x5c0] sm:$0xf]  ;;  %v8868_v31 = vor.u32 %v10801_v35, %v8867_v59  ;;  %v10099_v59 = vld [vmem:[#allocation26 + $0xba8] sm:$0xf] }
 0x50a   :  { %v9120_v18 = vor.u32 %v10864_v38, %v9119_v11  ;;  %v11060_v11 = vld [vmem:[#allocation26 + $0xa38] sm:$0xf0]  ;;  %v10127_v38 = vld [vmem:[#allocation26 + $0xbe0] sm:$0xf]  ;;  %v11165_v35 = vld [vmem:[#allocation26 + $0xd80] sm:$0xf0] }
 0x50b   :  { %6824 = vmatpush.bf16.msrb.mxu3 %v9536_v10  ;;  %6837 = vmatpush.bf16.msra.mxu0 %v9760_v23  ;;  %v8756_v10 = vor.u32 %v10773_v55, %v8755_v22  ;;  %v8727_v23 = vld [vmem:[#allocation26 + $0xf0] sm:$0xf]  ;;  %v6594_v57 = vadd.f32 %v12500_v46, %v6581_v29  ;;  %v8672_v22 = vor.u32 %v10752_v26, %v8671_v54  ;;  %v9091_v29 = vld [vmem:[#allocation26 + $0x3c8] sm:$0xf]  ;;  %v9679_v26 = vld [vmem:[#allocation26 + $0x860] sm:$0xf] }
 0x50c   :  { %6850 = vmatpush.bf16.msra.mxu1 %v9984_v13  ;;  %6863 = vmatpush.bf16.msra.mxu2 %v10208_v58  ;;  %v10766_v13 = vld [vmem:[#allocation26 + $0x108] sm:$0xf0]  ;;  %v8896_v55 = vor.u32 %v10808_v34, %v8895_v30  ;;  %v11004_v30 = vld [vmem:[#allocation26 + $0x878] sm:$0xf0] }
 0x50d   :  { %v10878_v58 = vld [vmem:[#allocation26 + $0x488] sm:$0xf0]  ;;  %v8728_v43 = vor.u32 %v10766_v13, %v8727_v23  ;;  %v6607_v46 = vadd.f32 %v12504_v37, %v6594_v57  ;;  %v9063_v57 = vld [vmem:[#allocation26 + $0x390] sm:$0xf] }
 0x50e   :  { %v9176_v51 = vor.u32 %v10878_v58, %v9175_v16 }
 0x50f   :  { %6825 = vmatpush.bf16.msrb.mxu3 %v9508_v32  ;;  %6838 = vmatpush.bf16.msra.mxu0 %v9732_v36  ;;  %v6632_v15 = vpop.f32.mrf.mxu0  ;;  %v8699_v32 = vld [vmem:[#allocation26 + $0xb8] sm:$0xf]  ;;  %v10815_v36 = vld [vmem:[#allocation26 + $0x290] sm:$0xf0] }
 0x510   :  { %6851 = vmatpush.bf16.msra.mxu1 %v9956_v33  ;;  %6864 = vmatpush.bf16.msra.mxu2 %v10180_v56  ;;  %v9147_v33 = vld [vmem:[#allocation26 + $0x438] sm:$0xf]  ;;  %v8700_v56 = vor.u32 %v10759_v24, %v8699_v32  ;;  %v11011_v24 = vld [vmem:[#allocation26 + $0x8b0] sm:$0xf0] }
 0x511   :  { %v9707_v32 = vld [vmem:[#allocation26 + $0x898] sm:$0xf] }
 0x512   :  { %6826 = vmatmul.bf16.vlgmr.msrb.gmra.mxu3 %v12457_v25  ;;  %6839 = vmatmul.bf16.vlgmr.msra.gmra.mxu0 %v12459_v4  ;;  %v6645_v48 = vpop.f32.mrf.mxu1 }
 0x513   :  { %6870 = vmatpush.bf16.msra.mxu3 %v8812_v50  ;;  %6883 = vmatpush.bf16.msrb.mxu0 %v9036_v63  ;;  %v8924_v50 = vor.u32 %v10815_v36, %v8923_v52  ;;  %v9148_v63 = vor.u32 %v10871_v47, %v9147_v33  ;;  %v9931_v52 = vld [vmem:[#allocation26 + $0xa58] sm:$0xf]  ;;  %v11067_v36 = vld [vmem:[#allocation26 + $0xa70] sm:$0xf0] }
 0x514   :  { %6896 = vmatpush.bf16.msrb.mxu1 %v9260_v2  ;;  %6909 = vmatpush.bf16.msrb.mxu2 %v9484_v3  ;;  %v9372_v3 = vor.u32 %v10927_v0, %v9371_v12  ;;  %v10155_v33 = vld [vmem:[#allocation26 + $0xc18] sm:$0xf]  ;;  %v11123_v47 = vld [vmem:[#allocation26 + $0xc30] sm:$0xf0]  ;;  %v8840_v12 = vor.u32 %v10794_v5, %v8839_v40  ;;  %v11158_v40 = vld [vmem:[#allocation26 + $0xd48] sm:$0xf0] }
 0x515   :  { %6852 = vmatmul.bf16.vlgmr.msra.gmra.mxu1 %v12461_v19  ;;  %6865 = vmatmul.bf16.vlgmr.msra.gmra.mxu2 %v12463_v1  ;;  %v6619_v2 = vpop.f32.mrf.mxu3  ;;  %v10156_v54 = vor.u32 %v11123_v47, %v10155_v33  ;;  %v10267_v33 = vld [vmem:[#allocation26 + $0xcf8] sm:$0xf]  ;;  %v11151_v47 = vld [vmem:[#allocation26 + $0xd10] sm:$0xf0] }
 0x516   :  { %v6620_v27 = vadd.f32 %v6619_v2, %v6607_v46  ;;  %v10379_v46 = vld [vmem:[#allocation26 + $0xdd8] sm:$0xf]  ;;  %v9932_v2 = vor.u32 %v11067_v36, %v9931_v52  ;;  %v11039_v52 = vld [vmem:[#allocation26 + $0x990] sm:$0xf0] }
 0x517   :  { %6871 = vmatpush.bf16.msra.mxu3 %v8784_v53  ;;  %6884 = vmatpush.bf16.msrb.mxu0 %v9008_v6  ;;  %v10920_v53 = vld [vmem:[#allocation26 + $0x5d8] sm:$0xf0]  ;;  %v6634_v6 = vpop.f32.mrf.mxu0  ;;  %v11095_v36 = vld [vmem:[#allocation26 + $0xb50] sm:$0xf0] }
 0x518   :  { %6897 = vmatpush.bf16.msrb.mxu1 %v9232_v21  ;;  %6910 = vmatpush.bf16.msrb.mxu2 %v9456_v14  ;;  %v6658_v45 = vpop.f32.mrf.mxu2  ;;  %v6633_v37 = vadd.f32 %v6632_v15, %v6620_v27  ;;  %v8643_v14 = vld [vmem:[#allocation26 + $0x48] sm:$0xf]  ;;  %v9344_v62 = vor.u32 %v10920_v53, %v9343_v28  ;;  %v10351_v28 = vld [vmem:[#allocation26 + $0xda0] sm:$0xf]  ;;  %v11172_v53 = vld [vmem:[#allocation26 + $0xdb8] sm:$0xf0] }
 0x519   :  { %v8644_v13 = vor.u32 %v10745_v39, %v8643_v14  ;;  %v10352_v14 = vor.u32 %v11172_v53, %v10351_v28  ;;  %v11053_v39 = vld [vmem:[#allocation26 + $0xa00] sm:$0xf0] }
 0x51a   :  { %v6647_v21 = vpop.f32.mrf.mxu1  ;;  %v6646_v44 = vadd.f32 %v6645_v48, %v6633_v37  ;;  %v10850_v48 = vld [vmem:[#allocation26 + $0x3a8] sm:$0xf0]  ;;  %v9680_v37 = vor.u32 %v11004_v30, %v9679_v26  ;;  %v11032_v26 = vld [vmem:[#allocation26 + $0x958] sm:$0xf0]  ;;  %v10015_v30 = vld [vmem:[#allocation26 + $0xb00] sm:$0xf] }
 0x51b   :  { %6872 = vmatpush.bf16.msra.mxu3 %v8756_v10  ;;  %6885 = vmatpush.bf16.msrb.mxu0 %v8980_v61  ;;  %v10857_v10 = vld [vmem:[#allocation26 + $0x3e0] sm:$0xf0]  ;;  %v9315_v61 = vld [vmem:[#allocation26 + $0x588] sm:$0xf]  ;;  %v9064_v0 = vor.u32 %v10850_v48, %v9063_v57 }
 0x51c   :  { %6898 = vmatpush.bf16.msrb.mxu1 %v9204_v8  ;;  %6911 = vmatpush.bf16.msrb.mxu2 %v9428_v7  ;;  %v10913_v8 = vld [vmem:[#allocation26 + $0x5a0] sm:$0xf0]  ;;  %v6659_v23 = vadd.f32 %v6658_v45, %v6646_v44  ;;  %v10738_v7 = vld [vmem:[#allocation26 + $0x28] sm:$0xf0]  ;;  %v9092_v16 = vor.u32 %v10857_v10, %v9091_v29  ;;  %v11116_v45 = vld [vmem:[#allocation26 + $0xbf8] sm:$0xf0] }
 0x51d   :  { %v6621_v58 = vpop.f32.mrf.mxu3  ;;  %v9316_v15 = vor.u32 %v10913_v8, %v9315_v61  ;;  %v10128_v21 = vor.u32 %v11116_v45, %v10127_v38  ;;  %v11109_v44 = vld [vmem:[#allocation26 + $0xbc0] sm:$0xf0]  ;;  %v9623_v8 = vld [vmem:[#allocation26 + $0x7f0] sm:$0xf] }
 0x51e   :  { %11243 = vtanh.f32 %v6659_v23  ;;  %v10100_v61 = vor.u32 %v11109_v44, %v10099_v59  ;;  %v10990_v23 = vld [vmem:[#allocation26 + $0x808] sm:$0xf0]  ;;  %v10295_v58 = vld [vmem:[#allocation26 + $0xd30] sm:$0xf]  ;;  %v10211_v59 = vld [vmem:[#allocation26 + $0xc88] sm:$0xf] }
 0x51f   :  { %6873 = vmatpush.bf16.msra.mxu3 %v8728_v43  ;;  %6886 = vmatpush.bf16.msrb.mxu0 %v8952_v42  ;;  %v9287_v43 = vld [vmem:[#allocation26 + $0x550] sm:$0xf]  ;;  %v10906_v42 = vld [vmem:[#allocation26 + $0x568] sm:$0xf0]  ;;  %v11137_v44 = vld [vmem:[#allocation26 + $0xca0] sm:$0xf0] }
 0x520   :  { %6899 = vmatpush.bf16.msrb.mxu1 %v9176_v51  ;;  %6912 = vmatpush.bf16.msrb.mxu2 %v9400_v20  ;;  %v6660_v51 = vpop.f32.mrf.mxu2  ;;  %v8616_v20 = vor.u32 %v10738_v7, %v8615_v9  ;;  %v11046_v7 = vld [vmem:[#allocation26 + $0x9c8] sm:$0xf0] }
 0x521   :  { %v10983_v51 = vld [vmem:[#allocation26 + $0x7d0] sm:$0xf0] }
 0x523   :  { %6874 = vmatpush.bf16.msra.mxu3 %v8700_v56  ;;  %6887 = vmatpush.bf16.msrb.mxu0 %v8924_v50  ;;  %v11179_v56 = vld [vmem:[#allocation26 + $0xdf0] sm:$0xf0]  ;;  %v9288_v50 = vor.u32 %v10906_v42, %v9287_v43  ;;  %v9595_v42 = vld [vmem:[#allocation26 + $0x7b8] sm:$0xf] }
 0x524   :  { %6900 = vmatpush.bf16.msrb.mxu1 %v9148_v63  ;;  %6913 = vmatpush.bf16.msrb.mxu2 %v9372_v3  ;;  %v9708_v63 = vor.u32 %v11011_v24, %v9707_v32  ;;  %v9903_v3 = vld [vmem:[#allocation26 + $0xa20] sm:$0xf]  ;;  %v11244_v27 = vpop.eup %11243  ;;  %v10380_v34 = vor.u32 %v11179_v56, %v10379_v46  ;;  %v9819_v32 = vld [vmem:[#allocation26 + $0x978] sm:$0xf]  ;;  %v10296_v24 = vor.u32 %v11158_v40, %v10295_v58  ;;  %v11130_v58 = vld [vmem:[#allocation26 + $0xc68] sm:$0xf0] }
 0x525   :  { %7190 = vst [vmem:[#allocation29 + $0x8] sm:$0xff] %v11244_v27  ;;  %v9904_v6 = vor.u32 %v11060_v11, %v9903_v3  ;;  %v11088_v3 = vld [vmem:[#allocation26 + $0xb18] sm:$0xf0] }
 0x526   :  { %v11144_v11 = vld [vmem:[#allocation26 + $0xcd8] sm:$0xf0] }
 0x527   :  { %6875 = vmatpush.bf16.msra.mxu3 %v8672_v22  ;;  %6888 = vmatpush.bf16.msrb.mxu0 %v8896_v55  ;;  %v9651_v22 = vld [vmem:[#allocation26 + $0x828] sm:$0xf]  ;;  %v10997_v55 = vld [vmem:[#allocation26 + $0x840] sm:$0xf0] }
 0x528   :  { %6901 = vmatpush.bf16.msrb.mxu1 %v9120_v18  ;;  %6914 = vmatpush.bf16.msrb.mxu2 %v9344_v62  ;;  %v9875_v18 = vld [vmem:[#allocation26 + $0x9e8] sm:$0xf]  ;;  %v9652_v29 = vor.u32 %v10997_v55, %v9651_v22 }
 0x529   :  { %v10323_v62 = vld [vmem:[#allocation26 + $0xd68] sm:$0xf]  ;;  %v9876_v10 = vor.u32 %v11053_v39, %v9875_v18  ;;  %v11025_v18 = vld [vmem:[#allocation26 + $0x920] sm:$0xf0] }
 0x52a   :  { %v10324_v9 = vor.u32 %v11165_v35, %v10323_v62  ;;  %v9763_v22 = vld [vmem:[#allocation26 + $0x908] sm:$0xf]  ;;  %v11081_v39 = vld [vmem:[#allocation26 + $0xae0] sm:$0xf0]  ;;  %v9511_v35 = vld [vmem:[#allocation26 + $0x710] sm:$0xf] }
 0x52b   :  { %6876 = vmatpush.bf16.msra.mxu3 %v8644_v13  ;;  %6889 = vmatpush.bf16.msrb.mxu0 %v8868_v31  ;;  %v9847_v13 = vld [vmem:[#allocation26 + $0x9b0] sm:$0xf] }
 0x52c   :  { %6902 = vmatpush.bf16.msrb.mxu1 %v9092_v16  ;;  %6915 = vmatpush.bf16.msrb.mxu2 %v9316_v15  ;;  %v10071_v31 = vld [vmem:[#allocation26 + $0xb70] sm:$0xf]  ;;  %v11102_v16 = vld [vmem:[#allocation26 + $0xb88] sm:$0xf0]  ;;  %v9624_v15 = vor.u32 %v10990_v23, %v9623_v8  ;;  %v9848_v48 = vor.u32 %v11046_v7, %v9847_v13  ;;  %v10212_v7 = vor.u32 %v11137_v44, %v10211_v59  ;;  %v9205_v59 = vld [vmem:[#allocation26 + $0x4c4] sm:$0xf0] }
 0x52d   :  { %v10072_v43 = vor.u32 %v11102_v16, %v10071_v31  ;;  %v9735_v23 = vld [vmem:[#allocation26 + $0x8d0] sm:$0xf]  ;;  %v11018_v13 = vld [vmem:[#allocation26 + $0x8e8] sm:$0xf0]  ;;  %v9429_v44 = vld [vmem:[#allocation26 + $0x684] sm:$0xf0] }
 0x52e   :  { %v11074_v31 = vld [vmem:[#allocation26 + $0xaa8] sm:$0xf0]  ;;  %v10183_v16 = vld [vmem:[#allocation26 + $0xc50] sm:$0xf] }
 0x52f   :  { %6877 = vmatpush.bf16.msra.mxu3 %v8616_v20  ;;  %6890 = vmatpush.bf16.msrb.mxu0 %v8840_v12  ;;  %v12519_v5 = vpop.f32.mrf.mxu0  ;;  %v10043_v20 = vld [vmem:[#allocation26 + $0xb38] sm:$0xf]  ;;  %v9596_v12 = vor.u32 %v10983_v51, %v9595_v42 }
 0x530   :  { %6903 = vmatpush.bf16.msrb.mxu1 %v9064_v0  ;;  %6916 = vmatpush.bf16.msrb.mxu2 %v9288_v50  ;;  %v9820_v0 = vor.u32 %v11039_v52, %v9819_v32  ;;  %v10044_v46 = vor.u32 %v11095_v36, %v10043_v20  ;;  %v9567_v50 = vld [vmem:[#allocation26 + $0x780] sm:$0xf]  ;;  %v9037_v51 = vld [vmem:[#allocation26 + $0x374] sm:$0xf0]  ;;  %v10896_v32 = vld [vmem:[#allocation26 + $0x51c] sm:$0xf]  ;;  %v9736_v52 = vor.u32 %v11018_v13, %v9735_v23 }
 0x531   :  { %v10952_v36 = vld [vmem:[#allocation26 + $0x6dc] sm:$0xf]  ;;  %v10819_v23 = vld [vmem:[#allocation26 + $0x2b4] sm:$0xf] }
 0x532   :  { %6878 = vmatmul.bf16.vlgmr.msra.gmra.mxu3 %v12426_v49  ;;  %6891 = vmatmul.bf16.vlgmr.msrb.gmra.mxu0 %v12428_v41  ;;  %v12521_v57 = vpop.f32.mrf.mxu1 }
 0x533   :  { %6922 = vmatpush.bf16.msrb.mxu3 %v9708_v63  ;;  %6935 = vmatpush.bf16.msra.mxu0 %v9932_v2  ;;  %v10976_v63 = vld [vmem:[#allocation26 + $0x798] sm:$0xf0]  ;;  %v9791_v2 = vld [vmem:[#allocation26 + $0x940] sm:$0xf] }
 0x534   :  { %6948 = vmatpush.bf16.msra.mxu1 %v10156_v54  ;;  %6961 = vmatpush.bf16.msra.mxu2 %v10380_v34  ;;  %v10268_v54 = vor.u32 %v11151_v47, %v10267_v33  ;;  %v10239_v34 = vld [vmem:[#allocation26 + $0xcc0] sm:$0xf]  ;;  %v9568_v28 = vor.u32 %v10976_v63, %v9567_v50  ;;  %v9792_v53 = vor.u32 %v11032_v26, %v9791_v2  ;;  %v9485_v33 = vld [vmem:[#allocation26 + $0x6f4] sm:$0xf0]  ;;  %v10777_v2 = vld [vmem:[#allocation26 + $0x164] sm:$0xf] }
 0x535   :  { %6904 = vmatmul.bf16.vlgmr.msrb.gmra.mxu1 %v12430_v17  ;;  %6917 = vmatmul.bf16.vlgmr.msrb.gmra.mxu2 %v12435_v60  ;;  %v12523_v56 = vpop.f32.mrf.mxu3  ;;  %v10240_v55 = vor.u32 %v11144_v11, %v10239_v34  ;;  %v12527_v47 = vld [vmem:[#allocation28] sm:$0xff] }
 0x536   :  { %v10833_v26 = vld [vmem:[#allocation26 + $0x324] sm:$0xf]  ;;  %v9233_v11 = vld [vmem:[#allocation26 + $0x4fc] sm:$0xf0] }
 0x537   :  { %6923 = vmatpush.bf16.msrb.mxu3 %v9680_v37  ;;  %6936 = vmatpush.bf16.msra.mxu0 %v9904_v6  ;;  %v6686_v38 = vpop.f32.mrf.mxu0  ;;  %v10016_v37 = vor.u32 %v11088_v3, %v10015_v30  ;;  %v9539_v6 = vld [vmem:[#allocation26 + $0x748] sm:$0xf]  ;;  %v9488_v30 = vor.u32 %v10952_v36, %v9485_v33  ;;  %v9009_v3 = vld [vmem:[#allocation26 + $0x33c] sm:$0xf0]  ;;  %v10889_v34 = vld [vmem:[#allocation26 + $0x4e4] sm:$0xf] }
 0x538   :  { %6949 = vmatpush.bf16.msra.mxu1 %v10128_v21  ;;  %6962 = vmatpush.bf16.msra.mxu2 %v10352_v14  ;;  %v12525_v27 = vpop.f32.mrf.mxu2  ;;  %v10969_v21 = vld [vmem:[#allocation26 + $0x760] sm:$0xf0]  ;;  %v9987_v14 = vld [vmem:[#allocation26 + $0xac8] sm:$0xf]  ;;  %v10868_v36 = vld [vmem:[#allocation26 + $0x43c] sm:$0xf] }
 0x539   :  { %v9540_v62 = vor.u32 %v10969_v21, %v9539_v6  ;;  %v10945_v38 = vld [vmem:[#allocation26 + $0x6a4] sm:$0xf]  ;;  %v9236_v6 = vor.u32 %v10889_v34, %v9233_v11  ;;  %v10770_v21 = vld [vmem:[#allocation26 + $0x12c] sm:$0xf]  ;;  %v9149_v33 = vld [vmem:[#allocation26 + $0x454] sm:$0xf0] }
 0x53a   :  { %v6699_v45 = vpop.f32.mrf.mxu1  ;;  %v8897_v11 = vld [vmem:[#allocation26 + $0x25c] sm:$0xf0] }
 0x53b   :  { %6924 = vmatpush.bf16.msrb.mxu3 %v9652_v29  ;;  %6937 = vmatpush.bf16.msra.mxu0 %v9876_v10  ;;  %v10962_v29 = vld [vmem:[#allocation26 + $0x728] sm:$0xf0]  ;;  %v9764_v10 = vor.u32 %v11025_v18, %v9763_v22  ;;  %v9457_v45 = vld [vmem:[#allocation26 + $0x6bc] sm:$0xf0]  ;;  %v8757_v22 = vld [vmem:[#allocation26 + $0x144] sm:$0xf0] }
 0x53c   :  { %6950 = vmatpush.bf16.msra.mxu1 %v10100_v61  ;;  %6963 = vmatpush.bf16.msra.mxu2 %v10324_v9  ;;  %v9988_v61 = vor.u32 %v11081_v39, %v9987_v14  ;;  %v9959_v9 = vld [vmem:[#allocation26 + $0xa90] sm:$0xf]  ;;  %v9512_v42 = vor.u32 %v10962_v29, %v9511_v35  ;;  %v9460_v18 = vor.u32 %v10945_v38, %v9457_v45  ;;  %v8981_v14 = vld [vmem:[#allocation26 + $0x304] sm:$0xf0]  ;;  %v10882_v39 = vld [vmem:[#allocation26 + $0x4ac] sm:$0xf] }
 0x53d   :  { %v6673_v8 = vpop.f32.mrf.mxu3  ;;  %v9960_v20 = vor.u32 %v11074_v31, %v9959_v9  ;;  %v8760_v35 = vor.u32 %v10770_v21, %v8757_v22  ;;  %v8953_v9 = vld [vmem:[#allocation26 + $0x2cc] sm:$0xf0]  ;;  %v10861_v38 = vld [vmem:[#allocation26 + $0x404] sm:$0xf]  ;;  %v9121_v45 = vld [vmem:[#allocation26 + $0x41c] sm:$0xf0] }
 0x53e   :  { %v8729_v8 = vld [vmem:[#allocation26 + $0x10c] sm:$0xf0] }
 0x53f   :  { %6925 = vmatpush.bf16.msrb.mxu3 %v9624_v15  ;;  %6938 = vmatpush.bf16.msra.mxu0 %v9848_v48  ;;  %v10784_v15 = vld [vmem:[#allocation26 + $0x19c] sm:$0xf]  ;;  %v8813_v48 = vld [vmem:[#allocation26 + $0x1b4] sm:$0xf0]  ;;  %v9177_v31 = vld [vmem:[#allocation26 + $0x48c] sm:$0xf0] }
 0x540   :  { %6951 = vmatpush.bf16.msra.mxu1 %v10072_v43  ;;  %6964 = vmatpush.bf16.msra.mxu2 %v10296_v24  ;;  %v6712_v40 = vpop.f32.mrf.mxu2  ;;  %v10840_v43 = vld [vmem:[#allocation26 + $0x35c] sm:$0xf]  ;;  %v9261_v24 = vld [vmem:[#allocation26 + $0x534] sm:$0xf0] }
 0x541   :  { %v9040_v50 = vor.u32 %v10840_v43, %v9037_v51  ;;  %v9264_v63 = vor.u32 %v10896_v32, %v9261_v24  ;;  %v8956_v43 = vor.u32 %v10819_v23, %v8953_v9  ;;  %v10756_v51 = vld [vmem:[#allocation26 + $0xbc] sm:$0xf]  ;;  %v8701_v32 = vld [vmem:[#allocation26 + $0xd4] sm:$0xf0]  ;;  %v8617_v9 = vld [vmem:[#allocation26 + $0x2c] sm:$0xf0] }
 0x542   :  { %v10812_v24 = vld [vmem:[#allocation26 + $0x27c] sm:$0xf] }
 0x543   :  { %6926 = vmatpush.bf16.msrb.mxu3 %v9596_v12  ;;  %6939 = vmatpush.bf16.msra.mxu0 %v9820_v0  ;;  %v4138_v12 = vperm.slane %v12527_v47, 2  ;;  %v10184_v0 = vor.u32 %v11130_v58, %v10183_v16  ;;  %v10931_v16 = vld [vmem:[#allocation26 + $0x634] sm:$0xf]  ;;  %v9401_v58 = vld [vmem:[#allocation26 + $0x64c] sm:$0xf0] }
 0x544   :  { %6952 = vmatpush.bf16.msra.mxu1 %v10044_v46  ;;  %6965 = vmatpush.bf16.msra.mxu2 %v10268_v54  ;;  %v8816_v46 = vor.u32 %v10784_v15, %v8813_v48  ;;  %v8785_v54 = vld [vmem:[#allocation26 + $0x17c] sm:$0xf0] }
 0x547   :  { %6927 = vmatpush.bf16.msrb.mxu3 %v9568_v28  ;;  %6940 = vmatpush.bf16.msra.mxu0 %v9792_v53  ;;  %v6672_v28 = vadd.f32 %v12523_v56, %v4138_v12  ;;  %v8788_v53 = vor.u32 %v10777_v2, %v8785_v54  ;;  %v10938_v56 = vld [vmem:[#allocation26 + $0x66c] sm:$0xf]  ;;  %v10924_v12 = vld [vmem:[#allocation26 + $0x5fc] sm:$0xf]  ;;  %v10749_v54 = vld [vmem:[#allocation26 + $0x84] sm:$0xf] }
 0x548   :  { %6953 = vmatpush.bf16.msra.mxu1 %v10016_v37  ;;  %6966 = vmatpush.bf16.msra.mxu2 %v10240_v55  ;;  %v9012_v37 = vor.u32 %v10833_v26, %v9009_v3  ;;  %v10826_v55 = vld [vmem:[#allocation26 + $0x2ec] sm:$0xf]  ;;  %v9432_v13 = vor.u32 %v10938_v56, %v9429_v44  ;;  %v8673_v26 = vld [vmem:[#allocation26 + $0x9c] sm:$0xf0] }
 0x549   :  { %v8984_v29 = vor.u32 %v10826_v55, %v8981_v14  ;;  %v8676_v22 = vor.u32 %v10749_v54, %v8673_v26  ;;  %v10742_v14 = vld [vmem:[#allocation26 + $0x4c] sm:$0xf] }
 0x54b   :  { %6928 = vmatpush.bf16.msrb.mxu3 %v9540_v62  ;;  %6941 = vmatpush.bf16.msra.mxu0 %v9764_v10  ;;  %v6685_v62 = vadd.f32 %v12519_v5, %v6672_v28  ;;  %v9208_v10 = vor.u32 %v10882_v39, %v9205_v59  ;;  %v8645_v39 = vld [vmem:[#allocation26 + $0x64] sm:$0xf0]  ;;  %v10798_v59 = vld [vmem:[#allocation26 + $0x20c] sm:$0xf] }
 0x54c   :  { %6954 = vmatpush.bf16.msra.mxu1 %v9988_v61  ;;  %6967 = vmatpush.bf16.msra.mxu2 %v10212_v7  ;;  %v10763_v61 = vld [vmem:[#allocation26 + $0xf4] sm:$0xf]  ;;  %v8648_v23 = vor.u32 %v10742_v14, %v8645_v39  ;;  %v11050_v14 = vld [vmem:[#allocation26 + $0x9ec] sm:$0xf] }
 0x54d   :  { %v10875_v7 = vld [vmem:[#allocation26 + $0x474] sm:$0xf]  ;;  %v6698_v5 = vadd.f32 %v12521_v57, %v6685_v62  ;;  %v8732_v48 = vor.u32 %v10763_v61, %v8729_v8  ;;  %v8869_v62 = vld [vmem:[#allocation26 + $0x224] sm:$0xf0] }
 0x54e   :  { %v9317_v61 = vld [vmem:[#allocation26 + $0x5a4] sm:$0xf0] }
 0x54f   :  { %6929 = vmatpush.bf16.msrb.mxu3 %v9512_v42  ;;  %6942 = vmatpush.bf16.msra.mxu0 %v9736_v52  ;;  %v6736_v40 = vpop.f32.mrf.mxu0  ;;  %v9180_v42 = vor.u32 %v10875_v7, %v9177_v31  ;;  %v9404_v52 = vor.u32 %v10931_v16, %v9401_v58  ;;  %v6711_v57 = vadd.f32 %v12525_v27, %v6698_v5  ;;  %v10791_v58 = vld [vmem:[#allocation26 + $0x1d4] sm:$0xf]  ;;  %v8841_v5 = vld [vmem:[#allocation26 + $0x1ec] sm:$0xf0] }
 0x550   :  { %6955 = vmatpush.bf16.msra.mxu1 %v9960_v20  ;;  %6968 = vmatpush.bf16.msra.mxu2 %v10184_v0  ;;  %v8925_v20 = vld [vmem:[#allocation26 + $0x294] sm:$0xf0]  ;;  %v8872_v7 = vor.u32 %v10798_v59, %v8869_v62  ;;  %v9877_v59 = vld [vmem:[#allocation26 + $0xa04] sm:$0xf0]  ;;  %v11162_v62 = vld [vmem:[#allocation26 + $0xd6c] sm:$0xf] }
 0x551   :  { %v9373_v0 = vld [vmem:[#allocation26 + $0x614] sm:$0xf0] }
 0x552   :  { %6930 = vmatmul.bf16.vlgmr.msrb.gmra.mxu3 %v12457_v25  ;;  %6943 = vmatmul.bf16.vlgmr.msra.gmra.mxu0 %v12459_v4  ;;  %v6749_v15 = vpop.f32.mrf.mxu1  ;;  %v9376_v3 = vor.u32 %v10924_v12, %v9373_v0  ;;  %v10157_v12 = vld [vmem:[#allocation26 + $0xc34] sm:$0xf0]  ;;  %v8844_v0 = vor.u32 %v10791_v58, %v8841_v5  ;;  %v11155_v58 = vld [vmem:[#allocation26 + $0xd34] sm:$0xf]  ;;  %v10297_v5 = vld [vmem:[#allocation26 + $0xd4c] sm:$0xf0] }
 0x553   :  { %6974 = vmatpush.bf16.msra.mxu3 %v8816_v46  ;;  %6987 = vmatpush.bf16.msrb.mxu0 %v9040_v50  ;;  %v8704_v46 = vor.u32 %v10756_v51, %v8701_v32  ;;  %v8928_v50 = vor.u32 %v10812_v24, %v8925_v20  ;;  %v11008_v32 = vld [vmem:[#allocation26 + $0x89c] sm:$0xf]  ;;  %v9709_v24 = vld [vmem:[#allocation26 + $0x8b4] sm:$0xf0] }
 0x554   :  { %7000 = vmatpush.bf16.msrb.mxu1 %v9264_v63  ;;  %7013 = vmatpush.bf16.msrb.mxu2 %v9488_v30  ;;  %v9152_v63 = vor.u32 %v10868_v36, %v9149_v33  ;;  %v10805_v30 = vld [vmem:[#allocation26 + $0x244] sm:$0xf]  ;;  %v9933_v36 = vld [vmem:[#allocation26 + $0xa74] sm:$0xf0]  ;;  %v11120_v33 = vld [vmem:[#allocation26 + $0xc1c] sm:$0xf] }
 0x555   :  { %6956 = vmatmul.bf16.vlgmr.msra.gmra.mxu1 %v12461_v19  ;;  %6969 = vmatmul.bf16.vlgmr.msra.gmra.mxu2 %v12463_v1  ;;  %v6723_v2 = vpop.f32.mrf.mxu3  ;;  %v8900_v55 = vor.u32 %v10805_v30, %v8897_v11  ;;  %v10160_v26 = vor.u32 %v11120_v33, %v10157_v12  ;;  %v11001_v30 = vld [vmem:[#allocation26 + $0x864] sm:$0xf]  ;;  %v10045_v33 = vld [vmem:[#allocation26 + $0xb54] sm:$0xf0]  ;;  %v11148_v12 = vld [vmem:[#allocation26 + $0xcfc] sm:$0xf] }
 0x556   :  { %v6724_v34 = vadd.f32 %v6723_v2, %v6711_v57  ;;  %v9712_v2 = vor.u32 %v11008_v32, %v9709_v24  ;;  %v9597_v32 = vld [vmem:[#allocation26 + $0x7d4] sm:$0xf0]  ;;  %v11036_v24 = vld [vmem:[#allocation26 + $0x97c] sm:$0xf] }
 0x557   :  { %6975 = vmatpush.bf16.msra.mxu3 %v8788_v53  ;;  %6988 = vmatpush.bf16.msrb.mxu0 %v9012_v37  ;;  %v10917_v53 = vld [vmem:[#allocation26 + $0x5c4] sm:$0xf]  ;;  %v9345_v37 = vld [vmem:[#allocation26 + $0x5dc] sm:$0xf0] }
 0x558   :  { %7001 = vmatpush.bf16.msrb.mxu1 %v9236_v6  ;;  %7014 = vmatpush.bf16.msrb.mxu2 %v9460_v18  ;;  %v6762_v28 = vpop.f32.mrf.mxu2  ;;  %v6737_v27 = vadd.f32 %v6736_v40, %v6724_v34  ;;  %v6738_v6 = vpop.f32.mrf.mxu0  ;;  %v9124_v18 = vor.u32 %v10861_v38, %v9121_v45  ;;  %v9348_v44 = vor.u32 %v10917_v53, %v9345_v37  ;;  %v10847_v40 = vld [vmem:[#allocation26 + $0x394] sm:$0xf]  ;;  %v11057_v34 = vld [vmem:[#allocation26 + $0xa24] sm:$0xf]  ;;  %v9905_v45 = vld [vmem:[#allocation26 + $0xa3c] sm:$0xf0] }
 0x559   :  { %v10129_v53 = vld [vmem:[#allocation26 + $0xbfc] sm:$0xf0]  ;;  %v11169_v37 = vld [vmem:[#allocation26 + $0xda4] sm:$0xf] }
 0x55a   :  { %v6751_v21 = vpop.f32.mrf.mxu1  ;;  %v6750_v56 = vadd.f32 %v6749_v15, %v6737_v27  ;;  %v10353_v27 = vld [vmem:[#allocation26 + $0xdbc] sm:$0xf0] }
 0x55b   :  { %6976 = vmatpush.bf16.msra.mxu3 %v8760_v35  ;;  %6989 = vmatpush.bf16.msrb.mxu0 %v8984_v29  ;;  %v10854_v35 = vld [vmem:[#allocation26 + $0x3cc] sm:$0xf]  ;;  %v9093_v29 = vld [vmem:[#allocation26 + $0x3e4] sm:$0xf0]  ;;  %v9908_v21 = vor.u32 %v11057_v34, %v9905_v45  ;;  %v10356_v39 = vor.u32 %v11169_v37, %v10353_v27  ;;  %v11085_v34 = vld [vmem:[#allocation26 + $0xb04] sm:$0xf] }
 0x55c   :  { %7002 = vmatpush.bf16.msrb.mxu1 %v9208_v10  ;;  %7015 = vmatpush.bf16.msrb.mxu2 %v9432_v13  ;;  %v10910_v10 = vld [vmem:[#allocation26 + $0x58c] sm:$0xf]  ;;  %v6763_v8 = vadd.f32 %v6762_v28, %v6750_v56  ;;  %v10735_v13 = vld [vmem:[#allocation26 + $0x14] sm:$0xf]  ;;  %v9096_v31 = vor.u32 %v10854_v35, %v9093_v29  ;;  %v11113_v28 = vld [vmem:[#allocation26 + $0xbe4] sm:$0xf] }
 0x55d   :  { %v6725_v16 = vpop.f32.mrf.mxu3  ;;  %v9320_v15 = vor.u32 %v10910_v10, %v9317_v61  ;;  %v8620_v20 = vor.u32 %v10735_v13, %v8617_v9  ;;  %v11106_v56 = vld [vmem:[#allocation26 + $0xbac] sm:$0xf]  ;;  %v10325_v35 = vld [vmem:[#allocation26 + $0xd84] sm:$0xf0]  ;;  %v9880_v10 = vor.u32 %v11050_v14, %v9877_v59  ;;  %v11043_v13 = vld [vmem:[#allocation26 + $0x9b4] sm:$0xf] }
 0x55e   :  { %11245 = vtanh.f32 %v6763_v8  ;;  %v10987_v8 = vld [vmem:[#allocation26 + $0x7f4] sm:$0xf]  ;;  %v10328_v9 = vor.u32 %v11162_v62, %v10325_v35  ;;  %v10073_v16 = vld [vmem:[#allocation26 + $0xb8c] sm:$0xf0]  ;;  %v11141_v45 = vld [vmem:[#allocation26 + $0xcc4] sm:$0xf] }
 0x55f   :  { %6977 = vmatpush.bf16.msra.mxu3 %v8732_v48  ;;  %6990 = vmatpush.bf16.msrb.mxu0 %v8956_v43  ;;  %v9065_v48 = vld [vmem:[#allocation26 + $0x3ac] sm:$0xf0]  ;;  %v10903_v43 = vld [vmem:[#allocation26 + $0x554] sm:$0xf]  ;;  %v11078_v59 = vld [vmem:[#allocation26 + $0xacc] sm:$0xf] }
 0x560   :  { %7003 = vmatpush.bf16.msrb.mxu1 %v9180_v42  ;;  %7016 = vmatpush.bf16.msrb.mxu2 %v9404_v52  ;;  %v9289_v42 = vld [vmem:[#allocation26 + $0x56c] sm:$0xf0]  ;;  %v6764_v51 = vpop.f32.mrf.mxu2  ;;  %v11064_v52 = vld [vmem:[#allocation26 + $0xa5c] sm:$0xf]  ;;  %v9068_v57 = vor.u32 %v10847_v40, %v9065_v48  ;;  %v10213_v62 = vld [vmem:[#allocation26 + $0xca4] sm:$0xf0] }
 0x561   :  { %v9936_v54 = vor.u32 %v11064_v52, %v9933_v36  ;;  %v10980_v51 = vld [vmem:[#allocation26 + $0x7bc] sm:$0xf]  ;;  %v10300_v52 = vor.u32 %v11155_v58, %v10297_v5  ;;  %v11127_v58 = vld [vmem:[#allocation26 + $0xc54] sm:$0xf]  ;;  %v10185_v5 = vld [vmem:[#allocation26 + $0xc6c] sm:$0xf0] }
 0x562   :  { %v11092_v36 = vld [vmem:[#allocation26 + $0xb3c] sm:$0xf] }
 0x563   :  { %6978 = vmatpush.bf16.msra.mxu3 %v8704_v46  ;;  %6991 = vmatpush.bf16.msrb.mxu0 %v8928_v50  ;;  %v11176_v46 = vld [vmem:[#allocation26 + $0xddc] sm:$0xf]  ;;  %v10381_v50 = vld [vmem:[#allocation26 + $0xdf4] sm:$0xf0] }
 0x564   :  { %7004 = vmatpush.bf16.msrb.mxu1 %v9152_v63  ;;  %7017 = vmatpush.bf16.msrb.mxu2 %v9376_v3  ;;  %v9292_v63 = vor.u32 %v10903_v43, %v9289_v42  ;;  %v9681_v3 = vld [vmem:[#allocation26 + $0x87c] sm:$0xf0]  ;;  %v11246_v11 = vpop.eup %11245  ;;  %v10384_v38 = vor.u32 %v11176_v46, %v10381_v50  ;;  %v10048_v50 = vor.u32 %v11092_v36, %v10045_v33 }
 0x565   :  { %7191 = vst [vmem:[#allocation29 + $0x10] sm:$0xff] %v11246_v11  ;;  %v9684_v6 = vor.u32 %v11001_v30, %v9681_v3  ;;  %v9793_v3 = vld [vmem:[#allocation26 + $0x95c] sm:$0xf0] }
 0x566   :  { %v10017_v11 = vld [vmem:[#allocation26 + $0xb1c] sm:$0xf0] }
 0x567   :  { %6979 = vmatpush.bf16.msra.mxu3 %v8676_v22  ;;  %6992 = vmatpush.bf16.msrb.mxu0 %v8900_v55  ;;  %v10132_v22 = vor.u32 %v11113_v28, %v10129_v53  ;;  %v10994_v55 = vld [vmem:[#allocation26 + $0x82c] sm:$0xf]  ;;  %v10241_v28 = vld [vmem:[#allocation26 + $0xcdc] sm:$0xf0] }
 0x568   :  { %7005 = vmatpush.bf16.msrb.mxu1 %v9124_v18  ;;  %7018 = vmatpush.bf16.msrb.mxu2 %v9348_v44  ;;  %v9653_v18 = vld [vmem:[#allocation26 + $0x844] sm:$0xf0]  ;;  %v10244_v14 = vor.u32 %v11141_v45, %v10241_v28  ;;  %v10893_v28 = vld [vmem:[#allocation26 + $0x500] sm:$0xf0] }
 0x569   :  { %v10101_v44 = vld [vmem:[#allocation26 + $0xbc4] sm:$0xf0]  ;;  %v9656_v29 = vor.u32 %v10994_v55, %v9653_v18  ;;  %v11022_v18 = vld [vmem:[#allocation26 + $0x90c] sm:$0xf] }
 0x56a   :  { %v10104_v61 = vor.u32 %v11106_v56, %v10101_v44  ;;  %v9541_v55 = vld [vmem:[#allocation26 + $0x764] sm:$0xf0]  ;;  %v11134_v44 = vld [vmem:[#allocation26 + $0xc8c] sm:$0xf] }
 0x56b   :  { %6980 = vmatpush.bf16.msra.mxu3 %v8648_v23  ;;  %6993 = vmatpush.bf16.msrb.mxu0 %v8872_v7  ;;  %v9625_v23 = vld [vmem:[#allocation26 + $0x80c] sm:$0xf0]  ;;  %v9989_v56 = vld [vmem:[#allocation26 + $0xae4] sm:$0xf0] }
 0x56c   :  { %7006 = vmatpush.bf16.msrb.mxu1 %v9096_v31  ;;  %7019 = vmatpush.bf16.msrb.mxu2 %v9320_v15  ;;  %v9849_v7 = vld [vmem:[#allocation26 + $0x9cc] sm:$0xf0]  ;;  %v11099_v31 = vld [vmem:[#allocation26 + $0xb74] sm:$0xf]  ;;  %v9628_v48 = vor.u32 %v10987_v8, %v9625_v23  ;;  %v9992_v8 = vor.u32 %v11078_v59, %v9989_v56  ;;  %v9239_v45 = vld [vmem:[#allocation26 + $0x4e8] sm:$0xf] }
 0x56d   :  { %v9852_v43 = vor.u32 %v11043_v13, %v9849_v7  ;;  %v10076_v42 = vor.u32 %v11099_v31, %v10073_v16  ;;  %v11015_v13 = vld [vmem:[#allocation26 + $0x8d4] sm:$0xf]  ;;  %v10216_v31 = vor.u32 %v11134_v44, %v10213_v62  ;;  %v9961_v16 = vld [vmem:[#allocation26 + $0xaac] sm:$0xf0]  ;;  %v10886_v56 = vld [vmem:[#allocation26 + $0x4c8] sm:$0xf0] }
 0x56e   :  { %v11071_v7 = vld [vmem:[#allocation26 + $0xa94] sm:$0xf]  ;;  %v9211_v59 = vld [vmem:[#allocation26 + $0x4b0] sm:$0xf]  ;;  %v10942_v44 = vld [vmem:[#allocation26 + $0x688] sm:$0xf0] }
 0x56f   :  { %6981 = vmatpush.bf16.msra.mxu3 %v8620_v20  ;;  %6994 = vmatpush.bf16.msrb.mxu0 %v8844_v0  ;;  %v12542_v40 = vpop.f32.mrf.mxu0  ;;  %v9821_v20 = vld [vmem:[#allocation26 + $0x994] sm:$0xf0]  ;;  %v9964_v33 = vor.u32 %v11071_v7, %v9961_v16 }
 0x570   :  { %7007 = vmatpush.bf16.msrb.mxu1 %v9068_v57  ;;  %7020 = vmatpush.bf16.msrb.mxu2 %v9292_v63  ;;  %v10269_v0 = vld [vmem:[#allocation26 + $0xd14] sm:$0xf0]  ;;  %v9600_v57 = vor.u32 %v10980_v51, %v9597_v32  ;;  %v9824_v46 = vor.u32 %v11036_v24, %v9821_v20  ;;  %v9043_v51 = vld [vmem:[#allocation26 + $0x360] sm:$0xf]  ;;  %v10844_v24 = vld [vmem:[#allocation26 + $0x378] sm:$0xf0] }
 0x571   :  { %v10272_v30 = vor.u32 %v11148_v12, %v10269_v0  ;;  %v10900_v20 = vld [vmem:[#allocation26 + $0x538] sm:$0xf0]  ;;  %v9491_v12 = vld [vmem:[#allocation26 + $0x6e0] sm:$0xf]  ;;  %v9183_v7 = vld [vmem:[#allocation26 + $0x478] sm:$0xf] }
 0x572   :  { %6982 = vmatmul.bf16.vlgmr.msra.gmra.mxu3 %v12426_v49  ;;  %6995 = vmatmul.bf16.vlgmr.msrb.gmra.mxu0 %v12428_v41  ;;  %v12544_v15 = vpop.f32.mrf.mxu1  ;;  %v10956_v0 = vld [vmem:[#allocation26 + $0x6f8] sm:$0xf0]  ;;  %v9407_v16 = vld [vmem:[#allocation26 + $0x638] sm:$0xf] }
 0x573   :  { %7026 = vmatpush.bf16.msrb.mxu3 %v9712_v2  ;;  %7039 = vmatpush.bf16.msra.mxu0 %v9936_v54  ;;  %v10973_v2 = vld [vmem:[#allocation26 + $0x784] sm:$0xf]  ;;  %v9569_v54 = vld [vmem:[#allocation26 + $0x79c] sm:$0xf0] }
 0x574   :  { %7052 = vmatpush.bf16.msra.mxu1 %v10160_v26  ;;  %7065 = vmatpush.bf16.msra.mxu2 %v10384_v38  ;;  %v11029_v26 = vld [vmem:[#allocation26 + $0x944] sm:$0xf]  ;;  %v9572_v27 = vor.u32 %v10973_v2, %v9569_v54  ;;  %v9044_v2 = vor.u32 %v10844_v24, %v9043_v51  ;;  %v10760_v24 = vld [vmem:[#allocation26 + $0xd8] sm:$0xf0] }
 0x575   :  { %7008 = vmatmul.bf16.vlgmr.msrb.gmra.mxu1 %v12430_v17  ;;  %7021 = vmatmul.bf16.vlgmr.msrb.gmra.mxu2 %v12435_v60  ;;  %v12546_v63 = vpop.f32.mrf.mxu3 }
 0x577   :  { %7027 = vmatpush.bf16.msrb.mxu3 %v9684_v6  ;;  %7040 = vmatpush.bf16.msra.mxu0 %v9908_v21  ;;  %v6790_v53 = vpop.f32.mrf.mxu0  ;;  %v9796_v6 = vor.u32 %v11029_v26, %v9793_v3  ;;  %v10020_v21 = vor.u32 %v11085_v34, %v10017_v11  ;;  %v8791_v26 = vld [vmem:[#allocation26 + $0x168] sm:$0xf]  ;;  %v9492_v34 = vor.u32 %v10956_v0, %v9491_v12  ;;  %v10837_v11 = vld [vmem:[#allocation26 + $0x340] sm:$0xf0]  ;;  %v10872_v12 = vld [vmem:[#allocation26 + $0x458] sm:$0xf0] }
 0x578   :  { %7053 = vmatpush.bf16.msra.mxu1 %v10132_v22  ;;  %7066 = vmatpush.bf16.msra.mxu2 %v10356_v39  ;;  %v12548_v38 = vpop.f32.mrf.mxu2  ;;  %v10966_v22 = vld [vmem:[#allocation26 + $0x74c] sm:$0xf]  ;;  %v9765_v39 = vld [vmem:[#allocation26 + $0x924] sm:$0xf0]  ;;  %v9379_v0 = vld [vmem:[#allocation26 + $0x600] sm:$0xf] }
 0x579   :  { %v9544_v35 = vor.u32 %v10966_v22, %v9541_v55  ;;  %v9015_v3 = vld [vmem:[#allocation26 + $0x328] sm:$0xf]  ;;  %v8763_v22 = vld [vmem:[#allocation26 + $0x130] sm:$0xf]  ;;  %v10774_v55 = vld [vmem:[#allocation26 + $0x148] sm:$0xf0] }
 0x57a   :  { %v6803_v37 = vpop.f32.mrf.mxu1  ;;  %v9463_v53 = vld [vmem:[#allocation26 + $0x6a8] sm:$0xf] }
 0x57b   :  { %7028 = vmatpush.bf16.msrb.mxu3 %v9656_v29  ;;  %7041 = vmatpush.bf16.msra.mxu0 %v9880_v10  ;;  %v10959_v29 = vld [vmem:[#allocation26 + $0x714] sm:$0xf]  ;;  %v9513_v10 = vld [vmem:[#allocation26 + $0x72c] sm:$0xf0]  ;;  %v10949_v37 = vld [vmem:[#allocation26 + $0x6c0] sm:$0xf0] }
 0x57c   :  { %7054 = vmatpush.bf16.msra.mxu1 %v10104_v61  ;;  %7067 = vmatpush.bf16.msra.mxu2 %v10328_v9  ;;  %v9768_v61 = vor.u32 %v11022_v18, %v9765_v39  ;;  %v9737_v9 = vld [vmem:[#allocation26 + $0x8ec] sm:$0xf0]  ;;  %v9516_v32 = vor.u32 %v10959_v29, %v9513_v10  ;;  %v10830_v39 = vld [vmem:[#allocation26 + $0x308] sm:$0xf0]  ;;  %v9212_v10 = vor.u32 %v10886_v56, %v9211_v59 }
 0x57d   :  { %v6777_v23 = vpop.f32.mrf.mxu3  ;;  %v9740_v36 = vor.u32 %v11015_v13, %v9737_v9  ;;  %v8987_v18 = vld [vmem:[#allocation26 + $0x2f0] sm:$0xf]  ;;  %v10823_v9 = vld [vmem:[#allocation26 + $0x2d0] sm:$0xf0] }
 0x57e   :  { %v8988_v29 = vor.u32 %v10830_v39, %v8987_v18  ;;  %v8959_v23 = vld [vmem:[#allocation26 + $0x2b8] sm:$0xf]  ;;  %v10746_v39 = vld [vmem:[#allocation26 + $0x68] sm:$0xf0]  ;;  %v8875_v59 = vld [vmem:[#allocation26 + $0x210] sm:$0xf] }
 0x57f   :  { %7029 = vmatpush.bf16.msrb.mxu3 %v9628_v48  ;;  %7042 = vmatpush.bf16.msra.mxu0 %v9852_v43  ;;  %v8819_v43 = vld [vmem:[#allocation26 + $0x1a0] sm:$0xf] }
 0x580   :  { %7055 = vmatpush.bf16.msra.mxu1 %v10076_v42  ;;  %7068 = vmatpush.bf16.msra.mxu2 %v10300_v52  ;;  %v6816_v48 = vpop.f32.mrf.mxu2  ;;  %v10788_v42 = vld [vmem:[#allocation26 + $0x1b8] sm:$0xf0]  ;;  %v9267_v52 = vld [vmem:[#allocation26 + $0x520] sm:$0xf] }
 0x581   :  { %v9268_v54 = vor.u32 %v10900_v20, %v9267_v52  ;;  %v8931_v52 = vld [vmem:[#allocation26 + $0x280] sm:$0xf] }
 0x583   :  { %7030 = vmatpush.bf16.msrb.mxu3 %v9600_v57  ;;  %7043 = vmatpush.bf16.msra.mxu0 %v9824_v46  ;;  %v4139_v57 = vperm.slane %v12527_v47, 3  ;;  %v10188_v46 = vor.u32 %v11127_v58, %v10185_v5  ;;  %v10935_v58 = vld [vmem:[#allocation26 + $0x650] sm:$0xf0] }
 0x584   :  { %7056 = vmatpush.bf16.msra.mxu1 %v10048_v50  ;;  %7069 = vmatpush.bf16.msra.mxu2 %v10272_v30  ;;  %v8820_v50 = vor.u32 %v10788_v42, %v8819_v43  ;;  %v10781_v30 = vld [vmem:[#allocation26 + $0x180] sm:$0xf0]  ;;  %v8960_v42 = vor.u32 %v10823_v9, %v8959_v23  ;;  %v9408_v20 = vor.u32 %v10935_v58, %v9407_v16  ;;  %v8623_v23 = vld [vmem:[#allocation26 + $0x18] sm:$0xf]  ;;  %v10795_v58 = vld [vmem:[#allocation26 + $0x1f0] sm:$0xf0] }
 0x585   :  { %v8792_v47 = vor.u32 %v10781_v30, %v8791_v26  ;;  %v8679_v26 = vld [vmem:[#allocation26 + $0x88] sm:$0xf]  ;;  %v10753_v30 = vld [vmem:[#allocation26 + $0xa0] sm:$0xf0]  ;;  %v8847_v16 = vld [vmem:[#allocation26 + $0x1d8] sm:$0xf] }
 0x587   :  { %7031 = vmatpush.bf16.msrb.mxu3 %v9572_v27  ;;  %7044 = vmatpush.bf16.msra.mxu0 %v9796_v6  ;;  %v6776_v27 = vadd.f32 %v12546_v63, %v4139_v57  ;;  %v9016_v6 = vor.u32 %v10837_v11, %v9015_v3  ;;  %v9435_v63 = vld [vmem:[#allocation26 + $0x670] sm:$0xf]  ;;  %v10928_v57 = vld [vmem:[#allocation26 + $0x618] sm:$0xf0]  ;;  %v8903_v3 = vld [vmem:[#allocation26 + $0x248] sm:$0xf] }
 0x588   :  { %7057 = vmatpush.bf16.msra.mxu1 %v10020_v21  ;;  %7070 = vmatpush.bf16.msra.mxu2 %v10244_v14  ;;  %v9240_v21 = vor.u32 %v10893_v28, %v9239_v45  ;;  %v9464_v14 = vor.u32 %v10949_v37, %v9463_v53  ;;  %v9436_v13 = vor.u32 %v10942_v44, %v9435_v63  ;;  %v10809_v45 = vld [vmem:[#allocation26 + $0x260] sm:$0xf0]  ;;  %v9127_v28 = vld [vmem:[#allocation26 + $0x408] sm:$0xf]  ;;  %v10802_v44 = vld [vmem:[#allocation26 + $0x228] sm:$0xf0] }
 0x589   :  { %v6789_v62 = vadd.f32 %v12542_v40, %v6776_v27  ;;  %v10865_v53 = vld [vmem:[#allocation26 + $0x420] sm:$0xf0]  ;;  %v9351_v27 = vld [vmem:[#allocation26 + $0x5c8] sm:$0xf]  ;;  %v8876_v9 = vor.u32 %v10802_v44, %v8875_v59  ;;  %v10107_v59 = vld [vmem:[#allocation26 + $0xbb0] sm:$0xf] }
 0x58a   :  { %v9128_v18 = vor.u32 %v10865_v53, %v9127_v28  ;;  %v11061_v28 = vld [vmem:[#allocation26 + $0xa40] sm:$0xf0]  ;;  %v10135_v53 = vld [vmem:[#allocation26 + $0xbe8] sm:$0xf]  ;;  %v11166_v44 = vld [vmem:[#allocation26 + $0xd88] sm:$0xf0] }
 0x58b   :  { %7032 = vmatpush.bf16.msrb.mxu3 %v9544_v35  ;;  %7045 = vmatpush.bf16.msra.mxu0 %v9768_v61  ;;  %v8764_v35 = vor.u32 %v10774_v55, %v8763_v22  ;;  %v8735_v61 = vld [vmem:[#allocation26 + $0xf8] sm:$0xf]  ;;  %v6802_v40 = vadd.f32 %v12544_v15, %v6789_v62  ;;  %v8680_v22 = vor.u32 %v10753_v30, %v8679_v26  ;;  %v9099_v62 = vld [vmem:[#allocation26 + $0x3d0] sm:$0xf]  ;;  %v9687_v30 = vld [vmem:[#allocation26 + $0x868] sm:$0xf] }
 0x58c   :  { %7058 = vmatpush.bf16.msra.mxu1 %v9992_v8  ;;  %7071 = vmatpush.bf16.msra.mxu2 %v10216_v31  ;;  %v10767_v8 = vld [vmem:[#allocation26 + $0x110] sm:$0xf0]  ;;  %v8904_v55 = vor.u32 %v10809_v45, %v8903_v3  ;;  %v11005_v3 = vld [vmem:[#allocation26 + $0x880] sm:$0xf0] }
 0x58d   :  { %v10879_v31 = vld [vmem:[#allocation26 + $0x490] sm:$0xf0]  ;;  %v8736_v43 = vor.u32 %v10767_v8, %v8735_v61  ;;  %v6815_v15 = vadd.f32 %v12548_v38, %v6802_v40  ;;  %v9071_v40 = vld [vmem:[#allocation26 + $0x398] sm:$0xf] }
 0x58e   :  { %v9184_v51 = vor.u32 %v10879_v31, %v9183_v7 }
 0x58f   :  { %7033 = vmatpush.bf16.msrb.mxu3 %v9516_v32  ;;  %7046 = vmatpush.bf16.msra.mxu0 %v9740_v36  ;;  %v6840_v5 = vpop.f32.mrf.mxu0  ;;  %v8707_v32 = vld [vmem:[#allocation26 + $0xc0] sm:$0xf]  ;;  %v10816_v36 = vld [vmem:[#allocation26 + $0x298] sm:$0xf0] }
 0x590   :  { %7059 = vmatpush.bf16.msra.mxu1 %v9964_v33  ;;  %7072 = vmatpush.bf16.msra.mxu2 %v10188_v46  ;;  %v9155_v33 = vld [vmem:[#allocation26 + $0x440] sm:$0xf]  ;;  %v8708_v46 = vor.u32 %v10760_v24, %v8707_v32  ;;  %v11012_v24 = vld [vmem:[#allocation26 + $0x8b8] sm:$0xf0] }
 0x591   :  { %v9715_v32 = vld [vmem:[#allocation26 + $0x8a0] sm:$0xf] }
 0x592   :  { %7034 = vmatmul.bf16.vlgmr.msrb.gmra.mxu3 %v12457_v25  ;;  %7047 = vmatmul.bf16.vlgmr.msra.gmra.mxu0 %v12459_v4  ;;  %v6853_v48 = vpop.f32.mrf.mxu1 }
 0x593   :  { %7078 = vmatpush.bf16.msra.mxu3 %v8820_v50  ;;  %7091 = vmatpush.bf16.msrb.mxu0 %v9044_v2  ;;  %v8932_v50 = vor.u32 %v10816_v36, %v8931_v52  ;;  %v9156_v2 = vor.u32 %v10872_v12, %v9155_v33  ;;  %v9939_v52 = vld [vmem:[#allocation26 + $0xa60] sm:$0xf]  ;;  %v11068_v36 = vld [vmem:[#allocation26 + $0xa78] sm:$0xf0] }
 0x594   :  { %7104 = vmatpush.bf16.msrb.mxu1 %v9268_v54  ;;  %7117 = vmatpush.bf16.msrb.mxu2 %v9492_v34  ;;  %v9380_v34 = vor.u32 %v10928_v57, %v9379_v0  ;;  %v10163_v33 = vld [vmem:[#allocation26 + $0xc20] sm:$0xf]  ;;  %v11124_v12 = vld [vmem:[#allocation26 + $0xc38] sm:$0xf0]  ;;  %v8848_v0 = vor.u32 %v10795_v58, %v8847_v16 }
 0x595   :  { %7060 = vmatmul.bf16.vlgmr.msra.gmra.mxu1 %v12461_v19  ;;  %7073 = vmatmul.bf16.vlgmr.msra.gmra.mxu2 %v12463_v1  ;;  %v6827_v54 = vpop.f32.mrf.mxu3  ;;  %v10164_v26 = vor.u32 %v11124_v12, %v10163_v33 }
 0x596   :  { %v6828_v11 = vadd.f32 %v6827_v54, %v6815_v15  ;;  %v10387_v15 = vld [vmem:[#allocation26 + $0xde0] sm:$0xf]  ;;  %v9940_v54 = vor.u32 %v11068_v36, %v9939_v52  ;;  %v11152_v52 = vld [vmem:[#allocation26 + $0xd18] sm:$0xf0] }
 0x597   :  { %7079 = vmatpush.bf16.msra.mxu3 %v8792_v47  ;;  %7092 = vmatpush.bf16.msrb.mxu0 %v9016_v6  ;;  %v10921_v47 = vld [vmem:[#allocation26 + $0x5e0] sm:$0xf0]  ;;  %v6842_v6 = vpop.f32.mrf.mxu0 }
 0x598   :  { %7105 = vmatpush.bf16.msrb.mxu1 %v9240_v21  ;;  %7118 = vmatpush.bf16.msrb.mxu2 %v9464_v14  ;;  %v6866_v37 = vpop.f32.mrf.mxu2  ;;  %v6841_v38 = vadd.f32 %v6840_v5, %v6828_v11  ;;  %v8651_v14 = vld [vmem:[#allocation26 + $0x50] sm:$0xf]  ;;  %v9352_v63 = vor.u32 %v10921_v47, %v9351_v27  ;;  %v10359_v27 = vld [vmem:[#allocation26 + $0xda8] sm:$0xf]  ;;  %v11173_v47 = vld [vmem:[#allocation26 + $0xdc0] sm:$0xf0] }
 0x599   :  { %v8652_v8 = vor.u32 %v10746_v39, %v8651_v14  ;;  %v10360_v14 = vor.u32 %v11173_v47, %v10359_v27  ;;  %v11054_v39 = vld [vmem:[#allocation26 + $0xa08] sm:$0xf0]  ;;  %v9771_v47 = vld [vmem:[#allocation26 + $0x910] sm:$0xf] }
 0x59a   :  { %v6855_v21 = vpop.f32.mrf.mxu1  ;;  %v6854_v56 = vadd.f32 %v6853_v48, %v6841_v38  ;;  %v10851_v48 = vld [vmem:[#allocation26 + $0x3b0] sm:$0xf0]  ;;  %v9688_v38 = vor.u32 %v11005_v3, %v9687_v30  ;;  %v10247_v30 = vld [vmem:[#allocation26 + $0xcc8] sm:$0xf]  ;;  %v11145_v3 = vld [vmem:[#allocation26 + $0xce0] sm:$0xf0] }
 0x59b   :  { %7080 = vmatpush.bf16.msra.mxu3 %v8764_v35  ;;  %7093 = vmatpush.bf16.msrb.mxu0 %v8988_v29  ;;  %v10858_v35 = vld [vmem:[#allocation26 + $0x3e8] sm:$0xf0]  ;;  %v9323_v29 = vld [vmem:[#allocation26 + $0x590] sm:$0xf]  ;;  %v9072_v57 = vor.u32 %v10851_v48, %v9071_v40  ;;  %v9603_v40 = vld [vmem:[#allocation26 + $0x7c0] sm:$0xf] }
 0x59c   :  { %7106 = vmatpush.bf16.msrb.mxu1 %v9212_v10  ;;  %7119 = vmatpush.bf16.msrb.mxu2 %v9436_v13  ;;  %v10914_v10 = vld [vmem:[#allocation26 + $0x5a8] sm:$0xf0]  ;;  %v6867_v61 = vadd.f32 %v6866_v37, %v6854_v56  ;;  %v10739_v13 = vld [vmem:[#allocation26 + $0x30] sm:$0xf0]  ;;  %v9100_v7 = vor.u32 %v10858_v35, %v9099_v62  ;;  %v11117_v37 = vld [vmem:[#allocation26 + $0xc00] sm:$0xf0] }
 0x59d   :  { %v6829_v31 = vpop.f32.mrf.mxu3  ;;  %v9324_v5 = vor.u32 %v10914_v10, %v9323_v29  ;;  %v10136_v21 = vor.u32 %v11117_v37, %v10135_v53  ;;  %v11110_v56 = vld [vmem:[#allocation26 + $0xbc8] sm:$0xf0]  ;;  %v9631_v10 = vld [vmem:[#allocation26 + $0x7f8] sm:$0xf]  ;;  %v9827_v48 = vld [vmem:[#allocation26 + $0x980] sm:$0xf] }
 0x59e   :  { %11247 = vtanh.f32 %v6867_v61  ;;  %v10108_v29 = vor.u32 %v11110_v56, %v10107_v59  ;;  %v9855_v61 = vld [vmem:[#allocation26 + $0x9b8] sm:$0xf]  ;;  %v9547_v37 = vld [vmem:[#allocation26 + $0x750] sm:$0xf]  ;;  %v10970_v27 = vld [vmem:[#allocation26 + $0x768] sm:$0xf0] }
 0x59f   :  { %7081 = vmatpush.bf16.msra.mxu3 %v8736_v43  ;;  %7094 = vmatpush.bf16.msrb.mxu0 %v8960_v42  ;;  %v9295_v43 = vld [vmem:[#allocation26 + $0x558] sm:$0xf]  ;;  %v10907_v42 = vld [vmem:[#allocation26 + $0x570] sm:$0xf0] }
 0x5a0   :  { %7107 = vmatpush.bf16.msrb.mxu1 %v9184_v51  ;;  %7120 = vmatpush.bf16.msrb.mxu2 %v9408_v20  ;;  %v6868_v51 = vpop.f32.mrf.mxu2  ;;  %v8624_v20 = vor.u32 %v10739_v13, %v8623_v23  ;;  %v11047_v23 = vld [vmem:[#allocation26 + $0x9d0] sm:$0xf0]  ;;  %v10079_v13 = vld [vmem:[#allocation26 + $0xb78] sm:$0xf] }
 0x5a1   :  { %v9856_v16 = vor.u32 %v11047_v23, %v9855_v61  ;;  %v10051_v51 = vld [vmem:[#allocation26 + $0xb40] sm:$0xf]  ;;  %v11131_v23 = vld [vmem:[#allocation26 + $0xc70] sm:$0xf0] }
 0x5a3   :  { %7082 = vmatpush.bf16.msra.mxu3 %v8708_v46  ;;  %7095 = vmatpush.bf16.msrb.mxu0 %v8932_v50  ;;  %v11180_v46 = vld [vmem:[#allocation26 + $0xdf8] sm:$0xf0]  ;;  %v9296_v50 = vor.u32 %v10907_v42, %v9295_v43 }
 0x5a4   :  { %7108 = vmatpush.bf16.msrb.mxu1 %v9156_v2  ;;  %7121 = vmatpush.bf16.msrb.mxu2 %v9380_v34  ;;  %v9716_v2 = vor.u32 %v11012_v24, %v9715_v32  ;;  %v9911_v34 = vld [vmem:[#allocation26 + $0xa28] sm:$0xf]  ;;  %v11248_v11 = vpop.eup %11247  ;;  %v10388_v45 = vor.u32 %v11180_v46, %v10387_v15  ;;  %v11040_v42 = vld [vmem:[#allocation26 + $0x998] sm:$0xf0]  ;;  %v10275_v24 = vld [vmem:[#allocation26 + $0xd00] sm:$0xf] }
 0x5a5   :  { %7192 = vst [vmem:[#allocation29 + $0x18] sm:$0xff] %v11248_v11  ;;  %v9912_v6 = vor.u32 %v11061_v28, %v9911_v34  ;;  %v11096_v32 = vld [vmem:[#allocation26 + $0xb58] sm:$0xf0]  ;;  %v9828_v36 = vor.u32 %v11040_v42, %v9827_v48  ;;  %v9799_v15 = vld [vmem:[#allocation26 + $0x948] sm:$0xf]  ;;  %v10276_v46 = vor.u32 %v11152_v52, %v10275_v24 }
 0x5a6   :  { %v10052_v33 = vor.u32 %v11096_v32, %v10051_v51 }
 0x5a7   :  { %7083 = vmatpush.bf16.msra.mxu3 %v8680_v22  ;;  %7096 = vmatpush.bf16.msrb.mxu0 %v8904_v55  ;;  %v9659_v22 = vld [vmem:[#allocation26 + $0x830] sm:$0xf]  ;;  %v10998_v55 = vld [vmem:[#allocation26 + $0x848] sm:$0xf0] }
 0x5a8   :  { %7109 = vmatpush.bf16.msrb.mxu1 %v9128_v18  ;;  %7122 = vmatpush.bf16.msrb.mxu2 %v9352_v63  ;;  %v9883_v18 = vld [vmem:[#allocation26 + $0x9f0] sm:$0xf]  ;;  %v9660_v62 = vor.u32 %v10998_v55, %v9659_v22  ;;  %v11082_v22 = vld [vmem:[#allocation26 + $0xae8] sm:$0xf0] }
 0x5a9   :  { %v10331_v63 = vld [vmem:[#allocation26 + $0xd70] sm:$0xf]  ;;  %v9884_v35 = vor.u32 %v11054_v39, %v9883_v18  ;;  %v11138_v18 = vld [vmem:[#allocation26 + $0xca8] sm:$0xf0] }
 0x5aa   :  { %v10219_v55 = vld [vmem:[#allocation26 + $0xc90] sm:$0xf] }
 0x5ab   :  { %7084 = vmatpush.bf16.msra.mxu3 %v8652_v8  ;;  %7097 = vmatpush.bf16.msrb.mxu0 %v8876_v9  ;;  %v10332_v8 = vor.u32 %v11166_v44, %v10331_v63  ;;  %v10303_v9 = vld [vmem:[#allocation26 + $0xd38] sm:$0xf]  ;;  %v10963_v44 = vld [vmem:[#allocation26 + $0x730] sm:$0xf0] }
 0x5ac   :  { %7110 = vmatpush.bf16.msrb.mxu1 %v9100_v7  ;;  %7123 = vmatpush.bf16.msrb.mxu2 %v9324_v5  ;;  %v10984_v5 = vld [vmem:[#allocation26 + $0x7d8] sm:$0xf0]  ;;  %v9519_v63 = vld [vmem:[#allocation26 + $0x718] sm:$0xf] }
 0x5af   :  { %7085 = vmatpush.bf16.msra.mxu3 %v8624_v20  ;;  %7098 = vmatpush.bf16.msrb.mxu0 %v8848_v0  ;;  %v12563_v7 = vpop.f32.mrf.mxu0  ;;  %v9604_v20 = vor.u32 %v10984_v5, %v9603_v40  ;;  %v9575_v0 = vld [vmem:[#allocation26 + $0x788] sm:$0xf] }
 0x5b0   :  { %7111 = vmatpush.bf16.msrb.mxu1 %v9072_v57  ;;  %7124 = vmatpush.bf16.msrb.mxu2 %v9296_v50  ;;  %v10977_v57 = vld [vmem:[#allocation26 + $0x7a0] sm:$0xf0] }
 0x5b1   :  { %v11033_v50 = vld [vmem:[#allocation26 + $0x960] sm:$0xf0] }
 0x5b2   :  { %7086 = vmatmul.bf16.vlgmr.msra.gmra.mxu3 %v12426_v49  ;;  %7099 = vmatmul.bf16.vlgmr.msrb.gmra.mxu0 %v12428_v41  ;;  %v10991_v49 = vld [vmem:[#allocation26 + $0x810] sm:$0xf0]  ;;  %v9800_v28 = vor.u32 %v11033_v50, %v9799_v15 }
 0x5b3   :  { %7130 = vmatpush.bf16.msrb.mxu3 %v9716_v2  ;;  %7143 = vmatpush.bf16.msra.mxu0 %v9940_v54  ;;  %v11103_v41 = vld [vmem:[#allocation26 + $0xb90] sm:$0xf0]  ;;  %v9632_v31 = vor.u32 %v10991_v49, %v9631_v10  ;;  %v10023_v2 = vld [vmem:[#allocation26 + $0xb08] sm:$0xf]  ;;  %v11089_v54 = vld [vmem:[#allocation26 + $0xb20] sm:$0xf0] }
 0x5b4   :  { %7156 = vmatpush.bf16.msra.mxu1 %v10164_v26  ;;  %7169 = vmatpush.bf16.msra.mxu2 %v10388_v45  ;;  %v10080_v58 = vor.u32 %v11103_v41, %v10079_v13  ;;  %v9576_v45 = vor.u32 %v10977_v57, %v9575_v0  ;;  %v10024_v53 = vor.u32 %v11089_v54, %v10023_v2  ;;  %v9967_v10 = vld [vmem:[#allocation26 + $0xa98] sm:$0xf]  ;;  %v11075_v49 = vld [vmem:[#allocation26 + $0xab0] sm:$0xf0] }
 0x5b5   :  { %7112 = vmatmul.bf16.vlgmr.msrb.gmra.mxu1 %v12430_v17  ;;  %7125 = vmatmul.bf16.vlgmr.msrb.gmra.mxu2 %v12435_v60  ;;  %v11159_v17 = vld [vmem:[#allocation26 + $0xd50] sm:$0xf0]  ;;  %v12565_v60 = vpop.f32.mrf.mxu1  ;;  %v6879_v12 = vpop.f32.mrf.mxu3  ;;  %v9520_v13 = vor.u32 %v10963_v44, %v9519_v63 }
 0x5b6   :  { %v10304_v43 = vor.u32 %v11159_v17, %v10303_v9  ;;  %v9968_v9 = vor.u32 %v11075_v49, %v9967_v10  ;;  %v12567_v17 = vld [vmem:[#allocation28] sm:$0xff] }
 0x5b7   :  { %7131 = vmatpush.bf16.msrb.mxu3 %v9688_v38  ;;  %7144 = vmatpush.bf16.msra.mxu0 %v9912_v6  ;;  %v6894_v34 = vpop.f32.mrf.mxu0  ;;  %v10248_v38 = vor.u32 %v11145_v3, %v10247_v30  ;;  %v11026_v6 = vld [vmem:[#allocation26 + $0x928] sm:$0xf0]  ;;  %v4141_v2 = vperm.slane %v12567_v17, 5 }
 0x5b8   :  { %7157 = vmatpush.bf16.msra.mxu1 %v10136_v21  ;;  %7170 = vmatpush.bf16.msra.mxu2 %v10360_v14  ;;  %v6918_v26 = vpop.f32.mrf.mxu2  ;;  %v9995_v21 = vld [vmem:[#allocation26 + $0xad0] sm:$0xf]  ;;  %v9548_v14 = vor.u32 %v10970_v27, %v9547_v37  ;;  %v9772_v39 = vor.u32 %v11026_v6, %v9771_v47 }
 0x5b9   :  { %v9996_v59 = vor.u32 %v11082_v22, %v9995_v21 }
 0x5bb   :  { %7132 = vmatpush.bf16.msrb.mxu3 %v9660_v62  ;;  %7145 = vmatpush.bf16.msra.mxu0 %v9884_v35  ;;  %v9743_v62 = vld [vmem:[#allocation26 + $0x8d8] sm:$0xf]  ;;  %v10220_v35 = vor.u32 %v11138_v18, %v10219_v55 }
 0x5bc   :  { %7158 = vmatpush.bf16.msra.mxu1 %v10108_v29  ;;  %7171 = vmatpush.bf16.msra.mxu2 %v10332_v8  ;;  %v11019_v29 = vld [vmem:[#allocation26 + $0x8f0] sm:$0xf0]  ;;  %v10191_v8 = vld [vmem:[#allocation26 + $0xc58] sm:$0xf] }
 0x5bd   :  { %v6907_v11 = vpop.f32.mrf.mxu1  ;;  %v6881_v56 = vpop.f32.mrf.mxu3  ;;  %v9744_v41 = vor.u32 %v11019_v29, %v9743_v62 }
 0x5bf   :  { %7133 = vmatpush.bf16.msrb.mxu3 %v9632_v31  ;;  %7146 = vmatpush.bf16.msra.mxu0 %v9856_v16  ;;  %v4140_v31 = vperm.slane %v12567_v17, 4  ;;  %v10192_v16 = vor.u32 %v11131_v23, %v10191_v8 }
 0x5c0   :  { %7159 = vmatpush.bf16.msra.mxu1 %v10080_v58  ;;  %7172 = vmatpush.bf16.msra.mxu2 %v10304_v43  ;;  %v6920_v61 = vpop.f32.mrf.mxu2 }
 0x5c1   :  { %v6880_v58 = vadd.f32 %v6879_v12, %v4140_v31 }
 0x5c3   :  { %7134 = vmatpush.bf16.msrb.mxu3 %v9604_v20  ;;  %7147 = vmatpush.bf16.msra.mxu0 %v9828_v36  ;;  %v6893_v40 = vadd.f32 %v12563_v7, %v6880_v58 }
 0x5c4   :  { %7160 = vmatpush.bf16.msra.mxu1 %v10052_v33  ;;  %7173 = vmatpush.bf16.msra.mxu2 %v10276_v46 }
 0x5c5   :  { %v6906_v5 = vadd.f32 %v12565_v60, %v6893_v40 }
 0x5c7   :  { %7135 = vmatpush.bf16.msrb.mxu3 %v9576_v45  ;;  %7148 = vmatpush.bf16.msra.mxu0 %v9800_v28  ;;  %v6919_v42 = vadd.f32 %v6918_v26, %v6906_v5 }
 0x5c8   :  { %7161 = vmatpush.bf16.msra.mxu1 %v10024_v53  ;;  %7174 = vmatpush.bf16.msra.mxu2 %v10248_v38 }
 0x5cb   :  { %7136 = vmatpush.bf16.msrb.mxu3 %v9548_v14  ;;  %7149 = vmatpush.bf16.msra.mxu0 %v9772_v39 }
 0x5cc   :  { %7162 = vmatpush.bf16.msra.mxu1 %v9996_v59  ;;  %7175 = vmatpush.bf16.msra.mxu2 %v10220_v35  ;;  %v4142_v35 = vperm.slane %v12567_v17, 6 }
 0x5cf   :  { %7137 = vmatpush.bf16.msrb.mxu3 %v9520_v13  ;;  %7150 = vmatpush.bf16.msra.mxu0 %v9744_v41  ;;  %v6944_v48 = vpop.f32.mrf.mxu0 }
 0x5d0   :  { %7163 = vmatpush.bf16.msra.mxu1 %v9968_v9  ;;  %7176 = vmatpush.bf16.msra.mxu2 %v10192_v16 }
 0x5d2   :  { %7138 = vmatmul.bf16.vlgmr.msrb.gmra.mxu3 %v12457_v25  ;;  %7151 = vmatmul.bf16.vlgmr.msra.gmra.mxu0 %v12459_v4  ;;  %v6957_v43 = vpop.f32.mrf.mxu1 }
 0x5d3   :  { %7164 = vmatmul.bf16.vlgmr.msra.gmra.mxu1 %v12461_v19  ;;  %7177 = vmatmul.bf16.vlgmr.msra.gmra.mxu2 %v12463_v1 }
 0x5d5   :  { %v6931_v51 = vpop.f32.mrf.mxu3 }
 0x5d6   :  { %v6932_v32 = vadd.f32 %v6931_v51, %v6919_v42 }
 0x5d7   :  { %v6946_v20 = vpop.f32.mrf.mxu0 }
 0x5d8   :  { %v6970_v24 = vpop.f32.mrf.mxu2  ;;  %v6945_v52 = vadd.f32 %v6944_v48, %v6932_v32 }
 0x5da   :  { %v6959_v36 = vpop.f32.mrf.mxu1  ;;  %v6958_v25 = vadd.f32 %v6957_v43, %v6945_v52 }
 0x5dc   :  { %v6971_v33 = vadd.f32 %v6970_v24, %v6958_v25 }
 0x5dd   :  { %v6933_v4 = vpop.f32.mrf.mxu3 }
 0x5de   :  { %11249 = vtanh.f32 %v6971_v33 }
 0x5e0   :  { %v6972_v19 = vpop.f32.mrf.mxu2 }
 0x5e4   :  { %v11250_v12 = vpop.eup %11249 }
 0x5e5   :  { %7193 = vst [vmem:[#allocation29 + $0x20] sm:$0xff] %v11250_v12 }
 0x5ef   :  { %v6996_v1 = vpop.f32.mrf.mxu0 }
 0x5f2   :  { %v7009_v7 = vpop.f32.mrf.mxu1 }
 0x5f5   :  { %v6983_v0 = vpop.f32.mrf.mxu3 }
 0x5f6   :  { %v6984_v54 = vadd.f32 %v6983_v0, %v4141_v2 }
 0x5f7   :  { %v6998_v57 = vpop.f32.mrf.mxu0 }
 0x5f8   :  { %v7022_v60 = vpop.f32.mrf.mxu2  ;;  %v6997_v26 = vadd.f32 %v6996_v1, %v6984_v54 }
 0x5fa   :  { %v7011_v15 = vpop.f32.mrf.mxu1  ;;  %v7010_v30 = vadd.f32 %v7009_v7, %v6997_v26 }
 0x5fc   :  { %v7023_v11 = vadd.f32 %v7022_v60, %v7010_v30 }
 0x5fd   :  { %v6985_v46 = vpop.f32.mrf.mxu3 }
 0x600   :  { %v7024_v50 = vpop.f32.mrf.mxu2 }
 0x60f   :  { %v7048_v3 = vpop.f32.mrf.mxu0 }
 0x612   :  { %v7061_v34 = vpop.f32.mrf.mxu1 }
 0x615   :  { %v7035_v45 = vpop.f32.mrf.mxu3 }
 0x616   :  { %v7036_v28 = vadd.f32 %v7035_v45, %v7023_v11 }
 0x617   :  { %v7050_v27 = vpop.f32.mrf.mxu0 }
 0x618   :  { %v7074_v53 = vpop.f32.mrf.mxu2  ;;  %v7049_v37 = vadd.f32 %v7048_v3, %v7036_v28 }
 0x61a   :  { %v7063_v47 = vpop.f32.mrf.mxu1  ;;  %v7062_v38 = vadd.f32 %v7061_v34, %v7049_v37 }
 0x61c   :  { %v7075_v6 = vadd.f32 %v7074_v53, %v7062_v38 }
 0x61d   :  { %v7037_v21 = vpop.f32.mrf.mxu3 }
 0x61e   :  { %11251 = vtanh.f32 %v7075_v6 }
 0x620   :  { %v7076_v22 = vpop.f32.mrf.mxu2 }
 0x624   :  { %v11252_v55 = vpop.eup %11251 }
 0x625   :  { %7194 = vst [vmem:[#allocation29 + $0x28] sm:$0xff] %v11252_v55 }
 0x62f   :  { %v7100_v18 = vpop.f32.mrf.mxu0 }
 0x632   :  { %v7113_v14 = vpop.f32.mrf.mxu1 }
 0x635   :  { %v7087_v39 = vpop.f32.mrf.mxu3 }
 0x636   :  { %v7088_v29 = vadd.f32 %v7087_v39, %v4142_v35 }
 0x637   :  { %v7102_v56 = vpop.f32.mrf.mxu0 }
 0x638   :  { %v7126_v59 = vpop.f32.mrf.mxu2  ;;  %v7101_v10 = vadd.f32 %v7100_v18, %v7088_v29 }
 0x63a   :  { %v7115_v63 = vpop.f32.mrf.mxu1  ;;  %v7114_v49 = vadd.f32 %v7113_v14, %v7101_v10 }
 0x63c   :  { %v7127_v23 = vadd.f32 %v7126_v59, %v7114_v49 }
 0x63d   :  { %v7089_v44 = vpop.f32.mrf.mxu3 }
 0x640   :  { %v7128_v62 = vpop.f32.mrf.mxu2 }
 0x64f   :  { %v7152_v61 = vpop.f32.mrf.mxu0 }
 0x650   :  { %v7165_v8 = vpop.f32.mrf.mxu1 }
 0x655   :  { %v7139_v13 = vpop.f32.mrf.mxu3 }
 0x656   :  { %v7140_v41 = vadd.f32 %v7139_v13, %v7127_v23  ;;  %v7178_v9 = vpop.f32.mrf.mxu2 }
 0x657   :  { %v7154_v16 = vpop.f32.mrf.mxu0 }
 0x658   :  { %v7153_v31 = vadd.f32 %v7152_v61, %v7140_v41  ;;  %v7167_v58 = vpop.f32.mrf.mxu1 }
 0x65a   :  { %v7166_v40 = vadd.f32 %v7165_v8, %v7153_v31 }
 0x65c   :  { %v7179_v5 = vadd.f32 %v7178_v9, %v7166_v40 }
 0x65d   :  { %v7141_v48 = vpop.f32.mrf.mxu3 }
 0x65e   :  { %11253 = vtanh.f32 %v7179_v5  ;;  %v7180_v43 = vpop.f32.mrf.mxu2 }
 0x664   :  { %v11254_v17 = vpop.eup %11253 }
 0x665   :  { %7195 = vst [vmem:[#allocation29 + $0x30] sm:$0xff] %v11254_v17 }
 0x666   :  { %7206 = dma.vmem_to_hbm [thread:$0]  %s7202_s16, 896, %s7204_s1, [#allocation4]  }
 0x667   :  { %11707 = dma.done.wait [#allocation4], 896  }
 0x668   :  { %11708 = vsyncadd [#allocation4], 4294966400 }
 0x669   :  { %7211 = vsyncpa [#allocation3], 1 }
 0x66a   :  { %7212 = vsyncpa [#allocation6], 1 }
 0x66b   :  { %7213 = vsyncpa [#allocation9], 1 }
 0x66c   :  { %7214 = vsyncpa [#allocation12], 1 }
 0x66d   :  { %7215 = vsyncpa [#allocation15], 1 }
 0x66e   :  { %7216 = vsyncpa [#allocation18], 1 }
 0x66f   :  { %7217 = vsyncpa [#allocation21], 1 }
 0x670   :  { %7218 = vsyncpa [#allocation24], 1 }
 0x671   :  { %7219 = vsyncpa [#allocation27], 1 }
 0x672   :  { %7220 = vsyncpa [#allocation4], 1 }

</bundles_post_ra>
